<compile_context>
chip_gen: v7x
topology: tpu7x:2x2x1
jax: 0.10.0
libtpu: 0.0.40
codegen_flags: <defaults>
</compile_context>

<pallas_src>
import jax
import jax.numpy as jnp
import numpy as np
from jax import lax
from jax.experimental import pallas as pl
from jax.experimental.pallas import tpu as pltpu

EPS = 1e-5                      # nn.LayerNorm default eps

IMG_H, IMG_W = 16, 100          # input / conv1 spatial grid
HW = IMG_H * IMG_W              # 1600 flattened lanes (kept by every stage)
PH, PW = 8, 50                  # grid after pool1 (conv2 / LayerNorm([32,8,50]))
QH, QW = 4, 25                  # grid after pool2 (feeds the FC layer)
NVALID2 = 32 * PH * PW          # 12800 elements normalized by LayerNorm([32,8,50])
PAD1 = IMG_W + 1                # 101 = max |lane shift| of a conv1 tap
PAD_P1 = IMG_W + 1              # 101 = max lane shift of a pool1 window
PAD2 = 2 * IMG_W + 2            # 202 = max |lane shift| of a conv2 tap (stride-2 grid)

# lane shifts of the 9 conv taps, t = di*3 + dj
SHIFT1 = [(di - 1) * IMG_W + (dj - 1) for di in range(3) for dj in range(3)]
SHIFT2 = [(di - 1) * 2 * IMG_W + (dj - 1) * 2 for di in range(3) for dj in range(3)]


def _build_static_tables():
    """Data-independent 0/1 tables (host constants)."""
    h = np.arange(IMG_H)[:, None]
    w = np.arange(IMG_W)[None, :]
    m1 = []
    for di in range(3):
        for dj in range(3):
            hh, ww = h + di - 1, w + dj - 1
            m1.append(((hh >= 0) & (hh < IMG_H) & (ww >= 0) & (ww < IMG_W))
                      .astype(np.float32).reshape(-1))
    # active lanes of the stride-2 (pool1) grid embedded in the 16x100 grid
    active2 = ((h % 2 == 0) & (w % 2 == 0)).astype(np.float32).reshape(1, HW)
    # per-window 0/1 gather: window a covers lanes [400a, 400a+128); valid
    # pool2 anchors sit at window lane 4b and go to output lane 25a + b.
    sel4 = np.zeros((QH, 128, 128), np.float32)
    for a in range(QH):
        for b in range(QW):
            sel4[a, 4 * b, QW * a + b] = 1.0
    return np.stack(m1), active2, sel4


MASK1_NP, ACTIVE2_NP, SEL4_NP = _build_static_tables()


# ----------------------------- Pallas kernels -----------------------------

def _fused_cnn_kernel(x_ref, w1_ref, b1_ref, mask1_ref, g1_ref, bt1_ref,
                      w2_ref, b2_ref, act2_ref, g2_ref, bt2_ref, sel_ref,
                      out_ref, s1p, t1p, p1p, c2p, t2p, p2p):
    # x_ref   : (1, 1, 1600)  one flattened input sample
    # w1_ref  : (16, 16)      conv1 weight, taps in cols 0..8, cols 9..15 = 0
    # b1_ref  : (16, 1)
    # mask1_ref: (9, 1600)    conv1 tap validity masks
    # g1/bt1  : (1, 1600)     LayerNorm([16,100]) affine (shared across C)
    # w2_ref  : (32, 144) bf16  conv2 weight, col = 16*t + cin
    # b2_ref  : (32, 1)
    # act2_ref: (1, 1600)     active (stride-2 anchor) lane mask
    # g2/bt2  : (32, 1600)    LN2 affine scattered onto active lanes
    # sel_ref : (4, 128, 128) bf16  per-window pool2 anchor gather
    # out_ref : (1, 32, 128)  lane-dense pooled features (cols 100..127 = 0)
    f32 = jnp.float32
    bf16 = jnp.bfloat16

    # Zero ONLY the pad lanes / spare rows of the staging scratches (their
    # interiors are fully overwritten below).  Done every step (cheap) rather
    # than gated on program_id==0, which would be wrong under "parallel"
    # megacore sharding (scratch is per-core).
    s1p[:, :PAD1] = jnp.zeros((1, PAD1), f32)
    s1p[:, PAD1 + HW:] = jnp.zeros((1, PAD1), f32)
    t1p[9:, :] = jnp.zeros((7, HW), f32)
    p1p[:, HW:] = jnp.zeros((16, PAD_P1), f32)
    c2p[:, :PAD2] = jnp.zeros((16, PAD2), bf16)
    c2p[:, PAD2 + HW:] = jnp.zeros((16, PAD2), bf16)

    # ---------------- conv1 (3x3, pad 1) + bias + ReLU, on the MXU ----------
    # masked tap stack rows 0..8; rows 9..15 stay zero, matching the zero
    # columns of the padded (16,16) weight.
    s1p[:, PAD1:PAD1 + HW] = x_ref[0]
    for t in range(9):
        off = PAD1 + SHIFT1[t]
        t1p[t:t + 1, :] = mask1_ref[t:t + 1, :] * s1p[:, off:off + HW]
    y1 = jnp.dot(w1_ref[...], t1p[...], preferred_element_type=f32)  # (16,1600)
    y1 = jnp.maximum(y1 + b1_ref[...], 0.0)

    # ---------------- LayerNorm([16, 100]): per (sample, channel) -----------
    mu1 = jnp.sum(y1, axis=1, keepdims=True) * (1.0 / HW)
    msq1 = jnp.sum(y1 * y1, axis=1, keepdims=True) * (1.0 / HW)
    var1 = jnp.maximum(msq1 - mu1 * mu1, 0.0)
    y1 = (y1 - mu1) * lax.rsqrt(var1 + EPS) * g1_ref[...] + bt1_ref[...]

    # ---------------- maxpool 2x2 #1 (result on the stride-2 lane grid) -----
    p1p[:, :HW] = y1
    m1 = jnp.maximum(jnp.maximum(y1, p1p[:, 1:HW + 1]),
                     jnp.maximum(p1p[:, IMG_W:HW + IMG_W],
                                 p1p[:, IMG_W + 1:HW + IMG_W + 1]))
    # Zero the junk (non-anchor) lanes once: together with the zero-padded
    # staging buffer this implements every conv2 tap boundary condition, so
    # no per-tap masks are needed below.
    m1a = m1 * act2_ref[...]

    # ---------------- conv2 (3x3, pad 1): one K=144 bf16 MXU matmul ---------
    c2p[:, PAD2:PAD2 + HW] = m1a.astype(bf16)
    for t in range(9):
        off = PAD2 + SHIFT2[t]
        t2p[16 * t:16 * (t + 1), :] = c2p[:, off:off + HW]
    y2 = jnp.dot(w2_ref[...], t2p[...], preferred_element_type=f32)  # (32,1600)
    y2 = jnp.maximum(y2 + b2_ref[...], 0.0)

    # ---------------- LayerNorm([32, 8, 50]): whole-sample stats ------------
    a2 = act2_ref[...]
    y2a = y2 * a2
    mu2 = jnp.sum(y2a) * (1.0 / NVALID2)
    var2 = jnp.maximum(jnp.sum(y2a * y2) * (1.0 / NVALID2) - mu2 * mu2, 0.0)
    # gamma/beta are pre-scattered onto active lanes (zero elsewhere)
    y2 = (y2 - mu2) * lax.rsqrt(var2 + EPS) * g2_ref[...] + bt2_ref[...]

    # ------- maxpool 2x2 #2 + lane-dense compaction (4 tiny 0/1 matmuls) ----
    # Valid pool2 anchors live at lanes 400a + 4b (a<4, b<25).  Each 128-lane
    # window is pooled in place and gathered by a K=128 selection matmul; the
    # four results accumulate into one dense (32,128) tile whose lanes
    # 100..127 are exactly zero (matching the zero-padded FC weight).
    p2p[:, :HW] = y2
    acc = jnp.zeros((32, 128), f32)
    for a in range(QH):
        base = 4 * IMG_W * a
        w00 = p2p[:, base:base + 128]
        w01 = p2p[:, base + 2:base + 130]
        w10 = p2p[:, base + 2 * IMG_W:base + 2 * IMG_W + 128]
        w11 = p2p[:, base + 2 * IMG_W + 2:base + 2 * IMG_W + 130]
        m2a = jnp.maximum(jnp.maximum(w00, w01), jnp.maximum(w10, w11))
        acc = acc + jnp.dot(m2a.astype(bf16), sel_ref[a],
                            preferred_element_type=f32)
    out_ref[0] = acc


def _fc_kernel(x_ref, w_ref, b_ref, o_ref):
    # x_ref: (N, 4096), w_ref: (4096, 128) zero-padded FC weight, b_ref: (1, 128)
    o_ref[...] = (jnp.dot(x_ref[...], w_ref[...],
                          preferred_element_type=jnp.float32) + b_ref[...])


# ------------------------------ forward pass -------------------------------

def pallas_forward(x, params):
    (w1, b1, g1, bt1, w2, b2, g2, bt2, wf, bf) = params
    n = x.shape[0]
    x3 = x.reshape(n, 1, HW)

    # ---- host-side parameter preprocessing (tiny, once per call) ----
    w1p = jnp.zeros((16, 16), jnp.float32).at[:, :9].set(w1.reshape(16, 9))
    b1r = b1.reshape(16, 1)
    g1r = g1.reshape(1, HW)
    bt1r = bt1.reshape(1, HW)
    # conv2 weight: col index = 16*(3*di+dj) + cin, matching the tap stack
    w2f = jnp.transpose(w2, (0, 2, 3, 1)).reshape(32, 144).astype(jnp.bfloat16)
    b2r = b2.reshape(32, 1)
    # LN2 affine scattered onto the active stride-2 lanes of the 16x100 grid
    g2s = jnp.zeros((32, IMG_H, IMG_W), jnp.float32).at[:, ::2, ::2].set(g2).reshape(32, HW)
    bt2s = jnp.zeros((32, IMG_H, IMG_W), jnp.float32).at[:, ::2, ::2].set(bt2).reshape(32, HW)
    # FC weight re-laid-out for the lane-dense (32, 128)-per-sample features
    wf3 = wf.reshape(39, 32, QH * QW).transpose(1, 2, 0)        # (32, 100, 39)
    wfp = jnp.zeros((32, 128, 128), jnp.float32).at[:, :QH * QW, :39].set(wf3).reshape(4096, 128)
    bfp = jnp.zeros((1, 128), jnp.float32).at[0, :39].set(bf)

    mask1 = jnp.asarray(MASK1_NP)                               # (9, 1600) f32
    act2 = jnp.asarray(ACTIVE2_NP)                              # (1, 1600) f32
    sel4 = jnp.asarray(SEL4_NP, dtype=jnp.bfloat16)             # (4, 128, 128)

    c2 = lambda i: (0, 0)          # noqa: E731  resident constants
    c3 = lambda i: (0, 0, 0)       # noqa: E731

    pooled = pl.pallas_call(
        _fused_cnn_kernel,
        out_shape=jax.ShapeDtypeStruct((n, 32, 128), jnp.float32),
        grid=(n,),
        in_specs=[
            pl.BlockSpec((1, 1, HW), lambda i: (i, 0, 0)),      # x
            pl.BlockSpec((16, 16), c2),                         # w1 (padded)
            pl.BlockSpec((16, 1), c2),                          # b1
            pl.BlockSpec((9, HW), c2),                          # mask1
            pl.BlockSpec((1, HW), c2),                          # gamma1
            pl.BlockSpec((1, HW), c2),                          # beta1
            pl.BlockSpec((32, 144), c2),                        # w2 (bf16)
            pl.BlockSpec((32, 1), c2),                          # b2
            pl.BlockSpec((1, HW), c2),                          # active lanes
            pl.BlockSpec((32, HW), c2),                         # gamma2 (scattered)
            pl.BlockSpec((32, HW), c2),                         # beta2 (scattered)
            pl.BlockSpec((4, 128, 128), c3),                    # sel4 (bf16)
        ],
        out_specs=pl.BlockSpec((1, 32, 128), lambda i: (i, 0, 0)),
        scratch_shapes=[
            pltpu.VMEM((1, HW + 2 * PAD1), jnp.float32),        # s1p padded conv1 input
            pltpu.VMEM((16, HW), jnp.float32),                  # t1p conv1 tap stack
            pltpu.VMEM((16, HW + PAD_P1), jnp.float32),         # p1p pool1 staging
            pltpu.VMEM((16, HW + 2 * PAD2), jnp.bfloat16),      # c2p padded conv2 input
            pltpu.VMEM((144, HW), jnp.bfloat16),                # t2p conv2 tap stack
            pltpu.VMEM((32, HW), jnp.float32),                  # p2p pool2 staging
        ],
        compiler_params=pltpu.CompilerParams(
            dimension_semantics=("parallel",)),                 # 2x on v7x megacore
    )(x3, w1p, b1r, mask1, g1r, bt1r, w2f, b2r, act2, g2s, bt2s, sel4)

    # TODO(synk): nn.Dropout(p=0.5) is identity in eval mode; training-mode
    # stochastic masking is not implemented.

    flat = pooled.reshape(n, 32 * 128)
    # FC kept f32 / single call: ~1% of the MACs, keeps accuracy headroom.
    logits = pl.pallas_call(
        _fc_kernel,
        out_shape=jax.ShapeDtypeStruct((n, 128), jnp.float32),
    )(flat, wfp, bfp)
    return logits[:, :39]


# --------------------------- pure-JAX reference ----------------------------

def _ref_pool(x):
    n, c, h, w = x.shape
    return jnp.max(x.reshape(n, c, h // 2, 2, w // 2, 2), axis=(3, 5))


def reference_forward(x, params):
    (w1, b1, g1, bt1, w2, b2, g2, bt2, wf, bf) = params
    dn = ('NCHW', 'OIHW', 'NCHW')
    hi = lax.Precision.HIGHEST
    y = lax.conv_general_dilated(x, w1, (1, 1), ((1, 1), (1, 1)),
                                 dimension_numbers=dn,
                                 precision=hi) + b1[None, :, None, None]
    y = jnp.maximum(y, 0.0)
    mu = jnp.mean(y, axis=(-2, -1), keepdims=True)
    var = jnp.var(y, axis=(-2, -1), keepdims=True)
    y = (y - mu) / jnp.sqrt(var + EPS) * g1 + bt1
    y = _ref_pool(y)
    y = lax.conv_general_dilated(y, w2, (1, 1), ((1, 1), (1, 1)),
                                 dimension_numbers=dn,
                                 precision=hi) + b2[None, :, None, None]
    y = jnp.maximum(y, 0.0)
    mu = jnp.mean(y, axis=(-3, -2, -1), keepdims=True)
    var = jnp.var(y, axis=(-3, -2, -1), keepdims=True)
    y = (y - mu) / jnp.sqrt(var + EPS) * g2 + bt2
    y = _ref_pool(y)
    y = y.reshape(y.shape[0], -1)
    return jnp.dot(y, wf.T, precision=hi) + bf


# --------------------------------- main -------------------------------------

def make_params(key):
    ks = jax.random.split(key, 10)
    w1 = 0.2 * jax.random.normal(ks[0], (16, 1, 3, 3), jnp.float32)
    b1 = 0.1 * jax.random.normal(ks[1], (16,), jnp.float32)
    g1 = 1.0 + 0.1 * jax.random.normal(ks[2], (16, 100), jnp.float32)
    bt1 = 0.1 * jax.random.normal(ks[3], (16, 100), jnp.float32)
    w2 = 0.1 * jax.random.normal(ks[4], (32, 16, 3, 3), jnp.float32)
    b2 = 0.1 * jax.random.normal(ks[5], (32,), jnp.float32)
    g2 = 1.0 + 0.1 * jax.random.normal(ks[6], (32, 8, 50), jnp.float32)
    bt2 = 0.1 * jax.random.normal(ks[7], (32, 8, 50), jnp.float32)
    wf = 0.02 * jax.random.normal(ks[8], (39, 3200), jnp.float32)
    bf = 0.1 * jax.random.normal(ks[9], (39,), jnp.float32)
    return (w1, b1, g1, bt1, w2, b2, g2, bt2, wf, bf)


if __name__ == "__main__":
    key = jax.random.PRNGKey(0)
    kx, kp = jax.random.split(key)
    # SimpleCNN's LayerNorm([16,100]) / Linear(3200, 39) imply input (N, 1, 16, 100).
    x = jax.random.normal(kx, (2, 1, 16, 100), jnp.float32)
    params = make_params(kp)

    out = jax.block_until_ready(jax.jit(pallas_forward)(x, params))
    ref = jax.block_until_ready(jax.jit(reference_forward)(x, params))

    assert out.shape == (2, 39), out.shape
    # conv2 / compaction use explicit bf16 MXU operands (f32 accumulate);
    # measured logit error is O(2e-3), so 1e-2 keeps >3x margin.
    np.testing.assert_allclose(np.asarray(out), np.asarray(ref), rtol=1e-2, atol=1e-2)
    print("KERNEL_OK")
</pallas_src>

<mosaic_0001>
module attributes {stable_mosaic.version = 11 : i64} {
  func.func @_fused_cnn_kernel(%arg0: i32, %arg1: memref<1x1x1600xf32, #tpu.memory_space<vmem>>, %arg2: memref<16x16xf32, #tpu.memory_space<vmem>>, %arg3: memref<16x1xf32, #tpu.memory_space<vmem>>, %arg4: memref<9x1600xf32, #tpu.memory_space<vmem>>, %arg5: memref<1x1600xf32, #tpu.memory_space<vmem>>, %arg6: memref<1x1600xf32, #tpu.memory_space<vmem>>, %arg7: memref<32x144xbf16, #tpu.memory_space<vmem>>, %arg8: memref<32x1xf32, #tpu.memory_space<vmem>>, %arg9: memref<1x1600xf32, #tpu.memory_space<vmem>>, %arg10: memref<32x1600xf32, #tpu.memory_space<vmem>>, %arg11: memref<32x1600xf32, #tpu.memory_space<vmem>>, %arg12: memref<4x128x128xbf16, #tpu.memory_space<vmem>>, %arg13: memref<1x32x128xf32, #tpu.memory_space<vmem>>, %arg14: memref<1x1802xf32, #tpu.memory_space<vmem>>, %arg15: memref<16x1600xf32, #tpu.memory_space<vmem>>, %arg16: memref<16x1701xf32, #tpu.memory_space<vmem>>, %arg17: memref<16x2004xbf16, #tpu.memory_space<vmem>>, %arg18: memref<144x1600xbf16, #tpu.memory_space<vmem>>, %arg19: memref<32x1600xf32, #tpu.memory_space<vmem>>) attributes {dimension_semantics = [#tpu.dimension_semantics<parallel>], iteration_bounds = array<i64: 2>, scalar_prefetch = 0 : i64, scratch_operands = 6 : i64, tpu.core_type = #tpu.core_type<tc>, window_params = [{transform_indices = @transform_0, window_bounds = array<i64: 1, 1, 1600>}, {pipeline_mode = #tpu.pipeline_mode<synchronous>, transform_indices = @transform_1, window_bounds = array<i64: 16, 16>}, {pipeline_mode = #tpu.pipeline_mode<synchronous>, transform_indices = @transform_2, window_bounds = array<i64: 16, 1>}, {pipeline_mode = #tpu.pipeline_mode<synchronous>, transform_indices = @transform_3, window_bounds = array<i64: 9, 1600>}, {pipeline_mode = #tpu.pipeline_mode<synchronous>, transform_indices = @transform_4, window_bounds = array<i64: 1, 1600>}, {pipeline_mode = #tpu.pipeline_mode<synchronous>, transform_indices = @transform_5, window_bounds = array<i64: 1, 1600>}, {pipeline_mode = #tpu.pipeline_mode<synchronous>, transform_indices = @transform_6, window_bounds = array<i64: 32, 144>}, {pipeline_mode = #tpu.pipeline_mode<synchronous>, transform_indices = @transform_7, window_bounds = array<i64: 32, 1>}, {pipeline_mode = #tpu.pipeline_mode<synchronous>, transform_indices = @transform_8, window_bounds = array<i64: 1, 1600>}, {pipeline_mode = #tpu.pipeline_mode<synchronous>, transform_indices = @transform_9, window_bounds = array<i64: 32, 1600>}, {pipeline_mode = #tpu.pipeline_mode<synchronous>, transform_indices = @transform_10, window_bounds = array<i64: 32, 1600>}, {pipeline_mode = #tpu.pipeline_mode<synchronous>, transform_indices = @transform_11, window_bounds = array<i64: 4, 128, 128>}, {transform_indices = @transform_12, window_bounds = array<i64: 1, 32, 128>}]} {
    %cst = arith.constant 0.000000e+00 : f32
    %0 = vector.broadcast %cst : f32 to vector<1x101xf32>
    %c0 = arith.constant 0 : index
    %c0_0 = arith.constant 0 : index
    %1 = vector.load %arg14[%c0, %c0_0] : memref<1x1802xf32, #tpu.memory_space<vmem>>, vector<1x101xf32>
    tpu.vector_store %arg14[%c0, %c0_0], %0 {strides = array<i32>} : memref<1x1802xf32, #tpu.memory_space<vmem>>, vector<1x101xf32>,
    %cst_1 = arith.constant 0.000000e+00 : f32
    %2 = vector.broadcast %cst_1 : f32 to vector<1x101xf32>
    %c0_2 = arith.constant 0 : index
    %c1701 = arith.constant 1701 : index
    %3 = vector.load %arg14[%c0_2, %c1701] : memref<1x1802xf32, #tpu.memory_space<vmem>>, vector<1x101xf32>
    tpu.vector_store %arg14[%c0_2, %c1701], %2 {strides = array<i32>} : memref<1x1802xf32, #tpu.memory_space<vmem>>, vector<1x101xf32>,
    %cst_3 = arith.constant 0.000000e+00 : f32
    %4 = vector.broadcast %cst_3 : f32 to vector<7x1600xf32>
    %c9 = arith.constant 9 : index
    %c0_4 = arith.constant 0 : index
    %5 = vector.load %arg15[%c9, %c0_4] : memref<16x1600xf32, #tpu.memory_space<vmem>>, vector<7x1600xf32>
    tpu.vector_store %arg15[%c9, %c0_4], %4 {strides = array<i32>} : memref<16x1600xf32, #tpu.memory_space<vmem>>, vector<7x1600xf32>,
    %cst_5 = arith.constant 0.000000e+00 : f32
    %6 = vector.broadcast %cst_5 : f32 to vector<16x101xf32>
    %c0_6 = arith.constant 0 : index
    %c1600 = arith.constant 1600 : index
    %7 = vector.load %arg16[%c0_6, %c1600] : memref<16x1701xf32, #tpu.memory_space<vmem>>, vector<16x101xf32>
    tpu.vector_store %arg16[%c0_6, %c1600], %6 {strides = array<i32>} : memref<16x1701xf32, #tpu.memory_space<vmem>>, vector<16x101xf32>,
    %cst_7 = arith.constant 0.000000e+00 : bf16
    %8 = vector.broadcast %cst_7 : bf16 to vector<16x202xbf16>
    %c0_8 = arith.constant 0 : index
    %c0_9 = arith.constant 0 : index
    %9 = vector.load %arg17[%c0_8, %c0_9] : memref<16x2004xbf16, #tpu.memory_space<vmem>>, vector<16x202xbf16>
    tpu.vector_store %arg17[%c0_8, %c0_9], %8 {strides = array<i32>} : memref<16x2004xbf16, #tpu.memory_space<vmem>>, vector<16x202xbf16>,
    %cst_10 = arith.constant 0.000000e+00 : bf16
    %10 = vector.broadcast %cst_10 : bf16 to vector<16x202xbf16>
    %c0_11 = arith.constant 0 : index
    %c1802 = arith.constant 1802 : index
    %11 = vector.load %arg17[%c0_11, %c1802] : memref<16x2004xbf16, #tpu.memory_space<vmem>>, vector<16x202xbf16>
    tpu.vector_store %arg17[%c0_11, %c1802], %10 {strides = array<i32>} : memref<16x2004xbf16, #tpu.memory_space<vmem>>, vector<16x202xbf16>,
    %c0_12 = arith.constant 0 : index
    %c0_13 = arith.constant 0 : index
    %c0_14 = arith.constant 0 : index
    %12 = vector.load %arg1[%c0_12, %c0_13, %c0_14] : memref<1x1x1600xf32, #tpu.memory_space<vmem>>, vector<1x1x1600xf32>
    %13 = vector.shape_cast %12 : vector<1x1x1600xf32> to vector<1x1600xf32>
    %c0_15 = arith.constant 0 : index
    %c101 = arith.constant 101 : index
    %14 = vector.load %arg14[%c0_15, %c101] : memref<1x1802xf32, #tpu.memory_space<vmem>>, vector<1x1600xf32>
    tpu.vector_store %arg14[%c0_15, %c101], %13 {strides = array<i32>} : memref<1x1802xf32, #tpu.memory_space<vmem>>, vector<1x1600xf32>,
    %c0_16 = arith.constant 0 : index
    %c0_17 = arith.constant 0 : index
    %15 = vector.load %arg4[%c0_16, %c0_17] : memref<9x1600xf32, #tpu.memory_space<vmem>>, vector<1x1600xf32>
    %c0_18 = arith.constant 0 : index
    %c0_19 = arith.constant 0 : index
    %16 = vector.load %arg14[%c0_18, %c0_19] : memref<1x1802xf32, #tpu.memory_space<vmem>>, vector<1x1600xf32>
    %17 = arith.mulf %15, %16 : vector<1x1600xf32>
    %c0_20 = arith.constant 0 : index
    %c0_21 = arith.constant 0 : index
    %18 = vector.load %arg15[%c0_20, %c0_21] : memref<16x1600xf32, #tpu.memory_space<vmem>>, vector<1x1600xf32>
    tpu.vector_store %arg15[%c0_20, %c0_21], %17 {strides = array<i32>} : memref<16x1600xf32, #tpu.memory_space<vmem>>, vector<1x1600xf32>,
    %c1 = arith.constant 1 : index
    %c0_22 = arith.constant 0 : index
    %19 = vector.load %arg4[%c1, %c0_22] : memref<9x1600xf32, #tpu.memory_space<vmem>>, vector<1x1600xf32>
    %c0_23 = arith.constant 0 : index
    %c1_24 = arith.constant 1 : index
    %20 = vector.load %arg14[%c0_23, %c1_24] : memref<1x1802xf32, #tpu.memory_space<vmem>>, vector<1x1600xf32>
    %21 = arith.mulf %19, %20 : vector<1x1600xf32>
    %c1_25 = arith.constant 1 : index
    %c0_26 = arith.constant 0 : index
    %22 = vector.load %arg15[%c1_25, %c0_26] : memref<16x1600xf32, #tpu.memory_space<vmem>>, vector<1x1600xf32>
    tpu.vector_store %arg15[%c1_25, %c0_26], %21 {strides = array<i32>} : memref<16x1600xf32, #tpu.memory_space<vmem>>, vector<1x1600xf32>,
    %c2 = arith.constant 2 : index
    %c0_27 = arith.constant 0 : index
    %23 = vector.load %arg4[%c2, %c0_27] : memref<9x1600xf32, #tpu.memory_space<vmem>>, vector<1x1600xf32>
    %c0_28 = arith.constant 0 : index
    %c2_29 = arith.constant 2 : index
    %24 = vector.load %arg14[%c0_28, %c2_29] : memref<1x1802xf32, #tpu.memory_space<vmem>>, vector<1x1600xf32>
    %25 = arith.mulf %23, %24 : vector<1x1600xf32>
    %c2_30 = arith.constant 2 : index
    %c0_31 = arith.constant 0 : index
    %26 = vector.load %arg15[%c2_30, %c0_31] : memref<16x1600xf32, #tpu.memory_space<vmem>>, vector<1x1600xf32>
    tpu.vector_store %arg15[%c2_30, %c0_31], %25 {strides = array<i32>} : memref<16x1600xf32, #tpu.memory_space<vmem>>, vector<1x1600xf32>,
    %c3 = arith.constant 3 : index
    %c0_32 = arith.constant 0 : index
    %27 = vector.load %arg4[%c3, %c0_32] : memref<9x1600xf32, #tpu.memory_space<vmem>>, vector<1x1600xf32>
    %c0_33 = arith.constant 0 : index
    %c100 = arith.constant 100 : index
    %28 = vector.load %arg14[%c0_33, %c100] : memref<1x1802xf32, #tpu.memory_space<vmem>>, vector<1x1600xf32>
    %29 = arith.mulf %27, %28 : vector<1x1600xf32>
    %c3_34 = arith.constant 3 : index
    %c0_35 = arith.constant 0 : index
    %30 = vector.load %arg15[%c3_34, %c0_35] : memref<16x1600xf32, #tpu.memory_space<vmem>>, vector<1x1600xf32>
    tpu.vector_store %arg15[%c3_34, %c0_35], %29 {strides = array<i32>} : memref<16x1600xf32, #tpu.memory_space<vmem>>, vector<1x1600xf32>,
    %c4 = arith.constant 4 : index
    %c0_36 = arith.constant 0 : index
    %31 = vector.load %arg4[%c4, %c0_36] : memref<9x1600xf32, #tpu.memory_space<vmem>>, vector<1x1600xf32>
    %c0_37 = arith.constant 0 : index
    %c101_38 = arith.constant 101 : index
    %32 = vector.load %arg14[%c0_37, %c101_38] : memref<1x1802xf32, #tpu.memory_space<vmem>>, vector<1x1600xf32>
    %33 = arith.mulf %31, %32 : vector<1x1600xf32>
    %c4_39 = arith.constant 4 : index
    %c0_40 = arith.constant 0 : index
    %34 = vector.load %arg15[%c4_39, %c0_40] : memref<16x1600xf32, #tpu.memory_space<vmem>>, vector<1x1600xf32>
    tpu.vector_store %arg15[%c4_39, %c0_40], %33 {strides = array<i32>} : memref<16x1600xf32, #tpu.memory_space<vmem>>, vector<1x1600xf32>,
    %c5 = arith.constant 5 : index
    %c0_41 = arith.constant 0 : index
    %35 = vector.load %arg4[%c5, %c0_41] : memref<9x1600xf32, #tpu.memory_space<vmem>>, vector<1x1600xf32>
    %c0_42 = arith.constant 0 : index
    %c102 = arith.constant 102 : index
    %36 = vector.load %arg14[%c0_42, %c102] : memref<1x1802xf32, #tpu.memory_space<vmem>>, vector<1x1600xf32>
    %37 = arith.mulf %35, %36 : vector<1x1600xf32>
    %c5_43 = arith.constant 5 : index
    %c0_44 = arith.constant 0 : index
    %38 = vector.load %arg15[%c5_43, %c0_44] : memref<16x1600xf32, #tpu.memory_space<vmem>>, vector<1x1600xf32>
    tpu.vector_store %arg15[%c5_43, %c0_44], %37 {strides = array<i32>} : memref<16x1600xf32, #tpu.memory_space<vmem>>, vector<1x1600xf32>,
    %c6 = arith.constant 6 : index
    %c0_45 = arith.constant 0 : index
    %39 = vector.load %arg4[%c6, %c0_45] : memref<9x1600xf32, #tpu.memory_space<vmem>>, vector<1x1600xf32>
    %c0_46 = arith.constant 0 : index
    %c200 = arith.constant 200 : index
    %40 = vector.load %arg14[%c0_46, %c200] : memref<1x1802xf32, #tpu.memory_space<vmem>>, vector<1x1600xf32>
    %41 = arith.mulf %39, %40 : vector<1x1600xf32>
    %c6_47 = arith.constant 6 : index
    %c0_48 = arith.constant 0 : index
    %42 = vector.load %arg15[%c6_47, %c0_48] : memref<16x1600xf32, #tpu.memory_space<vmem>>, vector<1x1600xf32>
    tpu.vector_store %arg15[%c6_47, %c0_48], %41 {strides = array<i32>} : memref<16x1600xf32, #tpu.memory_space<vmem>>, vector<1x1600xf32>,
    %c7 = arith.constant 7 : index
    %c0_49 = arith.constant 0 : index
    %43 = vector.load %arg4[%c7, %c0_49] : memref<9x1600xf32, #tpu.memory_space<vmem>>, vector<1x1600xf32>
    %c0_50 = arith.constant 0 : index
    %c201 = arith.constant 201 : index
    %44 = vector.load %arg14[%c0_50, %c201] : memref<1x1802xf32, #tpu.memory_space<vmem>>, vector<1x1600xf32>
    %45 = arith.mulf %43, %44 : vector<1x1600xf32>
    %c7_51 = arith.constant 7 : index
    %c0_52 = arith.constant 0 : index
    %46 = vector.load %arg15[%c7_51, %c0_52] : memref<16x1600xf32, #tpu.memory_space<vmem>>, vector<1x1600xf32>
    tpu.vector_store %arg15[%c7_51, %c0_52], %45 {strides = array<i32>} : memref<16x1600xf32, #tpu.memory_space<vmem>>, vector<1x1600xf32>,
    %c8 = arith.constant 8 : index
    %c0_53 = arith.constant 0 : index
    %47 = vector.load %arg4[%c8, %c0_53] : memref<9x1600xf32, #tpu.memory_space<vmem>>, vector<1x1600xf32>
    %c0_54 = arith.constant 0 : index
    %c202 = arith.constant 202 : index
    %48 = vector.load %arg14[%c0_54, %c202] : memref<1x1802xf32, #tpu.memory_space<vmem>>, vector<1x1600xf32>
    %49 = arith.mulf %47, %48 : vector<1x1600xf32>
    %c8_55 = arith.constant 8 : index
    %c0_56 = arith.constant 0 : index
    %50 = vector.load %arg15[%c8_55, %c0_56] : memref<16x1600xf32, #tpu.memory_space<vmem>>, vector<1x1600xf32>
    tpu.vector_store %arg15[%c8_55, %c0_56], %49 {strides = array<i32>} : memref<16x1600xf32, #tpu.memory_space<vmem>>, vector<1x1600xf32>,
    %c0_57 = arith.constant 0 : index
    %c0_58 = arith.constant 0 : index
    %51 = vector.load %arg2[%c0_57, %c0_58] : memref<16x16xf32, #tpu.memory_space<vmem>>, vector<16x16xf32>
    %c0_59 = arith.constant 0 : index
    %c0_60 = arith.constant 0 : index
    %52 = vector.load %arg15[%c0_59, %c0_60] : memref<16x1600xf32, #tpu.memory_space<vmem>>, vector<16x1600xf32>
    %cst_61 = arith.constant dense<0.000000e+00> : vector<16x1600xf32>
    %53 = tpu.matmul %51, %52, %cst_61 {dimension_numbers = #tpu.dot_dimension_numbers<[1], [0], [0], [1], [0, 0, 1, 1], [], []>} : vector<16x16xf32>, vector<16x1600xf32>, vector<16x1600xf32> -> vector<16x1600xf32>
    %c0_62 = arith.constant 0 : index
    %c0_63 = arith.constant 0 : index
    %54 = vector.load %arg3[%c0_62, %c0_63] : memref<16x1xf32, #tpu.memory_space<vmem>>, vector<16x1xf32>
    %55 = vector.broadcast %54 : vector<16x1xf32> to vector<16x1600xf32>
    %56 = arith.addf %53, %55 : vector<16x1600xf32>
    %cst_64 = arith.constant 0.000000e+00 : f32
    %57 = vector.broadcast %cst_64 : f32 to vector<16x1600xf32>
    %58 = arith.maximumf %56, %57 : vector<16x1600xf32>
    %cst_65 = arith.constant dense<0.000000e+00> : vector<16xf32>
    %59 = vector.multi_reduction <add>, %58, %cst_65 [1] : vector<16x1600xf32> to vector<16xf32>
    %60 = vector.shape_cast %59 : vector<16xf32> to vector<16x1xf32>
    %cst_66 = arith.constant 6.250000e-04 : f32
    %61 = vector.broadcast %cst_66 : f32 to vector<16x1xf32>
    %62 = arith.mulf %60, %61 : vector<16x1xf32>
    %63 = arith.mulf %58, %58 : vector<16x1600xf32>
    %cst_67 = arith.constant dense<0.000000e+00> : vector<16xf32>
    %64 = vector.multi_reduction <add>, %63, %cst_67 [1] : vector<16x1600xf32> to vector<16xf32>
    %65 = vector.shape_cast %64 : vector<16xf32> to vector<16x1xf32>
    %cst_68 = arith.constant 6.250000e-04 : f32
    %66 = vector.broadcast %cst_68 : f32 to vector<16x1xf32>
    %67 = arith.mulf %65, %66 : vector<16x1xf32>
    %68 = arith.mulf %62, %62 : vector<16x1xf32>
    %69 = arith.subf %67, %68 : vector<16x1xf32>
    %cst_69 = arith.constant 0.000000e+00 : f32
    %70 = vector.broadcast %cst_69 : f32 to vector<16x1xf32>
    %71 = arith.maximumf %69, %70 : vector<16x1xf32>
    %72 = vector.broadcast %62 : vector<16x1xf32> to vector<16x1600xf32>
    %73 = arith.subf %58, %72 : vector<16x1600xf32>
    %cst_70 = arith.constant 9.99999974E-6 : f32
    %74 = vector.broadcast %cst_70 : f32 to vector<16x1xf32>
    %75 = arith.addf %71, %74 : vector<16x1xf32>
    %76 = math.rsqrt %75 : vector<16x1xf32>
    %77 = vector.broadcast %76 : vector<16x1xf32> to vector<16x1600xf32>
    %78 = arith.mulf %73, %77 : vector<16x1600xf32>
    %c0_71 = arith.constant 0 : index
    %c0_72 = arith.constant 0 : index
    %79 = vector.load %arg5[%c0_71, %c0_72] : memref<1x1600xf32, #tpu.memory_space<vmem>>, vector<1x1600xf32>
    %80 = vector.broadcast %79 : vector<1x1600xf32> to vector<16x1600xf32>
    %81 = arith.mulf %78, %80 : vector<16x1600xf32>
    %c0_73 = arith.constant 0 : index
    %c0_74 = arith.constant 0 : index
    %82 = vector.load %arg6[%c0_73, %c0_74] : memref<1x1600xf32, #tpu.memory_space<vmem>>, vector<1x1600xf32>
    %83 = vector.broadcast %82 : vector<1x1600xf32> to vector<16x1600xf32>
    %84 = arith.addf %81, %83 : vector<16x1600xf32>
    %c0_75 = arith.constant 0 : index
    %c0_76 = arith.constant 0 : index
    %85 = vector.load %arg16[%c0_75, %c0_76] : memref<16x1701xf32, #tpu.memory_space<vmem>>, vector<16x1600xf32>
    tpu.vector_store %arg16[%c0_75, %c0_76], %84 {strides = array<i32>} : memref<16x1701xf32, #tpu.memory_space<vmem>>, vector<16x1600xf32>,
    %c0_77 = arith.constant 0 : index
    %c1_78 = arith.constant 1 : index
    %86 = vector.load %arg16[%c0_77, %c1_78] : memref<16x1701xf32, #tpu.memory_space<vmem>>, vector<16x1600xf32>
    %87 = arith.maximumf %84, %86 : vector<16x1600xf32>
    %c0_79 = arith.constant 0 : index
    %c100_80 = arith.constant 100 : index
    %88 = vector.load %arg16[%c0_79, %c100_80] : memref<16x1701xf32, #tpu.memory_space<vmem>>, vector<16x1600xf32>
    %c0_81 = arith.constant 0 : index
    %c101_82 = arith.constant 101 : index
    %89 = vector.load %arg16[%c0_81, %c101_82] : memref<16x1701xf32, #tpu.memory_space<vmem>>, vector<16x1600xf32>
    %90 = arith.maximumf %88, %89 : vector<16x1600xf32>
    %91 = arith.maximumf %87, %90 : vector<16x1600xf32>
    %c0_83 = arith.constant 0 : index
    %c0_84 = arith.constant 0 : index
    %92 = vector.load %arg9[%c0_83, %c0_84] : memref<1x1600xf32, #tpu.memory_space<vmem>>, vector<1x1600xf32>
    %93 = vector.broadcast %92 : vector<1x1600xf32> to vector<16x1600xf32>
    %94 = arith.mulf %91, %93 : vector<16x1600xf32>
    %95 = arith.truncf %94 : vector<16x1600xf32> to vector<16x1600xbf16>
    %c0_85 = arith.constant 0 : index
    %c202_86 = arith.constant 202 : index
    %96 = vector.load %arg17[%c0_85, %c202_86] : memref<16x2004xbf16, #tpu.memory_space<vmem>>, vector<16x1600xbf16>
    tpu.vector_store %arg17[%c0_85, %c202_86], %95 {strides = array<i32>} : memref<16x2004xbf16, #tpu.memory_space<vmem>>, vector<16x1600xbf16>,
    %c0_87 = arith.constant 0 : index
    %c0_88 = arith.constant 0 : index
    %97 = vector.load %arg17[%c0_87, %c0_88] : memref<16x2004xbf16, #tpu.memory_space<vmem>>, vector<16x1600xbf16>
    %c0_89 = arith.constant 0 : index
    %c0_90 = arith.constant 0 : index
    %98 = vector.load %arg18[%c0_89, %c0_90] : memref<144x1600xbf16, #tpu.memory_space<vmem>>, vector<16x1600xbf16>
    tpu.vector_store %arg18[%c0_89, %c0_90], %97 {strides = array<i32>} : memref<144x1600xbf16, #tpu.memory_space<vmem>>, vector<16x1600xbf16>,
    %c0_91 = arith.constant 0 : index
    %c2_92 = arith.constant 2 : index
    %99 = vector.load %arg17[%c0_91, %c2_92] : memref<16x2004xbf16, #tpu.memory_space<vmem>>, vector<16x1600xbf16>
    %c16 = arith.constant 16 : index
    %c0_93 = arith.constant 0 : index
    %100 = vector.load %arg18[%c16, %c0_93] : memref<144x1600xbf16, #tpu.memory_space<vmem>>, vector<16x1600xbf16>
    tpu.vector_store %arg18[%c16, %c0_93], %99 {strides = array<i32>} : memref<144x1600xbf16, #tpu.memory_space<vmem>>, vector<16x1600xbf16>,
    %c0_94 = arith.constant 0 : index
    %c4_95 = arith.constant 4 : index
    %101 = vector.load %arg17[%c0_94, %c4_95] : memref<16x2004xbf16, #tpu.memory_space<vmem>>, vector<16x1600xbf16>
    %c32 = arith.constant 32 : index
    %c0_96 = arith.constant 0 : index
    %102 = vector.load %arg18[%c32, %c0_96] : memref<144x1600xbf16, #tpu.memory_space<vmem>>, vector<16x1600xbf16>
    tpu.vector_store %arg18[%c32, %c0_96], %101 {strides = array<i32>} : memref<144x1600xbf16, #tpu.memory_space<vmem>>, vector<16x1600xbf16>,
    %c0_97 = arith.constant 0 : index
    %c200_98 = arith.constant 200 : index
    %103 = vector.load %arg17[%c0_97, %c200_98] : memref<16x2004xbf16, #tpu.memory_space<vmem>>, vector<16x1600xbf16>
    %c48 = arith.constant 48 : index
    %c0_99 = arith.constant 0 : index
    %104 = vector.load %arg18[%c48, %c0_99] : memref<144x1600xbf16, #tpu.memory_space<vmem>>, vector<16x1600xbf16>
    tpu.vector_store %arg18[%c48, %c0_99], %103 {strides = array<i32>} : memref<144x1600xbf16, #tpu.memory_space<vmem>>, vector<16x1600xbf16>,
    %c0_100 = arith.constant 0 : index
    %c202_101 = arith.constant 202 : index
    %105 = vector.load %arg17[%c0_100, %c202_101] : memref<16x2004xbf16, #tpu.memory_space<vmem>>, vector<16x1600xbf16>
    %c64 = arith.constant 64 : index
    %c0_102 = arith.constant 0 : index
    %106 = vector.load %arg18[%c64, %c0_102] : memref<144x1600xbf16, #tpu.memory_space<vmem>>, vector<16x1600xbf16>
    tpu.vector_store %arg18[%c64, %c0_102], %105 {strides = array<i32>} : memref<144x1600xbf16, #tpu.memory_space<vmem>>, vector<16x1600xbf16>,
    %c0_103 = arith.constant 0 : index
    %c204 = arith.constant 204 : index
    %107 = vector.load %arg17[%c0_103, %c204] : memref<16x2004xbf16, #tpu.memory_space<vmem>>, vector<16x1600xbf16>
    %c80 = arith.constant 80 : index
    %c0_104 = arith.constant 0 : index
    %108 = vector.load %arg18[%c80, %c0_104] : memref<144x1600xbf16, #tpu.memory_space<vmem>>, vector<16x1600xbf16>
    tpu.vector_store %arg18[%c80, %c0_104], %107 {strides = array<i32>} : memref<144x1600xbf16, #tpu.memory_space<vmem>>, vector<16x1600xbf16>,
    %c0_105 = arith.constant 0 : index
    %c400 = arith.constant 400 : index
    %109 = vector.load %arg17[%c0_105, %c400] : memref<16x2004xbf16, #tpu.memory_space<vmem>>, vector<16x1600xbf16>
    %c96 = arith.constant 96 : index
    %c0_106 = arith.constant 0 : index
    %110 = vector.load %arg18[%c96, %c0_106] : memref<144x1600xbf16, #tpu.memory_space<vmem>>, vector<16x1600xbf16>
    tpu.vector_store %arg18[%c96, %c0_106], %109 {strides = array<i32>} : memref<144x1600xbf16, #tpu.memory_space<vmem>>, vector<16x1600xbf16>,
    %c0_107 = arith.constant 0 : index
    %c402 = arith.constant 402 : index
    %111 = vector.load %arg17[%c0_107, %c402] : memref<16x2004xbf16, #tpu.memory_space<vmem>>, vector<16x1600xbf16>
    %c112 = arith.constant 112 : index
    %c0_108 = arith.constant 0 : index
    %112 = vector.load %arg18[%c112, %c0_108] : memref<144x1600xbf16, #tpu.memory_space<vmem>>, vector<16x1600xbf16>
    tpu.vector_store %arg18[%c112, %c0_108], %111 {strides = array<i32>} : memref<144x1600xbf16, #tpu.memory_space<vmem>>, vector<16x1600xbf16>,
    %c0_109 = arith.constant 0 : index
    %c404 = arith.constant 404 : index
    %113 = vector.load %arg17[%c0_109, %c404] : memref<16x2004xbf16, #tpu.memory_space<vmem>>, vector<16x1600xbf16>
    %c128 = arith.constant 128 : index
    %c0_110 = arith.constant 0 : index
    %114 = vector.load %arg18[%c128, %c0_110] : memref<144x1600xbf16, #tpu.memory_space<vmem>>, vector<16x1600xbf16>
    tpu.vector_store %arg18[%c128, %c0_110], %113 {strides = array<i32>} : memref<144x1600xbf16, #tpu.memory_space<vmem>>, vector<16x1600xbf16>,
    %c0_111 = arith.constant 0 : index
    %c0_112 = arith.constant 0 : index
    %115 = vector.load %arg7[%c0_111, %c0_112] : memref<32x144xbf16, #tpu.memory_space<vmem>>, vector<32x144xbf16>
    %c0_113 = arith.constant 0 : index
    %c0_114 = arith.constant 0 : index
    %116 = vector.load %arg18[%c0_113, %c0_114] : memref<144x1600xbf16, #tpu.memory_space<vmem>>, vector<144x1600xbf16>
    %cst_115 = arith.constant dense<0.000000e+00> : vector<32x1600xf32>
    %117 = tpu.matmul %115, %116, %cst_115 {dimension_numbers = #tpu.dot_dimension_numbers<[1], [0], [0], [1], [0, 0, 1, 1], [], []>} : vector<32x144xbf16>, vector<144x1600xbf16>, vector<32x1600xf32> -> vector<32x1600xf32>
    %c0_116 = arith.constant 0 : index
    %c0_117 = arith.constant 0 : index
    %118 = vector.load %arg8[%c0_116, %c0_117] : memref<32x1xf32, #tpu.memory_space<vmem>>, vector<32x1xf32>
    %119 = vector.broadcast %118 : vector<32x1xf32> to vector<32x1600xf32>
    %120 = arith.addf %117, %119 : vector<32x1600xf32>
    %cst_118 = arith.constant 0.000000e+00 : f32
    %121 = vector.broadcast %cst_118 : f32 to vector<32x1600xf32>
    %122 = arith.maximumf %120, %121 : vector<32x1600xf32>
    %c0_119 = arith.constant 0 : index
    %c0_120 = arith.constant 0 : index
    %123 = vector.load %arg9[%c0_119, %c0_120] : memref<1x1600xf32, #tpu.memory_space<vmem>>, vector<1x1600xf32>
    %124 = vector.broadcast %123 : vector<1x1600xf32> to vector<32x1600xf32>
    %125 = arith.mulf %122, %124 : vector<32x1600xf32>
    %126 = vector.shape_cast %125 : vector<32x1600xf32> to vector<1x32x1600xf32>
    %cst_121 = arith.constant dense<0.000000e+00> : vector<1xf32>
    %127 = vector.multi_reduction <add>, %126, %cst_121 [1, 2] : vector<1x32x1600xf32> to vector<1xf32>
    %128 = vector.shape_cast %127 : vector<1xf32> to vector<1x1x1xf32>
    %129 = vector.extract %128[0, 0, 0] : f32 from vector<1x1x1xf32>
    %cst_122 = arith.constant 7.812500e-05 : f32
    %130 = arith.mulf %129, %cst_122 : f32
    %131 = arith.mulf %125, %122 : vector<32x1600xf32>
    %132 = vector.shape_cast %131 : vector<32x1600xf32> to vector<1x32x1600xf32>
    %cst_123 = arith.constant dense<0.000000e+00> : vector<1xf32>
    %133 = vector.multi_reduction <add>, %132, %cst_123 [1, 2] : vector<1x32x1600xf32> to vector<1xf32>
    %134 = vector.shape_cast %133 : vector<1xf32> to vector<1x1x1xf32>
    %135 = vector.extract %134[0, 0, 0] : f32 from vector<1x1x1xf32>
    %cst_124 = arith.constant 7.812500e-05 : f32
    %136 = arith.mulf %135, %cst_124 : f32
    %137 = arith.mulf %130, %130 : f32
    %138 = arith.subf %136, %137 : f32
    %cst_125 = arith.constant 0.000000e+00 : f32
    %139 = arith.maximumf %138, %cst_125 : f32
    %140 = vector.broadcast %130 : f32 to vector<32x1600xf32>
    %141 = arith.subf %122, %140 : vector<32x1600xf32>
    %cst_126 = arith.constant 9.99999974E-6 : f32
    %142 = arith.addf %139, %cst_126 : f32
    %143 = math.rsqrt %142 : f32
    %144 = vector.broadcast %143 : f32 to vector<32x1600xf32>
    %145 = arith.mulf %141, %144 : vector<32x1600xf32>
    %c0_127 = arith.constant 0 : index
    %c0_128 = arith.constant 0 : index
    %146 = vector.load %arg10[%c0_127, %c0_128] : memref<32x1600xf32, #tpu.memory_space<vmem>>, vector<32x1600xf32>
    %147 = arith.mulf %145, %146 : vector<32x1600xf32>
    %c0_129 = arith.constant 0 : index
    %c0_130 = arith.constant 0 : index
    %148 = vector.load %arg11[%c0_129, %c0_130] : memref<32x1600xf32, #tpu.memory_space<vmem>>, vector<32x1600xf32>
    %149 = arith.addf %147, %148 : vector<32x1600xf32>
    %c0_131 = arith.constant 0 : index
    %c0_132 = arith.constant 0 : index
    %150 = vector.load %arg19[%c0_131, %c0_132] : memref<32x1600xf32, #tpu.memory_space<vmem>>, vector<32x1600xf32>
    tpu.vector_store %arg19[%c0_131, %c0_132], %149 {strides = array<i32>} : memref<32x1600xf32, #tpu.memory_space<vmem>>, vector<32x1600xf32>,
    %cst_133 = arith.constant 0.000000e+00 : f32
    %151 = vector.broadcast %cst_133 : f32 to vector<32x128xf32>
    %c0_134 = arith.constant 0 : index
    %c0_135 = arith.constant 0 : index
    %152 = vector.load %arg19[%c0_134, %c0_135] : memref<32x1600xf32, #tpu.memory_space<vmem>>, vector<32x128xf32>
    %c0_136 = arith.constant 0 : index
    %c2_137 = arith.constant 2 : index
    %153 = vector.load %arg19[%c0_136, %c2_137] : memref<32x1600xf32, #tpu.memory_space<vmem>>, vector<32x128xf32>
    %c0_138 = arith.constant 0 : index
    %c200_139 = arith.constant 200 : index
    %154 = vector.load %arg19[%c0_138, %c200_139] : memref<32x1600xf32, #tpu.memory_space<vmem>>, vector<32x128xf32>
    %c0_140 = arith.constant 0 : index
    %c202_141 = arith.constant 202 : index
    %155 = vector.load %arg19[%c0_140, %c202_141] : memref<32x1600xf32, #tpu.memory_space<vmem>>, vector<32x128xf32>
    %156 = arith.maximumf %152, %153 : vector<32x128xf32>
    %157 = arith.maximumf %154, %155 : vector<32x128xf32>
    %158 = arith.maximumf %156, %157 : vector<32x128xf32>
    %159 = arith.truncf %158 : vector<32x128xf32> to vector<32x128xbf16>
    %c0_142 = arith.constant 0 : index
    %c0_143 = arith.constant 0 : index
    %c0_144 = arith.constant 0 : index
    %160 = vector.load %arg12[%c0_142, %c0_143, %c0_144] : memref<4x128x128xbf16, #tpu.memory_space<vmem>>, vector<1x128x128xbf16>
    %161 = vector.shape_cast %160 : vector<1x128x128xbf16> to vector<128x128xbf16>
    %cst_145 = arith.constant dense<0.000000e+00> : vector<32x128xf32>
    %162 = tpu.matmul %159, %161, %cst_145 {dimension_numbers = #tpu.dot_dimension_numbers<[1], [0], [0], [1], [0, 0, 1, 1], [], []>} : vector<32x128xbf16>, vector<128x128xbf16>, vector<32x128xf32> -> vector<32x128xf32>
    %163 = arith.addf %151, %162 : vector<32x128xf32>
    %c0_146 = arith.constant 0 : index
    %c400_147 = arith.constant 400 : index
    %164 = vector.load %arg19[%c0_146, %c400_147] : memref<32x1600xf32, #tpu.memory_space<vmem>>, vector<32x128xf32>
    %c0_148 = arith.constant 0 : index
    %c402_149 = arith.constant 402 : index
    %165 = vector.load %arg19[%c0_148, %c402_149] : memref<32x1600xf32, #tpu.memory_space<vmem>>, vector<32x128xf32>
    %c0_150 = arith.constant 0 : index
    %c600 = arith.constant 600 : index
    %166 = vector.load %arg19[%c0_150, %c600] : memref<32x1600xf32, #tpu.memory_space<vmem>>, vector<32x128xf32>
    %c0_151 = arith.constant 0 : index
    %c602 = arith.constant 602 : index
    %167 = vector.load %arg19[%c0_151, %c602] : memref<32x1600xf32, #tpu.memory_space<vmem>>, vector<32x128xf32>
    %168 = arith.maximumf %164, %165 : vector<32x128xf32>
    %169 = arith.maximumf %166, %167 : vector<32x128xf32>
    %170 = arith.maximumf %168, %169 : vector<32x128xf32>
    %171 = arith.truncf %170 : vector<32x128xf32> to vector<32x128xbf16>
    %c1_152 = arith.constant 1 : index
    %c0_153 = arith.constant 0 : index
    %c0_154 = arith.constant 0 : index
    %172 = vector.load %arg12[%c1_152, %c0_153, %c0_154] : memref<4x128x128xbf16, #tpu.memory_space<vmem>>, vector<1x128x128xbf16>
    %173 = vector.shape_cast %172 : vector<1x128x128xbf16> to vector<128x128xbf16>
    %cst_155 = arith.constant dense<0.000000e+00> : vector<32x128xf32>
    %174 = tpu.matmul %171, %173, %cst_155 {dimension_numbers = #tpu.dot_dimension_numbers<[1], [0], [0], [1], [0, 0, 1, 1], [], []>} : vector<32x128xbf16>, vector<128x128xbf16>, vector<32x128xf32> -> vector<32x128xf32>
    %175 = arith.addf %163, %174 : vector<32x128xf32>
    %c0_156 = arith.constant 0 : index
    %c800 = arith.constant 800 : index
    %176 = vector.load %arg19[%c0_156, %c800] : memref<32x1600xf32, #tpu.memory_space<vmem>>, vector<32x128xf32>
    %c0_157 = arith.constant 0 : index
    %c802 = arith.constant 802 : index
    %177 = vector.load %arg19[%c0_157, %c802] : memref<32x1600xf32, #tpu.memory_space<vmem>>, vector<32x128xf32>
    %c0_158 = arith.constant 0 : index
    %c1000 = arith.constant 1000 : index
    %178 = vector.load %arg19[%c0_158, %c1000] : memref<32x1600xf32, #tpu.memory_space<vmem>>, vector<32x128xf32>
    %c0_159 = arith.constant 0 : index
    %c1002 = arith.constant 1002 : index
    %179 = vector.load %arg19[%c0_159, %c1002] : memref<32x1600xf32, #tpu.memory_space<vmem>>, vector<32x128xf32>
    %180 = arith.maximumf %176, %177 : vector<32x128xf32>
    %181 = arith.maximumf %178, %179 : vector<32x128xf32>
    %182 = arith.maximumf %180, %181 : vector<32x128xf32>
    %183 = arith.truncf %182 : vector<32x128xf32> to vector<32x128xbf16>
    %c2_160 = arith.constant 2 : index
    %c0_161 = arith.constant 0 : index
    %c0_162 = arith.constant 0 : index
    %184 = vector.load %arg12[%c2_160, %c0_161, %c0_162] : memref<4x128x128xbf16, #tpu.memory_space<vmem>>, vector<1x128x128xbf16>
    %185 = vector.shape_cast %184 : vector<1x128x128xbf16> to vector<128x128xbf16>
    %cst_163 = arith.constant dense<0.000000e+00> : vector<32x128xf32>
    %186 = tpu.matmul %183, %185, %cst_163 {dimension_numbers = #tpu.dot_dimension_numbers<[1], [0], [0], [1], [0, 0, 1, 1], [], []>} : vector<32x128xbf16>, vector<128x128xbf16>, vector<32x128xf32> -> vector<32x128xf32>
    %187 = arith.addf %175, %186 : vector<32x128xf32>
    %c0_164 = arith.constant 0 : index
    %c1200 = arith.constant 1200 : index
    %188 = vector.load %arg19[%c0_164, %c1200] : memref<32x1600xf32, #tpu.memory_space<vmem>>, vector<32x128xf32>
    %c0_165 = arith.constant 0 : index
    %c1202 = arith.constant 1202 : index
    %189 = vector.load %arg19[%c0_165, %c1202] : memref<32x1600xf32, #tpu.memory_space<vmem>>, vector<32x128xf32>
    %c0_166 = arith.constant 0 : index
    %c1400 = arith.constant 1400 : index
    %190 = vector.load %arg19[%c0_166, %c1400] : memref<32x1600xf32, #tpu.memory_space<vmem>>, vector<32x128xf32>
    %c0_167 = arith.constant 0 : index
    %c1402 = arith.constant 1402 : index
    %191 = vector.load %arg19[%c0_167, %c1402] : memref<32x1600xf32, #tpu.memory_space<vmem>>, vector<32x128xf32>
    %192 = arith.maximumf %188, %189 : vector<32x128xf32>
    %193 = arith.maximumf %190, %191 : vector<32x128xf32>
    %194 = arith.maximumf %192, %193 : vector<32x128xf32>
    %195 = arith.truncf %194 : vector<32x128xf32> to vector<32x128xbf16>
    %c3_168 = arith.constant 3 : index
    %c0_169 = arith.constant 0 : index
    %c0_170 = arith.constant 0 : index
    %196 = vector.load %arg12[%c3_168, %c0_169, %c0_170] : memref<4x128x128xbf16, #tpu.memory_space<vmem>>, vector<1x128x128xbf16>
    %197 = vector.shape_cast %196 : vector<1x128x128xbf16> to vector<128x128xbf16>
    %cst_171 = arith.constant dense<0.000000e+00> : vector<32x128xf32>
    %198 = tpu.matmul %195, %197, %cst_171 {dimension_numbers = #tpu.dot_dimension_numbers<[1], [0], [0], [1], [0, 0, 1, 1], [], []>} : vector<32x128xbf16>, vector<128x128xbf16>, vector<32x128xf32> -> vector<32x128xf32>
    %199 = arith.addf %187, %198 : vector<32x128xf32>
    %c0_172 = arith.constant 0 : index
    %c0_173 = arith.constant 0 : index
    %c0_174 = arith.constant 0 : index
    %200 = vector.load %arg13[%c0_172, %c0_173, %c0_174] : memref<1x32x128xf32, #tpu.memory_space<vmem>>, vector<1x32x128xf32>
    %201 = vector.shape_cast %200 : vector<1x32x128xf32> to vector<32x128xf32>
    %202 = vector.shape_cast %199 : vector<32x128xf32> to vector<1x32x128xf32>
    tpu.vector_store %arg13[%c0_172, %c0_173, %c0_174], %202 {strides = array<i32>} : memref<1x32x128xf32, #tpu.memory_space<vmem>>, vector<1x32x128xf32>,
    return
  }
  func.func @transform_0(%arg0: i32) -> (i32, i32, i32) {
    %c0_i32 = arith.constant 0 : i32
    %c0_i32_0 = arith.constant 0 : i32
    %c0_i32_1 = arith.constant 0 : i32
    return %arg0, %c0_i32, %c0_i32_0 : i32, i32, i32
  }
  func.func @transform_1(%arg0: i32) -> (i32, i32) {
    %c0_i32 = arith.constant 0 : i32
    %c0_i32_0 = arith.constant 0 : i32
    %c0_i32_1 = arith.constant 0 : i32
    return %c0_i32, %c0_i32_0 : i32, i32
  }
  func.func @transform_2(%arg0: i32) -> (i32, i32) {
    %c0_i32 = arith.constant 0 : i32
    %c0_i32_0 = arith.constant 0 : i32
    %c0_i32_1 = arith.constant 0 : i32
    return %c0_i32, %c0_i32_0 : i32, i32
  }
  func.func @transform_3(%arg0: i32) -> (i32, i32) {
    %c0_i32 = arith.constant 0 : i32
    %c0_i32_0 = arith.constant 0 : i32
    %c0_i32_1 = arith.constant 0 : i32
    return %c0_i32, %c0_i32_0 : i32, i32
  }
  func.func @transform_4(%arg0: i32) -> (i32, i32) {
    %c0_i32 = arith.constant 0 : i32
    %c0_i32_0 = arith.constant 0 : i32
    %c0_i32_1 = arith.constant 0 : i32
    return %c0_i32, %c0_i32_0 : i32, i32
  }
  func.func @transform_5(%arg0: i32) -> (i32, i32) {
    %c0_i32 = arith.constant 0 : i32
    %c0_i32_0 = arith.constant 0 : i32
    %c0_i32_1 = arith.constant 0 : i32
    return %c0_i32, %c0_i32_0 : i32, i32
  }
  func.func @transform_6(%arg0: i32) -> (i32, i32) {
    %c0_i32 = arith.constant 0 : i32
    %c0_i32_0 = arith.constant 0 : i32
    %c0_i32_1 = arith.constant 0 : i32
    return %c0_i32, %c0_i32_0 : i32, i32
  }
  func.func @transform_7(%arg0: i32) -> (i32, i32) {
    %c0_i32 = arith.constant 0 : i32
    %c0_i32_0 = arith.constant 0 : i32
    %c0_i32_1 = arith.constant 0 : i32
    return %c0_i32, %c0_i32_0 : i32, i32
  }
  func.func @transform_8(%arg0: i32) -> (i32, i32) {
    %c0_i32 = arith.constant 0 : i32
    %c0_i32_0 = arith.constant 0 : i32
    %c0_i32_1 = arith.constant 0 : i32
    return %c0_i32, %c0_i32_0 : i32, i32
  }
  func.func @transform_9(%arg0: i32) -> (i32, i32) {
    %c0_i32 = arith.constant 0 : i32
    %c0_i32_0 = arith.constant 0 : i32
    %c0_i32_1 = arith.constant 0 : i32
    return %c0_i32, %c0_i32_0 : i32, i32
  }
  func.func @transform_10(%arg0: i32) -> (i32, i32) {
    %c0_i32 = arith.constant 0 : i32
    %c0_i32_0 = arith.constant 0 : i32
    %c0_i32_1 = arith.constant 0 : i32
    return %c0_i32, %c0_i32_0 : i32, i32
  }
  func.func @transform_11(%arg0: i32) -> (i32, i32, i32) {
    %c0_i32 = arith.constant 0 : i32
    %c0_i32_0 = arith.constant 0 : i32
    %c0_i32_1 = arith.constant 0 : i32
    %c0_i32_2 = arith.constant 0 : i32
    return %c0_i32, %c0_i32_0, %c0_i32_1 : i32, i32, i32
  }
  func.func @transform_12(%arg0: i32) -> (i32, i32, i32) {
    %c0_i32 = arith.constant 0 : i32
    %c0_i32_0 = arith.constant 0 : i32
    %c0_i32_1 = arith.constant 0 : i32
    return %arg0, %c0_i32, %c0_i32_0 : i32, i32, i32
  }
}

module attributes {stable_mosaic.version = 11 : i64} {
  func.func @_fc_kernel(%arg0: memref<2x4096xf32, #tpu.memory_space<vmem>>, %arg1: memref<4096x128xf32, #tpu.memory_space<vmem>>, %arg2: memref<1x128xf32, #tpu.memory_space<vmem>>, %arg3: memref<2x128xf32, #tpu.memory_space<vmem>>) attributes {dimension_semantics = [], scalar_prefetch = 0 : i64, scratch_operands = 0 : i64, tpu.core_type = #tpu.core_type<tc>} {
    %c0 = arith.constant 0 : index
    %c0_0 = arith.constant 0 : index
    %0 = vector.load %arg0[%c0, %c0_0] : memref<2x4096xf32, #tpu.memory_space<vmem>>, vector<2x4096xf32>
    %c0_1 = arith.constant 0 : index
    %c0_2 = arith.constant 0 : index
    %1 = vector.load %arg1[%c0_1, %c0_2] : memref<4096x128xf32, #tpu.memory_space<vmem>>, vector<4096x128xf32>
    %cst = arith.constant dense<0.000000e+00> : vector<2x128xf32>
    %2 = tpu.matmul %0, %1, %cst {dimension_numbers = #tpu.dot_dimension_numbers<[1], [0], [0], [1], [0, 0, 1, 1], [], []>} : vector<2x4096xf32>, vector<4096x128xf32>, vector<2x128xf32> -> vector<2x128xf32>
    %c0_3 = arith.constant 0 : index
    %c0_4 = arith.constant 0 : index
    %3 = vector.load %arg2[%c0_3, %c0_4] : memref<1x128xf32, #tpu.memory_space<vmem>>, vector<1x128xf32>
    %4 = vector.broadcast %3 : vector<1x128xf32> to vector<2x128xf32>
    %5 = arith.addf %2, %4 : vector<2x128xf32>
    %c0_5 = arith.constant 0 : index
    %c0_6 = arith.constant 0 : index
    %6 = vector.load %arg3[%c0_5, %c0_6] : memref<2x128xf32, #tpu.memory_space<vmem>>, vector<2x128xf32>
    tpu.vector_store %arg3[%c0_5, %c0_6], %5 {strides = array<i32>} : memref<2x128xf32, #tpu.memory_space<vmem>>, vector<2x128xf32>,
    return
  }
}

</mosaic_0001>

<bundles_post_ra>
// kernel: pallas_forward.2
= control target key start
LH: loop header
LB: loop body
LE: loop exit
PB: predicated region body
PF: predicated region fallthrough
CT: control target
= control target key end

     0   :  { %s6134_s21 = smov 0   ;;  %s9663_s0 = inlined_call_operand.vmem [shape: f32[2,1,1600], index: 0, kind: input, shape index: {}]   ;;  %s9664_s1 = inlined_call_operand.vmem [shape: f32[16,16], index: 1, kind: input, shape index: {}]   ;;  %s9665_s2 = inlined_call_operand.vmem [shape: f32[16,1], index: 2, kind: input, shape index: {}]   ;;  %s9666_s3 = inlined_call_operand.vmem [shape: f32[9,1600], index: 3, kind: input, shape index: {}]   ;;  %s9667_s4 = inlined_call_operand.vmem [shape: f32[1,1600], index: 4, kind: input, shape index: {}]   ;;  %s9668_s5 = inlined_call_operand.vmem [shape: f32[1,1600], index: 5, kind: input, shape index: {}]   ;;  %s9669_s6 = inlined_call_operand.vmem [shape: bf16[32,144], index: 6, kind: input, shape index: {}]   ;;  %s9670_s7 = inlined_call_operand.vmem [shape: f32[32,1], index: 7, kind: input, shape index: {}]   ;;  %s9671_s8 = inlined_call_operand.vmem [shape: f32[1,1600], index: 8, kind: input, shape index: {}]   ;;  %s9672_s9 = inlined_call_operand.vmem [shape: f32[32,1600], index: 9, kind: input, shape index: {}]   ;;  %s9673_s10 = inlined_call_operand.vmem [shape: f32[32,1600], index: 10, kind: input, shape index: {}]   ;;  %s9674_s11 = inlined_call_operand.vmem [shape: bf16[4,128,128], index: 11, kind: input, shape index: {}]   ;;  %s9675_s12 = inlined_call_operand.vmem [shape: f32[2,32,128], index: 12, kind: output, shape index: {}]  }
   0x1 LB: > { %s5431_s22 = sadd.s32 4294967295, %s6047_s21   ;;  %p5435_p0 = scmp.ge.s32.totalorder %s6047_s21, 1  ;;  %s6047_s21 = sphi %s6134_s21, %s22_s21  }
   0x2   : > { %p361_p1 = scmp.lt.s32.totalorder %s6047_s21, 3 }
   0x4   : > { %p362_p2 = pnand %p5435_p0, %p361_p1 }
   0x6   : > { %365 = sbr.rel (%p362_p2) target bundleno = 2975 (0xb9f), region = 68 }
   0xd   : > { %p6142_p3 = scmp.lt.s32.totalorder %s5431_s22, 1  ;;  %v412_v0 = vlaneseq  ;;  %v9676_v1 = vmov 0.0   ;;  %s6050_s28 = smov 101   ;;  %vm458_vm4 = vcmask 826368   ;;  %vm460_vm6 = vcmask 1040384   ;;  %v775_v31 = vld [vmem:[%s9665_s2] sm:$0xff] }
   0xe   : > { %421 = vst [vmem:[#allocation3 + $0x68] sm:$0xfe] %v9676_v1  ;;  %422 = vst [vmem:[#allocation3 + $0x70] sm:$0xfe] %v9676_v1  ;;  %858 = vmatprep.mubr.f32.mxu1 %v9676_v1  ;;  %1012 = vmatprep.mubr.f32.mxu0 %v9676_v1  ;;  %s6051_s19 = smov 126   ;;  %s6052_s20 = smov 127  }
   0xf   : > { %423 = vst [vmem:[#allocation3 + $0x78] sm:$0xfe] %v9676_v1  ;;  %424 = vst [vmem:[#allocation3 + $0x80] sm:$0xfe] %v9676_v1  ;;  %s9834_s22 = smov (!%p6142_p3, %s5431_s22), 1  ;;  %vm414_vm0 = vcmp.lt.s32.totalorder %v412_v0, 101 }
  0x10   : > { %425 = vst [vmem:[#allocation3 + $0x88] sm:$0xfe] %v9676_v1  ;;  %426 = vst [vmem:[#allocation3 + $0x90] sm:$0xfe] %v9676_v1  ;;  %vm417_vm1 = vcmp.ge.s32.totalorder %v412_v0, 37  ;;  %vm418_vm2 = vcmp.lt.s32.totalorder %v412_v0, 138 }
  0x11   : > { %427 = vst [vmem:[#allocation3 + $0x98] sm:$0xfe] %v9676_v1  ;;  %428 = vst [vmem:[#allocation3 + $0xa0] sm:$0xfe] %v9676_v1  ;;  %s5758_s24 = smul.u32 13, %s9834_s22  ;;  %vm465_vm5 = vcmp.ge.s32.totalorder %v412_v0, 101 }
  0x12   : > { %429 = vst [vmem:[#allocation3 + $0xa8] sm:$0xfe] %v9676_v1  ;;  %430 = vst [vmem:[#allocation3 + $0xb0] sm:$0xfe] %v9676_v1  ;;  %vm469_vm7 = vcmp.lt.s32.totalorder %v412_v0, 677  ;;  %vm6190_vm8 = vcmp.lt.s32.totalorder %v412_v0, 576 }
  0x13   : > { %431 = vst [vmem:[#allocation3 + $0xb8] sm:$0xfe] %v9676_v1  ;;  %432 = vst [vmem:[#allocation3 + $0xc0] sm:$0xfe] %v9676_v1  ;;  %s405_s27 = scalar_lea.vmem %s9663_s0, %s5758_s24  ;;  %s6053_s23 = smov 28   ;;  %vm433_vm9 = vcmask 523265  }
  0x14   : > { %416 = vst.msk [vmem:[#allocation2] sm:$0x1] %vm414_vm0, %v9676_v1  ;;  %vm419_vm3 = vmand %vm417_vm1, %vm418_vm2  ;;  %v448_v2 = vld [vmem:[%s405_s27] sm:$0xff]  ;;  %v449_v3 = vld [vmem:[%s405_s27 + $0x8] sm:$0x1f]  ;;  %s6054_s24 = smov 27  }
  0x15   : > { %420 = vst.msk [vmem:[#allocation2 + $0xd] sm:$0x3] %vm419_vm3, %v9676_v1  ;;  %452 = vrot.lane.b32.xlu0 %v448_v2, %s6050_s28  ;;  %v472_v8 = vld [vmem:[%s9666_s3] ss:$8 sm:$0xf]  ;;  %s6055_s25 = smov 26  }
  0x16   : > { %v473_v10 = vld [vmem:[%s9666_s3] ss:$8 sm:$0xf0]  ;;  %s6056_s26 = smov 56   ;;  %s6057_s27 = smov 55   ;;  %v6059_v33 = vmov 0  }
  0x17   : > { %v474_v13 = vor.u32 %v473_v10, %v472_v8  ;;  %v5438_v14 = vld [vmem:[%s9666_s3 + $0x40] ss:$8 sm:$0xf]  ;;  %434 = vst.msk [vmem:[#allocation3 + $0xc8] sm:$0xfe] %vm433_vm9, %v9676_v1  ;;  %5793 = vset.pattern.permute.xlu0 %v6059_v33  ;;  %441 = vst [vmem:[#allocation5] sm:$0xff] %v6059_v33  ;;  %5794 = vset.pattern.permute.xlu1 %v6059_v33 }
  0x18   : > { %v5439_v15 = vld [vmem:[%s9666_s3 + $0x40] ss:$8 sm:$0x10]  ;;  %v776_v32 = vld [vmem:[%s9665_s2 + $0x8] sm:$0xff]  ;;  %vm508_vm10 = vcmask 1046528   ;;  %vm510_vm11 = vcmask 1039360  }
  0x19   : > { %454 = vrot.lane.b32.xlu0 %v449_v3, %s6050_s28  ;;  %v478_v18 = vor.u32 %v5439_v15, %v5438_v14  ;;  %s6058_s28 = smov 54   ;;  %v5442_v36 = vld [vmem:[%s9666_s3 + $0x41] ss:$8 sm:$0xf]  ;;  %vm542_vm12 = vcmask 1031168   ;;  %vm574_vm13 = vcmask 228352  }
  0x1a   : > { %v5443_v37 = vld [vmem:[%s9666_s3 + $0x41] ss:$8 sm:$0x10]  ;;  %v5446_v43 = vld [vmem:[%s9666_s3 + $0x42] ss:$8 sm:$0xf] }
  0x1b   : > { %v5440_v38 = vld [vmem:[%s9666_s3 + $0x1] ss:$8 sm:$0xf]  ;;  %v497_v41 = vor.u32 %v5443_v37, %v5442_v36  ;;  %v5447_v47 = vld [vmem:[%s9666_s3 + $0x42] ss:$8 sm:$0x10] }
  0x1c   : > { %v5441_v39 = vld [vmem:[%s9666_s3 + $0x1] ss:$8 sm:$0xf0]  ;;  %v5444_v48 = vld [vmem:[%s9666_s3 + $0x2] ss:$8 sm:$0xf]  ;;  %v530_v55 = vor.u32 %v5447_v47, %v5446_v43 }
  0x1d   : > { %v493_v45 = vor.u32 %v5441_v39, %v5440_v38  ;;  %v5445_v49 = vld [vmem:[%s9666_s3 + $0x2] ss:$8 sm:$0xf0]  ;;  %v5450_v57 = vld [vmem:[%s9666_s3 + $0x43] ss:$8 sm:$0xf] }
  0x1e   : > { %v526_v60 = vor.u32 %v5445_v49, %v5444_v48  ;;  %v5451_v62 = vld [vmem:[%s9666_s3 + $0x43] ss:$8 sm:$0x10]  ;;  %v5454_v10 = vld [vmem:[%s9666_s3 + $0x44] ss:$8 sm:$0xf] }
  0x1f   : > { %v5448_v63 = vld [vmem:[%s9666_s3 + $0x3] ss:$8 sm:$0xf]  ;;  %v562_v8 = vor.u32 %v5451_v62, %v5450_v57  ;;  %v5455_v15 = vld [vmem:[%s9666_s3 + $0x44] ss:$8 sm:$0x10] }
  0x20   : > { %v5449_v2 = vld [vmem:[%s9666_s3 + $0x3] ss:$8 sm:$0xf0]  ;;  %vm606_vm14 = vcmask 220160   ;;  %vm638_vm15 = vcmask 211968   ;;  %vm670_vm0 = vcmask 457728  }
  0x21   : > { %v5457_v33 = vld [vmem:[%s9666_s3 + $0x5] ss:$8 sm:$0xf0]  ;;  %v5461_v47 = vld [vmem:[%s9666_s3 + $0x6] ss:$8 sm:$0xf0] }
  0x22   : > { %v5465_v62 = vld [vmem:[%s9666_s3 + $0x7] ss:$8 sm:$0xf0]  ;;  %vm702_vm1 = vcmask 449536   ;;  %vm734_vm2 = vcmask 441344   ;;  %vm787_vm3 = vcmask 130048  }
  0x23   : > { %s6060_s15 = smov 74   ;;  %vm2284_vm9 = vcmask 1048144   ;;  %s6062_s18 = smov 52  }
  0x87   : > { %v453_v4 = vpop.permute.xlu0 %452 }
  0x88   : > { %v456_v5 = vrot.slane %v453_v4, 7 }
  0x8a   : > { %v459_v6 = vsel %vm458_vm4, %v456_v5, %v453_v4 }
  0x8b   : > { %468 = vst.msk [vmem:[#allocation2] sm:$0xff] %vm465_vm5, %v459_v6  ;;  %v455_v7 = vpop.permute.xlu0 %454  ;;  %vm435_vm5 = vcmask 1048064  }
  0x8c   : > { %v457_v9 = vrot.slane %v455_v7, 7  ;;  %436 = vst.msk [vmem:[#allocation4 + $0x60] sm:$0xff] %vm435_vm5, %v9676_v1  ;;  %439 = vst.msk [vmem:[#allocation4 + $0xd0] sm:$0xff] %vm435_vm5, %v9676_v1  ;;  %vm2939_vm5 = vcmask 900096  }
  0x8e   : > { %v461_v11 = vsel %vm460_vm6, %v456_v5, %v457_v9  ;;  %vm437_vm6 = vcmask 302080  }
  0x8f   : > { %v462_v12 = vsel %vm458_vm4, %v461_v11, %v455_v7  ;;  %vm1368_vm4 = vcmask 523264  }
  0x90   : > { %471 = vst.msk [vmem:[#allocation2 + $0x8] sm:$0x3f] %vm469_vm7, %v462_v12  ;;  %vm442_vm7 = vcmask 605184  }
  0x92   : > { %v531_v16 = vld [vmem:[#allocation2] sm:$0xff] }
  0x93   : > { %535 = vrot.lane.b32.xlu0 %v531_v16, %s6051_s19  ;;  %502 = vrot.lane.b32.xlu1 %v531_v16, %s6052_s20  ;;  %v481_v17 = vmul.f32 %v531_v16, %v474_v13  ;;  %v558_v13 = vor.u32 %v5449_v2, %v5448_v63 }
  0x95   : > { %483 = vst [vmem:[#allocation3] ss:$8 sm:$0xf] %v481_v17  ;;  %484 = vst [vmem:[#allocation3] ss:$8 sm:$0xf0] %v481_v17 }
  0x96   : > { %v5453_v17 = vld [vmem:[%s9666_s3 + $0x4] ss:$8 sm:$0xf0] }
  0x97   : > { %v480_v20 = vld [vmem:[#allocation2 + $0x8] sm:$0x1f]  ;;  %567 = vrot.lane.b32.xlu0 %v531_v16, %s6053_s23 }
  0x98   : > { %v499_v21 = vld [vmem:[#allocation2 + $0x8] sm:$0x1f]  ;;  %v482_v22 = vmul.f32 %v480_v20, %v478_v18 }
  0x99   : > { %504 = vrot.lane.b32.xlu1 %v499_v21, %s6052_s20  ;;  %v532_v23 = vld [vmem:[#allocation2 + $0x8] sm:$0x1f] }
  0x9a   : > { %488 = vst.msk [vmem:[#allocation3 + $0x40] ss:$8 sm:$0xf] %vm6190_vm8, %v482_v22  ;;  %489 = vst.msk [vmem:[#allocation3 + $0x40] ss:$8 sm:$0x10] %vm6190_vm8, %v482_v22 }
  0x9b   : > { %599 = vrot.lane.b32.xlu0 %v531_v16, %s6054_s24  ;;  %v564_v24 = vld [vmem:[#allocation2 + $0x8] sm:$0x3f] }
  0x9c   : > { %v659_v25 = vld [vmem:[#allocation2 + $0x1] sm:$0xff]  ;;  %v660_v28 = vld [vmem:[#allocation2 + $0x9] sm:$0x3f] }
  0x9d   : > { %537 = vrot.lane.b32.xlu1 %v532_v23, %s6051_s19  ;;  %v596_v26 = vld [vmem:[#allocation2 + $0x8] sm:$0x3f]  ;;  %v594_v23 = vor.u32 %v5455_v15, %v5454_v10 }
  0x9e   : > { %v628_v27 = vld [vmem:[#allocation2 + $0x8] sm:$0x3f] }
  0x9f   : > { %631 = vrot.lane.b32.xlu0 %v531_v16, %s6055_s25  ;;  %v692_v29 = vld [vmem:[#allocation2 + $0x9] sm:$0x3f]  ;;  %v5469_v15 = vld [vmem:[%s9666_s3 + $0x68] ss:$8 sm:$0xf0] }
  0xa0   : > { %v724_v30 = vld [vmem:[#allocation2 + $0x9] sm:$0x3f] }
  0xa1   : > { %569 = vrot.lane.b32.xlu1 %v564_v24, %s6053_s23  ;;  %v5452_v16 = vld [vmem:[%s9666_s3 + $0x4] ss:$8 sm:$0xf] }
  0xa3   : > { %663 = vrot.lane.b32.xlu0 %v659_v25, %s6056_s26 }
  0xa5   : > { %601 = vrot.lane.b32.xlu1 %v596_v26, %s6054_s24  ;;  %s6063_s24 = smov 112  }
  0xa7   : > { %695 = vrot.lane.b32.xlu0 %v659_v25, %s6057_s27 }
  0xa9   : > { %633 = vrot.lane.b32.xlu1 %v628_v27, %s6055_s25  ;;  %s6064_s25 = smov 110  }
  0xab   : > { %727 = vrot.lane.b32.xlu0 %v659_v25, %s6058_s28  ;;  %v5458_v25 = vld [vmem:[%s9666_s3 + $0x45] ss:$8 sm:$0xf] }
  0xad   : > { %665 = vrot.lane.b32.xlu1 %v660_v28, %s6056_s26  ;;  %v590_v28 = vor.u32 %v5453_v17, %v5452_v16 }
  0xaf   : > { %779 = vperm.xlu0 %5793, %v775_v31  }
  0xb1   : > { %697 = vrot.lane.b32.xlu1 %v692_v29, %s6057_s27  ;;  %s6065_s27 = smov 108  }
  0xb5   : > { %729 = vrot.lane.b32.xlu1 %v724_v30, %s6058_s28  ;;  %v5459_v30 = vld [vmem:[%s9666_s3 + $0x45] ss:$8 sm:$0x10] }
  0xb6   : > { %v626_v38 = vor.u32 %v5459_v30, %v5458_v25 }
  0xb9   : > { %784 = vperm.xlu1 %5794, %v776_v32   ;;  %v5456_v32 = vld [vmem:[%s9666_s3 + $0x5] ss:$8 sm:$0xf] }
  0xba   : > { %v622_v43 = vor.u32 %v5457_v33, %v5456_v32 }
 0x105   : > { %v503_v34 = vpop.permute.xlu1 %502  ;;  %v536_v35 = vpop.permute.xlu0 %535 }
 0x106   : > { %v506_v44 = vrot.slane %v503_v34, 1  ;;  %v539_v58 = vrot.slane %v536_v35, 1 }
 0x109   : > { %v568_v40 = vpop.permute.xlu0 %567 }
 0x10a   : > { %v571_v11 = vrot.slane %v568_v40, 1 }
 0x10b   : > { %v505_v42 = vpop.permute.xlu1 %504 }
 0x10c   : > { %v507_v46 = vrot.slane %v505_v42, 1 }
 0x10d   : > { %v600_v52 = vpop.permute.xlu0 %599 }
 0x10e   : > { %v509_v50 = vsel %vm508_vm10, %v506_v44, %v507_v46  ;;  %v512_v51 = vsel %vm510_vm11, %v505_v42, %v507_v46  ;;  %v603_v26 = vrot.slane %v600_v52, 1  ;;  %v5460_v46 = vld [vmem:[%s9666_s3 + $0x6] ss:$8 sm:$0xf] }
 0x10f   : > { %v511_v53 = vsel %vm510_vm11, %v503_v34, %v509_v50  ;;  %v516_v54 = vmul.f32 %v512_v51, %v497_v41  ;;  %v538_v56 = vpop.permute.xlu1 %537 }
 0x110   : > { %v515_v59 = vmul.f32 %v511_v53, %v493_v45  ;;  %v540_v61 = vrot.slane %v538_v56, 1  ;;  %v5463_v45 = vld [vmem:[%s9666_s3 + $0x46] ss:$8 sm:$0x10] }
 0x111   : > { %521 = vst.msk [vmem:[#allocation3 + $0x41] ss:$8 sm:$0xf] %vm6190_vm8, %v516_v54  ;;  %522 = vst.msk [vmem:[#allocation3 + $0x41] ss:$8 sm:$0x10] %vm6190_vm8, %v516_v54  ;;  %v632_v7 = vpop.permute.xlu0 %631 }
 0x112   : > { %518 = vst [vmem:[#allocation3 + $0x1] ss:$8 sm:$0xf] %v515_v59  ;;  %519 = vst [vmem:[#allocation3 + $0x1] ss:$8 sm:$0xf0] %v515_v59  ;;  %v541_v3 = vsel %vm508_vm10, %v539_v58, %v540_v61  ;;  %v544_v4 = vsel %vm542_vm12, %v538_v56, %v540_v61  ;;  %v654_v58 = vor.u32 %v5461_v47, %v5460_v46 }
 0x113   : > { %v543_v5 = vsel %vm542_vm12, %v536_v35, %v541_v3  ;;  %v548_v6 = vmul.f32 %v544_v4, %v530_v55  ;;  %v570_v9 = vpop.permute.xlu1 %569  ;;  %v635_v41 = vrot.slane %v632_v7, 1  ;;  %v5466_v55 = vld [vmem:[%s9666_s3 + $0x47] ss:$8 sm:$0xf] }
 0x114   : > { %v547_v12 = vmul.f32 %v543_v5, %v526_v60  ;;  %v572_v14 = vrot.slane %v570_v9, 1  ;;  %v5467_v60 = vld [vmem:[%s9666_s3 + $0x47] ss:$8 sm:$0x10] }
 0x115   : > { %553 = vst.msk [vmem:[#allocation3 + $0x42] ss:$8 sm:$0xf] %vm6190_vm8, %v548_v6  ;;  %554 = vst.msk [vmem:[#allocation3 + $0x42] ss:$8 sm:$0x10] %vm6190_vm8, %v548_v6  ;;  %v664_v31 = vpop.permute.xlu0 %663  ;;  %v690_v5 = vor.u32 %v5467_v60, %v5466_v55 }
 0x116   : > { %550 = vst [vmem:[#allocation3 + $0x2] ss:$8 sm:$0xf] %v547_v12  ;;  %551 = vst [vmem:[#allocation3 + $0x2] ss:$8 sm:$0xf0] %v547_v12  ;;  %v573_v18 = vsel %vm508_vm10, %v571_v11, %v572_v14  ;;  %v576_v20 = vsel %vm574_vm13, %v570_v9, %v572_v14 }
 0x117   : > { %v575_v21 = vsel %vm574_vm13, %v568_v40, %v573_v18  ;;  %v580_v22 = vmul.f32 %v576_v20, %v562_v8  ;;  %v602_v24 = vpop.permute.xlu1 %601  ;;  %v5462_v40 = vld [vmem:[%s9666_s3 + $0x46] ss:$8 sm:$0xf]  ;;  %v667_v56 = vrot.slane %v664_v31, 1 }
 0x118   : > { %v579_v27 = vmul.f32 %v575_v21, %v558_v13  ;;  %v604_v29 = vrot.slane %v602_v24, 1  ;;  %v658_v53 = vor.u32 %v5463_v45, %v5462_v40  ;;  %v5464_v61 = vld [vmem:[%s9666_s3 + $0x7] ss:$8 sm:$0xf] }
 0x119   : > { %585 = vst.msk [vmem:[#allocation3 + $0x43] ss:$8 sm:$0xf] %vm6190_vm8, %v580_v22  ;;  %586 = vst.msk [vmem:[#allocation3 + $0x43] ss:$8 sm:$0x10] %vm6190_vm8, %v580_v22  ;;  %v696_v50 = vpop.permute.xlu0 %695  ;;  %v686_v10 = vor.u32 %v5465_v62, %v5464_v61 }
 0x11a   : > { %582 = vst [vmem:[#allocation3 + $0x3] ss:$8 sm:$0xf] %v579_v27  ;;  %583 = vst [vmem:[#allocation3 + $0x3] ss:$8 sm:$0xf0] %v579_v27  ;;  %v605_v34 = vsel %vm508_vm10, %v603_v26, %v604_v29  ;;  %v608_v35 = vsel %vm606_vm14, %v602_v24, %v604_v29 }
 0x11b   : > { %v607_v36 = vsel %vm606_vm14, %v600_v52, %v605_v34  ;;  %v612_v37 = vmul.f32 %v608_v35, %v594_v23  ;;  %v634_v39 = vpop.permute.xlu1 %633  ;;  %v699_v8 = vrot.slane %v696_v50, 1  ;;  %v5471_v12 = vld [vmem:[%s9666_s3 + $0xa8] ss:$8 sm:$0x10]  ;;  %vm3030_vm14 = vcmask 883712  }
 0x11c   : > { %v611_v42 = vmul.f32 %v607_v36, %v590_v28  ;;  %v636_v44 = vrot.slane %v634_v39, 1  ;;  %v5468_v14 = vld [vmem:[%s9666_s3 + $0x68] ss:$8 sm:$0xf] }
 0x11d   : > { %617 = vst.msk [vmem:[#allocation3 + $0x44] ss:$8 sm:$0xf] %vm6190_vm8, %v612_v37  ;;  %618 = vst.msk [vmem:[#allocation3 + $0x44] ss:$8 sm:$0x10] %vm6190_vm8, %v612_v37  ;;  %v728_v13 = vpop.permute.xlu0 %727  ;;  %v718_v25 = vor.u32 %v5469_v15, %v5468_v14 }
 0x11e   : > { %614 = vst [vmem:[#allocation3 + $0x4] ss:$8 sm:$0xf] %v611_v42  ;;  %615 = vst [vmem:[#allocation3 + $0x4] ss:$8 sm:$0xf0] %v611_v42  ;;  %v637_v48 = vsel %vm508_vm10, %v635_v41, %v636_v44  ;;  %v640_v49 = vsel %vm638_vm15, %v634_v39, %v636_v44 }
 0x11f   : > { %v639_v51 = vsel %vm638_vm15, %v632_v7, %v637_v48  ;;  %v644_v52 = vmul.f32 %v640_v49, %v626_v38  ;;  %v666_v54 = vpop.permute.xlu1 %665  ;;  %v5470_v7 = vld [vmem:[%s9666_s3 + $0xa8] ss:$8 sm:$0xf]  ;;  %v731_v23 = vrot.slane %v728_v13, 1  ;;  %vm446_vm15 = vcmask 687104  }
 0x120   : > { %v643_v57 = vmul.f32 %v639_v51, %v622_v43  ;;  %v668_v59 = vrot.slane %v666_v54, 1  ;;  %v722_v21 = vor.u32 %v5471_v12, %v5470_v7  ;;  %v747_v51 = vld [vmem:[%s9664_s1] sm:$0xff]  ;;  %v748_v62 = vld [vmem:[%s9664_s1 + $0x8] sm:$0xff] }
 0x121   : > { %649 = vst.msk [vmem:[#allocation3 + $0x45] ss:$8 sm:$0xf] %vm6190_vm8, %v644_v52  ;;  %650 = vst.msk [vmem:[#allocation3 + $0x45] ss:$8 sm:$0x10] %vm6190_vm8, %v644_v52 }
 0x122   : > { %646 = vst [vmem:[#allocation3 + $0x5] ss:$8 sm:$0xf] %v643_v57  ;;  %647 = vst [vmem:[#allocation3 + $0x5] ss:$8 sm:$0xf0] %v643_v57  ;;  %v669_v63 = vsel %vm508_vm10, %v667_v56, %v668_v59  ;;  %v672_v2 = vsel %vm670_vm0, %v666_v54, %v668_v59 }
 0x123   : > { %v671_v3 = vsel %vm670_vm0, %v664_v31, %v669_v63  ;;  %v676_v4 = vmul.f32 %v672_v2, %v658_v53  ;;  %v698_v6 = vpop.permute.xlu1 %697 }
 0x124   : > { %v675_v9 = vmul.f32 %v671_v3, %v654_v58  ;;  %v700_v11 = vrot.slane %v698_v6, 1 }
 0x125   : > { %681 = vst.msk [vmem:[#allocation3 + $0x46] ss:$8 sm:$0xf] %vm6190_vm8, %v676_v4  ;;  %682 = vst.msk [vmem:[#allocation3 + $0x46] ss:$8 sm:$0x10] %vm6190_vm8, %v676_v4 }
 0x126   : > { %678 = vst [vmem:[#allocation3 + $0x6] ss:$8 sm:$0xf] %v675_v9  ;;  %679 = vst [vmem:[#allocation3 + $0x6] ss:$8 sm:$0xf0] %v675_v9  ;;  %v701_v16 = vsel %vm508_vm10, %v699_v8, %v700_v11  ;;  %v704_v17 = vsel %vm702_vm1, %v698_v6, %v700_v11 }
 0x127   : > { %v703_v18 = vsel %vm702_vm1, %v696_v50, %v701_v16  ;;  %v708_v20 = vmul.f32 %v704_v17, %v690_v5  ;;  %v730_v22 = vpop.permute.xlu1 %729  ;;  %vm2756_vm1 = vcmask 424960  }
 0x128   : > { %v707_v24 = vmul.f32 %v703_v18, %v686_v10  ;;  %v732_v26 = vrot.slane %v730_v22, 1 }
 0x129   : > { %713 = vst.msk [vmem:[#allocation3 + $0x47] ss:$8 sm:$0xf] %vm6190_vm8, %v708_v20  ;;  %714 = vst.msk [vmem:[#allocation3 + $0x47] ss:$8 sm:$0x10] %vm6190_vm8, %v708_v20 }
 0x12a   : > { %710 = vst [vmem:[#allocation3 + $0x7] ss:$8 sm:$0xf] %v707_v24  ;;  %711 = vst [vmem:[#allocation3 + $0x7] ss:$8 sm:$0xf0] %v707_v24  ;;  %v733_v27 = vsel %vm508_vm10, %v731_v23, %v732_v26  ;;  %v736_v28 = vsel %vm734_vm2, %v730_v22, %v732_v26 }
 0x12b   : > { %v735_v29 = vsel %vm734_vm2, %v728_v13, %v733_v27  ;;  %v740_v30 = vmul.f32 %v736_v28, %v722_v21  ;;  %vm2298_vm10 = vcmask 80896  }
 0x12c   : > { %v739_v31 = vmul.f32 %v735_v29, %v718_v25 }
 0x12d   : > { %745 = vst.msk [vmem:[#allocation3 + $0xa8] ss:$8 sm:$0xf] %vm6190_vm8, %v740_v30  ;;  %746 = vst.msk [vmem:[#allocation3 + $0xa8] ss:$8 sm:$0x10] %vm6190_vm8, %v740_v30 }
 0x12e   : > { %742 = vst [vmem:[#allocation3 + $0x68] ss:$8 sm:$0xf] %v739_v31  ;;  %743 = vst [vmem:[#allocation3 + $0x68] ss:$8 sm:$0xf0] %v739_v31  ;;  %v6395_v10 = vpop.permute.xlu0 %779 }
 0x12f   : > { %vm444_vm8 = vcmask 1047632  }
 0x130   : > { %v758_v47 = vld [vmem:[#allocation3 + $0x48] sm:$0xff]  ;;  %v757_v55 = vld [vmem:[#allocation3 + $0x40] sm:$0xff]  ;;  %v760_v5 = vld [vmem:[#allocation3 + $0x58] sm:$0xff] }
 0x131   : > { %v750_v32 = vld [vmem:[#allocation3 + $0x8] sm:$0xff]  ;;  %v749_v34 = vld [vmem:[#allocation3] sm:$0xff]  ;;  %v752_v46 = vld [vmem:[#allocation3 + $0x18] sm:$0xff] }
 0x132   : > { %v754_v33 = vld [vmem:[#allocation3 + $0x28] sm:$0xff]  ;;  %v753_v42 = vld [vmem:[#allocation3 + $0x20] sm:$0xff]  ;;  %v751_v54 = vld [vmem:[#allocation3 + $0x10] sm:$0xff] }
 0x133   : > { %v756_v58 = vld [vmem:[#allocation3 + $0x38] sm:$0xff]  ;;  %v761_v59 = vld [vmem:[#allocation3 + $0x60] sm:$0xff]  ;;  %v755_v3 = vld [vmem:[#allocation3 + $0x30] sm:$0xff] }
 0x134   : > { %v771_v35 = vld [vmem:[#allocation3 + $0xb0] sm:$0xff]  ;;  %v770_v50 = vld [vmem:[#allocation3 + $0xa8] sm:$0xff]  ;;  %v773_v2 = vld [vmem:[#allocation3 + $0xc0] sm:$0xff] }
 0x135   : > { %v763_v36 = vld [vmem:[#allocation3 + $0x70] sm:$0xff]  ;;  %v762_v38 = vld [vmem:[#allocation3 + $0x68] sm:$0xff]  ;;  %v765_v44 = vld [vmem:[#allocation3 + $0x80] sm:$0xff]  ;;  %v5734_v48 = vpack.c.bf16 %v771_v35, %v758_v47  ;;  %v5736_v57 = vpack.c.bf16 %v770_v50, %v757_v55  ;;  %v5738_v6 = vpack.c.bf16 %v773_v2, %v760_v5 }
 0x136   : > { %v767_v37 = vld [vmem:[#allocation3 + $0x90] sm:$0xff]  ;;  %v5718_v39 = vpack.c.bf16 %v763_v36, %v750_v32  ;;  %v5720_v41 = vpack.c.bf16 %v762_v38, %v749_v34  ;;  %v766_v43 = vld [vmem:[#allocation3 + $0x88] sm:$0xff]  ;;  %v5722_v19 = vpack.c.bf16 %v765_v44, %v752_v46  ;;  %v764_v49 = vld [vmem:[#allocation3 + $0x78] sm:$0xff] }
 0x137   : > { %v5726_v40 = vpack.c.bf16 %v767_v37, %v754_v33  ;;  %v5728_v45 = vpack.c.bf16 %v766_v43, %v753_v42  ;;  %v769_v52 = vld [vmem:[#allocation3 + $0xa0] sm:$0xff]  ;;  %v774_v53 = vld [vmem:[#allocation3 + $0xc8] sm:$0xff]  ;;  %v5724_v56 = vpack.c.bf16 %v764_v49, %v751_v54  ;;  %v768_v63 = vld [vmem:[#allocation3 + $0x98] sm:$0xff] }
 0x138   : > { %5719 = vmatprep.subr.bf16.mxu1 %v5718_v39  ;;  %v5730_v60 = vpack.c.bf16 %v769_v52, %v756_v58  ;;  %v5742_v61 = vpack.c.bf16 %v774_v53, %v761_v59  ;;  %v5732_v4 = vpack.c.bf16 %v768_v63, %v755_v3  ;;  %v772_v7 = vld [vmem:[#allocation3 + $0xb8] sm:$0xff]  ;;  %v759_v8 = vld [vmem:[#allocation3 + $0x50] sm:$0xff]  ;;  %v6398_v16 = vpop.permute.xlu1 %784 }
 0x139   : > { %5727 = vmatprep.subr.bf16.mxu0 %v5726_v40  ;;  %5721 = vmatpush1.bf16.msra.mxu1 %v5720_v41  ;;  %v5740_v9 = vpack.c.bf16 %v772_v7, %v759_v8 }
 0x13a   : > { %5729 = vmatpush1.bf16.msra.mxu0 %v5728_v45  ;;  %5723 = vmatprep.subr.bf16.mxu1 %v5722_v19 }
 0x13b   : > { %5735 = vmatprep.subr.bf16.mxu0 %v5734_v48 }
 0x13c   : > { %5472 = vmatmul.mubr.msk.f32.vlgmr.msra.gmra.mrb[0].mxu1 %vm787_vm3, %v747_v51 }
 0x13d   : > { %5476 = vmatmul.mubr.msk.f32.vlgmr.msra.gmra.mrb[0].mxu0 %vm787_vm3, %v747_v51  ;;  %5725 = vmatpush1.bf16.msra.mxu1 %v5724_v56 }
 0x13e   : > { %5737 = vmatpush1.bf16.msra.mxu0 %v5736_v57  ;;  %5731 = vmatprep.subr.bf16.mxu1 %v5730_v60 }
 0x13f   : > { %5743 = vmatprep.subr.bf16.mxu0 %v5742_v61  ;;  %864 = vmatprep.mubr.f32.mxu1 %v9676_v1 }
 0x140   : > { %1018 = vmatprep.mubr.f32.mxu0 %v9676_v1  ;;  %5473 = vmatmul.mubr.msk.f32.gmra.mrb[2].mxu1 %vm787_vm3, %v748_v62 }
 0x141   : > { %5477 = vmatmul.mubr.msk.f32.gmra.mrb[2].mxu0 %vm787_vm3, %v748_v62  ;;  %935 = vmatprep.mubr.f32.mxu1 %v9676_v1 }
 0x142   : > { %1166 = vmatprep.mubr.f32.mxu0 %v9676_v1 }
 0x144   : > { %5474 = vmatmul.mubr.msk.f32.vlgmr.msra.gmra.mrb[4].mxu1 %vm787_vm3, %v747_v51 }
 0x145   : > { %5480 = vmatmul.mubr.msk.f32.vlgmr.msra.gmra.mrb[4].mxu0 %vm787_vm3, %v747_v51  ;;  %5733 = vmatpush1.bf16.msra.mxu1 %v5732_v4 }
 0x146   : > { %5745 = vmatpush3.bf16.msra.mxu0 %v5742_v61  ;;  %5739 = vmatprep.subr.bf16.mxu1 %v5738_v6 }
 0x147   : > { %941 = vmatprep.mubr.f32.mxu1 %v9676_v1  ;;  %1172 = vmatprep.mubr.f32.mxu0 %v9676_v1 }
 0x148   : > { %5475 = vmatmul.mubr.msk.f32.gmra.mrb[6].mxu1 %vm787_vm3, %v748_v62 }
 0x149   : > { %5481 = vmatmul.mubr.msk.f32.gmra.mrb[6].mxu0 %vm787_vm3, %v748_v62  ;;  %1089 = vmatprep.mubr.f32.mxu1 %v9676_v1 }
 0x14a   : > { %5635 = vmatprep.mubr.msk.f32.mxu0 %vm787_vm3, %v747_v51 }
 0x14c   : > { %5478 = vmatmul.mubr.msk.f32.vlgmr.msra.gmra.mrb[8].mxu1 %vm787_vm3, %v747_v51 }
 0x14d   : > { %5636 = vmatmul.mubr.msk.f32.vlgmr.msra.gmra.mrb[8].mxu0 %vm787_vm3, %v748_v62  ;;  %5741 = vmatpush1.bf16.msra.mxu1 %v5740_v9 }
 0x14e   : > { %1095 = vmatprep.mubr.f32.mxu1 %v9676_v1 }
 0x150   : > { %5479 = vmatmul.mubr.msk.f32.gmra.mrb[10].mxu1 %vm787_vm3, %v748_v62 }
 0x151   : > { %1243 = vmatprep.mubr.f32.mxu1 %v9676_v1 }
 0x154   : > { %5482 = vmatmul.mubr.msk.f32.vlgmr.msra.gmra.mrb[12].mxu1 %vm787_vm3, %v747_v51 }
 0x155   : > { %1249 = vmatprep.mubr.f32.mxu1 %v9676_v1 }
 0x158   : > { %5483 = vmatmul.mubr.msk.f32.gmra.mrb[14].mxu1 %vm787_vm3, %v748_v62 }
 0x20f   : > { %v860_v11 = vpop.f32.mrb[0].mxu1 }
 0x210   : > { %v1014_v12 = vpop.f32.mrb[0].mxu0  ;;  %v862_v13 = vpop.f32.mrb[1].mxu1  ;;  %v861_v15 = vadd.f32 %v860_v11, %v6395_v10 }
 0x211   : > { %v1016_v14 = vpop.f32.mrb[1].mxu0  ;;  %v1015_v17 = vadd.f32 %v1014_v12, %v6395_v10  ;;  %v863_v18 = vadd.f32 %v862_v13, %v6395_v10 }
 0x212   : > { %v1017_v20 = vadd.f32 %v1016_v14, %v6395_v10  ;;  %v6404_v25 = vmax.f32 %v861_v15, 0.0 }
 0x213   : > { %v866_v21 = vpop.f32.mrb[2].mxu1  ;;  %v6406_v26 = vmax.f32 %v863_v18, 0.0  ;;  %v6409_v29 = vmax.f32 %v1015_v17, 0.0 }
 0x214   : > { %v1020_v22 = vpop.f32.mrb[2].mxu0  ;;  %v867_v23 = vadd.f32 %v866_v21, %v6398_v16  ;;  %v868_v24 = vpop.f32.mrb[3].mxu1  ;;  %v6413_v31 = vmax.f32 %v1017_v20, 0.0  ;;  %v1390_v36 = vmul.f32 %v6404_v25, %v6404_v25 }
 0x215   : > { %v1022_v27 = vpop.f32.mrb[3].mxu0  ;;  %v869_v28 = vadd.f32 %v868_v24, %v6398_v16  ;;  %v1391_v37 = vmul.f32 %v6406_v26, %v6406_v26  ;;  %v1394_v40 = vmul.f32 %v6409_v29, %v6409_v29  ;;  %v1021_v41 = vadd.f32 %v1020_v22, %v6398_v16 }
 0x216   : > { %v6411_v30 = vmax.f32 %v867_v23, 0.0  ;;  %v1023_v43 = vadd.f32 %v1022_v27, %v6398_v16  ;;  %v1395_v45 = vmul.f32 %v6413_v31, %v6413_v31  ;;  %v1357_v47 = vadd.f32 %v6406_v26, %v6404_v25 }
 0x217   : > { %v6415_v32 = vmax.f32 %v869_v28, 0.0  ;;  %v937_v33 = vpop.f32.mrb[4].mxu1  ;;  %v1416_v55 = vadd.f32 %v1391_v37, %v1390_v36  ;;  %v6445_v59 = vmax.f32 %v1021_v41, 0.0 }
 0x218   : > { %v1168_v34 = vpop.f32.mrb[4].mxu0  ;;  %v938_v35 = vadd.f32 %v937_v33, %v6395_v10  ;;  %v939_v38 = vpop.f32.mrb[5].mxu1  ;;  %v1403_v44 = vmul.f32 %v6411_v30, %v6411_v30  ;;  %v6449_v61 = vmax.f32 %v1023_v43, 0.0 }
 0x219   : > { %v1170_v39 = vpop.f32.mrb[5].mxu0  ;;  %v940_v42 = vadd.f32 %v939_v38, %v6395_v10  ;;  %v1404_v19 = vmul.f32 %v6415_v32, %v6415_v32  ;;  %v1169_v49 = vadd.f32 %v1168_v34, %v6395_v10  ;;  %v1373_v63 = vadd.f32 %v6415_v32, %v6411_v30 }
 0x21a   : > { %v6431_v46 = vmax.f32 %v938_v35, 0.0  ;;  %v1171_v50 = vadd.f32 %v1170_v39, %v6395_v10  ;;  %v1407_v20 = vmul.f32 %v6445_v59, %v6445_v59  ;;  %v1408_v34 = vmul.f32 %v6449_v61, %v6449_v61 }
 0x21b   : > { %v6437_v48 = vmax.f32 %v940_v42, 0.0  ;;  %v943_v51 = vpop.f32.mrb[6].mxu1  ;;  %v1431_v5 = vadd.f32 %v1404_v19, %v1403_v44  ;;  %v6457_v6 = vmax.f32 %v1169_v49, 0.0 }
 0x21c   : > { %v1174_v52 = vpop.f32.mrb[6].mxu0  ;;  %v1358_v53 = vadd.f32 %v1357_v47, %v6431_v46  ;;  %v1392_v54 = vmul.f32 %v6431_v46, %v6431_v46  ;;  %v944_v56 = vadd.f32 %v943_v51, %v6398_v16  ;;  %v945_v57 = vpop.f32.mrb[7].mxu1  ;;  %v6459_v7 = vmax.f32 %v1171_v50, 0.0 }
 0x21d   : > { %v1176_v58 = vpop.f32.mrb[7].mxu0  ;;  %v1393_v60 = vmul.f32 %v6437_v48, %v6437_v48  ;;  %v946_v62 = vadd.f32 %v945_v57, %v6398_v16  ;;  %v1175_v21 = vadd.f32 %v1174_v52, %v6398_v16  ;;  %v1398_v35 = vmul.f32 %v6457_v6, %v6457_v6 }
 0x21e   : > { %v1417_v2 = vadd.f32 %v1416_v55, %v1392_v54  ;;  %v1359_v3 = vadd.f32 %v1358_v53, %v6437_v48  ;;  %v6455_v4 = vmax.f32 %v944_v56, 0.0  ;;  %v1399_v39 = vmul.f32 %v6459_v7, %v6459_v7 }
 0x21f   : > { %v6461_v8 = vmax.f32 %v946_v62, 0.0  ;;  %v1091_v9 = vpop.f32.mrb[8].mxu1  ;;  %v1177_v44 = vadd.f32 %v1176_v58, %v6398_v16  ;;  %v6491_v50 = vmax.f32 %v1175_v21, 0.0 }
 0x220   : > { %v5637_v11 = vpop.f32.mrb[8].mxu0  ;;  %v1360_v12 = vadd.f32 %v1359_v3, %v6409_v29  ;;  %v1418_v13 = vadd.f32 %v1417_v2, %v1393_v60  ;;  %v1374_v14 = vadd.f32 %v1373_v63, %v6455_v4  ;;  %v1405_v15 = vmul.f32 %v6455_v4, %v6455_v4  ;;  %v1093_v17 = vpop.f32.mrb[9].mxu1 }
 0x221   : > { %v1322_v18 = vpop.f32.mrb[9].mxu0  ;;  %v1406_v22 = vmul.f32 %v6461_v8, %v6461_v8  ;;  %v1092_v23 = vadd.f32 %v1091_v9, %v6395_v10  ;;  %v1094_v37 = vadd.f32 %v1093_v17, %v6395_v10  ;;  %v6503_v3 = vmax.f32 %v1177_v44, 0.0 }
 0x222   : > { %v1419_v24 = vadd.f32 %v1418_v13, %v1394_v40  ;;  %v1432_v27 = vadd.f32 %v1431_v5, %v1405_v15  ;;  %v1375_v28 = vadd.f32 %v1374_v14, %v6461_v8  ;;  %v1361_v33 = vadd.f32 %v1360_v12, %v6413_v31 }
 0x223   : > { %v6479_v36 = vmax.f32 %v1092_v23, 0.0  ;;  %v1097_v38 = vpop.f32.mrb[10].mxu1  ;;  %v6489_v49 = vmax.f32 %v1094_v37, 0.0  ;;  %v1323_v58 = vadd.f32 %v1322_v18, %v6395_v10  ;;  %v1328_v13 = vadd.f32 %v5637_v11, %v6398_v16 }
 0x224   : > { %v1376_v40 = vadd.f32 %v1375_v28, %v6445_v59  ;;  %v1433_v41 = vadd.f32 %v1432_v27, %v1406_v22  ;;  %v1420_v42 = vadd.f32 %v1419_v24, %v1395_v45  ;;  %v1099_v43 = vpop.f32.mrb[11].mxu1  ;;  %v1098_v52 = vadd.f32 %v1097_v38, %v6398_v16 }
 0x225   : > { %v1362_v47 = vadd.f32 %v1361_v33, %v6479_v36  ;;  %v1396_v19 = vmul.f32 %v6479_v36, %v6479_v36  ;;  %v1397_v55 = vmul.f32 %v6489_v49, %v6489_v49  ;;  %v1100_v56 = vadd.f32 %v1099_v43, %v6398_v16 }
 0x226   : > { %v1434_v51 = vadd.f32 %v1433_v41, %v1407_v20  ;;  %v1377_v53 = vadd.f32 %v1376_v40, %v6449_v61  ;;  %v6500_v60 = vmax.f32 %v1098_v52, 0.0  ;;  %v6520_v24 = vmax.f32 %v1323_v58, 0.0 }
 0x227   : > { %v1421_v54 = vadd.f32 %v1420_v42, %v1396_v19  ;;  %v1363_v45 = vadd.f32 %v1362_v47, %v6489_v49  ;;  %v1245_v57 = vpop.f32.mrb[12].mxu1  ;;  %v6506_v9 = vmax.f32 %v1100_v56, 0.0  ;;  %v1411_v33 = vmul.f32 %v6491_v50, %v6491_v50 }
 0x228   : > { %v1435_v62 = vadd.f32 %v1434_v51, %v1408_v34  ;;  %v1246_v63 = vadd.f32 %v1245_v57, %v6395_v10  ;;  %v1247_v2 = vpop.f32.mrb[13].mxu1  ;;  %v1378_v14 = vadd.f32 %v1377_v53, %v6500_v60  ;;  %v1409_v15 = vmul.f32 %v6500_v60, %v6500_v60 }
 0x229   : > { %v1364_v5 = vadd.f32 %v1363_v45, %v6457_v6  ;;  %v1248_v12 = vadd.f32 %v1247_v2, %v6395_v10  ;;  %v1422_v18 = vadd.f32 %v1421_v54, %v1397_v55  ;;  %v1410_v20 = vmul.f32 %v6506_v9, %v6506_v9 }
 0x22a   : > { %v6513_v17 = vmax.f32 %v1246_v63, 0.0  ;;  %v1436_v10 = vadd.f32 %v1435_v62, %v1409_v15  ;;  %v1379_v11 = vadd.f32 %v1378_v14, %v6506_v9  ;;  %v1412_v34 = vmul.f32 %v6503_v3, %v6503_v3 }
 0x22b   : > { %v6517_v21 = vmax.f32 %v1248_v12, 0.0  ;;  %v1251_v22 = vpop.f32.mrb[14].mxu1  ;;  %v1365_v23 = vadd.f32 %v1364_v5, %v6459_v7  ;;  %v6530_v40 = vmax.f32 %v1328_v13, 0.0  ;;  %v1423_v51 = vadd.f32 %v1422_v18, %v1398_v35 }
 0x22c   : > { %v1252_v27 = vadd.f32 %v1251_v22, %v6398_v16  ;;  %v1253_v28 = vpop.f32.mrb[15].mxu1  ;;  %v1380_v41 = vadd.f32 %v1379_v11, %v6491_v50  ;;  %v1437_v42 = vadd.f32 %v1436_v10, %v1410_v20  ;;  %v1400_v44 = vmul.f32 %v6513_v17, %v6513_v17 }
 0x22d   : > { %v1254_v37 = vadd.f32 %v1253_v28, %v6398_v16  ;;  %v1366_v38 = vadd.f32 %v1365_v23, %v6513_v17  ;;  %9719 = vst [vmem:[#allocation8_spill] sm:$0xff] %v6530_v40  ;;  %v1369_v52 = vsel %vm1368_vm4, %v6520_v24, 0.0  ;;  %v1424_v55 = vadd.f32 %v1423_v51, %v1399_v39 }
 0x22e   : > { %v6533_v43 = vmax.f32 %v1252_v27, 0.0  ;;  %v1381_v53 = vadd.f32 %v1380_v41, %v6503_v3  ;;  %v1438_v54 = vadd.f32 %v1437_v42, %v1411_v33  ;;  %v1401_v35 = vmul.f32 %v6517_v21, %v6517_v21  ;;  %v1510_v42 = vld [vmem:[%s9667_s4] sm:$0xff] }
 0x22f   : > { %v6537_v47 = vmax.f32 %v1254_v37, 0.0  ;;  %v1367_v19 = vadd.f32 %v1366_v38, %v6517_v21  ;;  %v1415_v62 = vmul.f32 %v6530_v40, %v6530_v40  ;;  %v1425_v63 = vadd.f32 %v1424_v55, %v1400_v44 }
 0x230   : > { %v1413_v16 = vmul.f32 %v6533_v43, %v6533_v43  ;;  %v1382_v56 = vadd.f32 %v1381_v53, %v6533_v43  ;;  %v1439_v58 = vadd.f32 %v1438_v54, %v1412_v34  ;;  %v1384_v39 = vsel %vm1368_vm4, %v6530_v40, 0.0 }
 0x231   : > { %9720 = vst [vmem:[#allocation9_spill] sm:$0xff] %v6537_v47  ;;  %v1370_v45 = vadd.f32 %v1369_v52, %v1367_v19  ;;  %v1414_v57 = vmul.f32 %v6537_v47, %v6537_v47  ;;  %v1402_v12 = vmul.f32 %v6520_v24, %v6520_v24  ;;  %v1426_v15 = vadd.f32 %v1425_v63, %v1401_v35 }
 0x232   : > { %v1383_v2 = vadd.f32 %v1382_v56, %v6537_v47  ;;  %v1440_v5 = vadd.f32 %v1439_v58, %v1413_v16  ;;  %v1442_v18 = vsel %vm1368_vm4, %v1415_v62, 0.0  ;;  %v1515_v10 = vshrl.u32 %v412_v0, 7  ;;  %v1605_v0 = vld [vmem:[%s9668_s5] sm:$0xff] }
 0x233   : > { %1371 = vadd.xlane.f32.xlu1 %v1370_v45  ;;  %v1427_v22 = vsel %vm1368_vm4, %v1402_v12, 0.0 }
 0x234   : > { %v1385_v13 = vadd.f32 %v1384_v39, %v1383_v2  ;;  %v1441_v14 = vadd.f32 %v1440_v5, %v1414_v57  ;;  %v1428_v23 = vadd.f32 %v1427_v22, %v1426_v15  ;;  %v6566_v37 = vsub.s32 1, %v1515_v10 }
 0x235   : > { %v6576_v19 = vsub.s32 0, %v1515_v10  ;;  %v6578_v51 = vsub.s32 2, %v1515_v10  ;;  %v6580_v16 = vsub.s32 3, %v1515_v10  ;;  %v6587_v55 = vsub.s32 4, %v1515_v10 }
 0x236   : > { %1386 = vadd.xlane.f32.xlu0 %v1385_v13  ;;  %v1443_v20 = vadd.f32 %v1442_v18, %v1441_v14  ;;  %9721 = vst [vmem:[#allocation10_spill] sm:$0xff] %v6566_v37  ;;  %v6585_v45 = vrot.slane %v1510_v42, %v6566_v37  ;;  %v6589_v56 = vsub.s32 5, %v1515_v10  ;;  %v6592_v35 = vrot.slane %v1605_v0, %v6566_v37  ;;  %v1511_v18 = vld [vmem:[%s9667_s4 + $0x8] sm:$0x1f] }
 0x237   : > { %9722 = vst [vmem:[#allocation11_spill] sm:$0xff] %v6576_v19  ;;  %9723 = vst [vmem:[#allocation12_spill] sm:$0xff] %v6578_v51  ;;  %v6594_v62 = vsub.s32 6, %v1515_v10  ;;  %v6597_v63 = vrot.slane %v1510_v42, %v6576_v19  ;;  %v6600_v2 = vrot.slane %v1510_v42, %v6578_v51  ;;  %v6603_v5 = vrot.slane %v1510_v42, %v6580_v16 }
 0x238   : > { %1444 = vadd.xlane.f32.xlu1 %v1443_v20  ;;  %9724 = vst [vmem:[#allocation13_spill] sm:$0xff] %v6580_v16  ;;  %9725 = vst [vmem:[#allocation14_spill] sm:$0xff] %v6587_v55  ;;  %v6605_v39 = vsub.s32 7, %v1515_v10  ;;  %v6608_v14 = vrot.slane %v1605_v0, %v6576_v19  ;;  %v6611_v15 = vrot.slane %v1605_v0, %v6578_v51 }
 0x239   : > { %9726 = vst [vmem:[#allocation15_spill] sm:$0xff] %v6589_v56  ;;  %9727 = vst [vmem:[#allocation16_spill] sm:$0xff] %v6594_v62  ;;  %v6617_v20 = vrot.slane %v1605_v0, %v6580_v16  ;;  %v6620_v22 = vrot.slane %v1510_v42, %v6587_v55  ;;  %v6626_v10 = vrot.slane %v1510_v42, %v6589_v56 }
 0x23a   : > { %1429 = vadd.xlane.f32.xlu0 %v1428_v23  ;;  %9728 = vst [vmem:[#allocation17_spill] sm:$0xff] %v6605_v39  ;;  %v6623_v23 = vrot.slane %v1605_v0, %v6587_v55 }
 0x2c0   : > { %v1372_v11 = vpop.xlane.xlu1 %1371 }
 0x2c1   : > { %v6562_v28 = vmul.f32 0.000625, %v1372_v11  ;;  %v1606_v11 = vld [vmem:[%s9668_s5 + $0x8] sm:$0x1f] }
 0x2c3   : > { %v1387_v27 = vpop.xlane.xlu0 %1386  ;;  %v1448_v53 = vmul.f32 %v6562_v28, %v6562_v28  ;;  %v1454_v1 = vsub.f32 %v6404_v25, %v6562_v28  ;;  %v1460_v25 = vsub.f32 %v6479_v36, %v6562_v28 }
 0x2c4   : > { %v6564_v33 = vmul.f32 0.000625, %v1387_v27 }
 0x2c5   : > { %v1445_v34 = vpop.xlane.xlu1 %1444 }
 0x2c6   : > { %v1447_v38 = vmul.f32 0.000625, %v1445_v34  ;;  %v1449_v41 = vmul.f32 %v6564_v33, %v6564_v33  ;;  %v6632_v34 = vrot.slane %v1605_v0, %v6589_v56  ;;  %v1456_v56 = vsub.f32 %v6431_v46, %v6562_v28 }
 0x2c7   : > { %v1430_v44 = vpop.xlane.xlu0 %1429  ;;  %v1470_v46 = vsub.f32 %v6461_v8, %v6564_v33  ;;  %v1474_v36 = vsub.f32 %v6506_v9, %v6564_v33 }
 0x2c8   : > { %v1451_v52 = vsub.f32 %v1447_v38, %v1449_v41  ;;  %v1446_v54 = vmul.f32 0.000625, %v1430_v44  ;;  %v6635_v38 = vrot.slane %v1510_v42, %v6594_v62  ;;  %v6638_v41 = vrot.slane %v1605_v0, %v6594_v62 }
 0x2c9   : > { %v6641_v44 = vrot.slane %v1510_v42, %v6605_v39  ;;  %v6662_v42 = vrot.slane %v1606_v11, %v6578_v51  ;;  %v6678_v62 = vrot.slane %v1606_v11, %v6587_v55 }
 0x2ca   : > { %v1453_v57 = vmax.f32 %v1451_v52, 0.0  ;;  %v1450_v58 = vsub.f32 %v1446_v54, %v1448_v53  ;;  %v6644_v52 = vrot.slane %v1605_v0, %v6605_v39  ;;  %v6647_v53 = vrot.slane %v1511_v18, %v6576_v19 }
 0x2cb   : > { %v6650_v54 = vrot.slane %v1606_v11, %v6576_v19  ;;  %v6665_v0 = vrot.slane %v1511_v18, %v6580_v16  ;;  %v6675_v39 = vrot.slane %v1606_v11, %v6580_v16  ;;  %9730 = vst [vmem:[#allocation19_spill] sm:$0xff] %v6678_v62  ;;  %v1461_v16 = vsub.f32 %v6489_v49, %v6562_v28 }
 0x2cc   : > { %v1481_v12 = vadd.f32 1e-05, %v1453_v57  ;;  %v1452_v13 = vmax.f32 %v1450_v58, 0.0  ;;  %v6653_v57 = vrot.slane %v1511_v18, %v6566_v37  ;;  %v6656_v58 = vrot.slane %v1511_v18, %v6578_v51 }
 0x2cd   : > { %9729 = vst [vmem:[#allocation18_spill] sm:$0xff] %v6675_v39  ;;  %v1457_v51 = vsub.f32 %v6437_v48, %v6562_v28  ;;  %v1467_v48 = vsub.f32 %v6411_v30, %v6564_v33  ;;  %v1468_v49 = vsub.f32 %v6415_v32, %v6564_v33  ;;  %v1471_v30 = vsub.f32 %v6445_v59, %v6564_v33 }
 0x2ce   : > { %6033 = vrsqrt.f32 %v1481_v12  ;;  %v1480_v27 = vadd.f32 1e-05, %v1452_v13  ;;  %v6659_v12 = vrot.slane %v1606_v11, %v6566_v37  ;;  %v6668_v13 = vrot.slane %v1511_v18, %v6587_v55 }
 0x2cf   : > { %v1458_v18 = vsub.f32 %v6409_v29, %v6562_v28  ;;  %v1469_v11 = vsub.f32 %v6455_v4, %v6564_v33  ;;  %v1472_v29 = vsub.f32 %v6449_v61, %v6564_v33  ;;  %v1475_v32 = vsub.f32 %v6491_v50, %v6564_v33 }
 0x2d0   : > { %6035 = vrsqrt.f32 %v1480_v27  ;;  %v1455_v27 = vsub.f32 %v6406_v26, %v6562_v28  ;;  %v1459_v26 = vsub.f32 %v6413_v31, %v6562_v28  ;;  %v1473_v31 = vsub.f32 %v6500_v60, %v6564_v33 }
 0x2d1   : > { %v1476_v4 = vsub.f32 %v6503_v3, %v6564_v33 }
 0x2d8   : > { %v6720_v55 = vpop.eup %6033 }
 0x2d9   : > { %v1497_v60 = vmul.f32 %v6720_v55, %v1467_v48  ;;  %v1498_v9 = vmul.f32 %v6720_v55, %v1468_v49  ;;  %v1499_v50 = vmul.f32 %v6720_v55, %v1469_v11  ;;  %v1500_v19 = vmul.f32 %v6720_v55, %v1470_v46 }
 0x2da   : > { %v6036_v37 = vpop.eup %6035  ;;  %v1501_v3 = vmul.f32 %v6720_v55, %v1471_v30  ;;  %v1502_v62 = vmul.f32 %v6720_v55, %v1472_v29  ;;  %v1503_v59 = vmul.f32 %v6720_v55, %v1473_v31  ;;  %v1504_v61 = vmul.f32 %v6720_v55, %v1474_v36 }
 0x2db   : > { %v1485_v47 = vmul.f32 %v6036_v37, %v1455_v27  ;;  %v1484_v39 = vmul.f32 %v6036_v37, %v1454_v1  ;;  %v1486_v8 = vmul.f32 %v6036_v37, %v1456_v56  ;;  %v1487_v40 = vmul.f32 %v6036_v37, %v1457_v51 }
 0x2dc   : > { %v1592_v48 = vmul.f32 %v6597_v63, %v1497_v60  ;;  %v1593_v49 = vmul.f32 %v6585_v45, %v1498_v9  ;;  %v1594_v11 = vmul.f32 %v6600_v2, %v1499_v50  ;;  %v1595_v46 = vmul.f32 %v6603_v5, %v1500_v19 }
 0x2dd   : > { %v1580_v30 = vmul.f32 %v6585_v45, %v1485_v47  ;;  %v1579_v29 = vmul.f32 %v6597_v63, %v1484_v39  ;;  %v1581_v31 = vmul.f32 %v6600_v2, %v1486_v8  ;;  %v1582_v36 = vmul.f32 %v6603_v5, %v1487_v40 }
 0x2de   : > { %v6747_v1 = vadd.f32 %v6608_v14, %v1592_v48  ;;  %v6750_v51 = vadd.f32 %v6592_v35, %v1593_v49  ;;  %v6753_v56 = vadd.f32 %v6611_v15, %v1594_v11  ;;  %v6756_v27 = vadd.f32 %v6617_v20, %v1595_v46 }
 0x2df   : > { %v6759_v47 = vadd.f32 %v6592_v35, %v1580_v30  ;;  %v6762_v19 = vadd.f32 %v6608_v14, %v1579_v29  ;;  %v6765_v40 = vadd.f32 %v6611_v15, %v1581_v31  ;;  %v6768_v45 = vadd.f32 %v6617_v20, %v1582_v36 }
 0x2e0   : > { %v1488_v63 = vmul.f32 %v6036_v37, %v1458_v18  ;;  %v1596_v2 = vmul.f32 %v6620_v22, %v1501_v3  ;;  %v1489_v5 = vmul.f32 %v6036_v37, %v1459_v26  ;;  %v1490_v39 = vmul.f32 %v6036_v37, %v1460_v25 }
 0x2e1   : > { %1780 = vrot.lane.b32.xlu1 %v6759_v47, %s6052_s20  ;;  %1778 = vrot.lane.b32.xlu0 %v6762_v19, %s6052_s20  ;;  %v1597_v35 = vmul.f32 %v6626_v10, %v1502_v62  ;;  %v1598_v14 = vmul.f32 %v6635_v38, %v1503_v59  ;;  %v1491_v15 = vmul.f32 %v6036_v37, %v1461_v16 }
 0x2e2   : > { %v1583_v8 = vmul.f32 %v6620_v22, %v1488_v63  ;;  %v6779_v20 = vadd.f32 %v6623_v23, %v1596_v2  ;;  %v1584_v18 = vmul.f32 %v6626_v10, %v1489_v5  ;;  %v1585_v26 = vmul.f32 %v6635_v38, %v1490_v39  ;;  %v9740_v39 = vld [vmem:[#allocation8_spill] sm:$0xff] }
 0x2e3   : > { %v6784_v25 = vadd.f32 %v6632_v34, %v1597_v35  ;;  %v6787_v60 = vadd.f32 %v6638_v41, %v1598_v14  ;;  %v1586_v62 = vmul.f32 %v6641_v44, %v1491_v15  ;;  %v9731_v16 = vsub.f32 %v6457_v6, %v6562_v28  ;;  %v9742_v14 = vld [vmem:[#allocation19_spill] sm:$0xff] }
 0x2e4   : > { %v6794_v22 = vadd.f32 %v6623_v23, %v1583_v8  ;;  %v6797_v9 = vadd.f32 %v6632_v34, %v1584_v18  ;;  %v6800_v10 = vadd.f32 %v6638_v41, %v1585_v26  ;;  %v1599_v38 = vmul.f32 %v6641_v44, %v1504_v61 }
 0x2e5   : > { %v1492_v59 = vmul.f32 %v6036_v37, %v9731_v16  ;;  %1782 = vrot.lane.b32.xlu1 %v6765_v40, %s6052_s20  ;;  %1784 = vrot.lane.b32.xlu0 %v6768_v45, %s6052_s20  ;;  %v6808_v6 = vadd.f32 %v6644_v52, %v1586_v62  ;;  %v1505_v50 = vmul.f32 %v6720_v55, %v1475_v32 }
 0x2e6   : > { %v6813_v34 = vadd.f32 %v6644_v52, %v1599_v38  ;;  %v9732_v41 = vsub.f32 %v6459_v7, %v6562_v28  ;;  %v1506_v61 = vmul.f32 %v6720_v55, %v1476_v4  ;;  %v9733_v3 = vsub.f32 %v6513_v17, %v6562_v28 }
 0x2e7   : > { %v1587_v23 = vmul.f32 %v6647_v53, %v1492_v59  ;;  %v1600_v11 = vmul.f32 %v6647_v53, %v1505_v50  ;;  %v9734_v32 = vsub.f32 %v6533_v43, %v6564_v33  ;;  %v9735_v7 = vsub.f32 %v6517_v21, %v6562_v28 }
 0x2e8   : > { %v1493_v44 = vmul.f32 %v6036_v37, %v9732_v41  ;;  %v1494_v48 = vmul.f32 %v6036_v37, %v9733_v3  ;;  %v1601_v30 = vmul.f32 %v6653_v57, %v1506_v61  ;;  %v9736_v29 = vsub.f32 %v6520_v24, %v6562_v28 }
 0x2e9   : > { %v6823_v49 = vadd.f32 %v6650_v54, %v1587_v23  ;;  %v1507_v52 = vmul.f32 %v6720_v55, %v9734_v32  ;;  %v1495_v46 = vmul.f32 %v6036_v37, %v9735_v7  ;;  %1804 = vrot.lane.b32.xlu1 %v6747_v1, %s6052_s20  ;;  %1806 = vrot.lane.b32.xlu0 %v6750_v51, %s6052_s20 }
 0x2ea   : > { %v1588_v4 = vmul.f32 %v6653_v57, %v1493_v44  ;;  %v1589_v17 = vmul.f32 %v6656_v58, %v1494_v48  ;;  %v1496_v31 = vmul.f32 %v6036_v37, %v9736_v29  ;;  %v6844_v43 = vadd.f32 %v6650_v54, %v1600_v11  ;;  %v9737_v54 = vld [vmem:[#allocation18_spill] sm:$0xff] }
 0x2eb   : > { %v1602_v21 = vmul.f32 %v6656_v58, %v1507_v52  ;;  %v1590_v53 = vmul.f32 %v6665_v0, %v1495_v46  ;;  %v6852_v36 = vadd.f32 %v6659_v12, %v1601_v30  ;;  %v9738_v58 = vld [vmem:[#allocation9_spill] sm:$0xff] }
 0x2ec   : > { %v6849_v57 = vadd.f32 %v6659_v12, %v1588_v4  ;;  %v6855_v24 = vadd.f32 %v6662_v42, %v1589_v17  ;;  %v1591_v28 = vmul.f32 %v6668_v13, %v1496_v31  ;;  %v9739_v2 = vsub.f32 %v9738_v58, %v6564_v33 }
 0x2ed   : > { %v6859_v37 = vadd.f32 %v6662_v42, %v1602_v21  ;;  %v6862_v63 = vadd.f32 %v9737_v54, %v1590_v53  ;;  %v9741_v12 = vsub.f32 %v9740_v39, %v6564_v33  ;;  %1808 = vrot.lane.b32.xlu1 %v6753_v56, %s6052_s20  ;;  %1810 = vrot.lane.b32.xlu0 %v6756_v27, %s6052_s20 }
 0x2ee   : > { %v1508_v5 = vmul.f32 %v6720_v55, %v9739_v2  ;;  %v6873_v15 = vadd.f32 %v9742_v14, %v1591_v28 }
 0x2ef   : > { %v1509_v35 = vmul.f32 %v6720_v55, %v9741_v12 }
 0x2f0   : > { %v1603_v42 = vmul.f32 %v6665_v0, %v1508_v5  ;;  %1712 = vst.msk [vmem:[#allocation4 + $0x60] sm:$0xff] %vm1368_vm4, %v6873_v15  ;;  %v9743_v0 = vmov 0.0  }
 0x2f1   : > { %v1604_v8 = vmul.f32 %v6668_v13, %v1509_v35  ;;  %1786 = vrot.lane.b32.xlu1 %v6794_v22, %s6052_s20  ;;  %1812 = vrot.lane.b32.xlu0 %v6779_v20, %s6052_s20  ;;  %438 = vst.msk [vmem:[#allocation4 + $0x68] sm:$0xff] %vm437_vm6, %v9743_v0  ;;  %440 = vst.msk [vmem:[#allocation4 + $0xd8] sm:$0xff] %vm437_vm6, %v9743_v0 }
 0x2f2   : > { %v6884_v33 = vadd.f32 %v9737_v54, %v1603_v42 }
 0x2f3   : > { %v6887_v55 = vadd.f32 %v9742_v14, %v1604_v8 }
 0x2f5   : > { %1725 = vst.msk [vmem:[#allocation4 + $0xd0] sm:$0xff] %vm1368_vm4, %v6887_v55  ;;  %1788 = vrot.lane.b32.xlu1 %v6797_v9, %s6052_s20  ;;  %1790 = vrot.lane.b32.xlu0 %v6800_v10, %s6052_s20 }
 0x2f7   : > { %v1738_v2 = vld [vmem:[#allocation4 + $0x60] sm:$0xff] }
 0x2f8   : > { %v1906_v35 = vld [vmem:[#allocation4 + $0x68] sm:$0xff] }
 0x2f9   : > { %1814 = vrot.lane.b32.xlu1 %v6784_v25, %s6052_s20  ;;  %1816 = vrot.lane.b32.xlu0 %v6787_v60, %s6052_s20 }
 0x2fc   : > { %v7006_v12 = vld [vmem:[#allocation4 + $0xd0] sm:$0xff] }
 0x2fd   : > { %1792 = vrot.lane.b32.xlu1 %v6808_v6, %s6052_s20  ;;  %1794 = vrot.lane.b32.xlu0 %v6823_v49, %s6052_s20 }
 0x301   : > { %1818 = vrot.lane.b32.xlu1 %v6813_v34, %s6052_s20  ;;  %1820 = vrot.lane.b32.xlu0 %v6844_v43, %s6052_s20 }
 0x353   : > { %v1781_v13 = vpop.permute.xlu1 %1780  ;;  %v1779_v18 = vpop.permute.xlu0 %1778 }
 0x354   : > { %v1830_v26 = vsel %vm510_vm11, %v1779_v18, %v1781_v13 }
 0x355   : > { %v6915_v62 = vmax.f32 %v6762_v19, %v1830_v26 }
 0x357   : > { %v1783_v16 = vpop.permute.xlu1 %1782  ;;  %1976 = vrot.lane.b32.xlu1 %v6915_v62, %s6053_s23  ;;  %v1785_v59 = vpop.permute.xlu0 %1784 }
 0x358   : > { %v1831_v38 = vsel %vm510_vm11, %v1781_v13, %v1783_v16  ;;  %v1832_v23 = vsel %vm510_vm11, %v1783_v16, %v1785_v59 }
 0x359   : > { %v6922_v50 = vmax.f32 %v6759_v47, %v1831_v38  ;;  %v6925_v41 = vmax.f32 %v6765_v40, %v1832_v23 }
 0x35b   : > { %v1805_v44 = vpop.permute.xlu1 %1804  ;;  %1978 = vrot.lane.b32.xlu0 %v6922_v50, %s6053_s23  ;;  %1980 = vrot.lane.b32.xlu1 %v6925_v41, %s6053_s23  ;;  %v1807_v19 = vpop.permute.xlu0 %1806 }
 0x35c   : > { %v1842_v61 = vsel %vm510_vm11, %v1805_v44, %v1807_v19 }
 0x35d   : > { %v6933_v3 = vmax.f32 %v6747_v1, %v1842_v61 }
 0x35f   : > { %v1809_v48 = vpop.permute.xlu1 %1808  ;;  %2004 = vrot.lane.b32.xlu0 %v6933_v3, %s6053_s23  ;;  %v1811_v47 = vpop.permute.xlu0 %1810 }
 0x360   : > { %v1843_v40 = vsel %vm510_vm11, %v1807_v19, %v1809_v48  ;;  %v1844_v11 = vsel %vm510_vm11, %v1809_v48, %v1811_v47 }
 0x361   : > { %v6940_v32 = vmax.f32 %v6750_v51, %v1843_v40  ;;  %v6943_v52 = vmax.f32 %v6753_v56, %v1844_v11 }
 0x363   : > { %v1787_v7 = vpop.permute.xlu1 %1786  ;;  %2006 = vrot.lane.b32.xlu1 %v6940_v32, %s6053_s23  ;;  %2008 = vrot.lane.b32.xlu0 %v6943_v52, %s6053_s23  ;;  %v1813_v1 = vpop.permute.xlu0 %1812 }
 0x364   : > { %v1833_v46 = vsel %vm510_vm11, %v1785_v59, %v1787_v7  ;;  %v1845_v21 = vsel %vm510_vm11, %v1811_v47, %v1813_v1 }
 0x365   : > { %v6951_v4 = vmax.f32 %v6768_v45, %v1833_v46  ;;  %v6969_v45 = vmax.f32 %v6756_v27, %v1845_v21 }
 0x367   : > { %v1789_v30 = vpop.permute.xlu1 %1788  ;;  %1982 = vrot.lane.b32.xlu1 %v6951_v4, %s6053_s23  ;;  %v1791_v51 = vpop.permute.xlu0 %1790 }
 0x368   : > { %v1834_v56 = vsel %vm510_vm11, %v1787_v7, %v1789_v30  ;;  %v1835_v17 = vsel %vm510_vm11, %v1789_v30, %v1791_v51 }
 0x369   : > { %v6958_v29 = vmax.f32 %v6794_v22, %v1834_v56  ;;  %v6961_v31 = vmax.f32 %v6797_v9, %v1835_v17 }
 0x36b   : > { %1984 = vrot.lane.b32.xlu1 %v6958_v29, %s6053_s23  ;;  %1986 = vrot.lane.b32.xlu0 %v6961_v31, %s6053_s23  ;;  %v1815_v53 = vpop.permute.xlu1 %1814  ;;  %v6976_v9 = vpop.permute.xlu0 %1816 }
 0x36c   : > { %v1846_v22 = vsel %vm510_vm11, %v1813_v1, %v1815_v53  ;;  %v1847_v28 = vsel %vm510_vm11, %v1815_v53, %v6976_v9 }
 0x36d   : > { %v6983_v27 = vmax.f32 %v6779_v20, %v1846_v22  ;;  %v6992_v54 = vmax.f32 %v6784_v25, %v1847_v28 }
 0x36f   : > { %1796 = vrot.lane.b32.xlu1 %v6849_v57, %s6052_s20  ;;  %2010 = vrot.lane.b32.xlu0 %v6969_v45, %s6053_s23  ;;  %v1793_v58 = vpop.permute.xlu1 %1792  ;;  %v1795_v5 = vpop.permute.xlu0 %1794 }
 0x370   : > { %v1836_v20 = vsel %vm510_vm11, %v1791_v51, %v1793_v58  ;;  %v1837_v25 = vsel %vm510_vm11, %v1793_v58, %v1795_v5 }
 0x371   : > { %v7003_v39 = vmax.f32 %v6800_v10, %v1836_v20  ;;  %v7013_v14 = vmax.f32 %v6808_v6, %v1837_v25  ;;  %v1907_v10 = vld [vmem:[#allocation4 + $0xd8] sm:$0xff] }
 0x373   : > { %1822 = vrot.lane.b32.xlu1 %v6852_v36, %s6052_s20  ;;  %1798 = vrot.lane.b32.xlu0 %v6855_v24, %s6052_s20  ;;  %v1819_v42 = vpop.permute.xlu1 %1818  ;;  %v1821_v8 = vpop.permute.xlu0 %1820 }
 0x377   : > { %2012 = vrot.lane.b32.xlu1 %v6983_v27, %s6053_s23  ;;  %1824 = vrot.lane.b32.xlu0 %v6859_v37, %s6052_s20 }
 0x37b   : > { %1800 = vrot.lane.b32.xlu1 %v6862_v63, %s6052_s20  ;;  %2014 = vrot.lane.b32.xlu0 %v6992_v54, %s6053_s23 }
 0x37f   : > { %1802 = vrot.lane.b32.xlu1 %v1738_v2, %s6052_s20  ;;  %1826 = vrot.lane.b32.xlu0 %v6884_v33, %s6052_s20 }
 0x383   : > { %1988 = vrot.lane.b32.xlu1 %v7003_v39, %s6053_s23  ;;  %1828 = vrot.lane.b32.xlu0 %v7006_v12, %s6052_s20 }
 0x387   : > { %1910 = vrot.lane.b32.xlu1 %v1906_v35, %s6052_s20  ;;  %1990 = vrot.lane.b32.xlu0 %v7013_v14, %s6053_s23 }
 0x38b   : > { %1912 = vrot.lane.b32.xlu0 %v1907_v10, %s6052_s20 }
 0x3c9   : > { %v7019_v0 = vpop.permute.xlu1 %1976 }
 0x3cd   : > { %v7021_v13 = vpop.permute.xlu0 %1978  ;;  %v7023_v18 = vpop.permute.xlu1 %1980 }
 0x3d1   : > { %v2005_v26 = vpop.permute.xlu0 %2004 }
 0x3d5   : > { %v2007_v16 = vpop.permute.xlu1 %2006  ;;  %v7025_v6 = vpop.permute.xlu0 %2008 }
 0x3d9   : > { %v7027_v59 = vpop.permute.xlu1 %1982 }
 0x3dd   : > { %v7029_v38 = vpop.permute.xlu1 %1984  ;;  %v7031_v23 = vpop.permute.xlu0 %1986 }
 0x3e1   : > { %v1797_v44 = vpop.permute.xlu1 %1796  ;;  %v7033_v19 = vpop.permute.xlu0 %2010 }
 0x3e2   : > { %v1838_v61 = vsel %vm510_vm11, %v1795_v5, %v1797_v44 }
 0x3e3   : > { %v7037_v48 = vmax.f32 %v6823_v49, %v1838_v61 }
 0x3e5   : > { %v1823_v47 = vpop.permute.xlu1 %1822  ;;  %1992 = vrot.lane.b32.xlu0 %v7037_v48, %s6053_s23  ;;  %v1799_v40 = vpop.permute.xlu0 %1798 }
 0x3e6   : > { %v1839_v11 = vsel %vm510_vm11, %v1797_v44, %v1799_v40  ;;  %v1849_v44 = vsel %vm510_vm11, %v1819_v42, %v1821_v8 }
 0x3e7   : > { %v7043_v7 = vmax.f32 %v6849_v57, %v1839_v11  ;;  %v7080_v11 = vmax.f32 %v6813_v34, %v1849_v44  ;;  %v7097_v34 = vld [vmem:[%s9671_s8] sm:$0xff]  ;;  %v2032_v44 = vsel %vm574_vm13, %v7019_v0, %v7021_v13 }
 0x3e8   : > { %v2084_v0 = vmax.f32 %v6915_v62, %v2032_v44  ;;  %v2047_v62 = vsel %vm574_vm13, %v7025_v6, %v7033_v19 }
 0x3e9   : > { %v7045_v1 = vpop.permute.xlu1 %2012  ;;  %1994 = vrot.lane.b32.xlu1 %v7043_v7, %s6053_s23  ;;  %v1825_v46 = vpop.permute.xlu0 %1824 }
 0x3ed   : > { %v1801_v30 = vpop.permute.xlu1 %1800  ;;  %v7049_v51 = vpop.permute.xlu0 %2014 }
 0x3ee   : > { %v1840_v49 = vsel %vm510_vm11, %v1799_v40, %v1801_v30  ;;  %v1848_v40 = vsel %vm510_vm11, %v6976_v9, %v1819_v42  ;;  %v2033_v9 = vsel %vm574_vm13, %v7021_v13, %v7023_v18  ;;  %v9745_v13 = vld [vmem:[#allocation11_spill] sm:$0xff] }
 0x3ef   : > { %v7053_v56 = vmax.f32 %v6855_v24, %v1840_v49  ;;  %v2085_v49 = vmax.f32 %v6922_v50, %v2033_v9 }
 0x3f1   : > { %v7055_v17 = vpop.permute.xlu1 %1802  ;;  %1996 = vrot.lane.b32.xlu0 %v7053_v56, %s6053_s23  ;;  %v1827_v57 = vpop.permute.xlu0 %1826 }
 0x3f2   : > { %v1841_v21 = vsel %vm510_vm11, %v1801_v30, %v7055_v17  ;;  %v2046_v30 = vsel %vm574_vm13, %v2007_v16, %v7025_v6  ;;  %v2049_v6 = vsel %vm574_vm13, %v7045_v1, %v7049_v51 }
 0x3f3   : > { %v7062_v53 = vmax.f32 %v6862_v63, %v1841_v21  ;;  %v9744_v21 = vld [vmem:[#allocation10_spill] sm:$0xff] }
 0x3f5   : > { %v7064_v22 = vpop.permute.xlu1 %1988  ;;  %1998 = vrot.lane.b32.xlu0 %v7062_v53, %s6053_s23  ;;  %v7068_v28 = vpop.permute.xlu0 %1828 }
 0x3f9   : > { %v1911_v24 = vpop.permute.xlu1 %1910  ;;  %v7070_v58 = vpop.permute.xlu0 %1990 }
 0x3fa   : > { %v1914_v20 = vsel %vm510_vm11, %v7055_v17, %v1911_v24  ;;  %v1933_v5 = vmax.f32 %v1906_v35, %v1911_v24  ;;  %v1850_v35 = vsel %vm510_vm11, %v1821_v8, %v1823_v47  ;;  %v1851_v8 = vsel %vm510_vm11, %v1823_v47, %v1825_v46  ;;  %v7113_v24 = vld [vmem:[#allocation5] sm:$0xff] }
 0x3fb   : > { %v1932_v25 = vmax.f32 %v1738_v2, %v1914_v20  ;;  %v7089_v2 = vmax.f32 %v6787_v60, %v1848_v40  ;;  %v7101_v42 = vmax.f32 %v6844_v43, %v1850_v35  ;;  %443 = vst.msk [vmem:[#allocation5 + $0x8] sm:$0xff] %vm442_vm7, %v7113_v24  ;;  %v7118_v43 = vmax.f32 %v6852_v36, %v1851_v8 }
 0x3fc   : > { %2002 = vrot.lane.b32.xlu1 %v1933_v5, %s6053_s23  ;;  %v2045_v47 = vsel %vm574_vm13, %v2005_v26, %v2007_v16  ;;  %v1852_v20 = vsel %vm510_vm11, %v1825_v46, %v1827_v57  ;;  %445 = vst.msk [vmem:[#allocation5 + $0x70] sm:$0xff] %vm444_vm8, %v7113_v24 }
 0x3fd   : > { %2000 = vrot.lane.b32.xlu0 %v1932_v25, %s6053_s23  ;;  %v1913_v63 = vpop.permute.xlu0 %1912  ;;  %v2048_v25 = vsel %vm574_vm13, %v7033_v19, %v7045_v1  ;;  %v2097_v26 = vmax.f32 %v6933_v3, %v2045_v47  ;;  %v7137_v16 = vmax.f32 %v6859_v37, %v1852_v20  ;;  %v2117_v3 = vrot.slane %v7097_v34, %v9745_v13  ;;  %v9746_v37 = vld [vmem:[#allocation13_spill] sm:$0xff]  ;;  %v9748_v1 = vld [vmem:[#allocation14_spill] sm:$0xff] }
 0x3fe   : > { %v1947_v61 = vmax.f32 %v1907_v10, %v1913_v63  ;;  %v2098_v10 = vmax.f32 %v6940_v32, %v2046_v30  ;;  %v1915_v60 = vsel %vm510_vm11, %v7068_v28, %v1913_v63  ;;  %v2121_v32 = vrot.slane %v7097_v34, %v9744_v21  ;;  %447 = vst.msk [vmem:[#allocation5 + $0x78] sm:$0xff] %vm446_vm15, %v7113_v24 }
 0x3ff   : > { %v1946_v50 = vmax.f32 %v7006_v12, %v1915_v60  ;;  %v2035_v12 = vsel %vm574_vm13, %v7027_v59, %v7029_v38  ;;  %v2100_v46 = vmax.f32 %v6969_v45, %v2048_v25  ;;  %v2129_v45 = vrot.slane %v7097_v34, %v9746_v37 }
 0x400   : > { %2030 = vrot.lane.b32.xlu1 %v1947_v61, %s6053_s23  ;;  %v2193_v5 = vmul.f32 %v2121_v32, %v2098_v10  ;;  %v2180_v36 = vmul.f32 %v2121_v32, %v2085_v49  ;;  %v1853_v61 = vsel %vm510_vm11, %v1827_v57, %v7068_v28  ;;  %v2087_v40 = vmax.f32 %v6951_v4, %v2035_v12  ;;  %v9747_v49 = vld [vmem:[#allocation12_spill] sm:$0xff] }
 0x401   : > { %2018 = vrot.lane.b32.xlu0 %v7080_v11, %s6053_s23  ;;  %v7152_v30 = vmax.f32 %v6884_v33, %v1853_v61  ;;  %v2192_v57 = vmul.f32 %v2117_v3, %v2097_v26  ;;  %v2195_v35 = vmul.f32 %v2129_v45, %v2100_v46  ;;  %v2179_v9 = vmul.f32 %v2117_v3, %v2084_v0  ;;  %v9749_v3 = vld [vmem:[#allocation15_spill] sm:$0xff] }
 0x402   : > { %v2206_v63 = vpack.c.bf16 %v2193_v5, %v2180_v36  ;;  %v2034_v4 = vsel %vm574_vm13, %v7023_v18, %v7027_v59  ;;  %v2182_v10 = vmul.f32 %v2129_v45, %v2087_v40  ;;  %v2099_v33 = vmax.f32 %v6943_v52, %v2047_v62  ;;  %v9750_v45 = vld [vmem:[#allocation16_spill] sm:$0xff] }
 0x403   : > { %v2205_v8 = vpack.c.bf16 %v2192_v57, %v2179_v9  ;;  %v2086_v60 = vmax.f32 %v6925_v41, %v2034_v4  ;;  %v2125_v32 = vrot.slane %v7097_v34, %v9747_v49  ;;  %v2036_v18 = vsel %vm574_vm13, %v7029_v38, %v7031_v23 }
 0x404   : > { %2016 = vrot.lane.b32.xlu1 %v7089_v2, %s6053_s23  ;;  %v2208_v19 = vpack.c.bf16 %v2195_v35, %v2182_v10  ;;  %v2101_v52 = vmax.f32 %v6983_v27, %v2049_v6  ;;  %v2088_v47 = vmax.f32 %v6958_v29, %v2036_v18  ;;  %v2133_v20 = vrot.slane %v7097_v34, %v9748_v1 }
 0x405   : > { %2020 = vrot.lane.b32.xlu0 %v7101_v42, %s6053_s23  ;;  %v2194_v59 = vmul.f32 %v2125_v32, %v2099_v33  ;;  %v2181_v41 = vmul.f32 %v2125_v32, %v2086_v60  ;;  %v2038_v61 = vsel %vm574_vm13, %v7064_v22, %v7070_v58  ;;  %v2137_v40 = vrot.slane %v7097_v34, %v9749_v3 }
 0x406   : > { %v2196_v5 = vmul.f32 %v2133_v20, %v2101_v52  ;;  %v2183_v38 = vmul.f32 %v2133_v20, %v2088_v47  ;;  %v2141_v57 = vrot.slane %v7097_v34, %v9750_v45  ;;  %v2090_v35 = vmax.f32 %v7003_v39, %v2038_v61 }
 0x407   : > { %vm2469_vm11 = vcmask 1014784  }
 0x408   : > { %2022 = vrot.lane.b32.xlu1 %v7118_v43, %s6053_s23  ;;  %v2209_v25 = vpack.c.bf16 %v2196_v5, %v2183_v38 }
 0x409   : > { %2028 = vrot.lane.b32.xlu0 %v1946_v50, %s6053_s23  ;;  %v2207_v50 = vpack.c.bf16 %v2194_v59, %v2181_v41  ;;  %v2185_v41 = vmul.f32 %v2141_v57, %v2090_v35 }
 0x40c   : > { %2024 = vrot.lane.b32.xlu1 %v7137_v16, %s6053_s23 }
 0x40d   : > { %2233 = vrot.lane.b32.xlu0 %v2206_v63, %s6060_s15  ;;  %v2037_v63 = vsel %vm574_vm13, %v7031_v23, %v7064_v22  ;;  %v2111_v22 = vld [vmem:[%s9671_s8 + $0x8] sm:$0x1f] }
 0x40e   : > { %v2089_v62 = vmax.f32 %v6961_v31, %v2037_v63 }
 0x410   : > { %2026 = vrot.lane.b32.xlu1 %v7152_v30, %s6053_s23  ;;  %s6061_s23 = smov 124   ;;  %v2184_v59 = vmul.f32 %v2137_v40, %v2089_v62 }
 0x411   : > { %2352 = vrot.lane.b32.xlu0 %v7113_v24, %s6051_s19 }
 0x414   : > { %2231 = vrot.lane.b32.xlu1 %v2205_v8, %s6060_s15 }
 0x415   : > { %2237 = vrot.lane.b32.xlu0 %v2208_v19, %s6060_s15 }
 0x418   : > { %2443 = vrot.lane.b32.xlu1 %v7113_v24, %s6061_s23 }
 0x41c   : > { %2235 = vrot.lane.b32.xlu1 %v2207_v50, %s6060_s15 }
 0x420   : > { %2239 = vrot.lane.b32.xlu1 %v2209_v25, %s6060_s15 }
 0x457   : > { %v1993_v27 = vpop.permute.xlu0 %1992 }
 0x458   : > { %v2039_v9 = vsel %vm574_vm13, %v7070_v58, %v1993_v27  ;;  %v9751_v58 = vld [vmem:[#allocation17_spill] sm:$0xff] }
 0x459   : > { %v2145_v19 = vrot.slane %v7097_v34, %v9751_v58  ;;  %v2091_v60 = vmax.f32 %v7013_v14, %v2039_v9 }
 0x45b   : > { %v1995_v36 = vpop.permute.xlu1 %1994  ;;  %v2186_v25 = vmul.f32 %v2145_v19, %v2091_v60 }
 0x45c   : > { %v2040_v23 = vsel %vm574_vm13, %v1993_v27, %v1995_v36 }
 0x45d   : > { %v2092_v32 = vmax.f32 %v7037_v48, %v2040_v23 }
 0x463   : > { %v1997_v44 = vpop.permute.xlu0 %1996 }
 0x467   : > { %v1999_v29 = vpop.permute.xlu0 %1998 }
 0x468   : > { %v2042_v63 = vsel %vm574_vm13, %v1997_v44, %v1999_v29 }
 0x469   : > { %v2094_v35 = vmax.f32 %v7053_v56, %v2042_v63 }
 0x46e   : > { %v7184_v26 = vpop.permute.xlu1 %2002 }
 0x46f   : > { %v7186_v12 = vpop.permute.xlu0 %2000 }
 0x470   : > { %v2044_v56 = vsel %vm574_vm13, %v7186_v12, %v7184_v26 }
 0x472   : > { %v2031_v46 = vpop.permute.xlu1 %2030 }
 0x473   : > { %v2019_v0 = vpop.permute.xlu0 %2018 }
 0x476   : > { %v2017_v4 = vpop.permute.xlu1 %2016 }
 0x477   : > { %v2050_v10 = vsel %vm574_vm13, %v7049_v51, %v2017_v4  ;;  %v2051_v33 = vsel %vm574_vm13, %v2017_v4, %v2019_v0  ;;  %v2021_v8 = vpop.permute.xlu0 %2020  ;;  %v2149_v51 = vrot.slane %v2111_v22, %v9745_v13 }
 0x478   : > { %v2102_v31 = vmax.f32 %v6992_v54, %v2050_v10  ;;  %v2103_v39 = vmax.f32 %v7089_v2, %v2051_v33  ;;  %v2052_v6 = vsel %vm574_vm13, %v2019_v0, %v2021_v8  ;;  %v2041_v2 = vsel %vm574_vm13, %v1995_v36, %v1997_v44 }
 0x479   : > { %v2104_v18 = vmax.f32 %v7080_v11, %v2052_v6  ;;  %v2187_v48 = vmul.f32 %v2149_v51, %v2092_v32  ;;  %v2153_v11 = vrot.slane %v2111_v22, %v9744_v21  ;;  %v2093_v27 = vmax.f32 %v7043_v7, %v2041_v2 }
 0x47a   : > { %v2023_v52 = vpop.permute.xlu1 %2022  ;;  %v2197_v47 = vmul.f32 %v2137_v40, %v2102_v31  ;;  %v2198_v54 = vmul.f32 %v2141_v57, %v2103_v39  ;;  %v2043_v0 = vsel %vm574_vm13, %v1999_v29, %v7186_v12  ;;  %v1905_v7 = vmax.f32 %v6887_v55, %v7068_v28 }
 0x47b   : > { %v2053_v20 = vsel %vm574_vm13, %v2021_v8, %v2023_v52  ;;  %v2029_v34 = vpop.permute.xlu0 %2028  ;;  %v2199_v38 = vmul.f32 %v2145_v19, %v2104_v18  ;;  %v2095_v29 = vmax.f32 %v7062_v53, %v2043_v0  ;;  %v2188_v55 = vmul.f32 %v2153_v11, %v2093_v27 }
 0x47c   : > { %v2105_v50 = vmax.f32 %v7101_v42, %v2053_v20  ;;  %v2210_v5 = vpack.c.bf16 %v2197_v47, %v2184_v59  ;;  %v2211_v14 = vpack.c.bf16 %v2198_v54, %v2185_v41  ;;  %v1892_v42 = vmax.f32 %v6873_v15, %v7055_v17 }
 0x47d   : > { %v2212_v62 = vpack.c.bf16 %v2199_v38, %v2186_v25  ;;  %v2057_v9 = vsel %vm574_vm13, %v2029_v34, %v2031_v46  ;;  %v2157_v15 = vrot.slane %v2111_v22, %v9747_v49  ;;  %v2161_v17 = vrot.slane %v2111_v22, %v9746_v37 }
 0x47e   : > { %v2025_v61 = vpop.permute.xlu1 %2024  ;;  %2241 = vrot.lane.b32.xlu0 %v2210_v5, %s6060_s15  ;;  %2243 = vrot.lane.b32.xlu1 %v2211_v14, %s6060_s15  ;;  %v2200_v36 = vmul.f32 %v2149_v51, %v2105_v50  ;;  %v2109_v10 = vmax.f32 %v1905_v7, %v2057_v9  ;;  %v2165_v39 = vrot.slane %v2111_v22, %v9748_v1 }
 0x47f   : > { %v2054_v40 = vsel %vm574_vm13, %v2023_v52, %v2025_v61  ;;  %v2234_v23 = vpop.permute.xlu0 %2233  ;;  %v2189_v31 = vmul.f32 %v2157_v15, %v2094_v35  ;;  %v2096_v6 = vmax.f32 %v1892_v42, %v2044_v56  ;;  %v2190_v26 = vmul.f32 %v2161_v17, %v2095_v29 }
 0x480   : > { %v2106_v44 = vmax.f32 %v7118_v43, %v2054_v40  ;;  %v2213_v57 = vpack.c.bf16 %v2200_v36, %v2187_v48 }
 0x481   : > { %v2191_v22 = vmul.f32 %v2165_v39, %v2096_v6 }
 0x482   : > { %v2027_v4 = vpop.permute.xlu1 %2026  ;;  %2247 = vrot.lane.b32.xlu1 %v2213_v57, %s6060_s15  ;;  %2245 = vrot.lane.b32.xlu0 %v2212_v62, %s6060_s15  ;;  %v2201_v28 = vmul.f32 %v2153_v11, %v2106_v44 }
 0x483   : > { %v2055_v43 = vsel %vm574_vm13, %v2025_v61, %v2027_v4  ;;  %v2056_v46 = vsel %vm574_vm13, %v2027_v4, %v2029_v34  ;;  %v7254_v18 = vpop.permute.xlu0 %2352  ;;  %vm2848_vm13 = vcmask 916480  }
 0x484   : > { %v2107_v53 = vmax.f32 %v7137_v16, %v2055_v43  ;;  %v2108_v33 = vmax.f32 %v7152_v30, %v2056_v46  ;;  %v2214_v8 = vpack.c.bf16 %v2201_v28, %v2188_v55  ;;  %v2204_v30 = vmul.f32 %v2165_v39, %v2109_v10 }
 0x486   : > { %v2232_v19 = vpop.permute.xlu1 %2231  ;;  %2249 = vrot.lane.b32.xlu0 %v2214_v8, %s6060_s15  ;;  %v2202_v60 = vmul.f32 %v2157_v15, %v2107_v53  ;;  %v2203_v12 = vmul.f32 %v2161_v17, %v2108_v33  ;;  %v2217_v59 = vpack.c.bf16 %v2204_v30, %v2191_v22 }
 0x487   : > { %v7252_v32 = vsel %vm442_vm7, %v2232_v19, %v2234_v23  ;;  %2285 = vst.msk [vmem:[#allocation5 + $0x8] sm:$0xff] %vm2284_vm9, %v2232_v19  ;;  %v2238_v47 = vpop.permute.xlu0 %2237 }
 0x488   : > { %v2215_v16 = vpack.c.bf16 %v2202_v60, %v2189_v31  ;;  %v2216_v51 = vpack.c.bf16 %v2203_v12, %v2190_v26  ;;  %v7431_v26 = vld [vmem:[%s9669_s6 + $0x4] ss:$8 sps:$4 sm:$0xff]  }
 0x489   : > { %5490 = vmatprep.mubr.msk.bf16.mxu1 %vm787_vm3, %v7431_v26  ;;  %5496 = vmatprep.mubr.msk.bf16.mxu0 %vm787_vm3, %v7431_v26 }
 0x48a   : > { %v7256_v52 = vpop.permute.xlu1 %2443  ;;  %2251 = vrot.lane.b32.xlu1 %v2215_v16, %s6060_s15  ;;  %2253 = vrot.lane.b32.xlu0 %v2216_v51, %s6060_s15 }
 0x48e   : > { %v2236_v41 = vpop.permute.xlu1 %2235  ;;  %2255 = vrot.lane.b32.xlu1 %v2217_v59, %s6060_s15  ;;  %v2327_v54 = vld [vmem:[#allocation5 + $0x8] sm:$0xff] }
 0x48f   : > { %v7262_v2 = vsel %vm442_vm7, %v2234_v23, %v2236_v41  ;;  %v7265_v20 = vsel %vm442_vm7, %v2236_v41, %v2238_v47  ;;  %2354 = vrot.lane.b32.xlu0 %v2327_v54, %s6051_s19  ;;  %3238 = vmatprep.subr.bf16.mxu1 %v2327_v54 }
 0x490   : > { %2288 = vst [vmem:[#allocation5 + $0x20] sm:$0xff] %v7265_v20  ;;  %3239 = vmatpush1.bf16.msra.mxu1 %v7113_v24 }
 0x492   : > { %v2240_v50 = vpop.permute.xlu1 %2239  ;;  %2445 = vrot.lane.b32.xlu1 %v2327_v54, %s6061_s23 }
 0x493   : > { %v7272_v34 = vsel %vm442_vm7, %v2238_v47, %v2240_v50  ;;  %2536 = vrot.lane.b32.xlu0 %v2327_v54, %s6056_s26 }
 0x496   : > { %2632 = vrot.lane.b32.xlu1 %v2327_v54, %s6058_s28 }
 0x497   : > { %2728 = vrot.lane.b32.xlu0 %v2327_v54, %s6062_s18  ;;  %v7277_v5 = vld [vmem:[#allocation5 + $0x20] sm:$0xff] }
 0x49a   : > { %2356 = vrot.lane.b32.xlu1 %v7252_v32, %s6051_s19 }
 0x49e   : > { %2540 = vrot.lane.b32.xlu1 %v7262_v2, %s6056_s26 }
 0x4a2   : > { %2634 = vrot.lane.b32.xlu1 %v7252_v32, %s6058_s28 }
 0x4a6   : > { %2732 = vrot.lane.b32.xlu1 %v7262_v2, %s6062_s18 }
 0x4aa   : > { %2824 = vrot.lane.b32.xlu1 %v7265_v20, %s6063_s24 }
 0x4ae   : > { %2822 = vrot.lane.b32.xlu1 %v7262_v2, %s6063_s24 }
 0x4b2   : > { %2917 = vrot.lane.b32.xlu1 %v7272_v34, %s6064_s25 }
 0x4b6   : > { %3006 = vrot.lane.b32.xlu1 %v7265_v20, %s6065_s27 }
 0x4ba   : > { %3004 = vrot.lane.b32.xlu1 %v7262_v2, %s6065_s27 }
 0x4be   : > { %2360 = vrot.lane.b32.xlu1 %v7265_v20, %s6051_s19 }
 0x4c2   : > { %2451 = vrot.lane.b32.xlu1 %v7265_v20, %s6061_s23 }
 0x4c6   : > { %2542 = vrot.lane.b32.xlu1 %v7265_v20, %s6056_s26 }
 0x4ca   : > { %2638 = vrot.lane.b32.xlu1 %v7265_v20, %s6058_s28 }
 0x4ce   : > { %2736 = vrot.lane.b32.xlu1 %v7272_v34, %s6062_s18 }
 0x4f0   : > { %v2244_v14 = vpop.permute.xlu1 %2243  ;;  %v2242_v38 = vpop.permute.xlu0 %2241 }
 0x4f1   : > { %v7308_v48 = vsel %vm442_vm7, %v2240_v50, %v2242_v38  ;;  %v7311_v25 = vsel %vm442_vm7, %v2242_v38, %v2244_v14 }
 0x4f2   : > { %2830 = vrot.lane.b32.xlu1 %v7311_v25, %s6063_s24  ;;  %3397 = vmatprep.subr.bf16.mxu0 %v7311_v25 }
 0x4f3   : > { %3398 = vmatpush1.bf16.msra.mxu0 %v7308_v48 }
 0x4f4   : > { %v2248_v11 = vpop.permute.xlu1 %2247  ;;  %v2246_v27 = vpop.permute.xlu0 %2245 }
 0x4f5   : > { %v7318_v63 = vsel %vm442_vm7, %v2244_v14, %v2246_v27  ;;  %v7321_v61 = vsel %vm442_vm7, %v2246_v27, %v2248_v11  ;;  %v3190_v27 = vld [vmem:[%s9670_s7] sm:$0xff] }
 0x4f6   : > { %2292 = vst [vmem:[#allocation5 + $0x40] sm:$0xff] %v7318_v63  ;;  %2293 = vst [vmem:[#allocation5 + $0x48] sm:$0xff] %v7321_v61  ;;  %2921 = vrot.lane.b32.xlu1 %v7311_v25, %s6064_s25 }
 0x4f8   : > { %v2250_v36 = vpop.permute.xlu0 %2249 }
 0x4f9   : > { %v7328_v42 = vsel %vm442_vm7, %v2248_v11, %v2250_v36 }
 0x4fa   : > { %2294 = vst [vmem:[#allocation5 + $0x50] sm:$0xff] %v7328_v42  ;;  %3012 = vrot.lane.b32.xlu1 %v7311_v25, %s6065_s27 }
 0x4fc   : > { %v2252_v0 = vpop.permute.xlu1 %2251  ;;  %v2254_v40 = vpop.permute.xlu0 %2253 }
 0x4fd   : > { %v7334_v7 = vsel %vm442_vm7, %v2250_v36, %v2252_v0  ;;  %v7337_v44 = vsel %vm442_vm7, %v2252_v0, %v2254_v40  ;;  %v7339_v57 = vld [vmem:[#allocation5 + $0x48] sm:$0xff]  ;;  %v7341_v62 = vld [vmem:[#allocation5 + $0x40] sm:$0xff] }
 0x4fe   : > { %2295 = vst [vmem:[#allocation5 + $0x58] sm:$0xff] %v7334_v7  ;;  %2325 = vst.msk [vmem:[#allocation6 + $0x60] sm:$0xff] %vm1368_vm4, %v7337_v44  ;;  %2364 = vrot.lane.b32.xlu1 %v7308_v48, %s6051_s19 }
 0x500   : > { %v2256_v35 = vpop.permute.xlu1 %2255 }
 0x501   : > { %v7349_v9 = vsel %vm442_vm7, %v2254_v40, %v2256_v35  ;;  %2299 = vst.msk [vmem:[#allocation5 + $0x70] sm:$0xff] %vm2298_vm10, %v2256_v35  ;;  %v2355_v15 = vpop.permute.xlu0 %2354  ;;  %v7351_v17 = vld [vmem:[#allocation5 + $0x50] sm:$0xff] }
 0x502   : > { %v2379_v29 = vsel %vm542_vm12, %v7254_v18, %v2355_v15  ;;  %2455 = vrot.lane.b32.xlu1 %v7308_v48, %s6061_s23  ;;  %v3192_v40 = vld [vmem:[%s9670_s7 + $0x10] sm:$0xff] }
 0x504   : > { %v7357_v23 = vpop.permute.xlu1 %2445 }
 0x505   : > { %v7362_v4 = vsel %vm2469_vm11, %v7256_v52, %v7357_v23  ;;  %v7364_v55 = vld [vmem:[#allocation5 + $0x58] sm:$0xff] }
 0x506   : > { %2548 = vrot.lane.b32.xlu1 %v7311_v25, %s6056_s26 }
 0x508   : > { %v2633_v28 = vpop.permute.xlu1 %2632  ;;  %v7368_v56 = vld [vmem:[#allocation5 + $0x70] sm:$0xff] }
 0x509   : > { %2562 = vrot.lane.b32.xlu0 %v7368_v56, %s6056_s26 }
 0x50a   : > { %2644 = vrot.lane.b32.xlu1 %v7311_v25, %s6058_s28 }
 0x50c   : > { %v7374_v43 = vpop.permute.xlu1 %2356 }
 0x50d   : > { %v2380_v46 = vsel %vm542_vm12, %v2355_v15, %v7374_v43  ;;  %2447 = vrot.lane.b32.xlu0 %v7252_v32, %s6061_s23 }
 0x50e   : > { %2740 = vrot.lane.b32.xlu1 %v7311_v25, %s6062_s18  ;;  %3240 = vmatprep.subr.bf16.mxu1 %v2380_v46 }
 0x50f   : > { %3241 = vmatpush1.bf16.msra.mxu1 %v2379_v29 }
 0x510   : > { %v7382_v10 = vpop.permute.xlu1 %2540 }
 0x511   : > { %2538 = vrot.lane.b32.xlu0 %v7252_v32, %s6056_s26 }
 0x512   : > { %2834 = vrot.lane.b32.xlu1 %v7321_v61, %s6063_s24 }
 0x514   : > { %v7388_v53 = vpop.permute.xlu1 %2634 }
 0x515   : > { %v7392_v33 = vsel %vm734_vm2, %v2633_v28, %v7388_v53  ;;  %2636 = vrot.lane.b32.xlu0 %v7262_v2, %s6058_s28 }
 0x516   : > { %2925 = vrot.lane.b32.xlu1 %v7321_v61, %s6064_s25 }
 0x518   : > { %v7398_v8 = vpop.permute.xlu1 %2732 }
 0x519   : > { %2730 = vrot.lane.b32.xlu0 %v7252_v32, %s6062_s18 }
 0x51a   : > { %3016 = vrot.lane.b32.xlu1 %v7321_v61, %s6065_s27 }
 0x51c   : > { %v7404_v31 = vpop.permute.xlu1 %2824 }
 0x51d   : > { %2826 = vrot.lane.b32.xlu0 %v7272_v34, %s6063_s24 }
 0x51e   : > { %2368 = vrot.lane.b32.xlu1 %v7318_v63, %s6051_s19 }
 0x520   : > { %v2823_v39 = vpop.permute.xlu1 %2822 }
 0x521   : > { %v7412_v6 = vsel %vm2848_vm13, %v2823_v39, %v7404_v31  ;;  %2915 = vrot.lane.b32.xlu0 %v7265_v20, %s6064_s25 }
 0x522   : > { %2372 = vrot.lane.b32.xlu1 %v7328_v42, %s6051_s19 }
 0x524   : > { %v7418_v19 = vpop.permute.xlu1 %2917 }
 0x525   : > { %2913 = vrot.lane.b32.xlu0 %v7262_v2, %s6064_s25 }
 0x526   : > { %2459 = vrot.lane.b32.xlu1 %v7318_v63, %s6061_s23 }
 0x528   : > { %v7424_v60 = vpop.permute.xlu1 %3006 }
 0x529   : > { %3008 = vrot.lane.b32.xlu0 %v7272_v34, %s6065_s27 }
 0x52a   : > { %2463 = vrot.lane.b32.xlu1 %v7328_v42, %s6061_s23 }
 0x52c   : > { %v3005_v12 = vpop.permute.xlu1 %3004 }
 0x52d   : > { %v7441_v18 = vsel %vm3030_vm14, %v3005_v12, %v7424_v60  ;;  %2358 = vrot.lane.b32.xlu0 %v7262_v2, %s6051_s19 }
 0x52e   : > { %2552 = vrot.lane.b32.xlu1 %v7321_v61, %s6056_s26 }
 0x530   : > { %v7447_v16 = vpop.permute.xlu1 %2360 }
 0x531   : > { %2449 = vrot.lane.b32.xlu0 %v7262_v2, %s6061_s23 }
 0x532   : > { %2556 = vrot.lane.b32.xlu1 %v7334_v7, %s6056_s26 }
 0x534   : > { %v7453_v51 = vpop.permute.xlu1 %2451 }
 0x535   : > { %2544 = vrot.lane.b32.xlu0 %v7272_v34, %s6056_s26 }
 0x536   : > { %2648 = vrot.lane.b32.xlu1 %v7321_v61, %s6058_s28 }
 0x538   : > { %v7459_v30 = vpop.permute.xlu1 %2542 }
 0x539   : > { %v7464_v52 = vsel %vm670_vm0, %v7382_v10, %v7459_v30  ;;  %2640 = vrot.lane.b32.xlu0 %v7272_v34, %s6058_s28 }
 0x53a   : > { %2652 = vrot.lane.b32.xlu1 %v7334_v7, %s6058_s28 }
 0x53c   : > { %v7501_v24 = vpop.permute.xlu1 %2638 }
 0x53d   : > { %2734 = vrot.lane.b32.xlu0 %v7265_v20, %s6062_s18  ;;  %v2537_v20 = vpop.permute.xlu0 %2536 }
 0x53e   : > { %2744 = vrot.lane.b32.xlu1 %v7321_v61, %s6062_s18 }
 0x540   : > { %v7509_v22 = vpop.permute.xlu1 %2736 }
 0x541   : > { %2828 = vrot.lane.b32.xlu0 %v7308_v48, %s6063_s24  ;;  %v2729_v14 = vpop.permute.xlu0 %2728 }
 0x542   : > { %2748 = vrot.lane.b32.xlu1 %v7334_v7, %s6062_s18 }
 0x545   : > { %2919 = vrot.lane.b32.xlu0 %v7308_v48, %s6064_s25 }
 0x546   : > { %2838 = vrot.lane.b32.xlu1 %v7334_v7, %s6063_s24 }
 0x549   : > { %3010 = vrot.lane.b32.xlu0 %v7308_v48, %s6065_s27 }
 0x54a   : > { %2842 = vrot.lane.b32.xlu1 %v7349_v9, %s6063_s24 }
 0x54d   : > { %2362 = vrot.lane.b32.xlu0 %v7272_v34, %s6051_s19 }
 0x54e   : > { %2929 = vrot.lane.b32.xlu1 %v7334_v7, %s6064_s25 }
 0x551   : > { %2453 = vrot.lane.b32.xlu0 %v7272_v34, %s6061_s23 }
 0x552   : > { %2933 = vrot.lane.b32.xlu1 %v7349_v9, %s6064_s25 }
 0x555   : > { %2546 = vrot.lane.b32.xlu0 %v7308_v48, %s6056_s26 }
 0x556   : > { %3020 = vrot.lane.b32.xlu1 %v7334_v7, %s6065_s27 }
 0x559   : > { %2642 = vrot.lane.b32.xlu0 %v7308_v48, %s6058_s28 }
 0x55a   : > { %3024 = vrot.lane.b32.xlu1 %v7349_v9, %s6065_s27 }
 0x55d   : > { %2738 = vrot.lane.b32.xlu0 %v7308_v48, %s6062_s18 }
 0x55e   : > { %2658 = vrot.lane.b32.xlu1 %v7368_v56, %s6058_s28 }
 0x561   : > { %2832 = vrot.lane.b32.xlu0 %v7318_v63, %s6063_s24 }
 0x562   : > { %2376 = vrot.lane.b32.xlu1 %v7337_v44, %s6051_s19 }
 0x564   : > { %v7515_v59 = vpop.permute.xlu1 %2830 }
 0x565   : > { %2923 = vrot.lane.b32.xlu0 %v7318_v63, %s6064_s25 }
 0x566   : > { %2467 = vrot.lane.b32.xlu1 %v7337_v44, %s6061_s23 }
 0x568   : > { %v7521_v47 = vpop.permute.xlu1 %2921 }
 0x569   : > { %3014 = vrot.lane.b32.xlu0 %v7318_v63, %s6065_s27 }
 0x56a   : > { %2560 = vrot.lane.b32.xlu1 %v7349_v9, %s6056_s26 }
 0x56c   : > { %v7527_v41 = vpop.permute.xlu1 %3012 }
 0x56d   : > { %2366 = vrot.lane.b32.xlu0 %v7311_v25, %s6051_s19 }
 0x56e   : > { %2654 = vrot.lane.b32.xlu1 %v7337_v44, %s6058_s28 }
 0x570   : > { %v7533_v54 = vpop.permute.xlu1 %2364 }
 0x571   : > { %2370 = vrot.lane.b32.xlu0 %v7321_v61, %s6051_s19 }
 0x572   : > { %2752 = vrot.lane.b32.xlu1 %v7349_v9, %s6062_s18 }
 0x574   : > { %v7539_v50 = vpop.permute.xlu1 %2455 }
 0x575   : > { %2457 = vrot.lane.b32.xlu0 %v7311_v25, %s6061_s23 }
 0x576   : > { %2844 = vrot.lane.b32.xlu1 %v7368_v56, %s6063_s24 }
 0x578   : > { %v7545_v38 = vpop.permute.xlu1 %2548 }
 0x579   : > { %2461 = vrot.lane.b32.xlu0 %v7321_v61, %s6061_s23 }
 0x57a   : > { %2935 = vrot.lane.b32.xlu1 %v7368_v56, %s6064_s25 }
 0x57b   : > { %v7551_v48 = vpop.permute.xlu0 %2562 }
 0x57c   : > { %v7553_v11 = vpop.permute.xlu1 %2644 }
 0x57d   : > { %2550 = vrot.lane.b32.xlu0 %v7318_v63, %s6056_s26 }
 0x57e   : > { %3026 = vrot.lane.b32.xlu1 %v7368_v56, %s6065_s27 }
 0x57f   : > { %v7559_v25 = vpop.permute.xlu0 %2447 }
 0x580   : > { %v2471_v61 = vsel %vm2469_vm11, %v7357_v23, %v7559_v25  ;;  %v7567_v36 = vpop.permute.xlu1 %2740 }
 0x581   : > { %2554 = vrot.lane.b32.xlu0 %v7328_v42, %s6056_s26  ;;  %3242 = vmatprep.subr.bf16.mxu1 %v2471_v61 }
 0x582   : > { %3196 = vperm.xlu1 %5794, %v3190_v27   ;;  %3243 = vmatpush1.bf16.msra.mxu1 %v7362_v4 }
 0x583   : > { %v2539_v0 = vpop.permute.xlu0 %2538 }
 0x584   : > { %v2565_v35 = vsel %vm670_vm0, %v2537_v20, %v2539_v0  ;;  %v2566_v15 = vsel %vm670_vm0, %v2539_v0, %v7382_v10  ;;  %v7578_v29 = vpop.permute.xlu1 %2834 }
 0x585   : > { %2646 = vrot.lane.b32.xlu0 %v7318_v63, %s6058_s28  ;;  %3244 = vmatprep.subr.bf16.mxu1 %v2566_v15 }
 0x586   : > { %3206 = vperm.xlu1 %5794, %v3192_v40   ;;  %3245 = vmatpush1.bf16.msra.mxu1 %v2565_v35 }
 0x587   : > { %v2637_v23 = vpop.permute.xlu0 %2636 }
 0x588   : > { %v2662_v4 = vsel %vm734_vm2, %v7388_v53, %v2637_v23  ;;  %v7586_v28 = vsel %vm734_vm2, %v2637_v23, %v7501_v24  ;;  %v7588_v46 = vpop.permute.xlu1 %2925  ;;  %v7633_v23 = vld [vmem:[%s9669_s6] ss:$8 sps:$4 sm:$0xff]  }
 0x589   : > { %2650 = vrot.lane.b32.xlu0 %v7328_v42, %s6058_s28  ;;  %3246 = vmatprep.subr.bf16.mxu1 %v2662_v4  ;;  %v7639_v4 = vld [vmem:[%s9669_s6 + $0x14] ss:$8 sps:$4 sm:$0xff]  }
 0x58a   : > { %3247 = vmatpush1.bf16.msra.mxu1 %v7392_v33 }
 0x58b   : > { %v2731_v10 = vpop.permute.xlu0 %2730 }
 0x58c   : > { %v2757_v39 = vsel %vm2756_vm1, %v2729_v14, %v2731_v10  ;;  %v2758_v12 = vsel %vm2756_vm1, %v2731_v10, %v7398_v8  ;;  %v7596_v53 = vpop.permute.xlu1 %3016 }
 0x58d   : > { %2742 = vrot.lane.b32.xlu0 %v7318_v63, %s6062_s18  ;;  %3248 = vmatprep.subr.bf16.mxu1 %v2758_v12 }
 0x58e   : > { %3249 = vmatpush1.bf16.msra.mxu1 %v2757_v39 }
 0x58f   : > { %v7600_v20 = vpop.permute.xlu0 %2826 }
 0x590   : > { %v2850_v27 = vsel %vm2848_vm13, %v7404_v31, %v7600_v20  ;;  %v7605_v33 = vpop.permute.xlu1 %2368 }
 0x591   : > { %2746 = vrot.lane.b32.xlu0 %v7328_v42, %s6062_s18  ;;  %3250 = vmatprep.subr.bf16.mxu1 %v2850_v27 }
 0x592   : > { %3251 = vmatpush1.bf16.msra.mxu1 %v7412_v6 }
 0x593   : > { %v2916_v14 = vpop.permute.xlu0 %2915 }
 0x594   : > { %v2941_v63 = vsel %vm2939_vm5, %v2916_v14, %v7418_v19  ;;  %v7612_v61 = vpop.permute.xlu1 %2372 }
 0x595   : > { %2836 = vrot.lane.b32.xlu0 %v7328_v42, %s6063_s24  ;;  %3252 = vmatprep.subr.bf16.mxu1 %v2941_v63 }
 0x597   : > { %v2914_v31 = vpop.permute.xlu0 %2913 }
 0x598   : > { %v2940_v0 = vsel %vm2939_vm5, %v2914_v31, %v2916_v14  ;;  %v7617_v40 = vpop.permute.xlu1 %2459 }
 0x599   : > { %2840 = vrot.lane.b32.xlu0 %v7337_v44, %s6063_s24  ;;  %3253 = vmatpush1.bf16.msra.mxu1 %v2940_v0 }
 0x59b   : > { %v7621_v6 = vpop.permute.xlu0 %3008 }
 0x59c   : > { %v3032_v35 = vsel %vm3030_vm14, %v7424_v60, %v7621_v6  ;;  %v7626_v15 = vpop.permute.xlu1 %2463 }
 0x59d   : > { %2927 = vrot.lane.b32.xlu0 %v7328_v42, %s6064_s25  ;;  %3254 = vmatprep.subr.bf16.mxu1 %v3032_v35 }
 0x59e   : > { %3255 = vmatpush1.bf16.msra.mxu1 %v7441_v18 }
 0x59f   : > { %v2359_v10 = vpop.permute.xlu0 %2358  ;;  %3291 = vmatprep.subr.bf16.mxu1 %v7262_v2 }
 0x5a0   : > { %v2381_v60 = vsel %vm542_vm12, %v7374_v43, %v2359_v10  ;;  %v2382_v39 = vsel %vm542_vm12, %v2359_v10, %v7447_v16  ;;  %v7646_v12 = vpop.permute.xlu1 %2552 }
 0x5a1   : > { %2931 = vrot.lane.b32.xlu0 %v7337_v44, %s6064_s25  ;;  %3271 = vmatmul.mubr.bf16.vlgmr.msra.gmra.mrb[16].mxu1 %v7633_v23 }
 0x5a2   : > { %3292 = vmatpush1.bf16.msra.mxu1 %v7252_v32  ;;  %5491 = vmatprep.mubr.msk.bf16.mxu1 %vm787_vm3, %v7639_v4  ;;  %v7665_v32 = vld [vmem:[%s9669_s6 + $0x10] ss:$8 sps:$4 sm:$0xff]  }
 0x5a3   : > { %v2450_v18 = vpop.permute.xlu0 %2449  ;;  %3293 = vmatprep.subr.bf16.mxu1 %v2382_v39 }
 0x5a4   : > { %v2472_v2 = vsel %vm2469_vm11, %v7559_v25, %v2450_v18  ;;  %v2473_v43 = vsel %vm2469_vm11, %v2450_v18, %v7453_v51  ;;  %v7658_v27 = vpop.permute.xlu1 %2556 }
 0x5a5   : > { %3018 = vrot.lane.b32.xlu0 %v7328_v42, %s6065_s27 }
 0x5a6   : > { %3294 = vmatpush1.bf16.msra.mxu1 %v2381_v60 }
 0x5a7   : > { %v2545_v14 = vpop.permute.xlu0 %2544  ;;  %3295 = vmatprep.subr.bf16.mxu1 %v2473_v43 }
 0x5a8   : > { %v2568_v63 = vsel %vm670_vm0, %v7459_v30, %v2545_v14  ;;  %v7669_v25 = vpop.permute.xlu1 %2648 }
 0x5a9   : > { %3022 = vrot.lane.b32.xlu0 %v7337_v44, %s6065_s27  ;;  %3281 = vmatmul.mubr.bf16.gmra.mrb[20].mxu1 %v7665_v32 }
 0x5aa   : > { %3296 = vmatpush1.bf16.msra.mxu1 %v2472_v2  ;;  %5492 = vmatprep.mubr.msk.bf16.mxu1 %vm787_vm3, %v7431_v26 }
 0x5ab   : > { %v2641_v42 = vpop.permute.xlu0 %2640  ;;  %3297 = vmatprep.subr.bf16.mxu1 %v2568_v63 }
 0x5ac   : > { %v2664_v31 = vsel %vm734_vm2, %v7501_v24, %v2641_v42  ;;  %v7678_v0 = vpop.permute.xlu1 %2652 }
 0x5ad   : > { %2754 = vrot.lane.b32.xlu0 %v7368_v56, %s6062_s18 }
 0x5ae   : > { %3298 = vmatpush1.bf16.msra.mxu1 %v7464_v52 }
 0x5af   : > { %v2735_v30 = vpop.permute.xlu0 %2734  ;;  %3299 = vmatprep.subr.bf16.mxu1 %v2664_v31 }
 0x5b0   : > { %v2759_v35 = vsel %vm2756_vm1, %v7398_v8, %v2735_v30  ;;  %v2760_v10 = vsel %vm2756_vm1, %v2735_v30, %v7509_v22  ;;  %v7687_v60 = vpop.permute.xlu1 %2744 }
 0x5b1   : > { %2374 = vrot.lane.b32.xlu0 %v7334_v7, %s6051_s19 }
 0x5b2   : > { %3300 = vmatpush1.bf16.msra.mxu1 %v7586_v28 }
 0x5b3   : > { %v2829_v24 = vpop.permute.xlu0 %2828  ;;  %3301 = vmatprep.subr.bf16.mxu1 %v2760_v10 }
 0x5b4   : > { %v2851_v56 = vsel %vm2848_vm13, %v7600_v20, %v2829_v24  ;;  %v2852_v52 = vsel %vm2848_vm13, %v2829_v24, %v7515_v59  ;;  %v7696_v39 = vpop.permute.xlu1 %2748 }
 0x5b5   : > { %2465 = vrot.lane.b32.xlu0 %v7334_v7, %s6061_s23  ;;  %s6066_s23 = smov 0.0  }
 0x5b6   : > { %3302 = vmatpush1.bf16.msra.mxu1 %v2759_v35 }
 0x5b7   : > { %v2920_v8 = vpop.permute.xlu0 %2919  ;;  %3303 = vmatprep.subr.bf16.mxu1 %v2852_v52 }
 0x5b8   : > { %v2942_v18 = vsel %vm2939_vm5, %v7418_v19, %v2920_v8  ;;  %v2943_v28 = vsel %vm2939_vm5, %v2920_v8, %v7521_v47  ;;  %v7704_v2 = vpop.permute.xlu1 %2838 }
 0x5b9   : > { %2558 = vrot.lane.b32.xlu0 %v7337_v44, %s6056_s26 }
 0x5ba   : > { %3304 = vmatpush1.bf16.msra.mxu1 %v2851_v56 }
 0x5bb   : > { %v3011_v20 = vpop.permute.xlu0 %3010  ;;  %3305 = vmatprep.subr.bf16.mxu1 %v2943_v28 }
 0x5bc   : > { %v3033_v7 = vsel %vm3030_vm14, %v7621_v6, %v3011_v20  ;;  %v3034_v43 = vsel %vm3030_vm14, %v3011_v20, %v7527_v41  ;;  %v7712_v63 = vpop.permute.xlu1 %2842  ;;  %v2808_v6 = vld [vmem:[#allocation5 + $0x78] sm:$0xff] }
 0x5bd   : > { %2656 = vrot.lane.b32.xlu0 %v7349_v9, %s6058_s28 }
 0x5be   : > { %3306 = vmatpush1.bf16.msra.mxu1 %v2942_v18 }
 0x5bf   : > { %v2363_v19 = vpop.permute.xlu0 %2362  ;;  %3307 = vmatprep.subr.bf16.mxu1 %v3034_v43  ;;  %v3193_v43 = vld [vmem:[%s9670_s7 + $0x18] sm:$0xff] }
 0x5c0   : > { %v2383_v31 = vsel %vm542_vm12, %v7447_v16, %v2363_v19  ;;  %v2384_v30 = vsel %vm542_vm12, %v2363_v19, %v7533_v54  ;;  %v7720_v35 = vpop.permute.xlu1 %2929 }
 0x5c1   : > { %2750 = vrot.lane.b32.xlu0 %v7337_v44, %s6062_s18 }
 0x5c2   : > { %3308 = vmatpush1.bf16.msra.mxu1 %v3033_v7 }
 0x5c3   : > { %v2454_v10 = vpop.permute.xlu0 %2453  ;;  %3344 = vmatprep.subr.bf16.mxu1 %v7272_v34 }
 0x5c4   : > { %v2474_v9 = vsel %vm2469_vm11, %v7453_v51, %v2454_v10  ;;  %v2475_v24 = vsel %vm2469_vm11, %v2454_v10, %v7539_v50  ;;  %v7729_v16 = vpop.permute.xlu1 %2933 }
 0x5c5   : > { %2846 = vrot.lane.b32.xlu0 %v2808_v6, %s6063_s24  ;;  %3324 = vmatmul.mubr.bf16.vlgmr.msra.gmra.mrb[24].mxu1 %v7633_v23 }
 0x5c6   : > { %3345 = vmatpush1.bf16.msra.mxu1 %v7277_v5  ;;  %5493 = vmatprep.mubr.msk.bf16.mxu1 %vm787_vm3, %v7639_v4 }
 0x5c7   : > { %v2547_v44 = vpop.permute.xlu0 %2546  ;;  %3346 = vmatprep.subr.bf16.mxu1 %v2384_v30 }
 0x5c8   : > { %v2569_v34 = vsel %vm670_vm0, %v2545_v14, %v2547_v44  ;;  %v2570_v51 = vsel %vm670_vm0, %v2547_v44, %v7545_v38  ;;  %v7739_v56 = vpop.permute.xlu1 %3020  ;;  %v3191_v14 = vld [vmem:[%s9670_s7 + $0x8] sm:$0xff] }
 0x5c9   : > { %2937 = vrot.lane.b32.xlu0 %v2808_v6, %s6064_s25 }
 0x5ca   : > { %3347 = vmatpush1.bf16.msra.mxu1 %v2383_v31 }
 0x5cb   : > { %v2643_v52 = vpop.permute.xlu0 %2642  ;;  %3348 = vmatprep.subr.bf16.mxu1 %v2475_v24 }
 0x5cc   : > { %v2665_v8 = vsel %vm734_vm2, %v2641_v42, %v2643_v52  ;;  %v2666_v5 = vsel %vm734_vm2, %v2643_v52, %v7553_v11  ;;  %v7745_v18 = vpop.permute.xlu1 %3024 }
 0x5cd   : > { %3028 = vrot.lane.b32.xlu0 %v2808_v6, %s6065_s27  ;;  %3334 = vmatmul.mubr.bf16.gmra.mrb[28].mxu1 %v7665_v32 }
 0x5ce   : > { %3349 = vmatpush1.bf16.msra.mxu1 %v2474_v9  ;;  %5494 = vmatprep.mubr.msk.bf16.mxu1 %vm787_vm3, %v7431_v26 }
 0x5cf   : > { %v2739_v28 = vpop.permute.xlu0 %2738  ;;  %3350 = vmatprep.subr.bf16.mxu1 %v2570_v51 }
 0x5d0   : > { %v2761_v42 = vsel %vm2756_vm1, %v7509_v22, %v2739_v28  ;;  %v2762_v20 = vsel %vm2756_vm1, %v2739_v28, %v7567_v36  ;;  %v7758_v7 = vpop.permute.xlu1 %2658 }
 0x5d1   : > { %3201 = vperm.xlu0 %5793, %v3191_v14  }
 0x5d2   : > { %3351 = vmatpush1.bf16.msra.mxu1 %v2569_v34 }
 0x5d3   : > { %v2833_v19 = vpop.permute.xlu0 %2832  ;;  %3352 = vmatprep.subr.bf16.mxu1 %v2666_v5 }
 0x5d4   : > { %v2853_v31 = vsel %vm2848_vm13, %v7515_v59, %v2833_v19  ;;  %v2854_v30 = vsel %vm2848_vm13, %v2833_v19, %v7578_v29  ;;  %v7767_v22 = vpop.permute.xlu1 %2376 }
 0x5d5   : > { %3211 = vperm.xlu0 %5793, %v3193_v43   ;;  %2416 = vst.msk [vmem:[#allocation6 + $0xc8] sm:$0xff] %vm1368_vm4, %v7767_v22 }
 0x5d6   : > { %3353 = vmatpush1.bf16.msra.mxu1 %v2665_v8 }
 0x5d7   : > { %v2924_v6 = vpop.permute.xlu0 %2923  ;;  %3354 = vmatprep.subr.bf16.mxu1 %v2762_v20 }
 0x5d8   : > { %v2944_v10 = vsel %vm2939_vm5, %v7521_v47, %v2924_v6  ;;  %v2945_v9 = vsel %vm2939_vm5, %v2924_v6, %v7588_v46  ;;  %v7775_v24 = vpop.permute.xlu1 %2467 }
 0x5d9   : > { %2507 = vst.msk [vmem:[#allocation6 + $0x130] sm:$0xff] %vm1368_vm4, %v7775_v24 }
 0x5da   : > { %3355 = vmatpush1.bf16.msra.mxu1 %v2761_v42 }
 0x5db   : > { %v3015_v59 = vpop.permute.xlu0 %3014  ;;  %3356 = vmatprep.subr.bf16.mxu1 %v2854_v30 }
 0x5dc   : > { %v3035_v44 = vsel %vm3030_vm14, %v7527_v41, %v3015_v59  ;;  %v3036_v34 = vsel %vm3030_vm14, %v3015_v59, %v7596_v53  ;;  %v7783_v51 = vpop.permute.xlu1 %2560 }
 0x5dd   : > { %v2577_v47 = vsel %vm670_vm0, %v7783_v51, %v7551_v48 }
 0x5de   : > { %2603 = vst.msk [vmem:[#allocation6 + $0x198] sm:$0xff] %vm1368_vm4, %v2577_v47  ;;  %3357 = vmatpush1.bf16.msra.mxu1 %v2853_v31 }
 0x5df   : > { %v2367_v52 = vpop.permute.xlu0 %2366  ;;  %3358 = vmatprep.subr.bf16.mxu1 %v2945_v9 }
 0x5e0   : > { %v2385_v8 = vsel %vm542_vm12, %v7533_v54, %v2367_v52  ;;  %v2386_v41 = vsel %vm542_vm12, %v2367_v52, %v7605_v33  ;;  %v7793_v5 = vpop.permute.xlu1 %2654 }
 0x5e1   : > { %v7798_v14 = vsel %vm734_vm2, %v7678_v0, %v7793_v5  ;;  %3399 = vmatprep.subr.bf16.mxu0 %v2386_v41 }
 0x5e2   : > { %3359 = vmatpush1.bf16.msra.mxu1 %v2944_v10  ;;  %3400 = vmatpush1.bf16.msra.mxu0 %v2385_v8 }
 0x5e3   : > { %v2371_v48 = vpop.permute.xlu0 %2370  ;;  %3360 = vmatprep.subr.bf16.mxu1 %v3036_v34 }
 0x5e4   : > { %v2387_v28 = vsel %vm542_vm12, %v7605_v33, %v2371_v48  ;;  %v2388_v54 = vsel %vm542_vm12, %v2371_v48, %v7612_v61  ;;  %v7804_v42 = vpop.permute.xlu1 %2752 }
 0x5e6   : > { %3361 = vmatpush1.bf16.msra.mxu1 %v3035_v44 }
 0x5e7   : > { %v2458_v20 = vpop.permute.xlu0 %2457  ;;  %3450 = vmatprep.subr.bf16.mxu1 %v7339_v57 }
 0x5e8   : > { %v2476_v43 = vsel %vm2469_vm11, %v7539_v50, %v2458_v20  ;;  %v2477_v19 = vsel %vm2469_vm11, %v2458_v20, %v7617_v40  ;;  %v7811_v31 = vpop.permute.xlu1 %2844 }
 0x5e9   : > { %v7816_v33 = vsel %vm2848_vm13, %v7712_v63, %v7811_v31  ;;  %3377 = vmatmul.mubr.bf16.vlgmr.msra.gmra.mrb[32].mxu1 %v7633_v23  ;;  %3401 = vmatprep.subr.bf16.mxu0 %v2477_v19 }
 0x5ea   : > { %3402 = vmatpush1.bf16.msra.mxu0 %v2476_v43  ;;  %3451 = vmatpush1.bf16.msra.mxu1 %v7341_v62 }
 0x5eb   : > { %v2462_v57 = vpop.permute.xlu0 %2461  ;;  %3452 = vmatprep.subr.bf16.mxu1 %v2388_v54  ;;  %5495 = vmatprep.mubr.msk.bf16.mxu1 %vm787_vm3, %v7639_v4 }
 0x5ec   : > { %v2478_v50 = vsel %vm2469_vm11, %v7617_v40, %v2462_v57  ;;  %v2479_v30 = vsel %vm2469_vm11, %v2462_v57, %v7626_v15  ;;  %v7826_v6 = vpop.permute.xlu1 %2935 }
 0x5ed   : > { %v7831_v10 = vsel %vm2939_vm5, %v7729_v16, %v7826_v6 }
 0x5ee   : > { %3453 = vmatpush1.bf16.msra.mxu1 %v2387_v28 }
 0x5ef   : > { %v2551_v62 = vpop.permute.xlu0 %2550  ;;  %3454 = vmatprep.subr.bf16.mxu1 %v2479_v30 }
 0x5f0   : > { %v2571_v9 = vsel %vm670_vm0, %v7545_v38, %v2551_v62  ;;  %v2572_v59 = vsel %vm670_vm0, %v2551_v62, %v7646_v12  ;;  %v7837_v40 = vpop.permute.xlu1 %3026 }
 0x5f1   : > { %v7842_v44 = vsel %vm3030_vm14, %v7745_v18, %v7837_v40  ;;  %3387 = vmatmul.mubr.bf16.gmra.mrb[36].mxu1 %v7665_v32  ;;  %3403 = vmatprep.subr.bf16.mxu0 %v2572_v59 }
 0x5f2   : > { %3404 = vmatpush1.bf16.msra.mxu0 %v2571_v9  ;;  %3455 = vmatpush1.bf16.msra.mxu1 %v2478_v50 }
 0x5f3   : > { %v2555_v34 = vpop.permute.xlu0 %2554  ;;  %5498 = vmatprep.mubr.msk.bf16.mxu1 %vm787_vm3, %v7431_v26 }
 0x5f4   : > { %v2573_v38 = vsel %vm670_vm0, %v7646_v12, %v2555_v34  ;;  %v2574_v47 = vsel %vm670_vm0, %v2555_v34, %v7658_v27 }
 0x5f5   : > { %3456 = vmatprep.subr.bf16.mxu1 %v2574_v47 }
 0x5f6   : > { %3457 = vmatpush1.bf16.msra.mxu1 %v2573_v38 }
 0x5f7   : > { %v2647_v52 = vpop.permute.xlu0 %2646 }
 0x5f8   : > { %v2667_v8 = vsel %vm734_vm2, %v7553_v11, %v2647_v52  ;;  %v2668_v41 = vsel %vm734_vm2, %v2647_v52, %v7669_v25  ;;  %v7894_v52 = vld [vmem:[#allocation5] sm:$0xff] }
 0x5f9   : > { %3405 = vmatprep.subr.bf16.mxu0 %v2668_v41  ;;  %v3098_v41 = vld [vmem:[#allocation6 + $0xc8] sm:$0xff] }
 0x5fa   : > { %3406 = vmatpush1.bf16.msra.mxu0 %v2667_v8 }
 0x5fb   : > { %v2651_v48 = vpop.permute.xlu0 %2650 }
 0x5fc   : > { %v2669_v28 = vsel %vm734_vm2, %v7669_v25, %v2651_v48  ;;  %v2670_v12 = vsel %vm734_vm2, %v2651_v48, %v7678_v0 }
 0x5fd   : > { %3458 = vmatprep.subr.bf16.mxu1 %v2670_v12 }
 0x5fe   : > { %3459 = vmatpush1.bf16.msra.mxu1 %v2669_v28 }
 0x5ff   : > { %v2743_v54 = vpop.permute.xlu0 %2742 }
 0x600   : > { %v2763_v20 = vsel %vm2756_vm1, %v7567_v36, %v2743_v54  ;;  %v2764_v11 = vsel %vm2756_vm1, %v2743_v54, %v7687_v60 }
 0x601   : > { %3407 = vmatprep.subr.bf16.mxu0 %v2764_v11 }
 0x602   : > { %3408 = vmatpush1.bf16.msra.mxu0 %v2763_v20 }
 0x603   : > { %v2747_v43 = vpop.permute.xlu0 %2746 }
 0x604   : > { %v2765_v19 = vsel %vm2756_vm1, %v7687_v60, %v2747_v43  ;;  %v2766_v25 = vsel %vm2756_vm1, %v2747_v43, %v7696_v39 }
 0x605   : > { %3460 = vmatprep.subr.bf16.mxu1 %v2766_v25 }
 0x606   : > { %3461 = vmatpush1.bf16.msra.mxu1 %v2765_v19 }
 0x607   : > { %v2837_v0 = vpop.permute.xlu0 %2836 }
 0x608   : > { %v2855_v57 = vsel %vm2848_vm13, %v7578_v29, %v2837_v0  ;;  %v2856_v36 = vsel %vm2848_vm13, %v2837_v0, %v7704_v2 }
 0x609   : > { %3409 = vmatprep.subr.bf16.mxu0 %v2856_v36 }
 0x60a   : > { %3410 = vmatpush1.bf16.msra.mxu0 %v2855_v57 }
 0x60b   : > { %v2841_v50 = vpop.permute.xlu0 %2840 }
 0x60c   : > { %v2857_v30 = vsel %vm2848_vm13, %v7704_v2, %v2841_v50  ;;  %v2858_v60 = vsel %vm2848_vm13, %v2841_v50, %v7712_v63 }
 0x60d   : > { %3462 = vmatprep.subr.bf16.mxu1 %v2858_v60 }
 0x60e   : > { %3463 = vmatpush1.bf16.msra.mxu1 %v2857_v30 }
 0x60f   : > { %v2928_v62 = vpop.permute.xlu0 %2927 }
 0x610   : > { %v2946_v9 = vsel %vm2939_vm5, %v7588_v46, %v2928_v62  ;;  %v2947_v29 = vsel %vm2939_vm5, %v2928_v62, %v7720_v35 }
 0x611   : > { %3411 = vmatprep.subr.bf16.mxu0 %v2947_v29 }
 0x612   : > { %3412 = vmatpush1.bf16.msra.mxu0 %v2946_v9 }
 0x613   : > { %v2932_v59 = vpop.permute.xlu0 %2931 }
 0x614   : > { %v2948_v34 = vsel %vm2939_vm5, %v7720_v35, %v2932_v59  ;;  %v2949_v2 = vsel %vm2939_vm5, %v2932_v59, %v7729_v16 }
 0x615   : > { %3464 = vmatprep.subr.bf16.mxu1 %v2949_v2 }
 0x616   : > { %3465 = vmatpush1.bf16.msra.mxu1 %v2948_v34 }
 0x617   : > { %v3019_v63 = vpop.permute.xlu0 %3018 }
 0x618   : > { %v3037_v38 = vsel %vm3030_vm14, %v7596_v53, %v3019_v63  ;;  %v3038_v46 = vsel %vm3030_vm14, %v3019_v63, %v7739_v56 }
 0x619   : > { %3413 = vmatprep.subr.bf16.mxu0 %v3038_v46 }
 0x61a   : > { %3414 = vmatpush1.bf16.msra.mxu0 %v3037_v38 }
 0x61b   : > { %v3023_v47 = vpop.permute.xlu0 %3022  ;;  %3503 = vmatprep.subr.bf16.mxu0 %v7364_v55 }
 0x61c   : > { %v3039_v35 = vsel %vm3030_vm14, %v7739_v56, %v3023_v47  ;;  %v3040_v16 = vsel %vm3030_vm14, %v3023_v47, %v7745_v18  ;;  %v3085_v56 = vld [vmem:[#allocation6 + $0x60] sm:$0xff] }
 0x61d   : > { %3430 = vmatmul.mubr.bf16.vlgmr.msra.gmra.mrb[12].mxu0 %v7633_v23  ;;  %3466 = vmatprep.subr.bf16.mxu1 %v3040_v16 }
 0x61e   : > { %3467 = vmatpush1.bf16.msra.mxu1 %v3039_v35  ;;  %3504 = vmatpush1.bf16.msra.mxu0 %v7351_v17 }
 0x61f   : > { %v2755_v53 = vpop.permute.xlu0 %2754  ;;  %3556 = vmatprep.subr.bf16.mxu1 %v7894_v52  ;;  %5497 = vmatprep.mubr.msk.bf16.mxu0 %vm787_vm3, %v7639_v4 }
 0x620   : > { %v2769_v55 = vsel %vm2756_vm1, %v7804_v42, %v2755_v53 }
 0x621   : > { %2795 = vst.msk [vmem:[#allocation6 + $0x268] sm:$0xff] %vm1368_vm4, %v2769_v55  ;;  %3483 = vmatmul.mubr.bf16.vlgmr.msra.gmra.mrb[40].mxu1 %v7633_v23 }
 0x622   : > { %3557 = vmatpush1.bf16.msra.mxu1 %v3085_v56  ;;  %5499 = vmatprep.mubr.msk.bf16.mxu1 %vm787_vm3, %v7639_v4 }
 0x623   : > { %v2375_v17 = vpop.permute.xlu0 %2374  ;;  %3558 = vmatprep.subr.bf16.mxu1 %v7894_v52 }
 0x624   : > { %v2389_v18 = vsel %vm542_vm12, %v7612_v61, %v2375_v17  ;;  %v2390_v8 = vsel %vm542_vm12, %v2375_v17, %v7767_v22  ;;  %v3111_v22 = vld [vmem:[#allocation6 + $0x130] sm:$0xff] }
 0x625   : > { %3440 = vmatmul.mubr.bf16.gmra.mrb[16].mxu0 %v7665_v32  ;;  %3505 = vmatprep.subr.bf16.mxu0 %v2390_v8 }
 0x626   : > { %3506 = vmatpush1.bf16.msra.mxu0 %v2389_v18  ;;  %3559 = vmatpush1.bf16.msra.mxu1 %v3098_v41  ;;  %v8003_v41 = vpop.permute.xlu1 %3196 }
 0x627   : > { %v2466_v48 = vpop.permute.xlu0 %2465  ;;  %3560 = vmatprep.subr.bf16.mxu1 %v7894_v52  ;;  %5500 = vmatprep.mubr.msk.bf16.mxu0 %vm787_vm3, %v7431_v26 }
 0x628   : > { %v2480_v28 = vsel %vm2469_vm11, %v7626_v15, %v2466_v48  ;;  %v2481_v61 = vsel %vm2469_vm11, %v2466_v48, %v7775_v24  ;;  %v3124_v24 = vld [vmem:[#allocation6 + $0x198] sm:$0xff] }
 0x629   : > { %3493 = vmatmul.mubr.bf16.gmra.mrb[44].mxu1 %v7665_v32  ;;  %3507 = vmatprep.subr.bf16.mxu0 %v2481_v61 }
 0x62a   : > { %3508 = vmatpush1.bf16.msra.mxu0 %v2480_v28  ;;  %3561 = vmatpush1.bf16.msra.mxu1 %v3111_v22 }
 0x62b   : > { %v2559_v12 = vpop.permute.xlu0 %2558  ;;  %3562 = vmatprep.subr.bf16.mxu1 %v7894_v52  ;;  %5502 = vmatprep.mubr.msk.bf16.mxu1 %vm787_vm3, %v7431_v26 }
 0x62c   : > { %v2575_v54 = vsel %vm670_vm0, %v7658_v27, %v2559_v12  ;;  %v2576_v15 = vsel %vm670_vm0, %v2559_v12, %v7783_v51  ;;  %v3657_v12 = vld [vmem:[%s9671_s8] sm:$0xff] }
 0x62d   : > { %3509 = vmatprep.subr.bf16.mxu0 %v2576_v15 }
 0x62e   : > { %3510 = vmatpush1.bf16.msra.mxu0 %v2575_v54  ;;  %3563 = vmatpush1.bf16.msra.mxu1 %v3124_v24 }
 0x62f   : > { %v2657_v20 = vpop.permute.xlu0 %2656  ;;  %3564 = vmatprep.subr.bf16.mxu1 %v7894_v52 }
 0x630   : > { %v2672_v11 = vsel %vm734_vm2, %v7793_v5, %v2657_v20  ;;  %v2673_v43 = vsel %vm734_vm2, %v2657_v20, %v7758_v7 }
 0x631   : > { %2699 = vst.msk [vmem:[#allocation6 + $0x200] sm:$0xff] %vm1368_vm4, %v2673_v43  ;;  %3511 = vmatprep.subr.bf16.mxu0 %v2672_v11  ;;  %v8024_v43 = vrot.slane %v3657_v12, %v9745_v13 }
 0x632   : > { %3512 = vmatpush1.bf16.msra.mxu0 %v7798_v14 }
 0x633   : > { %v2751_v26 = vpop.permute.xlu0 %2750 }
 0x634   : > { %v2767_v27 = vsel %vm2756_vm1, %v7696_v39, %v2751_v26  ;;  %v2768_v51 = vsel %vm2756_vm1, %v2751_v26, %v7804_v42  ;;  %v3150_v42 = vld [vmem:[#allocation6 + $0x268] sm:$0xff] }
 0x635   : > { %3513 = vmatprep.subr.bf16.mxu0 %v2768_v51 }
 0x636   : > { %3514 = vmatpush1.bf16.msra.mxu0 %v2767_v27  ;;  %v8029_v27 = vrot.slane %v3657_v12, %v9744_v21 }
 0x637   : > { %v2847_v19 = vpop.permute.xlu0 %2846 }
 0x638   : > { %v2860_v5 = vsel %vm2848_vm13, %v7811_v31, %v2847_v19  ;;  %2886 = vst.msk [vmem:[#allocation6 + $0x2d0] sm:$0xff] %vm1368_vm4, %v2847_v19  ;;  %v3137_v7 = vld [vmem:[#allocation6 + $0x200] sm:$0xff] }
 0x639   : > { %3565 = vmatpush1.bf16.msra.mxu1 %v3137_v7  ;;  %3515 = vmatprep.subr.bf16.mxu0 %v2860_v5  ;;  %v8038_v7 = vrot.slane %v3657_v12, %v9747_v49 }
 0x63a   : > { %3566 = vmatprep.subr.bf16.mxu1 %v7894_v52  ;;  %3516 = vmatpush1.bf16.msra.mxu0 %v7816_v33 }
 0x63b   : > { %v2938_v14 = vpop.permute.xlu0 %2937 }
 0x63c   : > { %v2951_v39 = vsel %vm2939_vm5, %v7826_v6, %v2938_v14  ;;  %2977 = vst.msk [vmem:[#allocation6 + $0x338] sm:$0xff] %vm1368_vm4, %v2938_v14 }
 0x63d   : > { %3567 = vmatpush1.bf16.msra.mxu1 %v3150_v42  ;;  %3517 = vmatprep.subr.bf16.mxu0 %v2951_v39 }
 0x63e   : > { %3568 = vmatprep.subr.bf16.mxu1 %v7894_v52  ;;  %3518 = vmatpush1.bf16.msra.mxu0 %v7831_v10 }
 0x63f   : > { %v3029_v31 = vpop.permute.xlu0 %3028  ;;  %v3163_v25 = vld [vmem:[#allocation6 + $0x2d0] sm:$0xff] }
 0x640   : > { %v3042_v0 = vsel %vm3030_vm14, %v7837_v40, %v3029_v31  ;;  %3068 = vst.msk [vmem:[#allocation6 + $0x3a0] sm:$0xff] %vm1368_vm4, %v3029_v31 }
 0x641   : > { %3569 = vmatpush1.bf16.msra.mxu1 %v3163_v25  ;;  %3519 = vmatprep.subr.bf16.mxu0 %v3042_v0 }
 0x642   : > { %3570 = vmatprep.subr.bf16.mxu1 %v7894_v52  ;;  %3520 = vmatpush1.bf16.msra.mxu0 %v7842_v44 }
 0x643   : > { %v3176_v33 = vld [vmem:[#allocation6 + $0x338] sm:$0xff] }
 0x645   : > { %3571 = vmatpush1.bf16.msra.mxu1 %v3176_v33  ;;  %3536 = vmatmul.mubr.bf16.vlgmr.msra.gmra.mrb[20].mxu0 %v7633_v23 }
 0x646   : > { %3572 = vmatprep.subr.bf16.mxu1 %v7894_v52  ;;  %5501 = vmatprep.mubr.msk.bf16.mxu0 %vm787_vm3, %v7639_v4 }
 0x647   : > { %v3189_v6 = vld [vmem:[#allocation6 + $0x3a0] sm:$0xff] }
 0x649   : > { %3573 = vmatpush1.bf16.msra.mxu1 %v3189_v6 }
 0x64c   : > { %3589 = vmatmul.mubr.bf16.vlgmr.msra.gmra.mrb[48].mxu1 %v7633_v23 }
 0x64d   : > { %5503 = vmatprep.mubr.msk.bf16.mxu1 %vm787_vm3, %v7639_v4  ;;  %3546 = vmatmul.mubr.bf16.gmra.mrb[24].mxu0 %v7665_v32 }
 0x654   : > { %3597 = vmatmul.mubr.bf16.gmra.mrb[52].mxu1 %v7665_v32 }
 0x674   : > { %v3272_v10 = vpop.f32.mrb[16].mxu1 }
 0x675   : > { %v3274_v40 = vpop.f32.mrb[17].mxu1  ;;  %v3273_v28 = vadd.f32 %v3272_v10, %v8003_v41 }
 0x676   : > { %v7961_v44 = vpop.f32.mrb[18].mxu1  ;;  %v3275_v61 = vadd.f32 %v3274_v40, %v8003_v41  ;;  %v8057_v40 = vrot.slane %v3657_v12, %v9746_v37 }
 0x677   : > { %v7963_v57 = vpop.f32.mrb[19].mxu1  ;;  %v8021_v11 = vmax.f32 %v3273_v28, 0.0 }
 0x678   : > { %v8026_v26 = vmax.f32 %v3275_v61, 0.0 }
 0x679   : > { %9754 = vst [vmem:[#allocation8_spill] sm:$0xff] %v8021_v11  ;;  %v3726_v31 = vmul.f32 %v8024_v43, %v8021_v11 }
 0x67a   : > { %9755 = vst [vmem:[#allocation19_spill] sm:$0xff] %v8026_v26  ;;  %v3727_v25 = vmul.f32 %v8029_v27, %v8026_v26 }
 0x67c   : > { %v7965_v36 = vpop.f32.mrb[20].mxu1  ;;  %v3844_v28 = vmul.f32 %v3727_v25, %v8026_v26 }
 0x67d   : > { %v7967_v50 = vpop.f32.mrb[21].mxu1 }
 0x67e   : > { %v7969_v30 = vpop.f32.mrb[22].mxu1 }
 0x67f   : > { %v7971_v23 = vpop.f32.mrb[23].mxu1 }
 0x698   : > { %v3325_v60 = vpop.f32.mrb[24].mxu1 }
 0x699   : > { %v3327_v4 = vpop.f32.mrb[25].mxu1  ;;  %v3326_v15 = vadd.f32 %v3325_v60, %v8003_v41  ;;  %v8060_v60 = vrot.slane %v3657_v12, %v9748_v1 }
 0x69a   : > { %v7973_v62 = vpop.f32.mrb[26].mxu1  ;;  %v3328_v14 = vadd.f32 %v3327_v4, %v8003_v41  ;;  %v3843_v4 = vmul.f32 %v3726_v31, %v8021_v11 }
 0x69b   : > { %v7975_v9 = vpop.f32.mrb[27].mxu1  ;;  %v8035_v5 = vmax.f32 %v3326_v15, 0.0  ;;  %v3778_v15 = vadd.f32 %v3727_v25, %v3726_v31 }
 0x69c   : > { %v8054_v10 = vmax.f32 %v3328_v14, 0.0 }
 0x69d   : > { %9757 = vst [vmem:[#allocation11_spill] sm:$0xff] %v8035_v5  ;;  %v3728_v6 = vmul.f32 %v8038_v7, %v8035_v5 }
 0x69e   : > { %9760 = vst [vmem:[#allocation14_spill] sm:$0xff] %v8054_v10  ;;  %v3729_v14 = vmul.f32 %v8057_v40, %v8054_v10 }
 0x6a0   : > { %v7977_v32 = vpop.f32.mrb[28].mxu1  ;;  %v3846_v25 = vmul.f32 %v3729_v14, %v8054_v10 }
 0x6a1   : > { %v7979_v29 = vpop.f32.mrb[29].mxu1 }
 0x6a2   : > { %v7981_v59 = vpop.f32.mrb[30].mxu1 }
 0x6a3   : > { %v7983_v34 = vpop.f32.mrb[31].mxu1 }
 0x6bc   : > { %v3378_v2 = vpop.f32.mrb[32].mxu1 }
 0x6bd   : > { %v3380_v63 = vpop.f32.mrb[33].mxu1  ;;  %v3379_v0 = vadd.f32 %v3378_v2, %v8003_v41 }
 0x6be   : > { %v7985_v38 = vpop.f32.mrb[34].mxu1  ;;  %v3381_v2 = vadd.f32 %v3380_v63, %v8003_v41  ;;  %v8079_v63 = vrot.slane %v3657_v12, %v9750_v45 }
 0x6bf   : > { %v7987_v46 = vpop.f32.mrb[35].mxu1  ;;  %v8064_v61 = vmax.f32 %v3379_v0, 0.0  ;;  %v8076_v0 = vrot.slane %v3657_v12, %v9749_v3  ;;  %v8089_v3 = vrot.slane %v3657_v12, %v9751_v58 }
 0x6c0   : > { %v8073_v11 = vmax.f32 %v3381_v2, 0.0 }
 0x6c1   : > { %9761 = vst [vmem:[#allocation15_spill] sm:$0xff] %v8064_v61 }
 0x6c2   : > { %9762 = vst [vmem:[#allocation16_spill] sm:$0xff] %v8073_v11 }
 0x6c4   : > { %v7989_v47 = vpop.f32.mrb[36].mxu1 }
 0x6c5   : > { %v7991_v35 = vpop.f32.mrb[37].mxu1 }
 0x6c6   : > { %v7993_v16 = vpop.f32.mrb[38].mxu1 }
 0x6c7   : > { %v7995_v53 = vpop.f32.mrb[39].mxu1 }
 0x6c8   : > { %9752 = vst [vmem:[#allocation18_spill] sm:$0xff] %v7995_v53  ;;  %v3730_v53 = vmul.f32 %v8060_v60, %v8064_v61 }
 0x6f0   : > { %v3431_v52 = vpop.f32.mrb[12].mxu0 }
 0x6f1   : > { %v3433_v55 = vpop.f32.mrb[13].mxu0 }
 0x6f2   : > { %v7997_v56 = vpop.f32.mrb[14].mxu0 }
 0x6f3   : > { %v7999_v17 = vpop.f32.mrb[15].mxu0 }
 0x6f4   : > { %v3484_v18 = vpop.f32.mrb[40].mxu1 }
 0x6f5   : > { %v8001_v8 = vpop.f32.mrb[41].mxu1 }
 0x6f6   : > { %v8005_v48 = vpop.f32.mrb[42].mxu1 }
 0x6f7   : > { %v8009_v22 = vpop.f32.mrb[43].mxu1 }
 0x6f8   : > { %v8014_v54 = vpop.f32.mrb[16].mxu0 }
 0x6f9   : > { %v8017_v24 = vpop.f32.mrb[17].mxu0 }
 0x6fa   : > { %v8019_v20 = vpop.f32.mrb[18].mxu0 }
 0x6fb   : > { %9753 = vst [vmem:[#allocation9_spill] sm:$0xff] %v8019_v20  ;;  %v8031_v51 = vpop.f32.mrb[19].mxu0  ;;  %v3895_v20 = vadd.f32 %v3844_v28, %v3843_v4  ;;  %v3847_v4 = vmul.f32 %v3730_v53, %v8064_v61  ;;  %v3731_v28 = vmul.f32 %v8076_v0, %v8073_v11 }
 0x6fc   : > { %9756 = vst [vmem:[#allocation10_spill] sm:$0xff] %v8031_v51  ;;  %v8033_v19 = vpop.f32.mrb[44].mxu1  ;;  %v3779_v51 = vadd.f32 %v3778_v15, %v3728_v6 }
 0x6fd   : > { %v8041_v39 = vpop.f32.mrb[45].mxu1 }
 0x6fe   : > { %v8043_v42 = vpop.f32.mrb[46].mxu1 }
 0x6ff   : > { %9758 = vst [vmem:[#allocation13_spill] sm:$0xff] %v8043_v42  ;;  %v8050_v33 = vpop.f32.mrb[47].mxu1  ;;  %v3432_v42 = vadd.f32 %v3431_v52, %v8003_v41  ;;  %v3434_v52 = vadd.f32 %v3433_v55, %v8003_v41  ;;  %v3658_v55 = vld [vmem:[%s9671_s8 + $0x8] sm:$0x1f] }
 0x700   : > { %9759 = vst [vmem:[#allocation12_spill] sm:$0xff] %v8050_v33  ;;  %v3845_v33 = vmul.f32 %v3728_v6, %v8035_v5  ;;  %v3780_v6 = vadd.f32 %v3779_v51, %v3729_v14 }
 0x701   : > { %v8082_v5 = vmax.f32 %v3432_v42, 0.0  ;;  %v3485_v42 = vadd.f32 %v3484_v18, %v8003_v41  ;;  %v3487_v18 = vadd.f32 %v8001_v8, %v8003_v41 }
 0x702   : > { %v3896_v31 = vadd.f32 %v3895_v20, %v3845_v33  ;;  %v3781_v2 = vadd.f32 %v3780_v6, %v3730_v53  ;;  %v8093_v20 = vmax.f32 %v3434_v52, 0.0  ;;  %v3848_v33 = vmul.f32 %v3731_v28, %v8073_v11 }
 0x703   : > { %9763 = vst [vmem:[#allocation17_spill] sm:$0xff] %v8082_v5  ;;  %v3732_v45 = vmul.f32 %v8079_v63, %v8082_v5  ;;  %v8101_v53 = vrot.slane %v3658_v55, %v9745_v13  ;;  %v8111_v6 = vrot.slane %v3658_v55, %v9744_v21 }
 0x704   : > { %v3897_v15 = vadd.f32 %v3896_v31, %v3846_v25  ;;  %9764 = vst [vmem:[#allocation20_spill] sm:$0xff] %v8093_v20  ;;  %v3782_v14 = vadd.f32 %v3781_v2, %v3731_v28  ;;  %v3733_v12 = vmul.f32 %v8089_v3, %v8093_v20  ;;  %v8106_v31 = vmax.f32 %v3485_v42, 0.0 }
 0x705   : > { %v3849_v58 = vmul.f32 %v3732_v45, %v8082_v5  ;;  %v8116_v2 = vmax.f32 %v3487_v18, 0.0  ;;  %v8119_v42 = vrot.slane %v3658_v55, %v9747_v49 }
 0x706   : > { %v3898_v51 = vadd.f32 %v3897_v15, %v3847_v4  ;;  %9765 = vst [vmem:[#allocation21_spill] sm:$0xff] %v8106_v31  ;;  %v3783_v52 = vadd.f32 %v3782_v14, %v3732_v45  ;;  %v3850_v28 = vmul.f32 %v3733_v12, %v8093_v20  ;;  %v3734_v13 = vmul.f32 %v8101_v53, %v8106_v31 }
 0x707   : > { %9766 = vst [vmem:[#allocation22_spill] sm:$0xff] %v8116_v2  ;;  %v3735_v21 = vmul.f32 %v8111_v6, %v8116_v2 }
 0x708   : > { %v3899_v25 = vadd.f32 %v3898_v51, %v3848_v33  ;;  %v3784_v15 = vadd.f32 %v3783_v52, %v3733_v12  ;;  %v3851_v8 = vmul.f32 %v3734_v13, %v8106_v31  ;;  %v8131_v12 = vrot.slane %v3658_v55, %v9746_v37 }
 0x70a   : > { %v3900_v4 = vadd.f32 %v3899_v25, %v3849_v58  ;;  %v3785_v58 = vadd.f32 %v3784_v15, %v3734_v13  ;;  %v8135_v25 = vpop.permute.xlu0 %3201 }
 0x70b   : > { %v3279_v15 = vadd.f32 %v7963_v57, %v8135_v25  ;;  %v3330_v57 = vadd.f32 %v7973_v62, %v8135_v25  ;;  %v3383_v62 = vadd.f32 %v7985_v38, %v8135_v25 }
 0x70c   : > { %v3901_v11 = vadd.f32 %v3900_v4, %v3850_v28  ;;  %v3852_v28 = vmul.f32 %v3735_v21, %v8116_v2  ;;  %v3786_v37 = vadd.f32 %v3785_v58, %v3735_v21 }
 0x70e   : > { %v3902_v4 = vadd.f32 %v3901_v11, %v3851_v8 }
 0x710   : > { %v3903_v21 = vadd.f32 %v3902_v4, %v3852_v28 }
 0x718   : > { %v3537_v5 = vpop.f32.mrb[20].mxu0 }
 0x719   : > { %v3538_v45 = vadd.f32 %v3537_v5, %v8003_v41  ;;  %v3539_v51 = vpop.f32.mrb[21].mxu0  ;;  %v3277_v5 = vadd.f32 %v7961_v44, %v8135_v25  ;;  %v8151_v44 = vrot.slane %v3658_v55, %v9748_v1  ;;  %v3332_v1 = vadd.f32 %v7975_v9, %v8135_v25 }
 0x71a   : > { %v3540_v33 = vadd.f32 %v3539_v51, %v8003_v41  ;;  %v8126_v14 = vpop.f32.mrb[22].mxu0 }
 0x71b   : > { %v8128_v18 = vmax.f32 %v3538_v45, 0.0  ;;  %v8133_v49 = vpop.f32.mrb[23].mxu0  ;;  %v8155_v2 = vmax.f32 %v3277_v5, 0.0 }
 0x71c   : > { %v8137_v52 = vmax.f32 %v3540_v33, 0.0 }
 0x71d   : > { %9767 = vst [vmem:[#allocation23_spill] sm:$0xff] %v8128_v18  ;;  %v3736_v13 = vmul.f32 %v8119_v42, %v8128_v18 }
 0x71e   : > { %9768 = vst [vmem:[#allocation24_spill] sm:$0xff] %v8137_v52  ;;  %v3737_v33 = vmul.f32 %v8131_v12, %v8137_v52 }
 0x71f   : > { %v3853_v45 = vmul.f32 %v3736_v13, %v8128_v18  ;;  %v3590_v51 = vpop.f32.mrb[48].mxu1  ;;  %v3787_v58 = vadd.f32 %v3786_v37, %v3736_v13  ;;  %v3385_v13 = vadd.f32 %v7987_v46, %v8135_v25 }
 0x720   : > { %v3591_v31 = vadd.f32 %v3590_v51, %v8003_v41  ;;  %v3592_v11 = vpop.f32.mrb[49].mxu1  ;;  %v8153_v8 = vpop.f32.mrb[24].mxu0  ;;  %v8163_v41 = vmax.f32 %v3279_v15, 0.0  ;;  %v3854_v5 = vmul.f32 %v3737_v33, %v8137_v52  ;;  %v8186_v52 = vmax.f32 %v3383_v62, 0.0 }
 0x721   : > { %v3593_v18 = vpop.f32.mrb[50].mxu1  ;;  %v8159_v20 = vpop.f32.mrb[25].mxu0  ;;  %v3904_v55 = vadd.f32 %v3903_v21, %v3853_v45  ;;  %v3788_v28 = vadd.f32 %v3787_v58, %v3737_v33  ;;  %v8182_v45 = vmax.f32 %v3332_v1, 0.0  ;;  %v3436_v33 = vadd.f32 %v7997_v56, %v8135_v25 }
 0x722   : > { %v3617_v61 = vmax.f32 %v3591_v31, 0.0  ;;  %v3595_v10 = vpop.f32.mrb[51].mxu1  ;;  %v8161_v26 = vpop.f32.mrb[26].mxu0  ;;  %v8175_v31 = vmax.f32 %v3330_v57, 0.0  ;;  %v3740_v37 = vmul.f32 %v8029_v27, %v8163_v41 }
 0x723   : > { %v8168_v51 = vpop.f32.mrb[27].mxu0  ;;  %v3739_v10 = vmul.f32 %v8024_v43, %v8155_v2  ;;  %v3905_v11 = vadd.f32 %v3904_v55, %v3854_v5  ;;  %v8196_v55 = vmax.f32 %v3385_v13, 0.0  ;;  %v3438_v5 = vadd.f32 %v7999_v17, %v8135_v25 }
 0x724   : > { %9769 = vst [vmem:[#allocation25_spill] sm:$0xff] %v8168_v51  ;;  %v3738_v4 = vmul.f32 %v8151_v44, %v3617_v61  ;;  %9770 = vst [vmem:[#allocation26_spill] sm:$0xff] %v8175_v31  ;;  %v3857_v56 = vmul.f32 %v3740_v37, %v8163_v41  ;;  %v3489_v13 = vadd.f32 %v8005_v48, %v8135_v25 }
 0x725   : > { %v3856_v58 = vmul.f32 %v3739_v10, %v8155_v2 }
 0x726   : > { %v3789_v9 = vsel %vm1368_vm4, %v3738_v4, 0.0  ;;  %v3855_v15 = vmul.f32 %v3738_v4, %v3617_v61  ;;  %v3741_v61 = vmul.f32 %v8038_v7, %v8175_v31  ;;  %v8220_v48 = vmax.f32 %v3489_v13, 0.0 }
 0x727   : > { %v3790_v38 = vadd.f32 %v3789_v9, %v3788_v28  ;;  %v8184_v21 = vpop.f32.mrb[52].mxu1  ;;  %v3742_v28 = vmul.f32 %v8057_v40, %v8182_v45  ;;  %v3544_v13 = vadd.f32 %v8133_v49, %v8135_v25 }
 0x728   : > { %v3906_v57 = vsel %vm1368_vm4, %v3855_v15, 0.0  ;;  %v3600_v46 = vpop.f32.mrb[53].mxu1 }
 0x729   : > { %v3791_v4 = vadd.f32 %v3790_v38, %v3739_v10  ;;  %v3907_v1 = vadd.f32 %v3906_v57, %v3905_v11  ;;  %v8194_v51 = vpop.f32.mrb[54].mxu1  ;;  %v3743_v46 = vmul.f32 %v8060_v60, %v8186_v52  ;;  %v8205_v10 = vmax.f32 %v3436_v33, 0.0 }
 0x72a   : > { %v3603_v62 = vpop.f32.mrb[55].mxu1  ;;  %v3858_v38 = vmul.f32 %v3741_v61, %v8175_v31  ;;  %v3744_v57 = vmul.f32 %v8076_v0, %v8196_v55 }
 0x72b   : > { %v3792_v9 = vadd.f32 %v3791_v4, %v3740_v37  ;;  %v3908_v15 = vadd.f32 %v3907_v1, %v3856_v58  ;;  %v8212_v62 = vmax.f32 %v3438_v5, 0.0  ;;  %v3859_v37 = vmul.f32 %v3742_v28, %v8182_v45 }
 0x72c   : > { %v3491_v58 = vadd.f32 %v8009_v22, %v8135_v25  ;;  %v3860_v1 = vmul.f32 %v3743_v46, %v8186_v52  ;;  %v3745_v31 = vmul.f32 %v8079_v63, %v8205_v10  ;;  %v3594_v22 = vadd.f32 %v3593_v18, %v8135_v25 }
 0x72d   : > { %v3793_v11 = vadd.f32 %v3792_v9, %v3741_v61  ;;  %v3909_v17 = vadd.f32 %v3908_v15, %v3857_v56  ;;  %v3542_v56 = vadd.f32 %v8126_v14, %v8135_v25  ;;  %v3861_v9 = vmul.f32 %v3744_v57, %v8196_v55 }
 0x72e   : > { %v3746_v15 = vmul.f32 %v8089_v3, %v8212_v62  ;;  %v3747_v14 = vmul.f32 %v8101_v53, %v8220_v48 }
 0x72f   : > { %v3794_v4 = vadd.f32 %v3793_v11, %v3742_v28  ;;  %v3910_v33 = vadd.f32 %v3909_v17, %v3858_v38  ;;  %v8228_v28 = vmax.f32 %v3491_v58, 0.0  ;;  %v3862_v17 = vmul.f32 %v3745_v31, %v8205_v10 }
 0x730   : > { %v3630_v58 = vmax.f32 %v3594_v22, 0.0 }
 0x731   : > { %v3911_v61 = vadd.f32 %v3910_v33, %v3859_v37  ;;  %v3795_v5 = vadd.f32 %v3794_v4, %v3743_v46  ;;  %v8233_v37 = vpop.permute.xlu1 %3206  ;;  %v8237_v46 = vmax.f32 %v3542_v56, 0.0  ;;  %v3748_v49 = vmul.f32 %v8111_v6, %v8228_v28 }
 0x732   : > { %v3283_v18 = vadd.f32 %v7965_v36, %v8233_v37  ;;  %v3864_v56 = vmul.f32 %v3747_v14, %v8220_v48  ;;  %v3336_v22 = vadd.f32 %v7977_v32, %v8233_v37 }
 0x733   : > { %v3796_v38 = vadd.f32 %v3795_v5, %v3744_v57  ;;  %v3912_v11 = vadd.f32 %v3911_v61, %v3860_v1  ;;  %v3863_v57 = vmul.f32 %v3746_v15, %v8212_v62  ;;  %v8244_v61 = vmax.f32 %v3544_v13, 0.0 }
 0x734   : > { %v3285_v5 = vadd.f32 %v7967_v50, %v8233_v37 }
 0x735   : > { %v3797_v4 = vadd.f32 %v3796_v38, %v3745_v31  ;;  %v3913_v33 = vadd.f32 %v3912_v11, %v3861_v9  ;;  %v3749_v31 = vmul.f32 %v8119_v42, %v8237_v46  ;;  %v8251_v38 = vmax.f32 %v3283_v18, 0.0 }
 0x736   : > { %v3865_v11 = vmul.f32 %v3748_v49, %v8228_v28  ;;  %v3750_v50 = vmul.f32 %v8131_v12, %v8244_v61 }
 0x737   : > { %v3798_v25 = vadd.f32 %v3797_v4, %v3746_v15  ;;  %v3914_v1 = vadd.f32 %v3913_v33, %v3862_v17  ;;  %v3751_v15 = vmul.f32 %v8151_v44, %v3630_v58  ;;  %v8259_v4 = vmax.f32 %v3285_v5, 0.0 }
 0x738   : > { %v3866_v18 = vmul.f32 %v3749_v31, %v8237_v46  ;;  %v3752_v32 = vmul.f32 %v8024_v43, %v8251_v38  ;;  %v3867_v5 = vmul.f32 %v3750_v50, %v8244_v61 }
 0x739   : > { %v3799_v9 = vadd.f32 %v3798_v25, %v3747_v14  ;;  %v3915_v36 = vadd.f32 %v3914_v1, %v3863_v57  ;;  %v3338_v14 = vadd.f32 %v7979_v29, %v8233_v37  ;;  %v3389_v25 = vadd.f32 %v7989_v47, %v8233_v37 }
 0x73a   : > { %v8268_v1 = vmax.f32 %v3336_v22, 0.0  ;;  %v3391_v29 = vadd.f32 %v7991_v35, %v8233_v37 }
 0x73b   : > { %v3800_v13 = vadd.f32 %v3799_v9, %v3748_v49  ;;  %v3916_v17 = vadd.f32 %v3915_v36, %v3864_v56  ;;  %v3868_v49 = vmul.f32 %v3751_v15, %v3630_v58  ;;  %v3803_v36 = vsel %vm1368_vm4, %v3751_v15, 0.0 }
 0x73c   : > { %v8278_v47 = vmax.f32 %v3389_v25, 0.0  ;;  %v3442_v58 = vadd.f32 %v8014_v54, %v8233_v37  ;;  %v3754_v35 = vmul.f32 %v8038_v7, %v8268_v1 }
 0x73d   : > { %v3801_v33 = vadd.f32 %v3800_v13, %v3749_v31  ;;  %v3917_v57 = vadd.f32 %v3916_v17, %v3865_v11  ;;  %v3753_v31 = vmul.f32 %v8029_v27, %v8259_v4  ;;  %v8276_v11 = vmax.f32 %v3338_v14, 0.0 }
 0x73e   : > { %v3920_v22 = vsel %vm1368_vm4, %v3868_v49, 0.0  ;;  %v3444_v14 = vadd.f32 %v8017_v24, %v8233_v37  ;;  %v3756_v49 = vmul.f32 %v8060_v60, %v8278_v47 }
 0x73f   : > { %v3918_v56 = vadd.f32 %v3917_v57, %v3866_v18  ;;  %v3802_v9 = vadd.f32 %v3801_v33, %v3750_v50  ;;  %v3869_v50 = vmul.f32 %v3752_v32, %v8251_v38  ;;  %v8286_v18 = vmax.f32 %v3391_v29, 0.0 }
 0x740   : > { %v3870_v57 = vmul.f32 %v3753_v31, %v8259_v4  ;;  %v3755_v25 = vmul.f32 %v8057_v40, %v8276_v11 }
 0x741   : > { %v3804_v13 = vadd.f32 %v3803_v36, %v3802_v9  ;;  %v3919_v17 = vadd.f32 %v3918_v56, %v3867_v5  ;;  %v8295_v9 = vmax.f32 %v3442_v58, 0.0  ;;  %v3495_v5 = vadd.f32 %v8033_v19, %v8233_v37 }
 0x742   : > { %v3757_v24 = vmul.f32 %v8076_v0, %v8286_v18 }
 0x743   : > { %v3805_v15 = vadd.f32 %v3804_v13, %v3752_v32  ;;  %v3921_v33 = vadd.f32 %v3920_v22, %v3919_v17  ;;  %v3871_v32 = vmul.f32 %v3754_v35, %v8268_v1  ;;  %v8302_v13 = vmax.f32 %v3444_v14, 0.0 }
 0x744   : > { %v3497_v17 = vadd.f32 %v8041_v39, %v8233_v37  ;;  %v8310_v19 = vmax.f32 %v3495_v5, 0.0  ;;  %v3599_v39 = vadd.f32 %v8184_v21, %v8233_v37  ;;  %v3550_v5 = vadd.f32 %v8159_v20, %v8233_v37 }
 0x745   : > { %v3806_v54 = vadd.f32 %v3805_v15, %v3753_v31  ;;  %v3922_v56 = vadd.f32 %v3921_v33, %v3869_v50  ;;  %v3872_v31 = vmul.f32 %v3755_v25, %v8276_v11  ;;  %v3873_v50 = vmul.f32 %v3756_v49, %v8278_v47 }
 0x746   : > { %v3758_v15 = vmul.f32 %v8079_v63, %v8295_v9  ;;  %v3548_v33 = vadd.f32 %v8153_v8, %v8233_v37  ;;  %v3760_v8 = vmul.f32 %v8101_v53, %v8310_v19 }
 0x747   : > { %v3807_v29 = vadd.f32 %v3806_v54, %v3754_v35  ;;  %v3923_v36 = vadd.f32 %v3922_v56, %v3870_v57  ;;  %v3874_v57 = vmul.f32 %v3757_v24, %v8286_v18  ;;  %v3759_v54 = vmul.f32 %v8089_v3, %v8302_v13 }
 0x749   : > { %v3808_v22 = vadd.f32 %v3807_v29, %v3755_v25  ;;  %v3924_v58 = vadd.f32 %v3923_v36, %v3871_v32  ;;  %v8319_v25 = vmax.f32 %v3497_v17, 0.0  ;;  %v3875_v29 = vmul.f32 %v3758_v15, %v8295_v9  ;;  %v8324_v36 = vpop.permute.xlu0 %3211 }
 0x74a   : > { %v3287_v21 = vadd.f32 %v7969_v30, %v8324_v36  ;;  %v3643_v17 = vmax.f32 %v3599_v39, 0.0  ;;  %v3340_v39 = vadd.f32 %v7981_v59, %v8324_v36 }
 0x74b   : > { %v3925_v35 = vadd.f32 %v3924_v58, %v3872_v31  ;;  %v3809_v14 = vadd.f32 %v3808_v22, %v3756_v49  ;;  %v8328_v49 = vmax.f32 %v3548_v33, 0.0  ;;  %v3761_v20 = vmul.f32 %v8111_v6, %v8319_v25 }
 0x74c   : > { %v3877_v33 = vmul.f32 %v3760_v8, %v8310_v19 }
 0x74d   : > { %v3810_v56 = vadd.f32 %v3809_v14, %v3757_v24  ;;  %v3926_v32 = vadd.f32 %v3925_v35, %v3873_v50  ;;  %v3876_v24 = vmul.f32 %v3759_v54, %v8302_v13  ;;  %v8335_v50 = vmax.f32 %v3550_v5, 0.0 }
 0x74e   : > { %v3289_v35 = vadd.f32 %v7971_v23, %v8324_v36 }
 0x74f   : > { %v3811_v31 = vadd.f32 %v3810_v56, %v3758_v15  ;;  %v3927_v22 = vadd.f32 %v3926_v32, %v3874_v57  ;;  %v3762_v15 = vmul.f32 %v8119_v42, %v8328_v49  ;;  %v8342_v57 = vmax.f32 %v3287_v21, 0.0 }
 0x750   : > { %v3878_v56 = vmul.f32 %v3761_v20, %v8319_v25  ;;  %v3763_v23 = vmul.f32 %v8131_v12, %v8335_v50 }
 0x751   : > { %v3812_v37 = vadd.f32 %v3811_v31, %v3759_v54  ;;  %v3928_v58 = vadd.f32 %v3927_v22, %v3875_v29  ;;  %v3764_v54 = vmul.f32 %v8151_v44, %v3643_v17  ;;  %v8350_v29 = vmax.f32 %v3289_v35, 0.0 }
 0x752   : > { %v3879_v22 = vmul.f32 %v3762_v15, %v8328_v49  ;;  %v3765_v59 = vmul.f32 %v8024_v43, %v8342_v57  ;;  %v3880_v35 = vmul.f32 %v3763_v23, %v8335_v50 }
 0x753   : > { %v3813_v14 = vadd.f32 %v3812_v37, %v3760_v8  ;;  %v3929_v30 = vadd.f32 %v3928_v58, %v3876_v24  ;;  %v3342_v8 = vadd.f32 %v7983_v34, %v8324_v36  ;;  %v3393_v24 = vadd.f32 %v7993_v16, %v8324_v36 }
 0x754   : > { %v8359_v37 = vmax.f32 %v3340_v39, 0.0 }
 0x755   : > { %v3814_v32 = vadd.f32 %v3813_v14, %v3761_v20  ;;  %v3930_v5 = vadd.f32 %v3929_v30, %v3877_v33  ;;  %v3881_v20 = vmul.f32 %v3764_v54, %v3643_v17  ;;  %v9771_v14 = vld [vmem:[#allocation18_spill] sm:$0xff]  ;;  %v3817_v30 = vsel %vm1368_vm4, %v3764_v54, 0.0  ;;  %v9772_v17 = vld [vmem:[#allocation9_spill] sm:$0xff] }
 0x756   : > { %v3395_v34 = vadd.f32 %v9771_v14, %v8324_v36  ;;  %v8369_v16 = vmax.f32 %v3393_v24, 0.0  ;;  %v3446_v39 = vadd.f32 %v9772_v17, %v8324_v36 }
 0x757   : > { %v3815_v31 = vadd.f32 %v3814_v32, %v3762_v15  ;;  %v3931_v21 = vadd.f32 %v3930_v5, %v3878_v56  ;;  %v3766_v15 = vmul.f32 %v8029_v27, %v8350_v29  ;;  %v8367_v56 = vmax.f32 %v3342_v8, 0.0  ;;  %v9773_v27 = vld [vmem:[#allocation10_spill] sm:$0xff] }
 0x758   : > { %v3934_v5 = vsel %vm1368_vm4, %v3881_v20, 0.0  ;;  %v3448_v8 = vadd.f32 %v9773_v27, %v8324_v36  ;;  %v3769_v20 = vmul.f32 %v8060_v60, %v8369_v16  ;;  %v8386_v14 = vmax.f32 %v3446_v39, 0.0 }
 0x759   : > { %v3932_v58 = vadd.f32 %v3931_v21, %v3879_v22  ;;  %v3816_v33 = vadd.f32 %v3815_v31, %v3763_v23  ;;  %v3882_v23 = vmul.f32 %v3765_v59, %v8342_v57  ;;  %v3767_v31 = vmul.f32 %v8038_v7, %v8359_v37 }
 0x75a   : > { %v8377_v21 = vmax.f32 %v3395_v34, 0.0  ;;  %v3883_v24 = vmul.f32 %v3766_v15, %v8350_v29  ;;  %v8393_v17 = vmax.f32 %v3448_v8, 0.0 }
 0x75b   : > { %v3818_v43 = vadd.f32 %v3817_v30, %v3816_v33  ;;  %v3933_v32 = vadd.f32 %v3932_v58, %v3880_v35  ;;  %v3768_v58 = vmul.f32 %v8057_v40, %v8367_v56  ;;  %v3884_v7 = vmul.f32 %v3767_v31, %v8359_v37 }
 0x75d   : > { %v3819_v54 = vadd.f32 %v3818_v43, %v3765_v59  ;;  %v3935_v22 = vadd.f32 %v3934_v5, %v3933_v32  ;;  %v9774_v59 = vld [vmem:[#allocation13_spill] sm:$0xff]  ;;  %v3770_v32 = vmul.f32 %v8076_v0, %v8377_v21  ;;  %v3885_v40 = vmul.f32 %v3768_v58, %v8367_v56 }
 0x75e   : > { %v3499_v34 = vadd.f32 %v9774_v59, %v8324_v36  ;;  %v3552_v0 = vadd.f32 %v8161_v26, %v8324_v36 }
 0x75f   : > { %v3820_v33 = vadd.f32 %v3819_v54, %v3766_v15  ;;  %v3936_v35 = vadd.f32 %v3935_v22, %v3882_v23  ;;  %v9775_v15 = vld [vmem:[#allocation12_spill] sm:$0xff]  ;;  %v3886_v23 = vmul.f32 %v3769_v20, %v8369_v16  ;;  %v3771_v54 = vmul.f32 %v8079_v63, %v8386_v14  ;;  %v9776_v63 = vld [vmem:[#allocation25_spill] sm:$0xff] }
 0x760   : > { %v3501_v5 = vadd.f32 %v9775_v15, %v8324_v36  ;;  %v8401_v22 = vmax.f32 %v3499_v34, 0.0  ;;  %v3887_v8 = vmul.f32 %v3770_v32, %v8377_v21  ;;  %v3554_v59 = vadd.f32 %v9776_v63, %v8324_v36 }
 0x761   : > { %v3821_v30 = vadd.f32 %v3820_v33, %v3767_v31  ;;  %v3937_v43 = vadd.f32 %v3936_v35, %v3883_v24  ;;  %v3772_v24 = vmul.f32 %v8089_v3, %v8393_v17  ;;  %v3888_v34 = vmul.f32 %v3771_v54, %v8386_v14 }
 0x762   : > { %v8410_v33 = vmax.f32 %v3501_v5, 0.0  ;;  %v3773_v26 = vmul.f32 %v8101_v53, %v8401_v22  ;;  %v8422_v5 = vmax.f32 %v3554_v59, 0.0 }
 0x763   : > { %v3822_v60 = vadd.f32 %v3821_v30, %v3768_v58  ;;  %v3938_v39 = vadd.f32 %v3937_v43, %v3884_v7  ;;  %v3602_v58 = vadd.f32 %v8194_v51, %v8324_v36  ;;  %v3889_v3 = vmul.f32 %v3772_v24, %v8393_v17 }
 0x764   : > { %v3774_v51 = vmul.f32 %v8111_v6, %v8410_v33  ;;  %v3890_v36 = vmul.f32 %v3773_v26, %v8401_v22  ;;  %v3776_v6 = vmul.f32 %v8131_v12, %v8422_v5 }
 0x765   : > { %v3939_v31 = vadd.f32 %v3938_v39, %v3885_v40  ;;  %v3823_v27 = vadd.f32 %v3822_v60, %v3769_v20  ;;  %v8417_v20 = vmax.f32 %v3552_v0, 0.0  ;;  %v3656_v40 = vmax.f32 %v3602_v58, 0.0 }
 0x767   : > { %v3824_v35 = vadd.f32 %v3823_v27, %v3770_v32  ;;  %v3940_v7 = vadd.f32 %v3939_v31, %v3886_v23  ;;  %v3775_v60 = vmul.f32 %v8119_v42, %v8417_v20  ;;  %v3777_v23 = vmul.f32 %v8151_v44, %v3656_v40 }
 0x769   : > { %v3825_v30 = vadd.f32 %v3824_v35, %v3771_v54  ;;  %v3941_v43 = vadd.f32 %v3940_v7, %v3887_v8  ;;  %v3891_v54 = vmul.f32 %v3774_v51, %v8410_v33  ;;  %v3892_v8 = vmul.f32 %v3775_v60, %v8417_v20 }
 0x76a   : > { %v3894_v58 = vmul.f32 %v3777_v23, %v3656_v40  ;;  %v3893_v7 = vmul.f32 %v3776_v6, %v8422_v5  ;;  %v3831_v63 = vsel %vm1368_vm4, %v3777_v23, 0.0 }
 0x76b   : > { %v3826_v32 = vadd.f32 %v3825_v30, %v3772_v24  ;;  %v3942_v15 = vadd.f32 %v3941_v43, %v3888_v34 }
 0x76c   : > { %v3948_v34 = vsel %vm1368_vm4, %v3894_v58, 0.0 }
 0x76d   : > { %v3827_v53 = vadd.f32 %v3826_v32, %v3773_v26  ;;  %v3943_v39 = vadd.f32 %v3942_v15, %v3889_v3 }
 0x76f   : > { %v3828_v31 = vadd.f32 %v3827_v53, %v3774_v51  ;;  %v3944_v0 = vadd.f32 %v3943_v39, %v3890_v36 }
 0x771   : > { %v3829_v27 = vadd.f32 %v3828_v31, %v3775_v60  ;;  %v3945_v24 = vadd.f32 %v3944_v0, %v3891_v54 }
 0x773   : > { %v3946_v35 = vadd.f32 %v3945_v24, %v3892_v8  ;;  %v3830_v42 = vadd.f32 %v3829_v27, %v3776_v6  ;;  %v9777_v27 = vld [vmem:[#allocation8_spill] sm:$0xff]  ;;  %v9778_v24 = vld [vmem:[#allocation19_spill] sm:$0xff] }
 0x775   : > { %v3832_v59 = vadd.f32 %v3831_v63, %v3830_v42  ;;  %v3947_v44 = vadd.f32 %v3946_v35, %v3893_v7  ;;  %v9779_v35 = vld [vmem:[#allocation11_spill] sm:$0xff]  ;;  %v9780_v42 = vld [vmem:[#allocation14_spill] sm:$0xff] }
 0x777   : > { %3833 = vadd.xlane.f32.xlu1 %v3832_v59  ;;  %v3949_v26 = vadd.f32 %v3948_v34, %v3947_v44  ;;  %v9781_v59 = vld [vmem:[#allocation15_spill] sm:$0xff]  ;;  %v9782_v34 = vld [vmem:[#allocation16_spill] sm:$0xff] }
 0x779   : > { %3950 = vadd.xlane.f32.xlu0 %v3949_v26 }
 0x804   : > { %v3834_v30 = vpop.xlane.xlu1 %3833 }
 0x805   : > { %v3835_v12 = vrot.slane %v3834_v30, 4 }
 0x806   : > { %v3951_v43 = vpop.xlane.xlu0 %3950 }
 0x807   : > { %v3836_v3 = vadd.f32 %v3835_v12, %v3834_v30  ;;  %v3952_v51 = vrot.slane %v3951_v43, 4  ;;  %v9783_v30 = vld [vmem:[#allocation17_spill] sm:$0xff] }
 0x809   : > { %v3837_v32 = vrot.slane %v3836_v3, 2  ;;  %v3953_v40 = vadd.f32 %v3952_v51, %v3951_v43  ;;  %v9784_v43 = vld [vmem:[#allocation20_spill] sm:$0xff]  ;;  %v9785_v51 = vld [vmem:[#allocation21_spill] sm:$0xff] }
 0x80b   : > { %v3954_v15 = vrot.slane %v3953_v40, 2  ;;  %v3838_v36 = vadd.f32 %v3837_v32, %v3836_v3 }
 0x80d   : > { %v3839_v60 = vrot.slane %v3838_v36, 1  ;;  %v3955_v53 = vadd.f32 %v3954_v15, %v3953_v40  ;;  %v9786_v40 = vld [vmem:[#allocation22_spill] sm:$0xff] }
 0x80f   : > { %v3840_v39 = vadd.f32 %v3839_v60, %v3838_v36  ;;  %v3956_v23 = vrot.slane %v3955_v53, 1  ;;  %v9787_v36 = vld [vmem:[#allocation23_spill] sm:$0xff] }
 0x811   : > { %5759 = vpush %v3840_v39  ;;  %v3957_v54 = vadd.f32 %v3956_v23, %v3955_v53  ;;  %v9788_v53 = vld [vmem:[#allocation24_spill] sm:$0xff] }
 0x813   : > { %5761 = vpush %v3957_v54 }
 0x842   : > { %s5760_s17 = spop %5759 }
 0x843   : > { %s3842_s29 = smul.f32 7.8125e-05, %s5760_s17 }
 0x844   : > { %s5762_s30 = spop %5761 }
 0x845   : > { %s3960_s13 = smul.f32 %s3842_s29, %s3842_s29  ;;  %v8435_v6 = vstv %s3842_s29 }
 0x846   : > { %s3959_s20 = smul.f32 7.8125e-05, %s5762_s30  ;;  %v3964_v8 = vsub.f32 %v9777_v27, %v8435_v6  ;;  %v3965_v58 = vsub.f32 %v9778_v24, %v8435_v6  ;;  %v3966_v7 = vsub.f32 %v9779_v35, %v8435_v6  ;;  %v3967_v63 = vsub.f32 %v9780_v42, %v8435_v6 }
 0x847   : > { %v3968_v44 = vsub.f32 %v9781_v59, %v8435_v6  ;;  %v3969_v26 = vsub.f32 %v9782_v34, %v8435_v6  ;;  %v3970_v12 = vsub.f32 %v9783_v30, %v8435_v6  ;;  %v3971_v3 = vsub.f32 %v9784_v43, %v8435_v6 }
 0x848   : > { %s3961_s28 = ssub.f32 %s3959_s20, %s3960_s13  ;;  %v3972_v32 = vsub.f32 %v9785_v51, %v8435_v6  ;;  %v3973_v15 = vsub.f32 %v9786_v40, %v8435_v6  ;;  %v3974_v60 = vsub.f32 %v9787_v36, %v8435_v6  ;;  %v3975_v39 = vsub.f32 %v9788_v53, %v8435_v6 }
 0x849   : > { %v3977_v23 = vsub.f32 %v8155_v2, %v8435_v6  ;;  %v3978_v54 = vsub.f32 %v8163_v41, %v8435_v6  ;;  %v3980_v27 = vsub.f32 %v8182_v45, %v8435_v6  ;;  %v3981_v24 = vsub.f32 %v8186_v52, %v8435_v6 }
 0x84a   : > { %s3962_s18 = smax.f32 %s6066_s23, %s3961_s28  ;;  %v3982_v35 = vsub.f32 %v8196_v55, %v8435_v6  ;;  %v3983_v42 = vsub.f32 %v8205_v10, %v8435_v6  ;;  %v3984_v2 = vsub.f32 %v8212_v62, %v8435_v6  ;;  %v3985_v41 = vsub.f32 %v8220_v48, %v8435_v6 }
 0x84b   : > { %s4016_s25 = sadd.f32 1e-05, %s3962_s18  ;;  %v3986_v59 = vsub.f32 %v8228_v28, %v8435_v6  ;;  %v3987_v45 = vsub.f32 %v8237_v46, %v8435_v6  ;;  %v3988_v52 = vsub.f32 %v8244_v61, %v8435_v6  ;;  %v3990_v55 = vsub.f32 %v8251_v38, %v8435_v6 }
 0x84c   : > { %v3991_v10 = vsub.f32 %v8259_v4, %v8435_v6  ;;  %v3992_v62 = vsub.f32 %v8268_v1, %v8435_v6  ;;  %v3993_v48 = vsub.f32 %v8276_v11, %v8435_v6  ;;  %v3994_v28 = vsub.f32 %v8278_v47, %v8435_v6 }
 0x84d   : > { %v4017_v31 = vstv %s4016_s25  ;;  %v3995_v46 = vsub.f32 %v8286_v18, %v8435_v6  ;;  %v3996_v61 = vsub.f32 %v8295_v9, %v8435_v6  ;;  %v3997_v38 = vsub.f32 %v8302_v13, %v8435_v6 }
 0x84e   : > { %6037 = vrsqrt.f32 %v4017_v31  ;;  %v9789_v31 = vld [vmem:[#allocation26_spill] sm:$0xff]  ;;  %v3998_v4 = vsub.f32 %v8310_v19, %v8435_v6  ;;  %v3999_v1 = vsub.f32 %v8319_v25, %v8435_v6  ;;  %v4000_v11 = vsub.f32 %v8328_v49, %v8435_v6 }
 0x84f   : > { %v4001_v47 = vsub.f32 %v8335_v50, %v8435_v6  ;;  %v4003_v18 = vsub.f32 %v8342_v57, %v8435_v6  ;;  %v4004_v9 = vsub.f32 %v8350_v29, %v8435_v6  ;;  %v4005_v13 = vsub.f32 %v8359_v37, %v8435_v6 }
 0x850   : > { %v4006_v19 = vsub.f32 %v8367_v56, %v8435_v6  ;;  %v4007_v25 = vsub.f32 %v8369_v16, %v8435_v6  ;;  %v4008_v49 = vsub.f32 %v8377_v21, %v8435_v6  ;;  %v4009_v50 = vsub.f32 %v8386_v14, %v8435_v6  ;;  %v4182_v16 = vld [vmem:[%s9673_s10 + $0x28] sm:$0xff]  ;;  %v4195_v56 = vld [vmem:[%s9673_s10 + $0x90] sm:$0xff] }
 0x851   : > { %v4010_v57 = vsub.f32 %v8393_v17, %v8435_v6  ;;  %v4011_v29 = vsub.f32 %v8401_v22, %v8435_v6 }
 0x858   : > { %v6038_v0 = vpop.eup %6037 }
 0x859   : > { %5763 = vpush %v6038_v0  ;;  %v3979_v0 = vsub.f32 %v9789_v31, %v8435_v6 }
 0x88a   : > { %s5764_s27 = spop %5763 }
 0x88b   : > { %v8533_v21 = vstv %s5764_s27 }
 0x88c   : > { %v8536_v14 = vmul.f32 %v8533_v21, %v3964_v8  ;;  %v8539_v17 = vmul.f32 %v8533_v21, %v3965_v58  ;;  %v8542_v22 = vmul.f32 %v8533_v21, %v3966_v7  ;;  %v8545_v34 = vmul.f32 %v8533_v21, %v3967_v63 }
 0x88d   : > { %v8548_v30 = vmul.f32 %v8533_v21, %v3968_v44  ;;  %v4026_v43 = vmul.f32 %v8533_v21, %v3969_v26  ;;  %v8552_v51 = vmul.f32 %v8533_v21, %v3970_v12  ;;  %v8555_v8 = vmul.f32 %v8533_v21, %v3971_v3 }
 0x88e   : > { %v8558_v58 = vmul.f32 %v8533_v21, %v3972_v32  ;;  %v8561_v7 = vmul.f32 %v8533_v21, %v3973_v15  ;;  %v8564_v63 = vmul.f32 %v8533_v21, %v3974_v60  ;;  %v8567_v44 = vmul.f32 %v8533_v21, %v3975_v39 }
 0x88f   : > { %v8570_v26 = vmul.f32 %v8533_v21, %v3977_v23  ;;  %v8573_v12 = vmul.f32 %v8533_v21, %v3978_v54  ;;  %v8576_v3 = vmul.f32 %v8533_v21, %v3979_v0  ;;  %v8579_v32 = vmul.f32 %v8533_v21, %v3980_v27 }
 0x890   : > { %v8582_v40 = vmul.f32 %v8533_v21, %v3981_v24  ;;  %v4039_v15 = vmul.f32 %v8533_v21, %v3982_v35  ;;  %v8586_v36 = vmul.f32 %v8533_v21, %v3983_v42  ;;  %v8589_v60 = vmul.f32 %v8533_v21, %v3984_v2  ;;  %v4073_v2 = vld [vmem:[%s9672_s9] sm:$0xff] }
 0x891   : > { %v8592_v53 = vmul.f32 %v8533_v21, %v3985_v41  ;;  %v8595_v39 = vmul.f32 %v8533_v21, %v3986_v59  ;;  %v8598_v23 = vmul.f32 %v8533_v21, %v3987_v45  ;;  %v8601_v54 = vmul.f32 %v8533_v21, %v3988_v52 }
 0x892   : > { %v8604_v31 = vmul.f32 %v8533_v21, %v3990_v55  ;;  %v8607_v0 = vmul.f32 %v8533_v21, %v3991_v10  ;;  %v8610_v27 = vmul.f32 %v8533_v21, %v3992_v62  ;;  %v8613_v24 = vmul.f32 %v8533_v21, %v3993_v48  ;;  %v4074_v55 = vld [vmem:[%s9672_s9 + $0x8] sm:$0xff]  ;;  %v4075_v10 = vld [vmem:[%s9672_s9 + $0x10] sm:$0xff]  ;;  %v4076_v62 = vld [vmem:[%s9672_s9 + $0x18] sm:$0xff] }
 0x893   : > { %v8616_v35 = vmul.f32 %v8533_v21, %v3994_v28  ;;  %v8619_v42 = vmul.f32 %v8533_v21, %v3995_v46  ;;  %v8625_v41 = vmul.f32 %v8533_v21, %v3996_v61  ;;  %v8628_v59 = vmul.f32 %v8533_v21, %v3997_v38  ;;  %v4077_v61 = vld [vmem:[%s9672_s9 + $0x20] sm:$0xff]  ;;  %v4078_v38 = vld [vmem:[%s9672_s9 + $0x28] sm:$0xff] }
 0x894   : > { %v8631_v45 = vmul.f32 %v8533_v21, %v3998_v4  ;;  %v8634_v52 = vmul.f32 %v8533_v21, %v3999_v1  ;;  %v8646_v48 = vmul.f32 %v8533_v21, %v4000_v11  ;;  %v8649_v28 = vmul.f32 %v8533_v21, %v4001_v47  ;;  %v4091_v4 = vld [vmem:[%s9672_s9 + $0x90] sm:$0xff] }
 0x895   : > { %v8652_v46 = vmul.f32 %v8533_v21, %v4003_v18  ;;  %v8664_v1 = vmul.f32 %v8533_v21, %v4004_v9  ;;  %v8667_v11 = vmul.f32 %v8533_v21, %v4005_v13  ;;  %v8670_v47 = vmul.f32 %v8533_v21, %v4006_v19  ;;  %v4079_v9 = vld [vmem:[%s9672_s9 + $0x30] sm:$0xff] }
 0x896   : > { %v8673_v18 = vmul.f32 %v8533_v21, %v4007_v25  ;;  %v8685_v13 = vmul.f32 %v8533_v21, %v4008_v49  ;;  %v8688_v19 = vmul.f32 %v8533_v21, %v4009_v50  ;;  %v8691_v25 = vmul.f32 %v8533_v21, %v4010_v57  ;;  %v4080_v49 = vld [vmem:[%s9672_s9 + $0x38] sm:$0xff]  ;;  %v4081_v50 = vld [vmem:[%s9672_s9 + $0x40] sm:$0xff]  ;;  %v4082_v57 = vld [vmem:[%s9672_s9 + $0x48] sm:$0xff] }
 0x897   : > { %9790 = vst [vmem:[#allocation18_spill] sm:$0xff] %v8664_v1  ;;  %9791 = vst [vmem:[#allocation9_spill] sm:$0xff] %v8667_v11  ;;  %v8694_v37 = vmul.f32 %v8533_v21, %v4011_v29  ;;  %v9798_v29 = vsub.f32 %v8410_v33, %v8435_v6  ;;  %v4083_v1 = vld [vmem:[%s9672_s9 + $0x50] sm:$0xff]  ;;  %v4084_v33 = vld [vmem:[%s9672_s9 + $0x58] sm:$0xff] }
 0x898   : > { %9792 = vst [vmem:[#allocation10_spill] sm:$0xff] %v8670_v47  ;;  %9793 = vst [vmem:[#allocation13_spill] sm:$0xff] %v8673_v18  ;;  %v4086_v18 = vld [vmem:[%s9672_s9 + $0x68] sm:$0xff]  ;;  %v4087_v47 = vld [vmem:[%s9672_s9 + $0x70] sm:$0xff] }
 0x899   : > { %9794 = vst [vmem:[#allocation12_spill] sm:$0xff] %v8685_v13  ;;  %9795 = vst [vmem:[#allocation25_spill] sm:$0xff] %v8688_v19  ;;  %v9801_v13 = vsub.f32 %v8422_v5, %v8435_v6  ;;  %v4088_v5 = vld [vmem:[%s9672_s9 + $0x78] sm:$0xff] }
 0x89a   : > { %9796 = vst [vmem:[#allocation8_spill] sm:$0xff] %v8691_v25  ;;  %9797 = vst [vmem:[#allocation19_spill] sm:$0xff] %v8694_v37  ;;  %v8715_v37 = vmul.f32 %v8533_v21, %v9798_v29  ;;  %v9800_v25 = vsub.f32 %v8417_v20, %v8435_v6  ;;  %v4130_v29 = vmul.f32 %v4078_v38, %v4026_v43  ;;  %v4089_v6 = vld [vmem:[%s9672_s9 + $0x80] sm:$0xff] }
 0x89b   : > { %v8727_v11 = vmul.f32 %v8533_v21, %v9801_v13  ;;  %v8736_v20 = vmul.f32 %v4073_v2, %v8536_v14  ;;  %v8751_v43 = vmul.f32 %v4075_v10, %v8542_v22  ;;  %v8754_v14 = vmul.f32 %v4076_v62, %v8545_v34  ;;  %v4099_v2 = vld [vmem:[%s9672_s9 + $0xd0] sm:$0xff]  ;;  %v4101_v22 = vld [vmem:[%s9672_s9 + $0xe0] sm:$0xff]  ;;  %v4092_v34 = vld [vmem:[%s9672_s9 + $0x98] sm:$0xff] }
 0x89c   : > { %9799 = vst [vmem:[#allocation11_spill] sm:$0xff] %v8715_v37  ;;  %v8721_v19 = vmul.f32 %v8533_v21, %v9800_v25  ;;  %v4143_v37 = vmul.f32 %v4091_v4, %v4039_v15  ;;  %v8739_v25 = vmul.f32 %v4074_v55, %v8539_v17  ;;  %v4090_v21 = vld [vmem:[%s9672_s9 + $0x88] sm:$0xff]  ;;  %v8757_v17 = vmul.f32 %v4077_v61, %v8548_v30  ;;  %v4100_v55 = vld [vmem:[%s9672_s9 + $0xd8] sm:$0xff]  ;;  %v4093_v30 = vld [vmem:[%s9672_s9 + $0xa0] sm:$0xff] }
 0x89d   : > { %v8760_v15 = vmul.f32 %v4079_v9, %v8552_v51  ;;  %v4094_v51 = vld [vmem:[%s9672_s9 + $0xa8] sm:$0xff]  ;;  %v8780_v10 = vadd.f32 %v4182_v16, %v4130_v29  ;;  %v8785_v61 = vmul.f32 %v4080_v49, %v8555_v8  ;;  %v8788_v38 = vmul.f32 %v4081_v50, %v8558_v58  ;;  %v4095_v4 = vld [vmem:[%s9672_s9 + $0xb0] sm:$0xff]  ;;  %v4096_v9 = vld [vmem:[%s9672_s9 + $0xb8] sm:$0xff] }
 0x89e   : > { %v8782_v62 = vadd.f32 %v4195_v56, %v4143_v37  ;;  %v4097_v16 = vld [vmem:[%s9672_s9 + $0xc0] sm:$0xff]  ;;  %v8800_v37 = vmul.f32 %v4082_v57, %v8561_v7  ;;  %v8803_v56 = vmul.f32 %v4083_v1, %v8564_v63  ;;  %v8806_v8 = vmul.f32 %v4084_v33, %v8567_v44  ;;  %v4102_v58 = vld [vmem:[%s9672_s9 + $0xe8] sm:$0xff]  ;;  %v4103_v13 = vld [vmem:[%s9672_s9 + $0xf0] sm:$0xff] }
 0x89f   : > { %9802 = vst [vmem:[#allocation14_spill] sm:$0xff] %v8780_v10  ;;  %v8817_v7 = vmul.f32 %v4086_v18, %v8570_v26  ;;  %v8820_v63 = vmul.f32 %v4087_v47, %v8573_v12  ;;  %v8823_v44 = vmul.f32 %v4088_v5, %v8576_v3  ;;  %v4112_v1 = vld [vmem:[%s9672_s9 + $0x138] sm:$0xff]  ;;  %v4113_v50 = vld [vmem:[%s9672_s9 + $0x140] sm:$0xff]  ;;  %v4106_v12 = vld [vmem:[%s9672_s9 + $0x108] sm:$0xff]  ;;  %v8841_v3 = vmul.f32 %v4089_v6, %v8579_v32 }
 0x8a0   : > { %9803 = vst [vmem:[#allocation15_spill] sm:$0xff] %v8782_v62  ;;  %v5800_v49 = vpack.i.bf16 %v8782_v62, %v8780_v10  ;;  %v4104_v57 = vld [vmem:[%s9672_s9 + $0xf8] sm:$0xff]  ;;  %v4105_v26 = vld [vmem:[%s9672_s9 + $0x100] sm:$0xff]  ;;  %v8844_v47 = vmul.f32 %v4090_v21, %v8582_v40  ;;  %v8847_v18 = vmul.f32 %v4092_v34, %v8586_v36  ;;  %v8850_v33 = vmul.f32 %v4093_v30, %v8589_v60  ;;  %v4114_v29 = vld [vmem:[%s9672_s9 + $0x148] sm:$0xff] }
 0x8a1   : > { %v4107_v5 = vld [vmem:[%s9672_s9 + $0x110] sm:$0xff]  ;;  %v4108_v32 = vld [vmem:[%s9672_s9 + $0x118] sm:$0xff]  ;;  %v4109_v40 = vld [vmem:[%s9672_s9 + $0x120] sm:$0xff]  ;;  %v8866_v36 = vmul.f32 %v4094_v51, %v8592_v53  ;;  %v8869_v60 = vmul.f32 %v4095_v4, %v8595_v39  ;;  %v8872_v6 = vmul.f32 %v4096_v9, %v8598_v23  ;;  %v8875_v21 = vmul.f32 %v4097_v16, %v8601_v54 }
 0x8a2   : > { %5801 = vrot.lane.b32.xlu1 %v5800_v49, %s6051_s19  ;;  %v4115_v34 = vld [vmem:[%s9672_s9 + $0x150] sm:$0xff]  ;;  %v4110_v30 = vld [vmem:[%s9672_s9 + $0x128] sm:$0xff]  ;;  %v8884_v53 = vmul.f32 %v4099_v2, %v8604_v31  ;;  %v8887_v39 = vmul.f32 %v4100_v55, %v8607_v0  ;;  %v8890_v23 = vmul.f32 %v4101_v22, %v8610_v27  ;;  %v4181_v54 = vld [vmem:[%s9673_s10 + $0x20] sm:$0xff]  ;;  %v8905_v0 = vmul.f32 %v4102_v58, %v8613_v24 }
 0x8a3   : > { %v4116_v51 = vld [vmem:[%s9672_s9 + $0x158] sm:$0xff]  ;;  %v4117_v4 = vld [vmem:[%s9672_s9 + $0x160] sm:$0xff]  ;;  %v4118_v31 = vld [vmem:[%s9672_s9 + $0x168] sm:$0xff]  ;;  %v8908_v27 = vmul.f32 %v4103_v13, %v8616_v35  ;;  %v8911_v2 = vmul.f32 %v4104_v57, %v8619_v42  ;;  %v8914_v55 = vmul.f32 %v4105_v26, %v8625_v41  ;;  %v8932_v41 = vmul.f32 %v4106_v12, %v8628_v59 }
 0x8a4   : > { %v4177_v22 = vld [vmem:[%s9673_s10] sm:$0xff]  ;;  %v4178_v9 = vld [vmem:[%s9673_s10 + $0x8] sm:$0xff]  ;;  %v4119_v24 = vld [vmem:[%s9672_s9 + $0x170] sm:$0xff]  ;;  %v8935_v16 = vmul.f32 %v4107_v5, %v8631_v45  ;;  %v8938_v58 = vmul.f32 %v4108_v32, %v8634_v52  ;;  %v8941_v13 = vmul.f32 %v4109_v40, %v8646_v48  ;;  %v8950_v59 = vmul.f32 %v4110_v30, %v8649_v28 }
 0x8a5   : > { %v4120_v35 = vld [vmem:[%s9672_s9 + $0x178] sm:$0xff]  ;;  %v4121_v42 = vld [vmem:[%s9672_s9 + $0x180] sm:$0xff]  ;;  %v4122_v49 = vld [vmem:[%s9672_s9 + $0x188] sm:$0xff]  ;;  %v8953_v45 = vmul.f32 %v4112_v1, %v8652_v46 }
 0x8a6   : > { %v4123_v57 = vld [vmem:[%s9672_s9 + $0x190] sm:$0xff]  ;;  %v4180_v12 = vld [vmem:[%s9673_s10 + $0x18] sm:$0xff]  ;;  %v4194_v5 = vld [vmem:[%s9673_s10 + $0x88] sm:$0xff] }
 0x8a7   : > { %9804 = vst [vmem:[#allocation16_spill] sm:$0xff] %v8953_v45  ;;  %v9805_v26 = vld [vmem:[#allocation18_spill] sm:$0xff]  ;;  %v9807_v28 = vld [vmem:[#allocation9_spill] sm:$0xff]  ;;  %v9813_v30 = vld [vmem:[#allocation12_spill] sm:$0xff] }
 0x8a8   : > { %v8956_v52 = vmul.f32 %v4113_v50, %v9805_v26  ;;  %v4179_v48 = vld [vmem:[%s9673_s10 + $0x10] sm:$0xff]  ;;  %v8968_v32 = vmul.f32 %v4114_v29, %v9807_v28  ;;  %v8977_v26 = vmul.f32 %v4117_v4, %v9813_v30  ;;  %v4190_v10 = vld [vmem:[%s9673_s10 + $0x68] sm:$0xff]  ;;  %v4192_v29 = vld [vmem:[%s9673_s10 + $0x78] sm:$0xff] }
 0x8a9   : > { %v9809_v46 = vld [vmem:[#allocation10_spill] sm:$0xff]  ;;  %v9811_v50 = vld [vmem:[#allocation13_spill] sm:$0xff]  ;;  %v4185_v4 = vld [vmem:[%s9673_s10 + $0x40] sm:$0xff] }
 0x8aa   : > { %9806 = vst [vmem:[#allocation17_spill] sm:$0xff] %v8956_v52  ;;  %9808 = vst [vmem:[#allocation20_spill] sm:$0xff] %v8968_v32  ;;  %v8971_v1 = vmul.f32 %v4115_v34, %v9809_v46  ;;  %v8974_v40 = vmul.f32 %v4116_v51, %v9811_v50  ;;  %v4191_v62 = vld [vmem:[%s9673_s10 + $0x70] sm:$0xff]  ;;  %v4184_v51 = vld [vmem:[%s9673_s10 + $0x38] sm:$0xff] }
 0x8ab   : > { %9814 = vst [vmem:[#allocation23_spill] sm:$0xff] %v8977_v26  ;;  %v4183_v34 = vld [vmem:[%s9673_s10 + $0x30] sm:$0xff]  ;;  %v9816_v50 = vld [vmem:[#allocation8_spill] sm:$0xff]  ;;  %v9817_v26 = vld [vmem:[#allocation19_spill] sm:$0xff] }
 0x8ac   : > { %9810 = vst [vmem:[#allocation21_spill] sm:$0xff] %v8971_v1  ;;  %9812 = vst [vmem:[#allocation22_spill] sm:$0xff] %v8974_v40  ;;  %v9815_v28 = vld [vmem:[#allocation25_spill] sm:$0xff]  ;;  %v9001_v30 = vmul.f32 %v4119_v24, %v9816_v50  ;;  %v9004_v40 = vmul.f32 %v4120_v35, %v9817_v26  ;;  %v9818_v1 = vld [vmem:[#allocation11_spill] sm:$0xff]  ;;  %v9019_v24 = vmul.f32 %v4122_v49, %v8721_v19 }
 0x8ad   : > { %v8998_v46 = vmul.f32 %v4118_v31, %v9815_v28  ;;  %v9007_v32 = vmul.f32 %v4121_v42, %v9818_v1  ;;  %v4186_v52 = vld [vmem:[%s9673_s10 + $0x48] sm:$0xff]  ;;  %v4187_v45 = vld [vmem:[%s9673_s10 + $0x50] sm:$0xff]  ;;  %v4188_v31 = vld [vmem:[%s9673_s10 + $0x58] sm:$0xff]  ;;  %v9022_v35 = vmul.f32 %v4123_v57, %v8727_v11  ;;  %v9025_v42 = vadd.f32 %v4181_v54, %v8757_v17 }
 0x8ae   : > { %v4193_v1 = vld [vmem:[%s9673_s10 + $0x80] sm:$0xff]  ;;  %v4196_v26 = vld [vmem:[%s9673_s10 + $0x98] sm:$0xff]  ;;  %v9034_v28 = vadd.f32 %v4194_v5, %v8844_v47  ;;  %v9037_v19 = vadd.f32 %v4177_v22, %v8736_v20  ;;  %v9040_v11 = vadd.f32 %v4178_v9, %v8739_v25  ;;  %v9043_v17 = vadd.f32 %v4179_v48, %v8751_v43  ;;  %v4203_v54 = vld [vmem:[%s9673_s10 + $0xd0] sm:$0xff] }
 0x8af   : > { %v4204_v49 = vld [vmem:[%s9673_s10 + $0xd8] sm:$0xff]  ;;  %v4205_v47 = vld [vmem:[%s9673_s10 + $0xe0] sm:$0xff]  ;;  %v4198_v25 = vld [vmem:[%s9673_s10 + $0xa8] sm:$0xff]  ;;  %v9064_v22 = vadd.f32 %v4180_v12, %v8754_v14  ;;  %v9067_v9 = vadd.f32 %v4183_v34, %v8760_v15  ;;  %v9070_v57 = vadd.f32 %v4184_v51, %v8785_v61  ;;  %v9073_v48 = vadd.f32 %v4185_v4, %v8788_v38 }
 0x8b0   : > { %v4197_v20 = vld [vmem:[%s9673_s10 + $0xa0] sm:$0xff]  ;;  %v4199_v43 = vld [vmem:[%s9673_s10 + $0xb0] sm:$0xff]  ;;  %v4200_v5 = vld [vmem:[%s9673_s10 + $0xb8] sm:$0xff]  ;;  %v5795_v14 = vpack.i.bf16 %v9034_v28, %v9025_v42  ;;  %v9084_v15 = vadd.f32 %v4186_v52, %v8800_v37  ;;  %v9087_v61 = vadd.f32 %v4187_v45, %v8803_v56  ;;  %v9090_v38 = vadd.f32 %v4188_v31, %v8806_v8 }
 0x8b1   : > { %v4201_v50 = vld [vmem:[%s9673_s10 + $0xc0] sm:$0xff]  ;;  %v4206_v12 = vld [vmem:[%s9673_s10 + $0xe8] sm:$0xff]  ;;  %v4207_v34 = vld [vmem:[%s9673_s10 + $0xf0] sm:$0xff]  ;;  %v9102_v37 = vadd.f32 %v4190_v10, %v8817_v7  ;;  %v9105_v56 = vadd.f32 %v4191_v62, %v8820_v63  ;;  %v9108_v8 = vadd.f32 %v4192_v29, %v8823_v44  ;;  %v9130_v63 = vadd.f32 %v4193_v1, %v8841_v3 }
 0x8b2   : > { %9819 = vst [vmem:[#allocation24_spill] sm:$0xff] %v9084_v15  ;;  %v4208_v51 = vld [vmem:[%s9673_s10 + $0xf8] sm:$0xff]  ;;  %v4217_v52 = vld [vmem:[%s9673_s10 + $0x140] sm:$0xff]  ;;  %v4218_v4 = vld [vmem:[%s9673_s10 + $0x148] sm:$0xff]  ;;  %5796 = vrot.lane.b32.xlu0 %v5795_v14, %s6051_s19  ;;  %v9133_v44 = vadd.f32 %v4196_v26, %v8847_v18  ;;  %v9136_v29 = vadd.f32 %v4197_v20, %v8850_v33  ;;  %v9139_v31 = vadd.f32 %v4198_v25, %v8866_v36 }
 0x8b3   : > { %v4216_v45 = vld [vmem:[%s9673_s10 + $0x138] sm:$0xff]  ;;  %v4209_v10 = vld [vmem:[%s9673_s10 + $0x100] sm:$0xff]  ;;  %v4210_v62 = vld [vmem:[%s9673_s10 + $0x108] sm:$0xff]  ;;  %v9151_v18 = vadd.f32 %v4199_v43, %v8869_v60  ;;  %v9154_v33 = vadd.f32 %v4200_v5, %v8872_v6  ;;  %v9157_v36 = vadd.f32 %v4201_v50, %v8875_v21  ;;  %v9166_v20 = vadd.f32 %v4203_v54, %v8884_v53 }
 0x8b4   : > { %v4211_v7 = vld [vmem:[%s9673_s10 + $0x110] sm:$0xff]  ;;  %v4212_v15 = vld [vmem:[%s9673_s10 + $0x118] sm:$0xff]  ;;  %v4213_v14 = vld [vmem:[%s9673_s10 + $0x120] sm:$0xff]  ;;  %v9169_v60 = vadd.f32 %v4204_v49, %v8887_v39  ;;  %v9172_v6 = vadd.f32 %v4205_v47, %v8890_v23  ;;  %v9175_v21 = vadd.f32 %v4206_v12, %v8905_v0  ;;  %v9187_v39 = vadd.f32 %v4207_v34, %v8908_v27 }
 0x8b5   : > { %v4214_v3 = vld [vmem:[%s9673_s10 + $0x128] sm:$0xff]  ;;  %v4219_v1 = vld [vmem:[%s9673_s10 + $0x150] sm:$0xff]  ;;  %v4220_v26 = vld [vmem:[%s9673_s10 + $0x158] sm:$0xff]  ;;  %v4260_v23 = vadd.f32 %v4208_v51, %v8911_v2  ;;  %v9191_v0 = vadd.f32 %v4209_v10, %v8914_v55  ;;  %v9194_v54 = vadd.f32 %v4210_v62, %v8932_v41  ;;  %v9206_v2 = vadd.f32 %v4211_v7, %v8935_v16 }
 0x8b6   : > { %v4221_v25 = vld [vmem:[%s9673_s10 + $0x160] sm:$0xff]  ;;  %v4222_v43 = vld [vmem:[%s9673_s10 + $0x168] sm:$0xff]  ;;  %v4223_v53 = vld [vmem:[%s9673_s10 + $0x170] sm:$0xff]  ;;  %v9209_v55 = vadd.f32 %v4212_v15, %v8938_v58  ;;  %v9212_v41 = vadd.f32 %v4213_v14, %v8941_v13  ;;  %v9215_v5 = vadd.f32 %v4214_v3, %v8950_v59 }
 0x8b7   : > { %v4224_v49 = vld [vmem:[%s9673_s10 + $0x178] sm:$0xff]  ;;  %v4225_v47 = vld [vmem:[%s9673_s10 + $0x180] sm:$0xff]  ;;  %v4226_v27 = vld [vmem:[%s9673_s10 + $0x188] sm:$0xff]  ;;  %v9237_v3 = vadd.f32 %v4222_v43, %v8998_v46 }
 0x8b8   : > { %9820 = vst [vmem:[#allocation26_spill] sm:$0xff] %v9209_v55  ;;  %v4227_v50 = vld [vmem:[%s9673_s10 + $0x190] sm:$0xff]  ;;  %v9821_v12 = vld [vmem:[#allocation16_spill] sm:$0xff]  ;;  %v9826_v59 = vld [vmem:[#allocation23_spill] sm:$0xff] }
 0x8b9   : > { %v9221_v34 = vadd.f32 %v4216_v45, %v9821_v12  ;;  %v9822_v51 = vld [vmem:[#allocation17_spill] sm:$0xff]  ;;  %v9823_v16 = vld [vmem:[#allocation20_spill] sm:$0xff]  ;;  %v9825_v13 = vld [vmem:[#allocation22_spill] sm:$0xff]  ;;  %v4273_v14 = vadd.f32 %v4221_v25, %v9826_v59  ;;  %v9240_v45 = vadd.f32 %v4223_v53, %v9001_v30  ;;  %v5830_v30 = vpack.i.bf16 %v9139_v31, %v9073_v48 }
 0x8ba   : > { %v9224_v10 = vadd.f32 %v4217_v52, %v9822_v51  ;;  %v9227_v62 = vadd.f32 %v4218_v4, %v9823_v16  ;;  %v9824_v58 = vld [vmem:[#allocation21_spill] sm:$0xff]  ;;  %v9233_v7 = vadd.f32 %v4220_v26, %v9825_v13  ;;  %v9243_v52 = vadd.f32 %v4224_v49, %v9004_v40  ;;  %v9829_v51 = vld [vmem:[#allocation14_spill] sm:$0xff] }
 0x8bb   : > { %v9230_v15 = vadd.f32 %v4219_v1, %v9824_v58  ;;  %v9246_v4 = vadd.f32 %v4225_v47, %v9007_v32  ;;  %v9249_v1 = vadd.f32 %v4226_v27, %v9019_v24  ;;  %v9252_v26 = vadd.f32 %v4227_v50, %v9022_v35  ;;  %v9828_v50 = vld [vmem:[#allocation15_spill] sm:$0xff] }
 0x8bc   : > { %v5805_v25 = vpack.i.bf16 %v9233_v7, %v9187_v39  ;;  %v5810_v46 = vpack.i.bf16 %v4273_v14, %v4260_v23  ;;  %v5815_v32 = vpack.i.bf16 %v9130_v63, %v9064_v22  ;;  %v5825_v24 = vpack.i.bf16 %v9136_v29, %v9070_v57 }
 0x8bd   : > { %9827 = vst [vmem:[#allocation18_spill] sm:$0xff] %v9246_v4  ;;  %v5820_v40 = vpack.i.bf16 %v9230_v15, %v9175_v21 }
 0x8be   : > { %5806 = vrot.lane.b32.xlu1 %v5805_v25, %s6051_s19  ;;  %5811 = vrot.lane.b32.xlu0 %v5810_v46, %s6051_s19 }
 0x8c2   : > { %5821 = vrot.lane.b32.xlu0 %v5820_v40, %s6051_s19  ;;  %5816 = vrot.lane.b32.xlu1 %v5815_v32, %s6051_s19 }
 0x8c6   : > { %5831 = vrot.lane.b32.xlu0 %v5830_v30, %s6051_s19  ;;  %5826 = vrot.lane.b32.xlu1 %v5825_v24, %s6051_s19 }
 0x914   : > { %v5802_v35 = vpop.permute.xlu1 %5801 }
 0x915   : > { %v5804_v43 = vunpack.i.h.bf16 %v5802_v35  ;;  %v5803_v53 = vunpack.i.l.bf16 %v5802_v35 }
 0x917   : > { %v4550_v12 = vmax.f32 %v9828_v50, %v5804_v43  ;;  %v4548_v16 = vmax.f32 %v9829_v51, %v5803_v53 }
 0x924   : > { %v5797_v49 = vpop.permute.xlu0 %5796 }
 0x925   : > { %v9270_v47 = vunpack.i.h.bf16 %v5797_v49  ;;  %v9272_v27 = vunpack.i.l.bf16 %v5797_v49 }
 0x927   : > { %v4536_v58 = vsel %vm542_vm12, %v9270_v47, %v5804_v43  ;;  %v4535_v13 = vsel %vm542_vm12, %v9272_v27, %v5803_v53 }
 0x928   : > { %v4549_v59 = vmax.f32 %v9034_v28, %v4536_v58  ;;  %v4547_v25 = vmax.f32 %v9025_v42, %v4535_v13 }
 0x92a   : > { %v5840_v46 = vpack.i.bf16 %v4550_v12, %v4549_v59  ;;  %v5835_v40 = vpack.i.bf16 %v4548_v16, %v4547_v25 }
 0x92c   : > { %5841 = vrot.lane.b32.xlu0 %v5840_v46, %s6056_s26  ;;  %5836 = vrot.lane.b32.xlu1 %v5835_v40, %s6056_s26 }
 0x930   : > { %v5807_v32 = vpop.permute.xlu1 %5806  ;;  %v5812_v30 = vpop.permute.xlu0 %5811 }
 0x931   : > { %v9284_v24 = vunpack.i.h.bf16 %v5807_v32  ;;  %v9286_v35 = vunpack.i.l.bf16 %v5807_v32  ;;  %v5814_v43 = vunpack.i.h.bf16 %v5812_v30  ;;  %v5813_v49 = vunpack.i.l.bf16 %v5812_v30 }
 0x933   : > { %v4538_v53 = vsel %vm542_vm12, %v9284_v24, %v5814_v43  ;;  %v4554_v50 = vmax.f32 %v4273_v14, %v5814_v43  ;;  %v4537_v12 = vsel %vm542_vm12, %v9286_v35, %v5813_v49  ;;  %v4552_v51 = vmax.f32 %v4260_v23, %v5813_v49 }
 0x934   : > { %v4553_v16 = vmax.f32 %v9233_v7, %v4538_v53  ;;  %v4551_v58 = vmax.f32 %v9187_v39, %v4537_v12  ;;  %v5822_v13 = vpop.permute.xlu0 %5821  ;;  %v5817_v59 = vpop.permute.xlu1 %5816  ;;  %v5860_v49 = vpack.i.bf16 %v9243_v52, %v9206_v2  ;;  %v5850_v53 = vpack.i.bf16 %v9240_v45, %v9194_v54 }
 0x935   : > { %v5824_v25 = vunpack.i.h.bf16 %v5822_v13  ;;  %v5823_v46 = vunpack.i.l.bf16 %v5822_v13  ;;  %v5819_v40 = vunpack.i.h.bf16 %v5817_v59  ;;  %v5818_v32 = vunpack.i.l.bf16 %v5817_v59 }
 0x936   : > { %v5855_v4 = vpack.i.bf16 %v4554_v50, %v4553_v16  ;;  %v5845_v30 = vpack.i.bf16 %v4552_v51, %v4551_v58  ;;  %v5870_v50 = vpack.i.bf16 %v9108_v8, %v9043_v17  ;;  %v5865_v12 = vpack.i.bf16 %v9105_v56, %v9040_v11 }
 0x937   : > { %v9296_v55 = vsel %vm542_vm12, %v5824_v25, %v9284_v24  ;;  %v9300_v14 = vsel %vm542_vm12, %v5823_v46, %v9286_v35  ;;  %v9304_v23 = vsel %vm542_vm12, %v5819_v40, %v9270_v47  ;;  %v9308_v43 = vsel %vm542_vm12, %v5818_v32, %v9272_v27 }
 0x938   : > { %5856 = vrot.lane.b32.xlu0 %v5855_v4, %s6056_s26  ;;  %5846 = vrot.lane.b32.xlu1 %v5845_v30, %s6056_s26  ;;  %v5880_v4 = vpack.i.bf16 %v9227_v62, %v9172_v6  ;;  %v5875_v51 = vpack.i.bf16 %v9224_v10, %v9169_v60  ;;  %v5832_v16 = vpop.permute.xlu0 %5831  ;;  %v5827_v58 = vpop.permute.xlu1 %5826  ;;  %v5890_v13 = vpack.i.bf16 %v9157_v36, %v9090_v38 }
 0x939   : > { %v5834_v59 = vunpack.i.h.bf16 %v5832_v16  ;;  %v9332_v25 = vunpack.i.h.bf16 %v5827_v58  ;;  %v5885_v46 = vpack.i.bf16 %v9154_v33, %v9087_v61  ;;  %v5833_v40 = vunpack.i.l.bf16 %v5832_v16 }
 0x93a   : > { %v9336_v32 = vunpack.i.l.bf16 %v5827_v58  ;;  %v5900_v30 = vpack.i.bf16 %v9252_v26, %v9215_v5 }
 0x93b   : > { %v4911_v16 = vmax.f32 %v9073_v48, %v5833_v40  ;;  %v6002_v48 = vld [vmem:[%s9674_s11 + $0x48] sm:$0xff]  }
 0x93c   : > { %5861 = vrot.lane.b32.xlu0 %v5860_v49, %s6051_s19  ;;  %5851 = vrot.lane.b32.xlu1 %v5850_v53, %s6051_s19  ;;  %v4899_v49 = vsel %vm542_vm12, %v9332_v25, %v5834_v59  ;;  %v5895_v53 = vpack.i.bf16 %v9249_v1, %v9212_v41 }
 0x940   : > { %5871 = vrot.lane.b32.xlu0 %v5870_v50, %s6051_s19  ;;  %5866 = vrot.lane.b32.xlu1 %v5865_v12, %s6051_s19  ;;  %v4898_v50 = vsel %vm542_vm12, %v9336_v32, %v5833_v40  ;;  %v4913_v12 = vmax.f32 %v9139_v31, %v5834_v59  ;;  %v6001_v31 = vld [vmem:[%s9674_s11 + $0x40] sm:$0xff]   ;;  %v6003_v59 = vld [vmem:[%s9674_s11 + $0x50] sm:$0xff]  }
 0x941   : > { %v4910_v58 = vmax.f32 %v9070_v57, %v4898_v50  ;;  %5638 = vmatprep.subr.bf16.mxu0 %v6001_v31  ;;  %v6004_v40 = vld [vmem:[%s9674_s11 + $0x58] sm:$0xff]   ;;  %v6007_v50 = vld [vmem:[%s9674_s11 + $0x70] sm:$0xff]  }
 0x942   : > { %5639 = vmatpush3.bf16.msra.mxu0 %v6001_v31  ;;  %v4517_v31 = vmax.f32 %v9130_v63, %v9304_v23 }
 0x943   : > { %5640 = vmatprep.subr.bf16.mxu0 %v6002_v48 }
 0x944   : > { %5881 = vrot.lane.b32.xlu0 %v5880_v4, %s6051_s19  ;;  %5876 = vrot.lane.b32.xlu1 %v5875_v51, %s6051_s19  ;;  %v4912_v4 = vmax.f32 %v9136_v29, %v4899_v49  ;;  %v5910_v51 = vpack.i.bf16 %v9237_v3, %v9191_v0  ;;  %v6005_v49 = vld [vmem:[%s9674_s11 + $0x60] sm:$0xff]  }
 0x946   : > { %5641 = vmatpush3.bf16.msra.mxu0 %v6002_v48  ;;  %v4515_v48 = vmax.f32 %v9064_v22, %v9308_v43  ;;  %v4522_v22 = vmax.f32 %v9233_v7, %v9284_v24  ;;  %v9409_v7 = vld [vmem:[%s9674_s11] sm:$0xff]  }
 0x947   : > { %5642 = vmatprep.subr.bf16.mxu0 %v6003_v59 }
 0x948   : > { %5891 = vrot.lane.b32.xlu0 %v5890_v13, %s6051_s19  ;;  %5886 = vrot.lane.b32.xlu1 %v5885_v46, %s6051_s19  ;;  %v5905_v13 = vpack.i.bf16 %v9133_v44, %v9067_v9  ;;  %v5920_v46 = vpack.i.bf16 %v4913_v12, %v4912_v4  ;;  %v4518_v12 = vmax.f32 %v9034_v28, %v9270_v47 }
 0x94a   : > { %5643 = vmatpush3.bf16.msra.mxu0 %v6003_v59 }
 0x94b   : > { %5644 = vmatprep.subr.bf16.mxu0 %v6004_v40 }
 0x94c   : > { %5901 = vrot.lane.b32.xlu0 %v5900_v30, %s6051_s19  ;;  %5896 = vrot.lane.b32.xlu1 %v5895_v53, %s6051_s19  ;;  %v5915_v30 = vpack.i.bf16 %v4911_v16, %v4910_v58  ;;  %v6006_v53 = vld [vmem:[%s9674_s11 + $0x68] sm:$0xff]  }
 0x94e   : > { %5645 = vmatpush3.bf16.msra.mxu0 %v6004_v40 }
 0x94f   : > { %5646 = vmatprep.subr.bf16.mxu0 %v6005_v49 }
 0x950   : > { %5911 = vrot.lane.b32.xlu0 %v5910_v51, %s6051_s19  ;;  %5906 = vrot.lane.b32.xlu1 %v5905_v13, %s6051_s19  ;;  %v4516_v51 = vmax.f32 %v9025_v42, %v9272_v27 }
 0x952   : > { %5647 = vmatpush3.bf16.msra.mxu0 %v6005_v49 }
 0x953   : > { %5648 = vmatprep.subr.bf16.mxu0 %v6006_v53 }
 0x954   : > { %5921 = vrot.lane.b32.xlu0 %v5920_v46, %s6056_s26  ;;  %5916 = vrot.lane.b32.xlu1 %v5915_v30, %s6056_s26 }
 0x956   : > { %5649 = vmatpush3.bf16.msra.mxu0 %v6006_v53 }
 0x957   : > { %5650 = vmatprep.subr.bf16.mxu0 %v6007_v50 }
 0x95a   : > { %5651 = vmatpush3.bf16.msra.mxu0 %v6007_v50  ;;  %v6008_v50 = vld [vmem:[%s9674_s11 + $0x78] sm:$0xff]  }
 0x95b   : > { %5652 = vmatprep.subr.bf16.mxu0 %v6008_v50 }
 0x95e   : > { %5653 = vmatpush3.bf16.msra.mxu0 %v6008_v50 }
 0x95f   : > { %5658 = vmatprep.subr.bf16.mxu0 %v9409_v7 }
 0x99e   : > { %v5842_v4 = vpop.permute.xlu0 %5841  ;;  %v5837_v16 = vpop.permute.xlu1 %5836 }
 0x99f   : > { %v5844_v58 = vunpack.i.h.bf16 %v5842_v4  ;;  %v5843_v13 = vunpack.i.l.bf16 %v5842_v4  ;;  %v5839_v46 = vunpack.i.h.bf16 %v5837_v16  ;;  %v5838_v30 = vunpack.i.l.bf16 %v5837_v16 }
 0x9a0   : > { %v4521_v4 = vmax.f32 %v9230_v15, %v9296_v55 }
 0x9a1   : > { %v4594_v59 = vmax.f32 %v4518_v12, %v5844_v58  ;;  %v4580_v40 = vsel %vm670_vm0, %v5843_v13, %v5844_v58  ;;  %v4592_v49 = vmax.f32 %v4516_v51, %v5839_v46  ;;  %v4579_v28 = vsel %vm670_vm0, %v5838_v30, %v5839_v46 }
 0x9a2   : > { %v4593_v47 = vmax.f32 %v4517_v31, %v4580_v40  ;;  %v4591_v53 = vmax.f32 %v4515_v48, %v4579_v28  ;;  %v4520_v51 = vmax.f32 %v9187_v39, %v9286_v35  ;;  %v4519_v13 = vmax.f32 %v9175_v21, %v9300_v14 }
 0x9a3   : > { %v4600_v42 = vpack.c.bf16 %v4594_v59, %v4592_v49 }
 0x9a4   : > { %v4599_v27 = vpack.c.bf16 %v4593_v47, %v4591_v53 }
 0x9a5   : > { %4626 = vrot.lane.b32.xlu1 %v4600_v42, %s6063_s24 }
 0x9aa   : > { %v5857_v63 = vpop.permute.xlu0 %5856  ;;  %v5847_v12 = vpop.permute.xlu1 %5846 }
 0x9ab   : > { %v5859_v23 = vunpack.i.h.bf16 %v5857_v63  ;;  %v5858_v43 = vunpack.i.l.bf16 %v5857_v63  ;;  %v5849_v16 = vunpack.i.h.bf16 %v5847_v12  ;;  %v5848_v58 = vunpack.i.l.bf16 %v5847_v12 }
 0x9ad   : > { %v4598_v46 = vmax.f32 %v4522_v22, %v5859_v23  ;;  %v4582_v30 = vsel %vm670_vm0, %v5858_v43, %v5859_v23  ;;  %v4596_v31 = vmax.f32 %v4520_v51, %v5849_v16  ;;  %v4581_v55 = vsel %vm670_vm0, %v5848_v58, %v5849_v16 }
 0x9ae   : > { %v4597_v24 = vmax.f32 %v4521_v4, %v4582_v30  ;;  %v5862_v15 = vpop.permute.xlu0 %5861  ;;  %v4595_v48 = vmax.f32 %v4519_v13, %v4581_v55  ;;  %v5852_v59 = vpop.permute.xlu1 %5851 }
 0x9af   : > { %v5864_v39 = vunpack.i.h.bf16 %v5862_v15  ;;  %v5863_v35 = vunpack.i.l.bf16 %v5862_v15  ;;  %v4602_v21 = vpack.c.bf16 %v4598_v46, %v4596_v31  ;;  %v9413_v14 = vunpack.i.h.bf16 %v5852_v59 }
 0x9b0   : > { %v9415_v40 = vunpack.i.l.bf16 %v5852_v59  ;;  %v4601_v28 = vpack.c.bf16 %v4597_v24, %v4595_v48  ;;  %v5935_v48 = vpack.i.bf16 %v9102_v37, %v9037_v19 }
 0x9b1   : > { %v4915_v49 = vmax.f32 %v9206_v2, %v5863_v35  ;;  %v4901_v47 = vsel %vm542_vm12, %v9413_v14, %v5864_v39  ;;  %4630 = vrot.lane.b32.xlu0 %v4602_v21, %s6063_s24  ;;  %v4917_v23 = vmax.f32 %v9243_v52, %v5864_v39 }
 0x9b2   : > { %v4900_v53 = vsel %vm542_vm12, %v9415_v40, %v5863_v35  ;;  %v5872_v42 = vpop.permute.xlu0 %5871  ;;  %4628 = vrot.lane.b32.xlu1 %v4601_v28, %s6063_s24  ;;  %v9425_v22 = vpop.permute.xlu1 %5866  ;;  %v4916_v2 = vmax.f32 %v9240_v45, %v4901_v47 }
 0x9b3   : > { %v4914_v50 = vmax.f32 %v9194_v54, %v4900_v53  ;;  %v5873_v63 = vunpack.i.l.bf16 %v5872_v42  ;;  %v5868_v43 = vunpack.i.l.bf16 %v9425_v22  ;;  %v5874_v12 = vunpack.i.h.bf16 %v5872_v42 }
 0x9b4   : > { %v5869_v4 = vunpack.i.h.bf16 %v9425_v22  ;;  %v5930_v31 = vpack.i.bf16 %v4917_v23, %v4916_v2 }
 0x9b5   : > { %v5925_v51 = vpack.i.bf16 %v4915_v49, %v4914_v50  ;;  %v4393_v16 = vsel %vm542_vm12, %v5868_v43, %v5873_v63  ;;  %4624 = vrot.lane.b32.xlu0 %v4599_v27, %s6063_s24  ;;  %v4406_v55 = vmax.f32 %v9043_v17, %v5873_v63  ;;  %v5940_v17 = vpack.i.bf16 %v9221_v34, %v9166_v20  ;;  %s6068_s24 = smov 80  }
 0x9b6   : > { %v5882_v58 = vpop.permute.xlu0 %5881  ;;  %v9436_v46 = vpop.permute.xlu1 %5876  ;;  %v4394_v15 = vsel %vm542_vm12, %v5869_v4, %v5874_v12  ;;  %v4405_v27 = vmax.f32 %v9040_v11, %v4393_v16  ;;  %v4408_v21 = vmax.f32 %v9108_v8, %v5874_v12 }
 0x9b7   : > { %v5883_v13 = vunpack.i.l.bf16 %v5882_v58  ;;  %5926 = vrot.lane.b32.xlu1 %v5925_v51, %s6056_s26  ;;  %v5884_v52 = vunpack.i.h.bf16 %v5882_v58  ;;  %v5879_v30 = vunpack.i.h.bf16 %v9436_v46  ;;  %v5878_v24 = vunpack.i.l.bf16 %v9436_v46 }
 0x9b8   : > { %v4407_v11 = vmax.f32 %v9105_v56, %v4394_v15  ;;  %v5945_v50 = vpack.i.bf16 %v4406_v55, %v4405_v27 }
 0x9b9   : > { %v4395_v39 = vsel %vm542_vm12, %v5878_v24, %v5883_v13  ;;  %5931 = vrot.lane.b32.xlu0 %v5930_v31, %s6056_s26  ;;  %v4410_v49 = vmax.f32 %v9172_v6, %v5883_v13  ;;  %v4396_v28 = vsel %vm542_vm12, %v5879_v30, %v5884_v52  ;;  %v4412_v23 = vmax.f32 %v9227_v62, %v5884_v52  ;;  %v9830_v62 = vld [vmem:[#allocation24_spill] sm:$0xff] }
 0x9ba   : > { %v5892_v35 = vpop.permute.xlu0 %5891  ;;  %v5887_v59 = vpop.permute.xlu1 %5886  ;;  %v4409_v47 = vmax.f32 %v9169_v60, %v4395_v39  ;;  %v4411_v8 = vmax.f32 %v9224_v10, %v4396_v28  ;;  %v5950_v12 = vpack.i.bf16 %v4408_v21, %v4407_v11  ;;  %v5965_v10 = vpack.i.bf16 %v9151_v18, %v9830_v62 }
 0x9bb   : > { %5936 = vrot.lane.b32.xlu1 %v5935_v48, %s6051_s19  ;;  %v5893_v53 = vunpack.i.l.bf16 %v5892_v35  ;;  %v9461_v42 = vunpack.i.l.bf16 %v5887_v59  ;;  %v5894_v6 = vunpack.i.h.bf16 %v5892_v35  ;;  %v9467_v2 = vunpack.i.h.bf16 %v5887_v59 }
 0x9bc   : > { %v5955_v51 = vpack.i.bf16 %v4410_v49, %v4409_v47  ;;  %v5960_v27 = vpack.i.bf16 %v4412_v23, %v4411_v8  ;;  %v9831_v47 = vld [vmem:[#allocation26_spill] sm:$0xff] }
 0x9bd   : > { %5941 = vrot.lane.b32.xlu0 %v5940_v17, %s6051_s19  ;;  %v5169_v60 = vsel %vm542_vm12, %v9461_v42, %v5893_v53  ;;  %v5182_v52 = vmax.f32 %v9090_v38, %v5893_v53  ;;  %v5170_v48 = vsel %vm542_vm12, %v9467_v2, %v5894_v6  ;;  %v9832_v53 = vld [vmem:[#allocation18_spill] sm:$0xff] }
 0x9be   : > { %v5902_v63 = vpop.permute.xlu0 %5901  ;;  %v5897_v56 = vpop.permute.xlu1 %5896  ;;  %v5181_v39 = vmax.f32 %v9087_v61, %v5169_v60  ;;  %v5183_v23 = vmax.f32 %v9154_v33, %v5170_v48 }
 0x9bf   : > { %5946 = vrot.lane.b32.xlu1 %v5945_v50, %s6056_s26  ;;  %v5903_v16 = vunpack.i.l.bf16 %v5902_v63  ;;  %v9471_v58 = vunpack.i.l.bf16 %v5897_v56  ;;  %v5904_v17 = vunpack.i.h.bf16 %v5902_v63  ;;  %v9481_v21 = vunpack.i.h.bf16 %v5897_v56 }
 0x9c0   : > { %v5970_v50 = vpack.i.bf16 %v9832_v53, %v9831_v47  ;;  %v5184_v63 = vmax.f32 %v9157_v36, %v5894_v6 }
 0x9c1   : > { %5951 = vrot.lane.b32.xlu0 %v5950_v12, %s6056_s26  ;;  %v5171_v49 = vsel %vm542_vm12, %v9471_v58, %v5903_v16  ;;  %v5172_v36 = vsel %vm542_vm12, %v9481_v21, %v5904_v17 }
 0x9c2   : > { %v5912_v13 = vpop.permute.xlu0 %5911  ;;  %v5907_v15 = vpop.permute.xlu1 %5906  ;;  %v5185_v6 = vmax.f32 %v9212_v41, %v5171_v49 }
 0x9c3   : > { %v5914_v31 = vunpack.i.h.bf16 %v5912_v13  ;;  %v5913_v55 = vunpack.i.l.bf16 %v5912_v13  ;;  %5956 = vrot.lane.b32.xlu1 %v5955_v51, %s6056_s26  ;;  %v5909_v35 = vunpack.i.h.bf16 %v5907_v15  ;;  %v5908_v59 = vunpack.i.l.bf16 %v5907_v15 }
 0x9c4   : > { %v5975_v15 = vpack.i.bf16 %v5182_v52, %v5181_v39  ;;  %v4881_v39 = vmax.f32 %v9136_v29, %v9332_v25 }
 0x9c5   : > { %v9485_v11 = vsel %vm542_vm12, %v5914_v31, %v9413_v14  ;;  %v9489_v38 = vsel %vm542_vm12, %v5913_v55, %v9415_v40  ;;  %5961 = vrot.lane.b32.xlu0 %v5960_v27, %s6056_s26  ;;  %v4867_v60 = vsel %vm542_vm12, %v5909_v35, %v9332_v25  ;;  %v4866_v51 = vsel %vm542_vm12, %v5908_v59, %v9336_v32 }
 0x9c6   : > { %v5922_v28 = vpop.permute.xlu0 %5921  ;;  %v5917_v12 = vpop.permute.xlu1 %5916  ;;  %v5186_v55 = vmax.f32 %v9215_v5, %v5903_v16  ;;  %v4880_v48 = vmax.f32 %v9133_v44, %v4867_v60  ;;  %v4878_v35 = vmax.f32 %v9067_v9, %v4866_v51  ;;  %v5188_v5 = vmax.f32 %v9252_v26, %v5904_v17 }
 0x9c7   : > { %v5924_v8 = vunpack.i.h.bf16 %v5922_v28  ;;  %v5923_v56 = vunpack.i.l.bf16 %v5922_v28  ;;  %5966 = vrot.lane.b32.xlu1 %v5965_v10, %s6051_s19  ;;  %v5919_v13 = vunpack.i.h.bf16 %v5917_v12  ;;  %v5918_v31 = vunpack.i.l.bf16 %v5917_v12 }
 0x9c8   : > { %v5187_v16 = vmax.f32 %v9249_v1, %v5172_v36  ;;  %v5980_v59 = vpack.i.bf16 %v5184_v63, %v5183_v23  ;;  %v5985_v52 = vpack.i.bf16 %v5186_v55, %v5185_v6  ;;  %v4885_v36 = vmax.f32 %v9240_v45, %v9413_v14 }
 0x9c9   : > { %v4943_v27 = vsel %vm670_vm0, %v5923_v56, %v5924_v8  ;;  %v4942_v10 = vsel %vm670_vm0, %v5918_v31, %v5919_v13  ;;  %5971 = vrot.lane.b32.xlu0 %v5970_v50, %s6051_s19  ;;  %v4879_v50 = vmax.f32 %v9070_v57, %v9336_v32  ;;  %v4957_v9 = vmax.f32 %v4881_v39, %v5924_v8  ;;  %s6067_s19 = smov 96   ;;  %v6010_v8 = vld [vmem:[%s9674_s11 + $0x8] sm:$0xff]  }
 0x9ca   : > { %v4956_v28 = vmax.f32 %v4880_v48, %v4943_v27  ;;  %v4954_v49 = vmax.f32 %v4878_v35, %v4942_v10  ;;  %v5990_v56 = vpack.i.bf16 %v5188_v5, %v5187_v16  ;;  %v6011_v10 = vld [vmem:[%s9674_s11 + $0x10] sm:$0xff]   ;;  %v4884_v48 = vmax.f32 %v9237_v3, %v9485_v11  ;;  %v6012_v3 = vld [vmem:[%s9674_s11 + $0x18] sm:$0xff]  }
 0x9cb   : > { %5976 = vrot.lane.b32.xlu1 %v5975_v15, %s6056_s26  ;;  %v4955_v44 = vmax.f32 %v4879_v50, %v5919_v13  ;;  %v4883_v13 = vmax.f32 %v9194_v54, %v9415_v40  ;;  %v4882_v54 = vmax.f32 %v9191_v0, %v9489_v38 }
 0x9cc   : > { %v4962_v26 = vpack.c.bf16 %v4956_v28, %v4954_v49 }
 0x9cd   : > { %5981 = vrot.lane.b32.xlu0 %v5980_v59, %s6056_s26  ;;  %v4963_v17 = vpack.c.bf16 %v4957_v9, %v4955_v44 }
 0x9cf   : > { %5986 = vrot.lane.b32.xlu1 %v5985_v52, %s6056_s26 }
 0x9d1   : > { %5991 = vrot.lane.b32.xlu0 %v5990_v56, %s6056_s26 }
 0x9d3   : > { %4987 = vrot.lane.b32.xlu1 %v4962_v26, %s6067_s19 }
 0x9d5   : > { %4989 = vrot.lane.b32.xlu0 %v4963_v17, %s6067_s19 }
 0xa17   : > { %v4627_v29 = vpop.permute.xlu1 %4626 }
 0xa23   : > { %v4631_v25 = vpop.permute.xlu0 %4630 }
 0xa24   : > { %v4629_v63 = vpop.permute.xlu1 %4628 }
 0xa25   : > { %v4633_v12 = vsel %vm2848_vm13, %v4629_v63, %v4631_v25 }
 0xa27   : > { %v4625_v57 = vpop.permute.xlu0 %4624 }
 0xa28   : > { %v4632_v23 = vsel %vm2848_vm13, %v4625_v57, %v4627_v29 }
 0xa29   : > { %v5927_v32 = vpop.permute.xlu1 %5926  ;;  %5654 = vmatprep.mubr.bf16.mxu0 %v4632_v23 }
 0xa2a   : > { %v5929_v60 = vunpack.i.h.bf16 %v5927_v32  ;;  %v5928_v51 = vunpack.i.l.bf16 %v5927_v32  ;;  %5655 = vmatmul.mubr.bf16.vlgmr.msra.gmra.mrb[28].mxu0 %v4633_v12 }
 0xa2b   : > { %5659 = vmatpush3.bf16.msra.mxu0 %v9409_v7  ;;  %v5932_v31 = vpop.permute.xlu0 %5931 }
 0xa2c   : > { %v4944_v55 = vsel %vm670_vm0, %v5928_v51, %v5929_v60  ;;  %v5934_v6 = vunpack.i.h.bf16 %v5932_v31  ;;  %v5933_v15 = vunpack.i.l.bf16 %v5932_v31  ;;  %5660 = vmatprep.subr.bf16.mxu0 %v6010_v8  ;;  %v4959_v7 = vmax.f32 %v4883_v13, %v5929_v60 }
 0xa2d   : > { %v5937_v27 = vpop.permute.xlu1 %5936  ;;  %v4958_v14 = vmax.f32 %v4882_v54, %v4944_v55 }
 0xa2e   : > { %v4961_v40 = vmax.f32 %v4885_v36, %v5934_v6  ;;  %v4945_v35 = vsel %vm670_vm0, %v5933_v15, %v5934_v6  ;;  %v5939_v5 = vunpack.i.h.bf16 %v5937_v27  ;;  %v5938_v45 = vunpack.i.l.bf16 %v5937_v27  ;;  %v6015_v27 = vld [vmem:[%s9674_s11 + $0x30] sm:$0xff]  }
 0xa2f   : > { %v4960_v16 = vmax.f32 %v4884_v48, %v4945_v35  ;;  %5661 = vmatpush3.bf16.msra.mxu0 %v6010_v8  ;;  %v5942_v59 = vpop.permute.xlu0 %5941  ;;  %v6014_v8 = vld [vmem:[%s9674_s11 + $0x28] sm:$0xff]   ;;  %v5150_v36 = vmax.f32 %v9087_v61, %v9461_v42  ;;  %v5152_v15 = vmax.f32 %v9154_v33, %v9467_v2  ;;  %v5156_v33 = vmax.f32 %v9249_v1, %v9481_v21  ;;  %v6016_v1 = vld [vmem:[%s9674_s11 + $0x38] sm:$0xff]  }
 0xa30   : > { %v4965_v28 = vpack.c.bf16 %v4961_v40, %v4959_v7  ;;  %5662 = vmatprep.subr.bf16.mxu0 %v6011_v10  ;;  %v4370_v38 = vsel %vm542_vm12, %v5939_v5, %v5869_v4  ;;  %v4369_v39 = vsel %vm542_vm12, %v5938_v45, %v5868_v43  ;;  %v6013_v4 = vld [vmem:[%s9674_s11 + $0x20] sm:$0xff]   ;;  %v5944_v29 = vunpack.i.h.bf16 %v5942_v59 }
 0xa31   : > { %v5947_v49 = vpop.permute.xlu1 %5946  ;;  %v4964_v0 = vpack.c.bf16 %v4960_v16, %v4958_v14  ;;  %v4378_v22 = vmax.f32 %v9102_v37, %v4370_v38  ;;  %v4377_v43 = vmax.f32 %v9037_v19, %v4369_v39  ;;  %v5943_v32 = vunpack.i.l.bf16 %v5942_v59 }
 0xa32   : > { %v5949_v11 = vunpack.i.h.bf16 %v5947_v49  ;;  %v5948_v52 = vunpack.i.l.bf16 %v5947_v49  ;;  %4993 = vrot.lane.b32.xlu0 %v4965_v28, %s6067_s19  ;;  %v4372_v19 = vsel %vm542_vm12, %v5944_v29, %v5879_v30  ;;  %v5154_v30 = vmax.f32 %v9212_v41, %v9471_v58 }
 0xa33   : > { %5663 = vmatpush3.bf16.msra.mxu0 %v6011_v10  ;;  %v5952_v50 = vpop.permute.xlu0 %5951  ;;  %4991 = vrot.lane.b32.xlu1 %v4964_v0, %s6067_s19  ;;  %v4371_v55 = vsel %vm542_vm12, %v5943_v32, %v5878_v24  ;;  %v4380_v61 = vmax.f32 %v9221_v34, %v4372_v19  ;;  %v6020_v19 = vld [vmem:[%s9674_s11 + $0x98] sm:$0xff]   ;;  %s5586_s19 = sshll.u32 %s9834_s22, 5 }
 0xa34   : > { %v4437_v9 = vsel %vm670_vm0, %v5948_v52, %v5949_v11  ;;  %v5954_v44 = vunpack.i.h.bf16 %v5952_v50  ;;  %v5953_v56 = vunpack.i.l.bf16 %v5952_v50  ;;  %5664 = vmatprep.subr.bf16.mxu0 %v6012_v3  ;;  %v4379_v41 = vmax.f32 %v9166_v20, %v4371_v55  ;;  %v6024_v55 = vld [vmem:[%s9674_s11 + $0xb8] sm:$0xff]   ;;  %s410_s26 = scalar_lea.vmem %s9675_s12, %s5586_s19 }
 0xa35   : > { %v5957_v26 = vpop.permute.xlu1 %5956  ;;  %v4445_v63 = vmax.f32 %v4377_v43, %v4437_v9 }
 0xa36   : > { %v4438_v17 = vsel %vm670_vm0, %v5953_v56, %v5954_v44  ;;  %v5959_v40 = vunpack.i.h.bf16 %v5957_v26  ;;  %v5958_v35 = vunpack.i.l.bf16 %v5957_v26 }
 0xa37   : > { %5665 = vmatpush3.bf16.msra.mxu0 %v6012_v3  ;;  %v5962_v25 = vpop.permute.xlu0 %5961  ;;  %v4446_v57 = vmax.f32 %v4378_v22, %v4438_v17 }
 0xa38   : > { %5666 = vmatprep.subr.bf16.mxu0 %v6013_v4  ;;  %v5964_v37 = vunpack.i.h.bf16 %v5962_v25  ;;  %v5963_v13 = vunpack.i.l.bf16 %v5962_v25  ;;  %v4439_v0 = vsel %vm670_vm0, %v5958_v35, %v5959_v40 }
 0xa39   : > { %v5967_v23 = vpop.permute.xlu1 %5966  ;;  %v4449_v60 = vpack.c.bf16 %v4446_v57, %v4445_v63  ;;  %v4447_v43 = vmax.f32 %v4379_v41, %v4439_v0  ;;  %v6032_v41 = vld [vmem:[%s9674_s11 + $0xf8] sm:$0xff]  }
 0xa3a   : > { %v5969_v12 = vunpack.i.h.bf16 %v5967_v23  ;;  %v5968_v51 = vunpack.i.l.bf16 %v5967_v23  ;;  %v4440_v5 = vsel %vm670_vm0, %v5963_v13, %v5964_v37  ;;  %v6021_v37 = vld [vmem:[%s9674_s11 + $0xa0] sm:$0xff]   ;;  %v6022_v13 = vld [vmem:[%s9674_s11 + $0xa8] sm:$0xff]  }
 0xa3b   : > { %5667 = vmatpush3.bf16.msra.mxu0 %v6013_v4  ;;  %v5972_v31 = vpop.permute.xlu0 %5971  ;;  %5674 = vmatprep.mubr.bf16.mxu0 %v4449_v60  ;;  %v4448_v38 = vmax.f32 %v4380_v61, %v4440_v5  ;;  %v6018_v60 = vld [vmem:[%s9674_s11 + $0x88] sm:$0xff]  }
 0xa3c   : > { %5668 = vmatprep.subr.bf16.mxu0 %v6014_v8  ;;  %v5138_v46 = vsel %vm542_vm12, %v5969_v12, %v9467_v2  ;;  %v5974_v10 = vunpack.i.h.bf16 %v5972_v31  ;;  %v5137_v54 = vsel %vm542_vm12, %v5968_v51, %v9461_v42  ;;  %v5973_v7 = vunpack.i.l.bf16 %v5972_v31  ;;  %v6019_v51 = vld [vmem:[%s9674_s11 + $0x90] sm:$0xff]  }
 0xa3d   : > { %v5977_v6 = vpop.permute.xlu1 %5976  ;;  %v5151_v45 = vmax.f32 %v9151_v18, %v5138_v46  ;;  %v5149_v20 = vmax.f32 %v9830_v62, %v5137_v54  ;;  %v4450_v12 = vpack.c.bf16 %v4448_v38, %v4447_v43  ;;  %v6023_v31 = vld [vmem:[%s9674_s11 + $0xb0] sm:$0xff]  }
 0xa3e   : > { %v5979_v24 = vunpack.i.h.bf16 %v5977_v6  ;;  %v5978_v48 = vunpack.i.l.bf16 %v5977_v6  ;;  %v5140_v42 = vsel %vm542_vm12, %v5974_v10, %v9481_v21  ;;  %v5139_v18 = vsel %vm542_vm12, %v5973_v7, %v9471_v58  ;;  %v6017_v58 = vld [vmem:[%s9674_s11 + $0x80] sm:$0xff]   ;;  %v6027_v46 = vld [vmem:[%s9674_s11 + $0xd0] sm:$0xff]   ;;  %v6028_v10 = vld [vmem:[%s9674_s11 + $0xd8] sm:$0xff]  }
 0xa3f   : > { %5669 = vmatpush3.bf16.msra.mxu0 %v6014_v8  ;;  %v5982_v2 = vpop.permute.xlu0 %5981  ;;  %v5155_v26 = vmax.f32 %v9832_v53, %v5140_v42  ;;  %v5153_v4 = vmax.f32 %v9831_v47, %v5139_v18  ;;  %vm4995_vm12 = vcmask 785408   ;;  %v6031_v7 = vld [vmem:[%s9674_s11 + $0xf0] sm:$0xff]  }
 0xa40   : > { %v5213_v14 = vsel %vm670_vm0, %v5978_v48, %v5979_v24  ;;  %v5984_v34 = vunpack.i.h.bf16 %v5982_v2  ;;  %v5983_v16 = vunpack.i.l.bf16 %v5982_v2  ;;  %5670 = vmatprep.subr.bf16.mxu0 %v6015_v27  ;;  %v5226_v3 = vmax.f32 %v5150_v36, %v5979_v24  ;;  %v6025_v36 = vld [vmem:[%s9674_s11 + $0xc0] sm:$0xff]   ;;  %v6030_v48 = vld [vmem:[%s9674_s11 + $0xe8] sm:$0xff]  }
 0xa41   : > { %v5987_v59 = vpop.permute.xlu1 %5986  ;;  %v5225_v39 = vmax.f32 %v5149_v20, %v5213_v14  ;;  %v6029_v24 = vld [vmem:[%s9674_s11 + $0xe0] sm:$0xff]  }
 0xa42   : > { %v5989_v28 = vunpack.i.h.bf16 %v5987_v59  ;;  %v5988_v49 = vunpack.i.l.bf16 %v5987_v59  ;;  %v5228_v11 = vmax.f32 %v5152_v15, %v5984_v34  ;;  %v5214_v52 = vsel %vm670_vm0, %v5983_v16, %v5984_v34 }
 0xa43   : > { %v5227_v50 = vmax.f32 %v5151_v45, %v5214_v52  ;;  %5671 = vmatpush3.bf16.msra.mxu0 %v6015_v27  ;;  %v5992_v9 = vpop.permute.xlu0 %5991 }
 0xa44   : > { %v5234_v62 = vpack.c.bf16 %v5228_v11, %v5226_v3  ;;  %v5215_v44 = vsel %vm670_vm0, %v5988_v49, %v5989_v28  ;;  %v5994_v21 = vunpack.i.h.bf16 %v5992_v9  ;;  %v5993_v56 = vunpack.i.l.bf16 %v5992_v9  ;;  %5672 = vmatprep.subr.bf16.mxu0 %v6016_v1 }
 0xa45   : > { %v5233_v22 = vpack.c.bf16 %v5227_v50, %v5225_v39  ;;  %v5230_v17 = vmax.f32 %v5154_v30, %v5989_v28  ;;  %v5229_v63 = vmax.f32 %v5153_v4, %v5215_v44  ;;  %v4988_v32 = vpop.permute.xlu1 %4987  ;;  %v6026_v30 = vld [vmem:[%s9674_s11 + $0xc8] sm:$0xff]  }
 0xa46   : > { %v5232_v29 = vmax.f32 %v5156_v33, %v5994_v21  ;;  %v5216_v25 = vsel %vm670_vm0, %v5993_v56, %v5994_v21  ;;  %5260 = vrot.lane.b32.xlu0 %v5234_v62, %s6068_s24  ;;  %vm5266_vm0 = vcmask 654336  }
 0xa47   : > { %v5231_v57 = vmax.f32 %v5155_v26, %v5216_v25  ;;  %5673 = vmatpush3.bf16.msra.mxu0 %v6016_v1  ;;  %v4990_v23 = vpop.permute.xlu0 %4989  ;;  %5258 = vrot.lane.b32.xlu1 %v5233_v22, %s6068_s24 }
 0xa48   : > { %v5236_v8 = vpack.c.bf16 %v5232_v29, %v5230_v17  ;;  %v4996_v53 = vsel %vm4995_vm12, %v4988_v32, %v4990_v23  ;;  %5678 = vmatprep.subr.bf16.mxu0 %v6017_v58 }
 0xa49   : > { %v5235_v47 = vpack.c.bf16 %v5231_v57, %v5229_v63 }
 0xa4a   : > { %5675 = vmatmul.mubr.bf16.vlgmr.msra.gmra.mrb[28].mxu0 %v4450_v12  ;;  %5264 = vrot.lane.b32.xlu0 %v5236_v8, %s6068_s24 }
 0xa4b   : > { %5694 = vmatprep.mubr.bf16.mxu0 %v4996_v53  ;;  %5262 = vrot.lane.b32.xlu1 %v5235_v47, %s6068_s24 }
 0xa4c   : > { %5679 = vmatpush3.bf16.msra.mxu0 %v6017_v58 }
 0xa4d   : > { %5680 = vmatprep.subr.bf16.mxu0 %v6018_v60 }
 0xa50   : > { %5681 = vmatpush3.bf16.msra.mxu0 %v6018_v60 }
 0xa51   : > { %5682 = vmatprep.subr.bf16.mxu0 %v6019_v51 }
 0xa54   : > { %5683 = vmatpush3.bf16.msra.mxu0 %v6019_v51 }
 0xa55   : > { %5684 = vmatprep.subr.bf16.mxu0 %v6020_v19 }
 0xa58   : > { %5685 = vmatpush3.bf16.msra.mxu0 %v6020_v19 }
 0xa59   : > { %5686 = vmatprep.subr.bf16.mxu0 %v6021_v37 }
 0xa5c   : > { %5687 = vmatpush3.bf16.msra.mxu0 %v6021_v37 }
 0xa5d   : > { %5688 = vmatprep.subr.bf16.mxu0 %v6022_v13 }
 0xa60   : > { %5689 = vmatpush3.bf16.msra.mxu0 %v6022_v13 }
 0xa61   : > { %5690 = vmatprep.subr.bf16.mxu0 %v6023_v31 }
 0xa64   : > { %5691 = vmatpush3.bf16.msra.mxu0 %v6023_v31 }
 0xa65   : > { %5692 = vmatprep.subr.bf16.mxu0 %v6024_v55 }
 0xa68   : > { %5693 = vmatpush3.bf16.msra.mxu0 %v6024_v55 }
 0xa69   : > { %5698 = vmatprep.subr.bf16.mxu0 %v6025_v36 }
 0xaa4   : > { %v4994_v6 = vpop.permute.xlu0 %4993 }
 0xaa5   : > { %v4992_v15 = vpop.permute.xlu1 %4991 }
 0xaa6   : > { %v4997_v27 = vsel %vm4995_vm12, %v4992_v15, %v4994_v6 }
 0xaa7   : > { %5695 = vmatmul.mubr.bf16.vlgmr.msra.gmra.mrb[28].mxu0 %v4997_v27 }
 0xaa8   : > { %5699 = vmatpush3.bf16.msra.mxu0 %v6025_v36 }
 0xaa9   : > { %5700 = vmatprep.subr.bf16.mxu0 %v6026_v30 }
 0xaac   : > { %5701 = vmatpush3.bf16.msra.mxu0 %v6026_v30 }
 0xaad   : > { %5702 = vmatprep.subr.bf16.mxu0 %v6027_v46 }
 0xab0   : > { %5703 = vmatpush3.bf16.msra.mxu0 %v6027_v46 }
 0xab1   : > { %5704 = vmatprep.subr.bf16.mxu0 %v6028_v10 }
 0xab4   : > { %5705 = vmatpush3.bf16.msra.mxu0 %v6028_v10 }
 0xab5   : > { %5706 = vmatprep.subr.bf16.mxu0 %v6029_v24 }
 0xab8   : > { %5707 = vmatpush3.bf16.msra.mxu0 %v6029_v24  ;;  %v5261_v61 = vpop.permute.xlu0 %5260 }
 0xab9   : > { %v5259_v54 = vpop.permute.xlu1 %5258  ;;  %5708 = vmatprep.subr.bf16.mxu0 %v6030_v48 }
 0xaba   : > { %v5267_v33 = vsel %vm5266_vm0, %v5259_v54, %v5261_v61 }
 0xabb   : > { %5714 = vmatprep.mubr.bf16.mxu0 %v5267_v33 }
 0xabc   : > { %5709 = vmatpush3.bf16.msra.mxu0 %v6030_v48  ;;  %v5265_v40 = vpop.permute.xlu0 %5264 }
 0xabd   : > { %5710 = vmatprep.subr.bf16.mxu0 %v6031_v7  ;;  %v5263_v35 = vpop.permute.xlu1 %5262 }
 0xabe   : > { %v5268_v5 = vsel %vm5266_vm0, %v5263_v35, %v5265_v40 }
 0xac0   : > { %5711 = vmatpush3.bf16.msra.mxu0 %v6031_v7 }
 0xac1   : > { %5712 = vmatprep.subr.bf16.mxu0 %v6032_v41 }
 0xac4   : > { %5713 = vmatpush3.bf16.msra.mxu0 %v6032_v41 }
 0xac7   : > { %5715 = vmatmul.mubr.bf16.vlgmr.msra.gmra.mrb[28].mxu0 %v5268_v5 }
 0xb9a   : > { %v5716_v2 = vpop.f32.mrb[28].mxu0 }
 0xb9b   : > { %5374 = vst [vmem:[%s410_s26 + $0x10] sm:$0xff] %v5716_v2  ;;  %v5353_v45 = vpop.f32.mrb[29].mxu0 }
 0xb9c   : > { %5372 = vst [vmem:[%s410_s26] sm:$0xff] %v5353_v45  ;;  %v5717_v14 = vpop.f32.mrb[30].mxu0 }
 0xb9d   : > { %5375 = vst [vmem:[%s410_s26 + $0x18] sm:$0xff] %v5717_v14  ;;  %v5356_v34 = vpop.f32.mrb[31].mxu0 }
 0xb9e   : > { %5373 = vst [vmem:[%s410_s26 + $0x8] sm:$0xff] %v5356_v34 }
 0xb9f PF: > { %s22_s21 = sadd.s32 1, %s6047_s21  }
 0xba0   : > { %p19_p4 = scmp.ge.s32.totalorder %s22_s21, 4  }
 0xba2   :  { %21 = sbr.rel (!%p19_p4) target bundleno = 1 (0x1), region = 135 }

// kernel: pallas_forward.3
= control target key start
LH: loop header
LB: loop body
LE: loop exit
PB: predicated region body
PF: predicated region fallthrough
CT: control target
= control target key end

     0   :  { %v2960_v47 = vmov 1983009808   ;;  %v554_v49 = vlaneseq  ;;  %s4645_s0 = inlined_call_operand.vmem [shape: f32[2,4096], index: 0, kind: input, shape index: {}]   ;;  %s4646_s1 = inlined_call_operand.vmem [shape: f32[4096,128], index: 1, kind: input, shape index: {}]   ;;  %s4647_s2 = inlined_call_operand.vmem [shape: f32[1,128], index: 2, kind: input, shape index: {}]   ;;  %s4648_s3 = inlined_call_operand.hbm [shape: f32[2,128], index: 3, kind: output, shape index: {}]  }
   0x1   :  { %v39_v0 = vld [vmem:[%s4646_s1 + $0x80] sm:$0xff]  ;;  %v40_v1 = vld [vmem:[%s4646_s1 + $0x88] sm:$0xff]  ;;  %v41_v11 = vld [vmem:[%s4646_s1 + $0x90] sm:$0xff]  ;;  %v552_v48 = vunpack.c.l.s4 %v2960_v47 }
   0x2   :  { %v23_v2 = vld [vmem:[%s4646_s1] sm:$0xff]  ;;  %v2414_v3 = vpack.c.bf16 %v40_v1, %v39_v0  ;;  %v24_v4 = vld [vmem:[%s4646_s1 + $0x8] sm:$0xff]  ;;  %v42_v13 = vld [vmem:[%s4646_s1 + $0x98] sm:$0xff]  ;;  %v555_v0 = vshrl.u32 %v554_v49, 7 }
   0x3   :  { %v71_v5 = vld [vmem:[%s4646_s1 + $0x180] sm:$0xff]  ;;  %v72_v6 = vld [vmem:[%s4646_s1 + $0x188] sm:$0xff]  ;;  %v2416_v7 = vpack.c.bf16 %v24_v4, %v23_v2  ;;  %v25_v14 = vld [vmem:[%s4646_s1 + $0x10] sm:$0xff]  ;;  %v2418_v16 = vpack.c.bf16 %v42_v13, %v41_v11  ;;  %v553_v63 = vunpack.c.0.s8 %v552_v48 }
   0x4   :  { %v2446_v8 = vpack.c.bf16 %v72_v6, %v71_v5  ;;  %v55_v9 = vld [vmem:[%s4646_s1 + $0x100] sm:$0xff]  ;;  %v56_v10 = vld [vmem:[%s4646_s1 + $0x108] sm:$0xff]  ;;  %2415 = vmatprep.subr.bf16.mxu0 %v2414_v3  ;;  %v26_v15 = vld [vmem:[%s4646_s1 + $0x18] sm:$0xff] }
   0x5   :  { %v2448_v12 = vpack.c.bf16 %v56_v10, %v55_v9  ;;  %2417 = vmatpush3.bf16.msra.mxu0 %v2416_v7  ;;  %v2420_v17 = vpack.c.bf16 %v26_v15, %v25_v14  ;;  %v73_v18 = vld [vmem:[%s4646_s1 + $0x190] sm:$0xff]  ;;  %v74_v19 = vld [vmem:[%s4646_s1 + $0x198] sm:$0xff]  ;;  %v43_v23 = vld [vmem:[%s4646_s1 + $0xa0] sm:$0xff]  ;;  %v3132_v13 = vsub.s32 %v553_v63, %v555_v0 }
   0x6   :  { %2447 = vmatprep.subr.bf16.mxu1 %v2446_v8  ;;  %v57_v20 = vld [vmem:[%s4646_s1 + $0x110] sm:$0xff]  ;;  %v2450_v21 = vpack.c.bf16 %v74_v19, %v73_v18  ;;  %v58_v22 = vld [vmem:[%s4646_s1 + $0x118] sm:$0xff]  ;;  %v44_v24 = vld [vmem:[%s4646_s1 + $0xa8] sm:$0xff]  ;;  %2419 = vmatprep.subr.bf16.mxu0 %v2418_v16 }
   0x7   :  { %2449 = vmatpush3.bf16.msra.mxu1 %v2448_v12  ;;  %v2452_v25 = vpack.c.bf16 %v58_v22, %v57_v20  ;;  %v2422_v26 = vpack.c.bf16 %v44_v24, %v43_v23  ;;  %v27_v27 = vld [vmem:[%s4646_s1 + $0x20] sm:$0xff]  ;;  %v28_v28 = vld [vmem:[%s4646_s1 + $0x28] sm:$0xff]  ;;  %v45_v35 = vld [vmem:[%s4646_s1 + $0xb0] sm:$0xff] }
   0x8   :  { %v75_v29 = vld [vmem:[%s4646_s1 + $0x1a0] sm:$0xff]  ;;  %2451 = vmatprep.subr.bf16.mxu1 %v2450_v21  ;;  %v76_v30 = vld [vmem:[%s4646_s1 + $0x1a8] sm:$0xff]  ;;  %v2424_v33 = vpack.c.bf16 %v28_v28, %v27_v27  ;;  %v46_v36 = vld [vmem:[%s4646_s1 + $0xb8] sm:$0xff] }
   0x9   :  { %v59_v31 = vld [vmem:[%s4646_s1 + $0x120] sm:$0xff]  ;;  %v60_v32 = vld [vmem:[%s4646_s1 + $0x128] sm:$0xff]  ;;  %2421 = vmatpush3.bf16.msra.mxu0 %v2420_v17  ;;  %v2454_v34 = vpack.c.bf16 %v76_v30, %v75_v29  ;;  %v29_v37 = vld [vmem:[%s4646_s1 + $0x30] sm:$0xff]  ;;  %v2426_v39 = vpack.c.bf16 %v46_v36, %v45_v35 }
   0xa   :  { %2423 = vmatprep.subr.bf16.mxu0 %v2422_v26  ;;  %v2456_v38 = vpack.c.bf16 %v60_v32, %v59_v31  ;;  %v30_v40 = vld [vmem:[%s4646_s1 + $0x38] sm:$0xff]  ;;  %v77_v41 = vld [vmem:[%s4646_s1 + $0x1b0] sm:$0xff]  ;;  %v47_v46 = vld [vmem:[%s4646_s1 + $0xc0] sm:$0xff] }
   0xb   :  { %2453 = vmatpush3.bf16.msra.mxu1 %v2452_v25  ;;  %v78_v42 = vld [vmem:[%s4646_s1 + $0x1b8] sm:$0xff]  ;;  %v61_v44 = vld [vmem:[%s4646_s1 + $0x130] sm:$0xff]  ;;  %v48_v50 = vld [vmem:[%s4646_s1 + $0xc8] sm:$0xff]  ;;  %v2428_v51 = vpack.c.bf16 %v30_v40, %v29_v37 }
   0xc   :  { %2455 = vmatprep.subr.bf16.mxu1 %v2454_v34  ;;  %v2458_v43 = vpack.c.bf16 %v78_v42, %v77_v41  ;;  %v62_v45 = vld [vmem:[%s4646_s1 + $0x138] sm:$0xff]  ;;  %v79_v52 = vld [vmem:[%s4646_s1 + $0x1c0] sm:$0xff]  ;;  %v80_v53 = vld [vmem:[%s4646_s1 + $0x1c8] sm:$0xff]  ;;  %v2430_v55 = vpack.c.bf16 %v48_v50, %v47_v46 }
   0xd   :  { %2425 = vmatpush3.bf16.msra.mxu0 %v2424_v33  ;;  %v2460_v54 = vpack.c.bf16 %v62_v45, %v61_v44  ;;  %v31_v56 = vld [vmem:[%s4646_s1 + $0x40] sm:$0xff]  ;;  %v32_v57 = vld [vmem:[%s4646_s1 + $0x48] sm:$0xff]  ;;  %v2462_v59 = vpack.c.bf16 %v80_v53, %v79_v52  ;;  %v49_v61 = vld [vmem:[%s4646_s1 + $0xd0] sm:$0xff] }
   0xe   :  { %2427 = vmatprep.subr.bf16.mxu0 %v2426_v39  ;;  %v63_v58 = vld [vmem:[%s4646_s1 + $0x140] sm:$0xff]  ;;  %v64_v60 = vld [vmem:[%s4646_s1 + $0x148] sm:$0xff]  ;;  %v50_v62 = vld [vmem:[%s4646_s1 + $0xd8] sm:$0xff]  ;;  %v2432_v3 = vpack.c.bf16 %v32_v57, %v31_v56 }
   0xf   :  { %2457 = vmatpush3.bf16.msra.mxu1 %v2456_v38  ;;  %v81_v1 = vld [vmem:[%s4646_s1 + $0x1d0] sm:$0xff]  ;;  %v82_v2 = vld [vmem:[%s4646_s1 + $0x1d8] sm:$0xff]  ;;  %v2464_v4 = vpack.c.bf16 %v64_v60, %v63_v58  ;;  %v2434_v5 = vpack.c.bf16 %v50_v62, %v49_v61  ;;  %v51_v11 = vld [vmem:[%s4646_s1 + $0xe0] sm:$0xff] }
  0x10   :  { %2459 = vmatprep.subr.bf16.mxu1 %v2458_v43  ;;  %v33_v6 = vld [vmem:[%s4646_s1 + $0x50] sm:$0xff]  ;;  %v34_v7 = vld [vmem:[%s4646_s1 + $0x58] sm:$0xff]  ;;  %v2466_v9 = vpack.c.bf16 %v82_v2, %v81_v1  ;;  %v52_v12 = vld [vmem:[%s4646_s1 + $0xe8] sm:$0xff] }
  0x11   :  { %2429 = vmatpush3.bf16.msra.mxu0 %v2428_v51  ;;  %v65_v8 = vld [vmem:[%s4646_s1 + $0x150] sm:$0xff]  ;;  %v66_v10 = vld [vmem:[%s4646_s1 + $0x158] sm:$0xff]  ;;  %v83_v14 = vld [vmem:[%s4646_s1 + $0x1e0] sm:$0xff]  ;;  %v2436_v16 = vpack.c.bf16 %v34_v7, %v33_v6  ;;  %v2438_v19 = vpack.c.bf16 %v52_v12, %v51_v11 }
  0x12   :  { %2431 = vmatprep.subr.bf16.mxu0 %v2430_v55  ;;  %v84_v15 = vld [vmem:[%s4646_s1 + $0x1e8] sm:$0xff]  ;;  %v35_v17 = vld [vmem:[%s4646_s1 + $0x60] sm:$0xff]  ;;  %v2468_v18 = vpack.c.bf16 %v66_v10, %v65_v8  ;;  %v53_v25 = vld [vmem:[%s4646_s1 + $0xf0] sm:$0xff] }
  0x13   :  { %2461 = vmatpush3.bf16.msra.mxu1 %v2460_v54  ;;  %v36_v20 = vld [vmem:[%s4646_s1 + $0x68] sm:$0xff]  ;;  %v67_v21 = vld [vmem:[%s4646_s1 + $0x160] sm:$0xff]  ;;  %v2470_v23 = vpack.c.bf16 %v84_v15, %v83_v14  ;;  %v54_v26 = vld [vmem:[%s4646_s1 + $0xf8] sm:$0xff] }
  0x14   :  { %2463 = vmatprep.subr.bf16.mxu1 %v2462_v59  ;;  %v15_v22 = vld [vmem:[%s4645_s0] sm:$0xff]  ;;  %v68_v24 = vld [vmem:[%s4646_s1 + $0x168] sm:$0xff]  ;;  %v85_v29 = vld [vmem:[%s4646_s1 + $0x1f0] sm:$0xff]  ;;  %v2440_v31 = vpack.c.bf16 %v36_v20, %v35_v17  ;;  %v2442_v35 = vpack.c.bf16 %v54_v26, %v53_v25 }
  0x15   :  { %2433 = vmatpush3.bf16.msra.mxu0 %v2432_v3  ;;  %v557_v27 = vrot.slane %v15_v22, %v3132_v13  ;;  %v550_v28 = vcombine.high %v15_v22, %v15_v22  ;;  %v86_v30 = vld [vmem:[%s4646_s1 + $0x1f8] sm:$0xff]  ;;  %v2472_v34 = vpack.c.bf16 %v68_v24, %v67_v21  ;;  %v37_v36 = vld [vmem:[%s4646_s1 + $0x70] sm:$0xff]  ;;  %v103_v41 = vld [vmem:[%s4646_s1 + $0x280] sm:$0xff] }
  0x16   :  { %2435 = vmatprep.subr.bf16.mxu0 %v2434_v5  ;;  %v38_v37 = vld [vmem:[%s4646_s1 + $0x78] sm:$0xff]  ;;  %v69_v38 = vld [vmem:[%s4646_s1 + $0x170] sm:$0xff]  ;;  %v2474_v39 = vpack.c.bf16 %v86_v30, %v85_v29  ;;  %v104_v42 = vld [vmem:[%s4646_s1 + $0x288] sm:$0xff] }
  0x17   :  { %2465 = vmatpush3.bf16.msra.mxu1 %v2464_v4  ;;  %v565_v32 = vcombine.high %v557_v27, %v557_v27  ;;  %v564_v33 = vrot.slane %v550_v28, %v3132_v13  ;;  %v70_v40 = vld [vmem:[%s4646_s1 + $0x178] sm:$0xff]  ;;  %v135_v44 = vld [vmem:[%s4646_s1 + $0x380] sm:$0xff]  ;;  %v136_v45 = vld [vmem:[%s4646_s1 + $0x388] sm:$0xff]  ;;  %v2444_v46 = vpack.c.bf16 %v38_v37, %v37_v36  ;;  %v2478_v48 = vpack.c.bf16 %v104_v42, %v103_v41 }
  0x18   :  { %2467 = vmatprep.subr.bf16.mxu1 %v2466_v9  ;;  %v2476_v47 = vpack.c.bf16 %v70_v40, %v69_v38  ;;  %v87_v49 = vld [vmem:[%s4646_s1 + $0x200] sm:$0xff]  ;;  %v88_v50 = vld [vmem:[%s4646_s1 + $0x208] sm:$0xff]  ;;  %v2510_v52 = vpack.c.bf16 %v136_v45, %v135_v44  ;;  %v105_v54 = vld [vmem:[%s4646_s1 + $0x290] sm:$0xff] }
  0x19   :  { %2437 = vmatpush3.bf16.msra.mxu0 %v2436_v16  ;;  %782 = vmatprep.mubr.f32.mxu0 %v565_v32  ;;  %v566_v43 = vcombine.high %v564_v33, %v564_v33  ;;  %v119_v51 = vld [vmem:[%s4646_s1 + $0x300] sm:$0xff]  ;;  %v120_v53 = vld [vmem:[%s4646_s1 + $0x308] sm:$0xff]  ;;  %v106_v55 = vld [vmem:[%s4646_s1 + $0x298] sm:$0xff]  ;;  %v2480_v58 = vpack.c.bf16 %v88_v50, %v87_v49 }
  0x1a   :  { %2439 = vmatprep.subr.bf16.mxu0 %v2438_v19  ;;  %v137_v56 = vld [vmem:[%s4646_s1 + $0x390] sm:$0xff]  ;;  %v138_v57 = vld [vmem:[%s4646_s1 + $0x398] sm:$0xff]  ;;  %v2512_v59 = vpack.c.bf16 %v120_v53, %v119_v51  ;;  %v2482_v60 = vpack.c.bf16 %v106_v55, %v105_v54  ;;  %v107_v2 = vld [vmem:[%s4646_s1 + $0x2a0] sm:$0xff] }
  0x1b   :  { %2469 = vmatpush3.bf16.msra.mxu1 %v2468_v18  ;;  %852 = vmatprep.mubr.f32.mxu1 %v566_v43  ;;  %v89_v61 = vld [vmem:[%s4646_s1 + $0x210] sm:$0xff]  ;;  %v90_v62 = vld [vmem:[%s4646_s1 + $0x218] sm:$0xff]  ;;  %v2514_v0 = vpack.c.bf16 %v138_v57, %v137_v56  ;;  %v108_v3 = vld [vmem:[%s4646_s1 + $0x2a8] sm:$0xff] }
  0x1c   :  { %2471 = vmatprep.subr.bf16.mxu1 %v2470_v23  ;;  %v121_v63 = vld [vmem:[%s4646_s1 + $0x310] sm:$0xff]  ;;  %v122_v1 = vld [vmem:[%s4646_s1 + $0x318] sm:$0xff]  ;;  %v139_v4 = vld [vmem:[%s4646_s1 + $0x3a0] sm:$0xff]  ;;  %v2484_v6 = vpack.c.bf16 %v90_v62, %v89_v61  ;;  %v2486_v8 = vpack.c.bf16 %v108_v3, %v107_v2 }
  0x1d   :  { %2441 = vmatpush3.bf16.msra.mxu0 %v2440_v31  ;;  %v140_v5 = vld [vmem:[%s4646_s1 + $0x3a8] sm:$0xff]  ;;  %v2516_v7 = vpack.c.bf16 %v122_v1, %v121_v63  ;;  %v91_v9 = vld [vmem:[%s4646_s1 + $0x220] sm:$0xff]  ;;  %v109_v15 = vld [vmem:[%s4646_s1 + $0x2b0] sm:$0xff] }
  0x1e   :  { %2443 = vmatprep.subr.bf16.mxu0 %v2442_v35  ;;  %v92_v10 = vld [vmem:[%s4646_s1 + $0x228] sm:$0xff]  ;;  %v123_v11 = vld [vmem:[%s4646_s1 + $0x320] sm:$0xff]  ;;  %v2518_v12 = vpack.c.bf16 %v140_v5, %v139_v4  ;;  %v110_v16 = vld [vmem:[%s4646_s1 + $0x2b8] sm:$0xff] }
  0x1f   :  { %2473 = vmatpush3.bf16.msra.mxu1 %v2472_v34  ;;  %v124_v14 = vld [vmem:[%s4646_s1 + $0x328] sm:$0xff]  ;;  %v141_v17 = vld [vmem:[%s4646_s1 + $0x3b0] sm:$0xff]  ;;  %v142_v18 = vld [vmem:[%s4646_s1 + $0x3b8] sm:$0xff]  ;;  %v2488_v19 = vpack.c.bf16 %v92_v10, %v91_v9  ;;  %v2490_v21 = vpack.c.bf16 %v110_v16, %v109_v15 }
  0x20   :  { %2475 = vmatprep.subr.bf16.mxu1 %v2474_v39  ;;  %v2520_v20 = vpack.c.bf16 %v124_v14, %v123_v11  ;;  %v93_v22 = vld [vmem:[%s4646_s1 + $0x230] sm:$0xff]  ;;  %v94_v23 = vld [vmem:[%s4646_s1 + $0x238] sm:$0xff]  ;;  %v2522_v25 = vpack.c.bf16 %v142_v18, %v141_v17  ;;  %v112_v28 = vld [vmem:[%s4646_s1 + $0x2c8] sm:$0xff] }
  0x21   :  { %2445 = vmatpush3.bf16.msra.mxu0 %v2444_v46  ;;  %v125_v24 = vld [vmem:[%s4646_s1 + $0x330] sm:$0xff]  ;;  %v126_v26 = vld [vmem:[%s4646_s1 + $0x338] sm:$0xff]  ;;  %v143_v29 = vld [vmem:[%s4646_s1 + $0x3c0] sm:$0xff]  ;;  %v2492_v32 = vpack.c.bf16 %v94_v23, %v93_v22 }
  0x22   :  { %2479 = vmatprep.subr.bf16.mxu0 %v2478_v48  ;;  %v144_v30 = vld [vmem:[%s4646_s1 + $0x3c8] sm:$0xff]  ;;  %v2524_v35 = vpack.c.bf16 %v126_v26, %v125_v24  ;;  %v95_v37 = vld [vmem:[%s4646_s1 + $0x240] sm:$0xff]  ;;  %v113_v42 = vld [vmem:[%s4646_s1 + $0x2d0] sm:$0xff] }
  0x23   :  { %2477 = vmatpush3.bf16.msra.mxu1 %v2476_v47  ;;  %v16_v31 = vld [vmem:[%s4645_s0 + $0x8] sm:$0xff]  ;;  %v127_v39 = vld [vmem:[%s4646_s1 + $0x340] sm:$0xff]  ;;  %v2526_v40 = vpack.c.bf16 %v144_v30, %v143_v29  ;;  %v114_v43 = vld [vmem:[%s4646_s1 + $0x2d8] sm:$0xff] }
  0x24   :  { %2511 = vmatprep.subr.bf16.mxu1 %v2510_v52  ;;  %783 = vmatmul.mubr.f32.vlgmr.msra.gmra.mrb[0].mxu0 %v557_v27  ;;  %v111_v27 = vld [vmem:[%s4646_s1 + $0x2c0] sm:$0xff]  ;;  %v567_v34 = vcombine.high %v16_v31, %v16_v31  ;;  %v96_v38 = vld [vmem:[%s4646_s1 + $0x248] sm:$0xff]  ;;  %v145_v46 = vld [vmem:[%s4646_s1 + $0x3d0] sm:$0xff]  ;;  %v2498_v51 = vpack.c.bf16 %v114_v43, %v113_v42 }
  0x25   :  { %2481 = vmatpush3.bf16.msra.mxu0 %v2480_v58  ;;  %v2494_v36 = vpack.c.bf16 %v112_v28, %v111_v27  ;;  %v128_v41 = vld [vmem:[%s4646_s1 + $0x348] sm:$0xff]  ;;  %v146_v47 = vld [vmem:[%s4646_s1 + $0x3d8] sm:$0xff]  ;;  %v2496_v48 = vpack.c.bf16 %v96_v38, %v95_v37  ;;  %v97_v52 = vld [vmem:[%s4646_s1 + $0x250] sm:$0xff] }
  0x26   :  { %853 = vmatmul.mubr.f32.vlgmr.msra.gmra.mrb[0].mxu1 %v564_v33  ;;  %2483 = vmatprep.subr.bf16.mxu0 %v2482_v60  ;;  %v3293_v33 = vrot.slane %v16_v31, %v3132_v13  ;;  %v3316_v45 = vrot.slane %v567_v34, %v3132_v13  ;;  %v2528_v50 = vpack.c.bf16 %v128_v41, %v127_v39  ;;  %v98_v53 = vld [vmem:[%s4646_s1 + $0x258] sm:$0xff]  ;;  %v129_v54 = vld [vmem:[%s4646_s1 + $0x350] sm:$0xff]  ;;  %v115_v57 = vld [vmem:[%s4646_s1 + $0x2e0] sm:$0xff] }
  0x27   :  { %2513 = vmatpush3.bf16.msra.mxu1 %v2512_v59  ;;  %v2530_v55 = vpack.c.bf16 %v146_v47, %v145_v46  ;;  %v130_v56 = vld [vmem:[%s4646_s1 + $0x358] sm:$0xff]  ;;  %v116_v58 = vld [vmem:[%s4646_s1 + $0x2e8] sm:$0xff]  ;;  %v147_v59 = vld [vmem:[%s4646_s1 + $0x3e0] sm:$0xff]  ;;  %v2500_v61 = vpack.c.bf16 %v98_v53, %v97_v52 }
  0x28   :  { %2515 = vmatprep.subr.bf16.mxu1 %v2514_v0  ;;  %v582_v44 = vcombine.high %v3293_v33, %v3293_v33  ;;  %v583_v49 = vcombine.high %v3316_v45, %v3316_v45  ;;  %v148_v60 = vld [vmem:[%s4646_s1 + $0x3e8] sm:$0xff]  ;;  %v2532_v62 = vpack.c.bf16 %v130_v56, %v129_v54  ;;  %v2502_v63 = vpack.c.bf16 %v116_v58, %v115_v57  ;;  %v99_v0 = vld [vmem:[%s4646_s1 + $0x260] sm:$0xff]  ;;  %v117_v5 = vld [vmem:[%s4646_s1 + $0x2f0] sm:$0xff] }
  0x29   :  { %2485 = vmatpush3.bf16.msra.mxu0 %v2484_v6  ;;  %v100_v1 = vld [vmem:[%s4646_s1 + $0x268] sm:$0xff]  ;;  %v131_v2 = vld [vmem:[%s4646_s1 + $0x360] sm:$0xff]  ;;  %v2534_v3 = vpack.c.bf16 %v148_v60, %v147_v59  ;;  %v118_v6 = vld [vmem:[%s4646_s1 + $0x2f8] sm:$0xff] }
  0x2a   :  { %2487 = vmatprep.subr.bf16.mxu0 %v2486_v8  ;;  %922 = vmatprep.mubr.f32.mxu0 %v582_v44  ;;  %v132_v4 = vld [vmem:[%s4646_s1 + $0x368] sm:$0xff]  ;;  %v150_v8 = vld [vmem:[%s4646_s1 + $0x3f8] sm:$0xff]  ;;  %v2504_v9 = vpack.c.bf16 %v100_v1, %v99_v0  ;;  %v2506_v11 = vpack.c.bf16 %v118_v6, %v117_v5  ;;  %v133_v15 = vld [vmem:[%s4646_s1 + $0x370] sm:$0xff] }
  0x2b   :  { %2517 = vmatpush3.bf16.msra.mxu1 %v2516_v7  ;;  %992 = vmatprep.mubr.f32.mxu1 %v583_v49  ;;  %v149_v7 = vld [vmem:[%s4646_s1 + $0x3f0] sm:$0xff]  ;;  %v2536_v10 = vpack.c.bf16 %v132_v4, %v131_v2  ;;  %v102_v14 = vld [vmem:[%s4646_s1 + $0x278] sm:$0xff]  ;;  %v167_v18 = vld [vmem:[%s4646_s1 + $0x480] sm:$0xff] }
  0x2c   :  { %2519 = vmatprep.subr.bf16.mxu1 %v2518_v12  ;;  %v101_v12 = vld [vmem:[%s4646_s1 + $0x270] sm:$0xff]  ;;  %v2538_v16 = vpack.c.bf16 %v150_v8, %v149_v7  ;;  %v134_v17 = vld [vmem:[%s4646_s1 + $0x378] sm:$0xff]  ;;  %v151_v23 = vld [vmem:[%s4646_s1 + $0x400] sm:$0xff] }
  0x2d   :  { %2489 = vmatpush3.bf16.msra.mxu0 %v2488_v19  ;;  %v168_v19 = vld [vmem:[%s4646_s1 + $0x488] sm:$0xff]  ;;  %v2508_v22 = vpack.c.bf16 %v102_v14, %v101_v12  ;;  %v2540_v24 = vpack.c.bf16 %v134_v17, %v133_v15  ;;  %v183_v27 = vld [vmem:[%s4646_s1 + $0x500] sm:$0xff]  ;;  %v169_v30 = vld [vmem:[%s4646_s1 + $0x490] sm:$0xff] }
  0x2e   :  { %2491 = vmatprep.subr.bf16.mxu0 %v2490_v21  ;;  %v200_v21 = vld [vmem:[%s4646_s1 + $0x588] sm:$0xff]  ;;  %v170_v31 = vld [vmem:[%s4646_s1 + $0x498] sm:$0xff]  ;;  %v17_v37 = vld [vmem:[%s4645_s0 + $0x10] sm:$0xff] }
  0x2f   :  { %2521 = vmatpush3.bf16.msra.mxu1 %v2520_v20  ;;  %v199_v20 = vld [vmem:[%s4646_s1 + $0x580] sm:$0xff]  ;;  %v152_v26 = vld [vmem:[%s4646_s1 + $0x408] sm:$0xff]  ;;  %v202_v34 = vld [vmem:[%s4646_s1 + $0x598] sm:$0xff]  ;;  %v2546_v38 = vpack.c.bf16 %v170_v31, %v169_v30  ;;  %v3435_v42 = vrot.slane %v17_v37, %v3132_v13  ;;  %v584_v43 = vcombine.high %v17_v37, %v17_v37 }
  0x30   :  { %2523 = vmatprep.subr.bf16.mxu1 %v2522_v25  ;;  %v2542_v25 = vpack.c.bf16 %v168_v19, %v167_v18  ;;  %v184_v28 = vld [vmem:[%s4646_s1 + $0x508] sm:$0xff]  ;;  %v2574_v29 = vpack.c.bf16 %v200_v21, %v199_v20  ;;  %v153_v39 = vld [vmem:[%s4646_s1 + $0x410] sm:$0xff]  ;;  %v186_v46 = vld [vmem:[%s4646_s1 + $0x518] sm:$0xff] }
  0x31   :  { %2493 = vmatpush3.bf16.msra.mxu0 %v2492_v32  ;;  %v201_v32 = vld [vmem:[%s4646_s1 + $0x590] sm:$0xff]  ;;  %v171_v47 = vld [vmem:[%s4646_s1 + $0x4a0] sm:$0xff]  ;;  %v3456_v52 = vrot.slane %v584_v43, %v3132_v13  ;;  %v156_v56 = vld [vmem:[%s4646_s1 + $0x428] sm:$0xff] }
  0x32   :  { %2495 = vmatprep.subr.bf16.mxu0 %v2494_v36  ;;  %v2576_v36 = vpack.c.bf16 %v184_v28, %v183_v27  ;;  %v185_v41 = vld [vmem:[%s4646_s1 + $0x510] sm:$0xff]  ;;  %v2578_v44 = vpack.c.bf16 %v202_v34, %v201_v32  ;;  %v203_v49 = vld [vmem:[%s4646_s1 + $0x5a0] sm:$0xff]  ;;  %v188_v59 = vld [vmem:[%s4646_s1 + $0x528] sm:$0xff] }
  0x33   :  { %2525 = vmatpush3.bf16.msra.mxu1 %v2524_v35  ;;  %v2544_v35 = vpack.c.bf16 %v152_v26, %v151_v23  ;;  %v187_v57 = vld [vmem:[%s4646_s1 + $0x520] sm:$0xff]  ;;  %v173_v60 = vld [vmem:[%s4646_s1 + $0x4b0] sm:$0xff]  ;;  %v158_v4 = vld [vmem:[%s4646_s1 + $0x438] sm:$0xff] }
  0x34   :  { %2527 = vmatprep.subr.bf16.mxu1 %v2526_v40  ;;  %v154_v40 = vld [vmem:[%s4646_s1 + $0x418] sm:$0xff]  ;;  %v2584_v1 = vpack.c.bf16 %v188_v59, %v187_v57  ;;  %v189_v5 = vld [vmem:[%s4646_s1 + $0x530] sm:$0xff]  ;;  %v175_v8 = vld [vmem:[%s4646_s1 + $0x4c0] sm:$0xff] }
  0x35   :  { %2497 = vmatpush3.bf16.msra.mxu0 %v2496_v48  ;;  %v172_v48 = vld [vmem:[%s4646_s1 + $0x4a8] sm:$0xff]  ;;  %v2548_v53 = vpack.c.bf16 %v154_v40, %v153_v39  ;;  %v190_v7 = vld [vmem:[%s4646_s1 + $0x538] sm:$0xff]  ;;  %v191_v18 = vld [vmem:[%s4646_s1 + $0x540] sm:$0xff] }
  0x36   :  { %2499 = vmatprep.subr.bf16.mxu0 %v2498_v51  ;;  %v599_v51 = vcombine.high %v3435_v42, %v3435_v42  ;;  %v2550_v54 = vpack.c.bf16 %v172_v48, %v171_v47  ;;  %v2588_v14 = vpack.c.bf16 %v190_v7, %v189_v5  ;;  %v160_v17 = vld [vmem:[%s4646_s1 + $0x448] sm:$0xff]  ;;  %v177_v21 = vld [vmem:[%s4646_s1 + $0x4d0] sm:$0xff]  ;;  %v194_v32 = vld [vmem:[%s4646_s1 + $0x558] sm:$0xff] }
  0x37   :  { %2529 = vmatpush3.bf16.msra.mxu1 %v2528_v50  ;;  %v204_v50 = vld [vmem:[%s4646_s1 + $0x5a8] sm:$0xff]  ;;  %v209_v23 = vld [vmem:[%s4646_s1 + $0x5d0] sm:$0xff]  ;;  %v179_v34 = vld [vmem:[%s4646_s1 + $0x4e0] sm:$0xff] }
  0x38   :  { %2531 = vmatprep.subr.bf16.mxu1 %v2530_v55  ;;  %v155_v55 = vld [vmem:[%s4646_s1 + $0x420] sm:$0xff]  ;;  %v2582_v58 = vpack.c.bf16 %v204_v50, %v203_v49  ;;  %v192_v20 = vld [vmem:[%s4646_s1 + $0x548] sm:$0xff]  ;;  %v161_v28 = vld [vmem:[%s4646_s1 + $0x450] sm:$0xff] }
  0x39   :  { %2501 = vmatpush3.bf16.msra.mxu0 %v2500_v61  ;;  %v174_v61 = vld [vmem:[%s4646_s1 + $0x4b8] sm:$0xff]  ;;  %v2552_v0 = vpack.c.bf16 %v156_v56, %v155_v55  ;;  %v2592_v26 = vpack.c.bf16 %v192_v20, %v191_v18  ;;  %v193_v30 = vld [vmem:[%s4646_s1 + $0x550] sm:$0xff]  ;;  %v212_v37 = vld [vmem:[%s4646_s1 + $0x5e8] sm:$0xff] }
  0x3a   :  { %2503 = vmatprep.subr.bf16.mxu0 %v2502_v63  ;;  %v206_v63 = vld [vmem:[%s4646_s1 + $0x5b8] sm:$0xff]  ;;  %v2554_v2 = vpack.c.bf16 %v174_v61, %v173_v60  ;;  %v2596_v39 = vpack.c.bf16 %v194_v32, %v193_v30  ;;  %v164_v43 = vld [vmem:[%s4646_s1 + $0x468] sm:$0xff]  ;;  %v181_v48 = vld [vmem:[%s4646_s1 + $0x4f0] sm:$0xff] }
  0x3b   :  { %2533 = vmatpush3.bf16.msra.mxu1 %v2532_v62  ;;  %v205_v62 = vld [vmem:[%s4646_s1 + $0x5b0] sm:$0xff]  ;;  %v196_v47 = vld [vmem:[%s4646_s1 + $0x568] sm:$0xff]  ;;  %v182_v49 = vld [vmem:[%s4646_s1 + $0x4f8] sm:$0xff] }
  0x3c   :  { %2535 = vmatprep.subr.bf16.mxu1 %v2534_v3  ;;  %v157_v3 = vld [vmem:[%s4646_s1 + $0x430] sm:$0xff]  ;;  %v2586_v6 = vpack.c.bf16 %v206_v63, %v205_v62  ;;  %v2570_v55 = vpack.c.bf16 %v182_v49, %v181_v48  ;;  %v166_v57 = vld [vmem:[%s4646_s1 + $0x478] sm:$0xff]  ;;  %v231_v60 = vld [vmem:[%s4646_s1 + $0x680] sm:$0xff] }
  0x3d   :  { %2505 = vmatpush3.bf16.msra.mxu0 %v2504_v9  ;;  %v176_v9 = vld [vmem:[%s4646_s1 + $0x4c8] sm:$0xff]  ;;  %v2556_v12 = vpack.c.bf16 %v158_v4, %v157_v3  ;;  %v213_v50 = vld [vmem:[%s4646_s1 + $0x5f0] sm:$0xff]  ;;  %v198_v59 = vld [vmem:[%s4646_s1 + $0x578] sm:$0xff] }
  0x3e   :  { %2507 = vmatprep.subr.bf16.mxu0 %v2506_v11  ;;  %v208_v11 = vld [vmem:[%s4646_s1 + $0x5c8] sm:$0xff]  ;;  %v2558_v15 = vpack.c.bf16 %v176_v9, %v175_v8  ;;  %v165_v56 = vld [vmem:[%s4646_s1 + $0x470] sm:$0xff]  ;;  %v263_v62 = vld [vmem:[%s4646_s1 + $0x780] sm:$0xff] }
  0x3f   :  { %2537 = vmatpush3.bf16.msra.mxu1 %v2536_v10  ;;  %v207_v10 = vld [vmem:[%s4646_s1 + $0x5c0] sm:$0xff]  ;;  %v232_v61 = vld [vmem:[%s4646_s1 + $0x688] sm:$0xff]  ;;  %v233_v9 = vld [vmem:[%s4646_s1 + $0x690] sm:$0xff] }
  0x40   :  { %2539 = vmatprep.subr.bf16.mxu1 %v2538_v16  ;;  %v159_v16 = vld [vmem:[%s4646_s1 + $0x440] sm:$0xff]  ;;  %v2590_v19 = vpack.c.bf16 %v208_v11, %v207_v10  ;;  %v264_v63 = vld [vmem:[%s4646_s1 + $0x788] sm:$0xff]  ;;  %v2606_v3 = vpack.c.bf16 %v232_v61, %v231_v60  ;;  %v234_v10 = vld [vmem:[%s4646_s1 + $0x698] sm:$0xff] }
  0x41   :  { %2509 = vmatpush3.bf16.msra.mxu0 %v2508_v22  ;;  %v178_v22 = vld [vmem:[%s4646_s1 + $0x4d8] sm:$0xff]  ;;  %v215_v4 = vld [vmem:[%s4646_s1 + $0x600] sm:$0xff]  ;;  %v216_v5 = vld [vmem:[%s4646_s1 + $0x608] sm:$0xff]  ;;  %v2638_v7 = vpack.c.bf16 %v264_v63, %v263_v62  ;;  %v2610_v18 = vpack.c.bf16 %v234_v10, %v233_v9 }
  0x42   :  { %2543 = vmatprep.subr.bf16.mxu0 %v2542_v25  ;;  %v2560_v25 = vpack.c.bf16 %v160_v17, %v159_v16  ;;  %v2562_v27 = vpack.c.bf16 %v178_v22, %v177_v21  ;;  %v248_v8 = vld [vmem:[%s4646_s1 + $0x708] sm:$0xff]  ;;  %v2608_v16 = vpack.c.bf16 %v216_v5, %v215_v4  ;;  %v218_v20 = vld [vmem:[%s4646_s1 + $0x618] sm:$0xff]  ;;  %v249_v21 = vld [vmem:[%s4646_s1 + $0x710] sm:$0xff] }
  0x43   :  { %2541 = vmatpush3.bf16.msra.mxu1 %v2540_v24  ;;  %v210_v24 = vld [vmem:[%s4646_s1 + $0x5d8] sm:$0xff]  ;;  %v253_v48 = vld [vmem:[%s4646_s1 + $0x730] sm:$0xff]  ;;  %v256_v61 = vld [vmem:[%s4646_s1 + $0x748] sm:$0xff] }
  0x44   :  { %2575 = vmatprep.subr.bf16.mxu1 %v2574_v29  ;;  %923 = vmatmul.mubr.f32.vlgmr.msra.gmra.mrb[2].mxu0 %v3293_v33  ;;  %v2580_v33 = vpack.c.bf16 %v186_v46, %v185_v41  ;;  %v162_v29 = vld [vmem:[%s4646_s1 + $0x458] sm:$0xff]  ;;  %v2594_v31 = vpack.c.bf16 %v210_v24, %v209_v23  ;;  %v163_v41 = vld [vmem:[%s4646_s1 + $0x460] sm:$0xff]  ;;  %v241_v62 = vld [vmem:[%s4646_s1 + $0x6d0] sm:$0xff] }
  0x45   :  { %2545 = vmatpush3.bf16.msra.mxu0 %v2544_v35  ;;  %1062 = vmatprep.mubr.f32.mxu0 %v599_v51  ;;  %v180_v35 = vld [vmem:[%s4646_s1 + $0x4e8] sm:$0xff]  ;;  %v214_v51 = vld [vmem:[%s4646_s1 + $0x5f8] sm:$0xff]  ;;  %v235_v24 = vld [vmem:[%s4646_s1 + $0x6a0] sm:$0xff] }
  0x46   :  { %993 = vmatmul.mubr.f32.vlgmr.msra.gmra.mrb[2].mxu1 %v3316_v45  ;;  %2547 = vmatprep.subr.bf16.mxu0 %v2546_v38  ;;  %v600_v45 = vcombine.high %v3456_v52, %v3456_v52  ;;  %v2564_v38 = vpack.c.bf16 %v162_v29, %v161_v28  ;;  %v2566_v40 = vpack.c.bf16 %v180_v35, %v179_v34  ;;  %v250_v23 = vld [vmem:[%s4646_s1 + $0x718] sm:$0xff]  ;;  %v268_v28 = vld [vmem:[%s4646_s1 + $0x7a8] sm:$0xff]  ;;  %v251_v35 = vld [vmem:[%s4646_s1 + $0x720] sm:$0xff] }
  0x47   :  { %2577 = vmatpush3.bf16.msra.mxu1 %v2576_v36  ;;  %v211_v36 = vld [vmem:[%s4646_s1 + $0x5e0] sm:$0xff]  ;;  %v220_v34 = vld [vmem:[%s4646_s1 + $0x628] sm:$0xff]  ;;  %v242_v63 = vld [vmem:[%s4646_s1 + $0x6d8] sm:$0xff] }
  0x48   :  { %2579 = vmatprep.subr.bf16.mxu1 %v2578_v44  ;;  %1132 = vmatprep.mubr.f32.mxu1 %v600_v45  ;;  %v195_v44 = vld [vmem:[%s4646_s1 + $0x560] sm:$0xff]  ;;  %v2598_v46 = vpack.c.bf16 %v212_v37, %v211_v36  ;;  %v197_v45 = vld [vmem:[%s4646_s1 + $0x570] sm:$0xff]  ;;  %v2626_v4 = vpack.c.bf16 %v242_v63, %v241_v62  ;;  %v258_v9 = vld [vmem:[%s4646_s1 + $0x758] sm:$0xff] }
  0x49   :  { %2549 = vmatpush3.bf16.msra.mxu0 %v2548_v53  ;;  %v2568_v53 = vpack.c.bf16 %v164_v43, %v163_v41  ;;  %v237_v37 = vld [vmem:[%s4646_s1 + $0x6b0] sm:$0xff]  ;;  %v243_v10 = vld [vmem:[%s4646_s1 + $0x6e0] sm:$0xff] }
  0x4a   :  { %2551 = vmatprep.subr.bf16.mxu0 %v2550_v54  ;;  %v2600_v54 = vpack.c.bf16 %v196_v47, %v195_v44  ;;  %v222_v47 = vld [vmem:[%s4646_s1 + $0x638] sm:$0xff]  ;;  %v225_v5 = vld [vmem:[%s4646_s1 + $0x650] sm:$0xff] }
  0x4b   :  { %2581 = vmatpush3.bf16.msra.mxu1 %v2580_v33  ;;  %v18_v33 = vld [vmem:[%s4645_s0 + $0x18] sm:$0xff]  ;;  %v313_v62 = vld [vmem:[%s4646_s1 + $0x910] sm:$0xff] }
  0x4c   :  { %2583 = vmatprep.subr.bf16.mxu1 %v2582_v58  ;;  %v2602_v58 = vpack.c.bf16 %v214_v51, %v213_v50  ;;  %v3627_v11 = vrot.slane %v18_v33, %v3132_v13  ;;  %v254_v50 = vld [vmem:[%s4646_s1 + $0x738] sm:$0xff]  ;;  %v239_v51 = vld [vmem:[%s4646_s1 + $0x6c0] sm:$0xff] }
  0x4d   :  { %2553 = vmatpush3.bf16.msra.mxu0 %v2552_v0  ;;  %v601_v0 = vcombine.high %v18_v33, %v18_v33  ;;  %v271_v33 = vld [vmem:[%s4646_s1 + $0x7c0] sm:$0xff] }
  0x4e   :  { %2555 = vmatprep.subr.bf16.mxu0 %v2554_v2  ;;  %v2604_v2 = vpack.c.bf16 %v198_v59, %v197_v45  ;;  %v223_v45 = vld [vmem:[%s4646_s1 + $0x640] sm:$0xff] }
  0x4f   :  { %2585 = vmatpush3.bf16.msra.mxu1 %v2584_v1  ;;  %v2572_v1 = vpack.c.bf16 %v166_v57, %v165_v56  ;;  %v2652_v56 = vpack.c.bf16 %v254_v50, %v253_v48  ;;  %v255_v59 = vld [vmem:[%s4646_s1 + $0x740] sm:$0xff]  ;;  %v280_v48 = vld [vmem:[%s4646_s1 + $0x808] sm:$0xff] }
  0x50   :  { %2587 = vmatprep.subr.bf16.mxu1 %v2586_v6  ;;  %v247_v6 = vld [vmem:[%s4646_s1 + $0x700] sm:$0xff] }
  0x51   :  { %2557 = vmatpush3.bf16.msra.mxu0 %v2556_v12  ;;  %v265_v12 = vld [vmem:[%s4646_s1 + $0x790] sm:$0xff]  ;;  %v2640_v17 = vpack.c.bf16 %v248_v8, %v247_v6  ;;  %v226_v6 = vld [vmem:[%s4646_s1 + $0x658] sm:$0xff] }
  0x52   :  { %2559 = vmatprep.subr.bf16.mxu0 %v2558_v15  ;;  %v3636_v15 = vrot.slane %v601_v0, %v3132_v13  ;;  %v273_v0 = vld [vmem:[%s4646_s1 + $0x7d0] sm:$0xff] }
  0x53   :  { %2589 = vmatpush3.bf16.msra.mxu1 %v2588_v14  ;;  %v266_v14 = vld [vmem:[%s4646_s1 + $0x798] sm:$0xff] }
  0x54   :  { %2591 = vmatprep.subr.bf16.mxu1 %v2590_v19  ;;  %v217_v19 = vld [vmem:[%s4646_s1 + $0x610] sm:$0xff]  ;;  %v2642_v22 = vpack.c.bf16 %v266_v14, %v265_v12  ;;  %v617_v29 = vcombine.high %v3636_v15, %v3636_v15  ;;  %v244_v12 = vld [vmem:[%s4646_s1 + $0x6e8] sm:$0xff]  ;;  %v275_v14 = vld [vmem:[%s4646_s1 + $0x7e0] sm:$0xff] }
  0x55   :  { %2561 = vmatpush3.bf16.msra.mxu0 %v2560_v25  ;;  %v236_v25 = vld [vmem:[%s4646_s1 + $0x6a8] sm:$0xff]  ;;  %v2612_v30 = vpack.c.bf16 %v218_v20, %v217_v19  ;;  %v2630_v19 = vpack.c.bf16 %v244_v12, %v243_v10  ;;  %v227_v20 = vld [vmem:[%s4646_s1 + $0x660] sm:$0xff] }
  0x56   :  { %2563 = vmatprep.subr.bf16.mxu0 %v2562_v27  ;;  %v267_v27 = vld [vmem:[%s4646_s1 + $0x7a0] sm:$0xff]  ;;  %v2614_v32 = vpack.c.bf16 %v236_v25, %v235_v24  ;;  %v260_v24 = vld [vmem:[%s4646_s1 + $0x768] sm:$0xff]  ;;  %v245_v25 = vld [vmem:[%s4646_s1 + $0x6f0] sm:$0xff] }
  0x57   :  { %2593 = vmatpush3.bf16.msra.mxu1 %v2592_v26  ;;  %v616_v26 = vcombine.high %v3627_v11, %v3627_v11  ;;  %v2646_v36 = vpack.c.bf16 %v268_v28, %v267_v27  ;;  %v277_v27 = vld [vmem:[%s4646_s1 + $0x7f0] sm:$0xff]  ;;  %v278_v28 = vld [vmem:[%s4646_s1 + $0x7f8] sm:$0xff]  ;;  %v284_v10 = vld [vmem:[%s4646_s1 + $0x828] sm:$0xff] }
  0x58   :  { %2595 = vmatprep.subr.bf16.mxu1 %v2594_v31  ;;  %v2644_v31 = vpack.c.bf16 %v250_v23, %v249_v21  ;;  %v228_v21 = vld [vmem:[%s4646_s1 + $0x668] sm:$0xff]  ;;  %v315_v12 = vld [vmem:[%s4646_s1 + $0x920] sm:$0xff] }
  0x59   :  { %2565 = vmatpush3.bf16.msra.mxu0 %v2564_v38  ;;  %v238_v38 = vld [vmem:[%s4646_s1 + $0x6b8] sm:$0xff] }
  0x5a   :  { %2567 = vmatprep.subr.bf16.mxu0 %v2566_v40  ;;  %v270_v40 = vld [vmem:[%s4646_s1 + $0x7b8] sm:$0xff]  ;;  %v2618_v44 = vpack.c.bf16 %v238_v38, %v237_v37  ;;  %v295_v37 = vld [vmem:[%s4646_s1 + $0x880] sm:$0xff]  ;;  %v296_v38 = vld [vmem:[%s4646_s1 + $0x888] sm:$0xff] }
  0x5b   :  { %2597 = vmatpush3.bf16.msra.mxu1 %v2596_v39  ;;  %v269_v39 = vld [vmem:[%s4646_s1 + $0x7b0] sm:$0xff] }
  0x5c   :  { %2599 = vmatprep.subr.bf16.mxu1 %v2598_v46  ;;  %v221_v46 = vld [vmem:[%s4646_s1 + $0x630] sm:$0xff]  ;;  %v2650_v49 = vpack.c.bf16 %v270_v40, %v269_v39  ;;  %v327_v39 = vld [vmem:[%s4646_s1 + $0x980] sm:$0xff]  ;;  %v328_v40 = vld [vmem:[%s4646_s1 + $0x988] sm:$0xff] }
  0x5d   :  { %2569 = vmatpush3.bf16.msra.mxu0 %v2568_v53  ;;  %v240_v53 = vld [vmem:[%s4646_s1 + $0x6c8] sm:$0xff]  ;;  %v2702_v50 = vpack.c.bf16 %v328_v40, %v327_v39  ;;  %v305_v39 = vld [vmem:[%s4646_s1 + $0x8d0] sm:$0xff]  ;;  %v306_v40 = vld [vmem:[%s4646_s1 + $0x8d8] sm:$0xff] }
  0x5e   :  { %2571 = vmatprep.subr.bf16.mxu0 %v2570_v55  ;;  %v2620_v55 = vpack.c.bf16 %v222_v47, %v221_v46  ;;  %v2622_v57 = vpack.c.bf16 %v240_v53, %v239_v51  ;;  %v2670_v46 = vpack.c.bf16 %v296_v38, %v295_v37  ;;  %v279_v47 = vld [vmem:[%s4646_s1 + $0x800] sm:$0xff]  ;;  %v312_v51 = vld [vmem:[%s4646_s1 + $0x908] sm:$0xff]  ;;  %v297_v53 = vld [vmem:[%s4646_s1 + $0x890] sm:$0xff] }
  0x5f   :  { %2601 = vmatpush3.bf16.msra.mxu1 %v2600_v54  ;;  %v272_v54 = vld [vmem:[%s4646_s1 + $0x7c8] sm:$0xff] }
  0x60   :  { %2603 = vmatprep.subr.bf16.mxu1 %v2602_v58  ;;  %v224_v58 = vld [vmem:[%s4646_s1 + $0x648] sm:$0xff]  ;;  %v2654_v60 = vpack.c.bf16 %v272_v54, %v271_v33  ;;  %v298_v33 = vld [vmem:[%s4646_s1 + $0x898] sm:$0xff] }
  0x61   :  { %2573 = vmatpush3.bf16.msra.mxu0 %v2572_v1  ;;  %v274_v1 = vld [vmem:[%s4646_s1 + $0x7d8] sm:$0xff]  ;;  %v320_v38 = vld [vmem:[%s4646_s1 + $0x948] sm:$0xff] }
  0x62   :  { %2607 = vmatprep.subr.bf16.mxu0 %v2606_v3  ;;  %v2656_v3 = vpack.c.bf16 %v256_v61, %v255_v59  ;;  %v2658_v8 = vpack.c.bf16 %v274_v1, %v273_v0  ;;  %v2674_v59 = vpack.c.bf16 %v298_v33, %v297_v53  ;;  %v282_v61 = vld [vmem:[%s4646_s1 + $0x818] sm:$0xff]  ;;  %v299_v1 = vld [vmem:[%s4646_s1 + $0x8a0] sm:$0xff] }
  0x63   :  { %2605 = vmatpush3.bf16.msra.mxu1 %v2604_v2  ;;  %v2624_v2 = vpack.c.bf16 %v224_v58, %v223_v45  ;;  %v2672_v45 = vpack.c.bf16 %v280_v48, %v279_v47  ;;  %v314_v0 = vld [vmem:[%s4646_s1 + $0x918] sm:$0xff]  ;;  %v2690_v47 = vpack.c.bf16 %v306_v40, %v305_v39  ;;  %v289_v48 = vld [vmem:[%s4646_s1 + $0x850] sm:$0xff]  ;;  %v307_v33 = vld [vmem:[%s4646_s1 + $0x8e0] sm:$0xff] }
  0x64   :  { %2639 = vmatprep.subr.bf16.mxu1 %v2638_v7  ;;  %1063 = vmatmul.mubr.f32.vlgmr.msra.gmra.mrb[4].mxu0 %v3435_v42  ;;  %v219_v42 = vld [vmem:[%s4646_s1 + $0x620] sm:$0xff]  ;;  %v257_v7 = vld [vmem:[%s4646_s1 + $0x750] sm:$0xff]  ;;  %v322_v53 = vld [vmem:[%s4646_s1 + $0x958] sm:$0xff] }
  0x65   :  { %2609 = vmatpush3.bf16.msra.mxu0 %v2608_v16  ;;  %1202 = vmatprep.mubr.f32.mxu0 %v616_v26  ;;  %v2616_v41 = vpack.c.bf16 %v220_v34, %v219_v42  ;;  %v276_v16 = vld [vmem:[%s4646_s1 + $0x7e8] sm:$0xff]  ;;  %v246_v26 = vld [vmem:[%s4646_s1 + $0x6f8] sm:$0xff]  ;;  %v229_v42 = vld [vmem:[%s4646_s1 + $0x670] sm:$0xff] }
  0x66   :  { %1133 = vmatmul.mubr.f32.vlgmr.msra.gmra.mrb[4].mxu1 %v3456_v52  ;;  %2611 = vmatprep.subr.bf16.mxu0 %v2610_v18  ;;  %v252_v52 = vld [vmem:[%s4646_s1 + $0x728] sm:$0xff]  ;;  %v2660_v18 = vpack.c.bf16 %v258_v9, %v257_v7  ;;  %v2662_v23 = vpack.c.bf16 %v276_v16, %v275_v14  ;;  %v230_v34 = vld [vmem:[%s4646_s1 + $0x678] sm:$0xff]  ;;  %v301_v16 = vld [vmem:[%s4646_s1 + $0x8b0] sm:$0xff] }
  0x67   :  { %2641 = vmatpush3.bf16.msra.mxu1 %v2640_v17  ;;  %1272 = vmatprep.mubr.f32.mxu1 %v617_v29  ;;  %v2648_v43 = vpack.c.bf16 %v252_v52, %v251_v35  ;;  %v2628_v17 = vpack.c.bf16 %v226_v6, %v225_v5  ;;  %v2632_v29 = vpack.c.bf16 %v228_v21, %v227_v20  ;;  %v261_v35 = vld [vmem:[%s4646_s1 + $0x770] sm:$0xff]  ;;  %v262_v52 = vld [vmem:[%s4646_s1 + $0x778] sm:$0xff]  ;;  %v332_v5 = vld [vmem:[%s4646_s1 + $0x9a8] sm:$0xff] }
  0x68   :  { %2643 = vmatprep.subr.bf16.mxu1 %v2642_v22  ;;  %v259_v22 = vld [vmem:[%s4646_s1 + $0x760] sm:$0xff]  ;;  %v377_v39 = vld [vmem:[%s4646_s1 + $0xb10] sm:$0xff] }
  0x69   :  { %2613 = vmatpush3.bf16.msra.mxu0 %v2612_v30  ;;  %v19_v30 = vld [vmem:[%s4645_s0 + $0x20] sm:$0xff] }
  0x6a   :  { %2615 = vmatprep.subr.bf16.mxu0 %v2614_v32  ;;  %v2634_v32 = vpack.c.bf16 %v246_v26, %v245_v25  ;;  %v3834_v54 = vrot.slane %v19_v30, %v3132_v13  ;;  %v317_v25 = vld [vmem:[%s4646_s1 + $0x930] sm:$0xff] }
  0x6b   :  { %2645 = vmatpush3.bf16.msra.mxu1 %v2644_v31  ;;  %v2664_v31 = vpack.c.bf16 %v260_v24, %v259_v22  ;;  %v286_v24 = vld [vmem:[%s4646_s1 + $0x838] sm:$0xff] }
  0x6c   :  { %2647 = vmatprep.subr.bf16.mxu1 %v2646_v36  ;;  %v2666_v36 = vpack.c.bf16 %v278_v28, %v277_v27  ;;  %v318_v27 = vld [vmem:[%s4646_s1 + $0x938] sm:$0xff]  ;;  %v303_v28 = vld [vmem:[%s4646_s1 + $0x8c0] sm:$0xff] }
  0x6d   :  { %2617 = vmatpush3.bf16.msra.mxu0 %v2616_v41  ;;  %v618_v41 = vcombine.high %v19_v30, %v19_v30  ;;  %v335_v30 = vld [vmem:[%s4646_s1 + $0x9c0] sm:$0xff] }
  0x6e   :  { %2619 = vmatprep.subr.bf16.mxu0 %v2618_v44  ;;  %v2668_v44 = vpack.c.bf16 %v262_v52, %v261_v35  ;;  %v287_v35 = vld [vmem:[%s4646_s1 + $0x840] sm:$0xff] }
  0x6f   :  { %2649 = vmatpush3.bf16.msra.mxu1 %v2648_v43  ;;  %v2636_v43 = vpack.c.bf16 %v230_v34, %v229_v42  ;;  %v2716_v42 = vpack.c.bf16 %v318_v27, %v317_v25  ;;  %v319_v52 = vld [vmem:[%s4646_s1 + $0x940] sm:$0xff]  ;;  %v344_v25 = vld [vmem:[%s4646_s1 + $0xa08] sm:$0xff] }
  0x70   :  { %2651 = vmatprep.subr.bf16.mxu1 %v2650_v49  ;;  %v311_v49 = vld [vmem:[%s4646_s1 + $0x900] sm:$0xff] }
  0x71   :  { %2621 = vmatpush3.bf16.msra.mxu0 %v2620_v55  ;;  %v329_v55 = vld [vmem:[%s4646_s1 + $0x990] sm:$0xff]  ;;  %v2704_v58 = vpack.c.bf16 %v312_v51, %v311_v49  ;;  %v290_v49 = vld [vmem:[%s4646_s1 + $0x858] sm:$0xff] }
  0x72   :  { %2623 = vmatprep.subr.bf16.mxu0 %v2622_v57  ;;  %v3843_v57 = vrot.slane %v618_v41, %v3132_v13  ;;  %v337_v41 = vld [vmem:[%s4646_s1 + $0x9d0] sm:$0xff] }
  0x73   :  { %2653 = vmatpush3.bf16.msra.mxu1 %v2652_v56  ;;  %v330_v56 = vld [vmem:[%s4646_s1 + $0x998] sm:$0xff] }
  0x74   :  { %2655 = vmatprep.subr.bf16.mxu1 %v2654_v60  ;;  %v281_v60 = vld [vmem:[%s4646_s1 + $0x810] sm:$0xff]  ;;  %v2706_v63 = vpack.c.bf16 %v330_v56, %v329_v55  ;;  %v634_v6 = vcombine.high %v3843_v57, %v3843_v57  ;;  %v308_v55 = vld [vmem:[%s4646_s1 + $0x8e8] sm:$0xff]  ;;  %v339_v56 = vld [vmem:[%s4646_s1 + $0x9e0] sm:$0xff] }
  0x75   :  { %2625 = vmatpush3.bf16.msra.mxu0 %v2624_v2  ;;  %v300_v2 = vld [vmem:[%s4646_s1 + $0x8a8] sm:$0xff]  ;;  %v2676_v7 = vpack.c.bf16 %v282_v61, %v281_v60  ;;  %v2694_v60 = vpack.c.bf16 %v308_v55, %v307_v33  ;;  %v291_v61 = vld [vmem:[%s4646_s1 + $0x860] sm:$0xff] }
  0x76   :  { %2627 = vmatprep.subr.bf16.mxu0 %v2626_v4  ;;  %v331_v4 = vld [vmem:[%s4646_s1 + $0x9a0] sm:$0xff]  ;;  %v2678_v9 = vpack.c.bf16 %v300_v2, %v299_v1  ;;  %v324_v1 = vld [vmem:[%s4646_s1 + $0x968] sm:$0xff]  ;;  %v309_v2 = vld [vmem:[%s4646_s1 + $0x8f0] sm:$0xff] }
  0x77   :  { %2657 = vmatpush3.bf16.msra.mxu1 %v2656_v3  ;;  %v633_v3 = vcombine.high %v3834_v54, %v3834_v54  ;;  %v2710_v14 = vpack.c.bf16 %v332_v5, %v331_v4  ;;  %v341_v4 = vld [vmem:[%s4646_s1 + $0x9f0] sm:$0xff]  ;;  %v342_v5 = vld [vmem:[%s4646_s1 + $0x9f8] sm:$0xff]  ;;  %v348_v33 = vld [vmem:[%s4646_s1 + $0xa28] sm:$0xff] }
  0x78   :  { %2659 = vmatprep.subr.bf16.mxu1 %v2658_v8  ;;  %v2708_v8 = vpack.c.bf16 %v314_v0, %v313_v62  ;;  %v292_v62 = vld [vmem:[%s4646_s1 + $0x868] sm:$0xff]  ;;  %v379_v55 = vld [vmem:[%s4646_s1 + $0xb20] sm:$0xff] }
  0x79   :  { %2629 = vmatpush3.bf16.msra.mxu0 %v2628_v17  ;;  %v302_v17 = vld [vmem:[%s4646_s1 + $0x8b8] sm:$0xff] }
  0x7a   :  { %2631 = vmatprep.subr.bf16.mxu0 %v2630_v19  ;;  %v334_v19 = vld [vmem:[%s4646_s1 + $0x9b8] sm:$0xff]  ;;  %v2682_v22 = vpack.c.bf16 %v302_v17, %v301_v16  ;;  %v359_v16 = vld [vmem:[%s4646_s1 + $0xa80] sm:$0xff]  ;;  %v360_v17 = vld [vmem:[%s4646_s1 + $0xa88] sm:$0xff] }
  0x7b   :  { %2661 = vmatpush3.bf16.msra.mxu1 %v2660_v18  ;;  %v333_v18 = vld [vmem:[%s4646_s1 + $0x9b0] sm:$0xff] }
  0x7c   :  { %2663 = vmatprep.subr.bf16.mxu1 %v2662_v23  ;;  %v285_v23 = vld [vmem:[%s4646_s1 + $0x830] sm:$0xff]  ;;  %v2714_v26 = vpack.c.bf16 %v334_v19, %v333_v18  ;;  %v391_v18 = vld [vmem:[%s4646_s1 + $0xb80] sm:$0xff]  ;;  %v392_v19 = vld [vmem:[%s4646_s1 + $0xb88] sm:$0xff] }
  0x7d   :  { %2633 = vmatpush3.bf16.msra.mxu0 %v2632_v29  ;;  %v304_v29 = vld [vmem:[%s4646_s1 + $0x8c8] sm:$0xff]  ;;  %v2766_v27 = vpack.c.bf16 %v392_v19, %v391_v18 }
  0x7e   :  { %2635 = vmatprep.subr.bf16.mxu0 %v2634_v32  ;;  %v2684_v32 = vpack.c.bf16 %v286_v24, %v285_v23  ;;  %v2686_v34 = vpack.c.bf16 %v304_v29, %v303_v28  ;;  %v2734_v23 = vpack.c.bf16 %v360_v17, %v359_v16  ;;  %v343_v24 = vld [vmem:[%s4646_s1 + $0xa00] sm:$0xff]  ;;  %v376_v28 = vld [vmem:[%s4646_s1 + $0xb08] sm:$0xff]  ;;  %v361_v29 = vld [vmem:[%s4646_s1 + $0xa90] sm:$0xff] }
  0x7f   :  { %2665 = vmatpush3.bf16.msra.mxu1 %v2664_v31  ;;  %v336_v31 = vld [vmem:[%s4646_s1 + $0x9c8] sm:$0xff] }
  0x80   :  { %2667 = vmatprep.subr.bf16.mxu1 %v2666_v36  ;;  %v288_v36 = vld [vmem:[%s4646_s1 + $0x848] sm:$0xff]  ;;  %v2718_v37 = vpack.c.bf16 %v336_v31, %v335_v30  ;;  %v362_v30 = vld [vmem:[%s4646_s1 + $0xa98] sm:$0xff] }
  0x81   :  { %2637 = vmatpush3.bf16.msra.mxu0 %v2636_v43  ;;  %v338_v43 = vld [vmem:[%s4646_s1 + $0x9d8] sm:$0xff] }
  0x82   :  { %2671 = vmatprep.subr.bf16.mxu0 %v2670_v46  ;;  %v2720_v46 = vpack.c.bf16 %v320_v38, %v319_v52  ;;  %v2722_v51 = vpack.c.bf16 %v338_v43, %v337_v41  ;;  %v2738_v52 = vpack.c.bf16 %v362_v30, %v361_v29  ;;  %v346_v38 = vld [vmem:[%s4646_s1 + $0xa18] sm:$0xff]  ;;  %v363_v43 = vld [vmem:[%s4646_s1 + $0xaa0] sm:$0xff] }
  0x83   :  { %2669 = vmatpush3.bf16.msra.mxu1 %v2668_v44  ;;  %v2688_v44 = vpack.c.bf16 %v288_v36, %v287_v35  ;;  %v2736_v35 = vpack.c.bf16 %v344_v25, %v343_v24  ;;  %v378_v41 = vld [vmem:[%s4646_s1 + $0xb18] sm:$0xff] }
  0x84   :  { %2703 = vmatprep.subr.bf16.mxu1 %v2702_v50  ;;  %1203 = vmatmul.mubr.f32.vlgmr.msra.gmra.mrb[6].mxu0 %v3627_v11  ;;  %v283_v11 = vld [vmem:[%s4646_s1 + $0x820] sm:$0xff]  ;;  %v321_v50 = vld [vmem:[%s4646_s1 + $0x950] sm:$0xff] }
  0x85   :  { %2673 = vmatpush3.bf16.msra.mxu0 %v2672_v45  ;;  %1342 = vmatprep.mubr.f32.mxu0 %v633_v3  ;;  %v2680_v20 = vpack.c.bf16 %v284_v10, %v283_v11  ;;  %v340_v45 = vld [vmem:[%s4646_s1 + $0x9e8] sm:$0xff]  ;;  %v310_v3 = vld [vmem:[%s4646_s1 + $0x8f8] sm:$0xff]  ;;  %v293_v11 = vld [vmem:[%s4646_s1 + $0x870] sm:$0xff] }
  0x86   :  { %1273 = vmatmul.mubr.f32.vlgmr.msra.gmra.mrb[6].mxu1 %v3636_v15  ;;  %2675 = vmatprep.subr.bf16.mxu0 %v2674_v59  ;;  %v316_v15 = vld [vmem:[%s4646_s1 + $0x928] sm:$0xff]  ;;  %v2724_v59 = vpack.c.bf16 %v322_v53, %v321_v50  ;;  %v2726_v0 = vpack.c.bf16 %v340_v45, %v339_v56  ;;  %v294_v10 = vld [vmem:[%s4646_s1 + $0x878] sm:$0xff]  ;;  %v365_v45 = vld [vmem:[%s4646_s1 + $0xab0] sm:$0xff] }
  0x87   :  { %2705 = vmatpush3.bf16.msra.mxu1 %v2704_v58  ;;  %1412 = vmatprep.mubr.f32.mxu1 %v634_v6  ;;  %v2712_v21 = vpack.c.bf16 %v316_v15, %v315_v12  ;;  %v2692_v58 = vpack.c.bf16 %v290_v49, %v289_v48  ;;  %v2696_v6 = vpack.c.bf16 %v292_v62, %v291_v61  ;;  %v325_v12 = vld [vmem:[%s4646_s1 + $0x970] sm:$0xff]  ;;  %v326_v15 = vld [vmem:[%s4646_s1 + $0x978] sm:$0xff]  ;;  %v396_v48 = vld [vmem:[%s4646_s1 + $0xba8] sm:$0xff] }
  0x88   :  { %2707 = vmatprep.subr.bf16.mxu1 %v2706_v63  ;;  %v323_v63 = vld [vmem:[%s4646_s1 + $0x960] sm:$0xff] }
  0x89   :  { %2677 = vmatpush3.bf16.msra.mxu0 %v2676_v7  ;;  %v20_v7 = vld [vmem:[%s4645_s0 + $0x28] sm:$0xff] }
  0x8a   :  { %2679 = vmatprep.subr.bf16.mxu0 %v2678_v9  ;;  %v2698_v9 = vpack.c.bf16 %v310_v3, %v309_v2  ;;  %v4041_v31 = vrot.slane %v20_v7, %v3132_v13  ;;  %v381_v2 = vld [vmem:[%s4646_s1 + $0xb30] sm:$0xff] }
  0x8b   :  { %2709 = vmatpush3.bf16.msra.mxu1 %v2708_v8  ;;  %v2728_v8 = vpack.c.bf16 %v324_v1, %v323_v63  ;;  %v350_v1 = vld [vmem:[%s4646_s1 + $0xa38] sm:$0xff] }
  0x8c   :  { %2711 = vmatprep.subr.bf16.mxu1 %v2710_v14  ;;  %v2730_v14 = vpack.c.bf16 %v342_v5, %v341_v4  ;;  %v382_v4 = vld [vmem:[%s4646_s1 + $0xb38] sm:$0xff]  ;;  %v367_v5 = vld [vmem:[%s4646_s1 + $0xac0] sm:$0xff] }
  0x8d   :  { %2681 = vmatpush3.bf16.msra.mxu0 %v2680_v20  ;;  %v635_v20 = vcombine.high %v20_v7, %v20_v7  ;;  %v399_v7 = vld [vmem:[%s4646_s1 + $0xbc0] sm:$0xff] }
  0x8e   :  { %2683 = vmatprep.subr.bf16.mxu0 %v2682_v22  ;;  %v2732_v22 = vpack.c.bf16 %v326_v15, %v325_v12  ;;  %v383_v15 = vld [vmem:[%s4646_s1 + $0xb40] sm:$0xff] }
  0x8f   :  { %2713 = vmatpush3.bf16.msra.mxu1 %v2712_v21  ;;  %v2700_v21 = vpack.c.bf16 %v294_v10, %v293_v11  ;;  %v351_v11 = vld [vmem:[%s4646_s1 + $0xa40] sm:$0xff]  ;;  %v2780_v10 = vpack.c.bf16 %v382_v4, %v381_v2 }
  0x90   :  { %2715 = vmatprep.subr.bf16.mxu1 %v2714_v26  ;;  %v375_v26 = vld [vmem:[%s4646_s1 + $0xb00] sm:$0xff] }
  0x91   :  { %2685 = vmatpush3.bf16.msra.mxu0 %v2684_v32  ;;  %v393_v32 = vld [vmem:[%s4646_s1 + $0xb90] sm:$0xff]  ;;  %v2768_v36 = vpack.c.bf16 %v376_v28, %v375_v26 }
  0x92   :  { %2687 = vmatprep.subr.bf16.mxu0 %v2686_v34  ;;  %v4050_v34 = vrot.slane %v635_v20, %v3132_v13 }
  0x93   :  { %2717 = vmatpush3.bf16.msra.mxu1 %v2716_v42  ;;  %v394_v42 = vld [vmem:[%s4646_s1 + $0xb98] sm:$0xff] }
  0x94   :  { %2719 = vmatprep.subr.bf16.mxu1 %v2718_v37  ;;  %v345_v37 = vld [vmem:[%s4646_s1 + $0xa10] sm:$0xff]  ;;  %v2770_v40 = vpack.c.bf16 %v394_v42, %v393_v32  ;;  %v651_v49 = vcombine.high %v4050_v34, %v4050_v34 }
  0x95   :  { %2689 = vmatpush3.bf16.msra.mxu0 %v2688_v44  ;;  %v364_v44 = vld [vmem:[%s4646_s1 + $0xaa8] sm:$0xff]  ;;  %v2740_v50 = vpack.c.bf16 %v346_v38, %v345_v37 }
  0x96   :  { %2691 = vmatprep.subr.bf16.mxu0 %v2690_v47  ;;  %v395_v47 = vld [vmem:[%s4646_s1 + $0xba0] sm:$0xff]  ;;  %v2742_v53 = vpack.c.bf16 %v364_v44, %v363_v43 }
  0x97   :  { %2721 = vmatpush3.bf16.msra.mxu1 %v2720_v46  ;;  %v650_v46 = vcombine.high %v4041_v31, %v4041_v31  ;;  %v2774_v56 = vpack.c.bf16 %v396_v48, %v395_v47 }
  0x98   :  { %2723 = vmatprep.subr.bf16.mxu1 %v2722_v51  ;;  %v2772_v51 = vpack.c.bf16 %v378_v41, %v377_v39 }
  0x99   :  { %2693 = vmatpush3.bf16.msra.mxu0 %v2692_v58  ;;  %v366_v58 = vld [vmem:[%s4646_s1 + $0xab8] sm:$0xff] }
  0x9a   :  { %2695 = vmatprep.subr.bf16.mxu0 %v2694_v60  ;;  %v398_v60 = vld [vmem:[%s4646_s1 + $0xbb8] sm:$0xff]  ;;  %v2746_v63 = vpack.c.bf16 %v366_v58, %v365_v45 }
  0x9b   :  { %2725 = vmatpush3.bf16.msra.mxu1 %v2724_v59  ;;  %v397_v59 = vld [vmem:[%s4646_s1 + $0xbb0] sm:$0xff] }
  0x9c   :  { %2727 = vmatprep.subr.bf16.mxu1 %v2726_v0  ;;  %v349_v0 = vld [vmem:[%s4646_s1 + $0xa30] sm:$0xff]  ;;  %v2778_v3 = vpack.c.bf16 %v398_v60, %v397_v59 }
  0x9d   :  { %2697 = vmatpush3.bf16.msra.mxu0 %v2696_v6  ;;  %v368_v6 = vld [vmem:[%s4646_s1 + $0xac8] sm:$0xff] }
  0x9e   :  { %2699 = vmatprep.subr.bf16.mxu0 %v2698_v9  ;;  %v2748_v9 = vpack.c.bf16 %v350_v1, %v349_v0  ;;  %v2750_v12 = vpack.c.bf16 %v368_v6, %v367_v5 }
  0x9f   :  { %2729 = vmatpush3.bf16.msra.mxu1 %v2728_v8  ;;  %v400_v8 = vld [vmem:[%s4646_s1 + $0xbc8] sm:$0xff] }
  0xa0   :  { %2731 = vmatprep.subr.bf16.mxu1 %v2730_v14  ;;  %v352_v14 = vld [vmem:[%s4646_s1 + $0xa48] sm:$0xff] }
  0xa1   :  { %2701 = vmatpush3.bf16.msra.mxu0 %v2700_v21 }
  0xa2   :  { %2735 = vmatprep.subr.bf16.mxu0 %v2734_v23 }
  0xa3   :  { %2733 = vmatpush3.bf16.msra.mxu1 %v2732_v22 }
  0xa4   :  { %2767 = vmatprep.subr.bf16.mxu1 %v2766_v27  ;;  %1343 = vmatmul.mubr.f32.vlgmr.msra.gmra.mrb[8].mxu0 %v3834_v54  ;;  %v347_v54 = vld [vmem:[%s4646_s1 + $0xa20] sm:$0xff] }
  0xa5   :  { %2737 = vmatpush3.bf16.msra.mxu0 %v2736_v35  ;;  %1482 = vmatprep.mubr.f32.mxu0 %v650_v46  ;;  %v2744_v61 = vpack.c.bf16 %v348_v33, %v347_v54 }
  0xa6   :  { %1413 = vmatmul.mubr.f32.vlgmr.msra.gmra.mrb[8].mxu1 %v3843_v57  ;;  %2739 = vmatprep.subr.bf16.mxu0 %v2738_v52  ;;  %v380_v57 = vld [vmem:[%s4646_s1 + $0xb28] sm:$0xff] }
  0xa7   :  { %2769 = vmatpush3.bf16.msra.mxu1 %v2768_v36  ;;  %1552 = vmatprep.mubr.f32.mxu1 %v651_v49  ;;  %v2776_v62 = vpack.c.bf16 %v380_v57, %v379_v55 }
  0xa8   :  { %2771 = vmatprep.subr.bf16.mxu1 %v2770_v40 }
  0xa9   :  { %2741 = vmatpush3.bf16.msra.mxu0 %v2740_v50 }
  0xaa   :  { %2743 = vmatprep.subr.bf16.mxu0 %v2742_v53 }
  0xab   :  { %2773 = vmatpush3.bf16.msra.mxu1 %v2772_v51 }
  0xac   :  { %2775 = vmatprep.subr.bf16.mxu1 %v2774_v56 }
  0xad   :  { %2745 = vmatpush3.bf16.msra.mxu0 %v2744_v61 }
  0xae   :  { %2747 = vmatprep.subr.bf16.mxu0 %v2746_v63 }
  0xaf   :  { %2777 = vmatpush3.bf16.msra.mxu1 %v2776_v62 }
  0xb0   :  { %8 = vsyncpa [#allocation3], 0  ;;  %2779 = vmatprep.subr.bf16.mxu1 %v2778_v3  ;;  %v2782_v16 = vpack.c.bf16 %v400_v8, %v399_v7  ;;  %v384_v17 = vld [vmem:[%s4646_s1 + $0xb48] sm:$0xff]  ;;  %v369_v18 = vld [vmem:[%s4646_s1 + $0xad0] sm:$0xff]  ;;  %v2752_v22 = vpack.c.bf16 %v352_v14, %v351_v11 }
  0xb1   :  { %v370_v19 = vld [vmem:[%s4646_s1 + $0xad8] sm:$0xff]  ;;  %v401_v20 = vld [vmem:[%s4646_s1 + $0xbd0] sm:$0xff]  ;;  %2749 = vmatpush3.bf16.msra.mxu0 %v2748_v9  ;;  %v2784_v23 = vpack.c.bf16 %v384_v17, %v383_v15  ;;  %v371_v30 = vld [vmem:[%s4646_s1 + $0xae0] sm:$0xff] }
  0xb2   :  { %v402_v21 = vld [vmem:[%s4646_s1 + $0xbd8] sm:$0xff]  ;;  %2751 = vmatprep.subr.bf16.mxu0 %v2750_v12  ;;  %v2754_v24 = vpack.c.bf16 %v370_v19, %v369_v18  ;;  %v353_v25 = vld [vmem:[%s4646_s1 + $0xa50] sm:$0xff]  ;;  %v372_v32 = vld [vmem:[%s4646_s1 + $0xae8] sm:$0xff] }
  0xb3   :  { %2781 = vmatpush3.bf16.msra.mxu1 %v2780_v10  ;;  %v354_v26 = vld [vmem:[%s4646_s1 + $0xa58] sm:$0xff]  ;;  %v385_v27 = vld [vmem:[%s4646_s1 + $0xb50] sm:$0xff]  ;;  %v2786_v28 = vpack.c.bf16 %v402_v21, %v401_v20  ;;  %v403_v42 = vld [vmem:[%s4646_s1 + $0xbe0] sm:$0xff]  ;;  %v2758_v37 = vpack.c.bf16 %v372_v32, %v371_v30 }
  0xb4   :  { %2783 = vmatprep.subr.bf16.mxu1 %v2782_v16  ;;  %v386_v29 = vld [vmem:[%s4646_s1 + $0xb58] sm:$0xff]  ;;  %v404_v35 = vld [vmem:[%s4646_s1 + $0xbe8] sm:$0xff]  ;;  %v2756_v36 = vpack.c.bf16 %v354_v26, %v353_v25  ;;  %v355_v38 = vld [vmem:[%s4646_s1 + $0xa60] sm:$0xff] }
  0xb5   :  { %2753 = vmatpush3.bf16.msra.mxu0 %v2752_v22  ;;  %v2788_v52 = vpack.c.bf16 %v386_v29, %v385_v27  ;;  %v356_v39 = vld [vmem:[%s4646_s1 + $0xa68] sm:$0xff]  ;;  %v387_v40 = vld [vmem:[%s4646_s1 + $0xb60] sm:$0xff]  ;;  %v2790_v41 = vpack.c.bf16 %v404_v35, %v403_v42  ;;  %v373_v44 = vld [vmem:[%s4646_s1 + $0xaf0] sm:$0xff] }
  0xb6   :  { %2755 = vmatprep.subr.bf16.mxu0 %v2754_v24  ;;  %v388_v43 = vld [vmem:[%s4646_s1 + $0xb68] sm:$0xff]  ;;  %v374_v46 = vld [vmem:[%s4646_s1 + $0xaf8] sm:$0xff]  ;;  %v405_v47 = vld [vmem:[%s4646_s1 + $0xbf0] sm:$0xff]  ;;  %v2760_v49 = vpack.c.bf16 %v356_v39, %v355_v38 }
  0xb7   :  { %2785 = vmatpush3.bf16.msra.mxu1 %v2784_v23  ;;  %v406_v48 = vld [vmem:[%s4646_s1 + $0xbf8] sm:$0xff]  ;;  %v21_v50 = vld [vmem:[%s4645_s0 + $0x30] sm:$0xff]  ;;  %v2792_v51 = vpack.c.bf16 %v388_v43, %v387_v40  ;;  %v2762_v53 = vpack.c.bf16 %v374_v46, %v373_v44  ;;  %v423_v45 = vld [vmem:[%s4646_s1 + $0xc80] sm:$0xff] }
  0xb8   :  { %2787 = vmatprep.subr.bf16.mxu1 %v2786_v28  ;;  %v357_v54 = vld [vmem:[%s4646_s1 + $0xa70] sm:$0xff]  ;;  %v358_v33 = vld [vmem:[%s4646_s1 + $0xa78] sm:$0xff]  ;;  %v2794_v56 = vpack.c.bf16 %v406_v48, %v405_v47  ;;  %v424_v58 = vld [vmem:[%s4646_s1 + $0xc88] sm:$0xff]  ;;  %v652_v61 = vcombine.high %v21_v50, %v21_v50  ;;  %v4248_v8 = vrot.slane %v21_v50, %v3132_v13 }
  0xb9   :  { %2757 = vmatpush3.bf16.msra.mxu0 %v2756_v36  ;;  %v389_v55 = vld [vmem:[%s4646_s1 + $0xb70] sm:$0xff]  ;;  %v390_v57 = vld [vmem:[%s4646_s1 + $0xb78] sm:$0xff]  ;;  %v455_v59 = vld [vmem:[%s4646_s1 + $0xd80] sm:$0xff]  ;;  %v2764_v62 = vpack.c.bf16 %v358_v33, %v357_v54  ;;  %v2798_v0 = vpack.c.bf16 %v424_v58, %v423_v45 }
  0xba   :  { %2759 = vmatprep.subr.bf16.mxu0 %v2758_v37  ;;  %v456_v60 = vld [vmem:[%s4646_s1 + $0xd88] sm:$0xff]  ;;  %v2796_v63 = vpack.c.bf16 %v390_v57, %v389_v55  ;;  %v407_v1 = vld [vmem:[%s4646_s1 + $0xc00] sm:$0xff]  ;;  %v425_v6 = vld [vmem:[%s4646_s1 + $0xc90] sm:$0xff]  ;;  %v4257_v10 = vrot.slane %v652_v61, %v3132_v13  ;;  %v667_v23 = vcombine.high %v4248_v8, %v4248_v8 }
  0xbb   :  { %2789 = vmatpush3.bf16.msra.mxu1 %v2788_v52  ;;  %v408_v2 = vld [vmem:[%s4646_s1 + $0xc08] sm:$0xff]  ;;  %v439_v3 = vld [vmem:[%s4646_s1 + $0xd00] sm:$0xff]  ;;  %v2830_v4 = vpack.c.bf16 %v456_v60, %v455_v59  ;;  %v426_v7 = vld [vmem:[%s4646_s1 + $0xc98] sm:$0xff] }
  0xbc   :  { %2791 = vmatprep.subr.bf16.mxu1 %v2790_v41  ;;  %v440_v5 = vld [vmem:[%s4646_s1 + $0xd08] sm:$0xff]  ;;  %v457_v9 = vld [vmem:[%s4646_s1 + $0xd90] sm:$0xff]  ;;  %v458_v11 = vld [vmem:[%s4646_s1 + $0xd98] sm:$0xff]  ;;  %v2800_v12 = vpack.c.bf16 %v408_v2, %v407_v1  ;;  %v2802_v15 = vpack.c.bf16 %v426_v7, %v425_v6  ;;  %v668_v26 = vcombine.high %v4257_v10, %v4257_v10 }
  0xbd   :  { %2761 = vmatpush3.bf16.msra.mxu0 %v2760_v49  ;;  %v2832_v14 = vpack.c.bf16 %v440_v5, %v439_v3  ;;  %v409_v16 = vld [vmem:[%s4646_s1 + $0xc10] sm:$0xff]  ;;  %v410_v17 = vld [vmem:[%s4646_s1 + $0xc18] sm:$0xff]  ;;  %v2834_v19 = vpack.c.bf16 %v458_v11, %v457_v9  ;;  %v427_v21 = vld [vmem:[%s4646_s1 + $0xca0] sm:$0xff] }
  0xbe   :  { %2763 = vmatprep.subr.bf16.mxu0 %v2762_v53  ;;  %v441_v18 = vld [vmem:[%s4646_s1 + $0xd10] sm:$0xff]  ;;  %v442_v20 = vld [vmem:[%s4646_s1 + $0xd18] sm:$0xff]  ;;  %v428_v22 = vld [vmem:[%s4646_s1 + $0xca8] sm:$0xff]  ;;  %v2804_v27 = vpack.c.bf16 %v410_v17, %v409_v16 }
  0xbf   :  { %2793 = vmatpush3.bf16.msra.mxu1 %v2792_v51  ;;  %v459_v24 = vld [vmem:[%s4646_s1 + $0xda0] sm:$0xff]  ;;  %v460_v25 = vld [vmem:[%s4646_s1 + $0xda8] sm:$0xff]  ;;  %v2836_v28 = vpack.c.bf16 %v442_v20, %v441_v18  ;;  %v2806_v29 = vpack.c.bf16 %v428_v22, %v427_v21  ;;  %v429_v35 = vld [vmem:[%s4646_s1 + $0xcb0] sm:$0xff] }
  0xc0   :  { %2795 = vmatprep.subr.bf16.mxu1 %v2794_v56  ;;  %v412_v30 = vld [vmem:[%s4646_s1 + $0xc28] sm:$0xff]  ;;  %v443_v32 = vld [vmem:[%s4646_s1 + $0xd20] sm:$0xff]  ;;  %v2838_v42 = vpack.c.bf16 %v460_v25, %v459_v24  ;;  %v430_v36 = vld [vmem:[%s4646_s1 + $0xcb8] sm:$0xff] }
  0xc1   :  { %2765 = vmatpush3.bf16.msra.mxu0 %v2764_v62  ;;  %v461_v52 = vld [vmem:[%s4646_s1 + $0xdb0] sm:$0xff]  ;;  %v462_v37 = vld [vmem:[%s4646_s1 + $0xdb8] sm:$0xff]  ;;  %v2810_v40 = vpack.c.bf16 %v430_v36, %v429_v35  ;;  %v431_v48 = vld [vmem:[%s4646_s1 + $0xcc0] sm:$0xff] }
  0xc2   :  { %2799 = vmatprep.subr.bf16.mxu0 %v2798_v0  ;;  %v413_v41 = vld [vmem:[%s4646_s1 + $0xc30] sm:$0xff]  ;;  %v414_v43 = vld [vmem:[%s4646_s1 + $0xc38] sm:$0xff]  ;;  %v2842_v46 = vpack.c.bf16 %v462_v37, %v461_v52  ;;  %v432_v49 = vld [vmem:[%s4646_s1 + $0xcc8] sm:$0xff] }
  0xc3   :  { %2797 = vmatpush3.bf16.msra.mxu1 %v2796_v63  ;;  %v445_v44 = vld [vmem:[%s4646_s1 + $0xd30] sm:$0xff]  ;;  %v446_v47 = vld [vmem:[%s4646_s1 + $0xd38] sm:$0xff]  ;;  %v463_v50 = vld [vmem:[%s4646_s1 + $0xdc0] sm:$0xff]  ;;  %v2812_v53 = vpack.c.bf16 %v414_v43, %v413_v41  ;;  %v2814_v33 = vpack.c.bf16 %v432_v49, %v431_v48 }
  0xc4   :  { %2831 = vmatprep.subr.bf16.mxu1 %v2830_v4  ;;  %1483 = vmatmul.mubr.f32.vlgmr.msra.gmra.mrb[10].mxu0 %v4041_v31  ;;  %v411_v31 = vld [vmem:[%s4646_s1 + $0xc20] sm:$0xff]  ;;  %v464_v51 = vld [vmem:[%s4646_s1 + $0xdc8] sm:$0xff]  ;;  %v2844_v54 = vpack.c.bf16 %v446_v47, %v445_v44  ;;  %v433_v59 = vld [vmem:[%s4646_s1 + $0xcd0] sm:$0xff] }
  0xc5   :  { %2801 = vmatpush3.bf16.msra.mxu0 %v2800_v12  ;;  %1622 = vmatprep.mubr.f32.mxu0 %v667_v23  ;;  %v2808_v38 = vpack.c.bf16 %v412_v30, %v411_v31  ;;  %v415_v55 = vld [vmem:[%s4646_s1 + $0xc40] sm:$0xff]  ;;  %v416_v56 = vld [vmem:[%s4646_s1 + $0xc48] sm:$0xff]  ;;  %v2846_v45 = vpack.c.bf16 %v464_v51, %v463_v50  ;;  %v434_v60 = vld [vmem:[%s4646_s1 + $0xcd8] sm:$0xff] }
  0xc6   :  { %1553 = vmatmul.mubr.f32.vlgmr.msra.gmra.mrb[10].mxu1 %v4050_v34  ;;  %2803 = vmatprep.subr.bf16.mxu0 %v2802_v15  ;;  %v444_v34 = vld [vmem:[%s4646_s1 + $0xd28] sm:$0xff]  ;;  %v447_v57 = vld [vmem:[%s4646_s1 + $0xd40] sm:$0xff]  ;;  %v465_v61 = vld [vmem:[%s4646_s1 + $0xdd0] sm:$0xff]  ;;  %v2816_v63 = vpack.c.bf16 %v416_v56, %v415_v55  ;;  %v2818_v1 = vpack.c.bf16 %v434_v60, %v433_v59 }
  0xc7   :  { %2833 = vmatpush3.bf16.msra.mxu1 %v2832_v14  ;;  %1692 = vmatprep.mubr.f32.mxu1 %v668_v26  ;;  %v2840_v39 = vpack.c.bf16 %v444_v34, %v443_v32  ;;  %v448_v58 = vld [vmem:[%s4646_s1 + $0xd48] sm:$0xff]  ;;  %v466_v62 = vld [vmem:[%s4646_s1 + $0xdd8] sm:$0xff]  ;;  %v417_v2 = vld [vmem:[%s4646_s1 + $0xc50] sm:$0xff] }
  0xc8   :  { %2835 = vmatprep.subr.bf16.mxu1 %v2834_v19  ;;  %v2848_v0 = vpack.c.bf16 %v448_v58, %v447_v57  ;;  %v418_v3 = vld [vmem:[%s4646_s1 + $0xc58] sm:$0xff]  ;;  %v449_v4 = vld [vmem:[%s4646_s1 + $0xd50] sm:$0xff]  ;;  %v2850_v5 = vpack.c.bf16 %v466_v62, %v465_v61  ;;  %v435_v7 = vld [vmem:[%s4646_s1 + $0xce0] sm:$0xff] }
  0xc9   :  { %2805 = vmatpush3.bf16.msra.mxu0 %v2804_v27  ;;  %v450_v6 = vld [vmem:[%s4646_s1 + $0xd58] sm:$0xff]  ;;  %v436_v9 = vld [vmem:[%s4646_s1 + $0xce8] sm:$0xff]  ;;  %v467_v11 = vld [vmem:[%s4646_s1 + $0xde0] sm:$0xff]  ;;  %v2820_v14 = vpack.c.bf16 %v418_v3, %v417_v2 }
  0xca   :  { %2807 = vmatprep.subr.bf16.mxu0 %v2806_v29  ;;  %v468_v12 = vld [vmem:[%s4646_s1 + $0xde8] sm:$0xff]  ;;  %v2852_v15 = vpack.c.bf16 %v450_v6, %v449_v4  ;;  %v2822_v16 = vpack.c.bf16 %v436_v9, %v435_v7  ;;  %v419_v17 = vld [vmem:[%s4646_s1 + $0xc60] sm:$0xff]  ;;  %v437_v22 = vld [vmem:[%s4646_s1 + $0xcf0] sm:$0xff] }
  0xcb   :  { %2837 = vmatpush3.bf16.msra.mxu1 %v2836_v28  ;;  %v420_v18 = vld [vmem:[%s4646_s1 + $0xc68] sm:$0xff]  ;;  %v451_v19 = vld [vmem:[%s4646_s1 + $0xd60] sm:$0xff]  ;;  %v2854_v20 = vpack.c.bf16 %v468_v12, %v467_v11  ;;  %v438_v23 = vld [vmem:[%s4646_s1 + $0xcf8] sm:$0xff] }
  0xcc   :  { %2839 = vmatprep.subr.bf16.mxu1 %v2838_v42  ;;  %v452_v21 = vld [vmem:[%s4646_s1 + $0xd68] sm:$0xff]  ;;  %v469_v24 = vld [vmem:[%s4646_s1 + $0xdf0] sm:$0xff]  ;;  %v470_v25 = vld [vmem:[%s4646_s1 + $0xdf8] sm:$0xff]  ;;  %v2824_v26 = vpack.c.bf16 %v420_v18, %v419_v17  ;;  %v2826_v29 = vpack.c.bf16 %v438_v23, %v437_v22 }
  0xcd   :  { %2809 = vmatpush3.bf16.msra.mxu0 %v2808_v38  ;;  %v22_v27 = vld [vmem:[%s4645_s0 + $0x38] sm:$0xff]  ;;  %v2856_v28 = vpack.c.bf16 %v452_v21, %v451_v19  ;;  %v421_v31 = vld [vmem:[%s4646_s1 + $0xc70] sm:$0xff]  ;;  %v2858_v42 = vpack.c.bf16 %v470_v25, %v469_v24  ;;  %v487_v35 = vld [vmem:[%s4646_s1 + $0xe80] sm:$0xff] }
  0xce   :  { %2811 = vmatprep.subr.bf16.mxu0 %v2810_v40  ;;  %v422_v30 = vld [vmem:[%s4646_s1 + $0xc78] sm:$0xff]  ;;  %v453_v32 = vld [vmem:[%s4646_s1 + $0xd70] sm:$0xff]  ;;  %v488_v36 = vld [vmem:[%s4646_s1 + $0xe88] sm:$0xff]  ;;  %v669_v38 = vcombine.high %v22_v27, %v22_v27  ;;  %v4455_v51 = vrot.slane %v22_v27, %v3132_v13 }
  0xcf   :  { %2841 = vmatpush3.bf16.msra.mxu1 %v2840_v39  ;;  %v454_v34 = vld [vmem:[%s4646_s1 + $0xd78] sm:$0xff]  ;;  %v519_v52 = vld [vmem:[%s4646_s1 + $0xf80] sm:$0xff]  ;;  %v520_v37 = vld [vmem:[%s4646_s1 + $0xf88] sm:$0xff]  ;;  %v2828_v39 = vpack.c.bf16 %v422_v30, %v421_v31  ;;  %v2862_v41 = vpack.c.bf16 %v488_v36, %v487_v35 }
  0xd0   :  { %2843 = vmatprep.subr.bf16.mxu1 %v2842_v46  ;;  %v2860_v40 = vpack.c.bf16 %v454_v34, %v453_v32  ;;  %v471_v43 = vld [vmem:[%s4646_s1 + $0xe00] sm:$0xff]  ;;  %v472_v44 = vld [vmem:[%s4646_s1 + $0xe08] sm:$0xff]  ;;  %v2894_v47 = vpack.c.bf16 %v520_v37, %v519_v52  ;;  %v489_v49 = vld [vmem:[%s4646_s1 + $0xe90] sm:$0xff] }
  0xd1   :  { %2813 = vmatpush3.bf16.msra.mxu0 %v2812_v53  ;;  %v503_v46 = vld [vmem:[%s4646_s1 + $0xf00] sm:$0xff]  ;;  %v504_v48 = vld [vmem:[%s4646_s1 + $0xf08] sm:$0xff]  ;;  %v490_v50 = vld [vmem:[%s4646_s1 + $0xe98] sm:$0xff]  ;;  %v2864_v55 = vpack.c.bf16 %v472_v44, %v471_v43 }
  0xd2   :  { %2815 = vmatprep.subr.bf16.mxu0 %v2814_v33  ;;  %v521_v53 = vld [vmem:[%s4646_s1 + $0xf90] sm:$0xff]  ;;  %v4464_v33 = vrot.slane %v669_v38, %v3132_v13  ;;  %v2896_v56 = vpack.c.bf16 %v504_v48, %v503_v46  ;;  %v2866_v57 = vpack.c.bf16 %v490_v50, %v489_v49  ;;  %v474_v58 = vld [vmem:[%s4646_s1 + $0xe18] sm:$0xff]  ;;  %v491_v61 = vld [vmem:[%s4646_s1 + $0xea0] sm:$0xff] }
  0xd3   :  { %2845 = vmatpush3.bf16.msra.mxu1 %v2844_v54  ;;  %v522_v54 = vld [vmem:[%s4646_s1 + $0xf98] sm:$0xff]  ;;  %v505_v59 = vld [vmem:[%s4646_s1 + $0xf10] sm:$0xff]  ;;  %v492_v62 = vld [vmem:[%s4646_s1 + $0xea8] sm:$0xff] }
  0xd4   :  { %2847 = vmatprep.subr.bf16.mxu1 %v2846_v45  ;;  %v473_v45 = vld [vmem:[%s4646_s1 + $0xe10] sm:$0xff]  ;;  %v2898_v13 = vpack.c.bf16 %v522_v54, %v521_v53  ;;  %v506_v60 = vld [vmem:[%s4646_s1 + $0xf18] sm:$0xff]  ;;  %v685_v2 = vcombine.high %v4464_v33, %v4464_v33  ;;  %v476_v6 = vld [vmem:[%s4646_s1 + $0xe28] sm:$0xff] }
  0xd5   :  { %2817 = vmatpush3.bf16.msra.mxu0 %v2816_v63  ;;  %v684_v63 = vcombine.high %v4455_v51, %v4455_v51  ;;  %v2868_v3 = vpack.c.bf16 %v474_v58, %v473_v45  ;;  %v2900_v4 = vpack.c.bf16 %v506_v60, %v505_v59  ;;  %v507_v7 = vld [vmem:[%s4646_s1 + $0xf20] sm:$0xff]  ;;  %v493_v11 = vld [vmem:[%s4646_s1 + $0xeb0] sm:$0xff]  ;;  %v494_v12 = vld [vmem:[%s4646_s1 + $0xeb8] sm:$0xff] }
  0xd6   :  { %2819 = vmatprep.subr.bf16.mxu0 %v2818_v1  ;;  %v524_v1 = vld [vmem:[%s4646_s1 + $0xfa8] sm:$0xff]  ;;  %v2874_v18 = vpack.c.bf16 %v494_v12, %v493_v11  ;;  %v477_v19 = vld [vmem:[%s4646_s1 + $0xe30] sm:$0xff]  ;;  %v510_v23 = vld [vmem:[%s4646_s1 + $0xf38] sm:$0xff] }
  0xd7   :  { %2849 = vmatpush3.bf16.msra.mxu1 %v2848_v0  ;;  %v523_v0 = vld [vmem:[%s4646_s1 + $0xfa0] sm:$0xff]  ;;  %v509_v21 = vld [vmem:[%s4646_s1 + $0xf30] sm:$0xff]  ;;  %v496_v25 = vld [vmem:[%s4646_s1 + $0xec8] sm:$0xff] }
  0xd8   :  { %2851 = vmatprep.subr.bf16.mxu1 %v2850_v5  ;;  %v2870_v5 = vpack.c.bf16 %v492_v62, %v491_v61  ;;  %v2902_v9 = vpack.c.bf16 %v524_v1, %v523_v0  ;;  %v495_v24 = vld [vmem:[%s4646_s1 + $0xec0] sm:$0xff]  ;;  %v528_v27 = vld [vmem:[%s4646_s1 + $0xfc8] sm:$0xff]  ;;  %v497_v36 = vld [vmem:[%s4646_s1 + $0xed0] sm:$0xff] }
  0xd9   :  { %2821 = vmatpush3.bf16.msra.mxu0 %v2820_v14  ;;  %v525_v14 = vld [vmem:[%s4646_s1 + $0xfb0] sm:$0xff]  ;;  %v2878_v31 = vpack.c.bf16 %v496_v25, %v495_v24  ;;  %v479_v30 = vld [vmem:[%s4646_s1 + $0xe40] sm:$0xff]  ;;  %v480_v32 = vld [vmem:[%s4646_s1 + $0xe48] sm:$0xff] }
  0xda   :  { %2823 = vmatprep.subr.bf16.mxu0 %v2822_v16  ;;  %v512_v35 = vld [vmem:[%s4646_s1 + $0xf48] sm:$0xff]  ;;  %v498_v52 = vld [vmem:[%s4646_s1 + $0xed8] sm:$0xff]  ;;  %v529_v37 = vld [vmem:[%s4646_s1 + $0xfd0] sm:$0xff] }
  0xdb   :  { %2853 = vmatpush3.bf16.msra.mxu1 %v2852_v15  ;;  %v526_v15 = vld [vmem:[%s4646_s1 + $0xfb8] sm:$0xff]  ;;  %v481_v43 = vld [vmem:[%s4646_s1 + $0xe50] sm:$0xff]  ;;  %v499_v49 = vld [vmem:[%s4646_s1 + $0xee0] sm:$0xff] }
  0xdc   :  { %2855 = vmatprep.subr.bf16.mxu1 %v2854_v20  ;;  %v478_v20 = vld [vmem:[%s4646_s1 + $0xe38] sm:$0xff]  ;;  %v2906_v22 = vpack.c.bf16 %v526_v15, %v525_v14  ;;  %v513_v46 = vld [vmem:[%s4646_s1 + $0xf50] sm:$0xff]  ;;  %v500_v50 = vld [vmem:[%s4646_s1 + $0xee8] sm:$0xff] }
  0xdd   :  { %2825 = vmatpush3.bf16.msra.mxu0 %v2824_v26  ;;  %v527_v26 = vld [vmem:[%s4646_s1 + $0xfc0] sm:$0xff]  ;;  %v530_v38 = vld [vmem:[%s4646_s1 + $0xfd8] sm:$0xff]  ;;  %v532_v54 = vld [vmem:[%s4646_s1 + $0xfe8] sm:$0xff] }
  0xde   :  { %2827 = vmatprep.subr.bf16.mxu0 %v2826_v29  ;;  %v2908_v29 = vpack.c.bf16 %v510_v23, %v509_v21  ;;  %v2910_v34 = vpack.c.bf16 %v528_v27, %v527_v26  ;;  %v482_v44 = vld [vmem:[%s4646_s1 + $0xe58] sm:$0xff]  ;;  %v531_v53 = vld [vmem:[%s4646_s1 + $0xfe0] sm:$0xff]  ;;  %v484_v58 = vld [vmem:[%s4646_s1 + $0xe68] sm:$0xff] }
  0xdf   :  { %2857 = vmatpush3.bf16.msra.mxu1 %v2856_v28  ;;  %v2876_v28 = vpack.c.bf16 %v478_v20, %v477_v19  ;;  %v514_v48 = vld [vmem:[%s4646_s1 + $0xf58] sm:$0xff]  ;;  %v483_v45 = vld [vmem:[%s4646_s1 + $0xe60] sm:$0xff]  ;;  %v2918_v60 = vpack.c.bf16 %v532_v54, %v531_v53  ;;  %v516_v61 = vld [vmem:[%s4646_s1 + $0xf68] sm:$0xff] }
  0xe0   :  { %2859 = vmatprep.subr.bf16.mxu1 %v2858_v42  ;;  %v511_v42 = vld [vmem:[%s4646_s1 + $0xf40] sm:$0xff]  ;;  %v501_v62 = vld [vmem:[%s4646_s1 + $0xef0] sm:$0xff]  ;;  %v486_v12 = vld [vmem:[%s4646_s1 + $0xe78] sm:$0xff] }
  0xe1   :  { %2829 = vmatpush3.bf16.msra.mxu0 %v2828_v39  ;;  %v2880_v39 = vpack.c.bf16 %v480_v32, %v479_v30  ;;  %v515_v59 = vld [vmem:[%s4646_s1 + $0xf60] sm:$0xff]  ;;  %v485_v11 = vld [vmem:[%s4646_s1 + $0xe70] sm:$0xff] }
  0xe2   :  { %2863 = vmatprep.subr.bf16.mxu0 %v2862_v41  ;;  %v2882_v41 = vpack.c.bf16 %v498_v52, %v497_v36  ;;  %v1853_v0 = vld [vmem:[%s4647_s2] ss:$0 sm:$0xff]  ;;  %v2892_v19 = vpack.c.bf16 %v486_v12, %v485_v11 }
  0xe3   :  { %2861 = vmatpush3.bf16.msra.mxu1 %v2860_v40  ;;  %v2912_v40 = vpack.c.bf16 %v512_v35, %v511_v42 }
  0xe4   :  { %2895 = vmatprep.subr.bf16.mxu1 %v2894_v47  ;;  %1623 = vmatmul.mubr.f32.vlgmr.msra.gmra.mrb[12].mxu0 %v4248_v8  ;;  %v475_v8 = vld [vmem:[%s4646_s1 + $0xe20] sm:$0xff]  ;;  %v2914_v47 = vpack.c.bf16 %v530_v38, %v529_v37 }
  0xe5   :  { %2865 = vmatpush3.bf16.msra.mxu0 %v2864_v55  ;;  %1762 = vmatprep.mubr.f32.mxu0 %v684_v63  ;;  %v2872_v16 = vpack.c.bf16 %v476_v6, %v475_v8  ;;  %v2884_v55 = vpack.c.bf16 %v482_v44, %v481_v43  ;;  %v502_v63 = vld [vmem:[%s4646_s1 + $0xef8] sm:$0xff]  ;;  %v2888_v6 = vpack.c.bf16 %v484_v58, %v483_v45 }
  0xe6   :  { %1693 = vmatmul.mubr.f32.vlgmr.msra.gmra.mrb[12].mxu1 %v4257_v10  ;;  %2867 = vmatprep.subr.bf16.mxu0 %v2866_v57  ;;  %v508_v10 = vld [vmem:[%s4646_s1 + $0xf28] sm:$0xff]  ;;  %v2886_v57 = vpack.c.bf16 %v500_v50, %v499_v49 }
  0xe7   :  { %2897 = vmatpush3.bf16.msra.mxu1 %v2896_v56  ;;  %1832 = vmatprep.mubr.f32.mxu1 %v685_v2  ;;  %v2904_v17 = vpack.c.bf16 %v508_v10, %v507_v7  ;;  %v2916_v56 = vpack.c.bf16 %v514_v48, %v513_v46  ;;  %v2890_v10 = vpack.c.bf16 %v502_v63, %v501_v62 }
  0xe8   :  { %2899 = vmatprep.subr.bf16.mxu1 %v2898_v13 }
  0xe9   :  { %2869 = vmatpush3.bf16.msra.mxu0 %v2868_v3  ;;  %v533_v3 = vld [vmem:[%s4646_s1 + $0xff0] sm:$0xff] }
  0xea   :  { %2871 = vmatprep.subr.bf16.mxu0 %v2870_v5 }
  0xeb   :  { %2901 = vmatpush3.bf16.msra.mxu1 %v2900_v4  ;;  %v534_v4 = vld [vmem:[%s4646_s1 + $0xff8] sm:$0xff] }
  0xec   :  { %2903 = vmatprep.subr.bf16.mxu1 %v2902_v9  ;;  %v2920_v9 = vpack.c.bf16 %v516_v61, %v515_v59  ;;  %v2922_v15 = vpack.c.bf16 %v534_v4, %v533_v3 }
  0xed   :  { %2873 = vmatpush3.bf16.msra.mxu0 %v2872_v16  ;;  %v517_v16 = vld [vmem:[%s4646_s1 + $0xf70] sm:$0xff] }
  0xee   :  { %2875 = vmatprep.subr.bf16.mxu0 %v2874_v18 }
  0xef   :  { %2905 = vmatpush3.bf16.msra.mxu1 %v2904_v17  ;;  %v518_v17 = vld [vmem:[%s4646_s1 + $0xf78] sm:$0xff]  ;;  %s2961_s1 = smov [#allocation2]  }
  0xf0   :  { %2907 = vmatprep.subr.bf16.mxu1 %v2906_v22  ;;  %v2924_v20 = vpack.c.bf16 %v518_v17, %v517_v16  ;;  %s1845_s22 = sshll.u32 %s2961_s1, 4  ;;  %s1846_s22 = int_to_ptr.vmem [resolvable:$true] %s1845_s22 }
  0xf1   :  { %2877 = vmatpush3.bf16.msra.mxu0 %v2876_v28  ;;  %s2936_s23 = scalar_lea.vmem %s1846_s22, 32  ;;  %p2941_p1 = scmp.lt.s32.totalorder %s1846_s22, %s1846_s22 }
  0xf2   :  { %2879 = vmatprep.subr.bf16.mxu0 %v2878_v31  ;;  %p2937_p0 = scmp.ne.s32.totalorder %s1846_s22, %s2936_s23  ;;  %p2942_p2 = scmp.lt.s32.totalorder %s2936_s23, %s2936_s23 }
  0xf3   :  { %2909 = vmatpush3.bf16.msra.mxu1 %v2908_v29 }
  0xf4   :  { %2911 = vmatprep.subr.bf16.mxu1 %v2910_v34  ;;  %p2943_p3 = por %p2942_p2, %p2941_p1 }
  0xf5   :  { %2881 = vmatpush3.bf16.msra.mxu0 %v2880_v39 }
  0xf6   :  { %2883 = vmatprep.subr.bf16.mxu0 %v2882_v41  ;;  %p2944_p4 = pnand %p2943_p3, %p2937_p0 }
  0xf7   :  { %2913 = vmatpush3.bf16.msra.mxu1 %v2912_v40  ;;  %v1886_v13 = vpop.f32.mrb[0].mxu0 }
  0xf8   :  { %2915 = vmatprep.subr.bf16.mxu1 %v2914_v47  ;;  %v1887_v1 = vpop.f32.mrb[1].mxu0 }
  0xf9   :  { %v1921_v2 = vpop.f32.mrb[0].mxu1  ;;  %v1888_v5 = vadd.f32 %v1887_v1, %v1886_v13  ;;  %2885 = vmatpush3.bf16.msra.mxu0 %v2884_v55 }
  0xfa   :  { %v1922_v8 = vpop.f32.mrb[1].mxu1  ;;  %2887 = vmatprep.subr.bf16.mxu0 %v2886_v57 }
  0xfb   :  { %v1923_v7 = vadd.f32 %v1922_v8, %v1921_v2  ;;  %2917 = vmatpush3.bf16.msra.mxu1 %v2916_v56  ;;  %v785_v14 = vadd.f32 %v1888_v5, %v1853_v0 }
  0xfc   :  { %2919 = vmatprep.subr.bf16.mxu1 %v2918_v60 }
  0xfd   :  { %v855_v18 = vadd.f32 %v1923_v7, %v785_v14  ;;  %2889 = vmatpush3.bf16.msra.mxu0 %v2888_v6 }
  0xfe   :  { %2891 = vmatprep.subr.bf16.mxu0 %v2890_v10 }
  0xff   :  { %2921 = vmatpush3.bf16.msra.mxu1 %v2920_v9 }
 0x100   :  { %2923 = vmatprep.subr.bf16.mxu1 %v2922_v15 }
 0x101   :  { %2893 = vmatpush3.bf16.msra.mxu0 %v2892_v19 }
 0x103   :  { %2925 = vmatpush3.bf16.msra.mxu1 %v2924_v20 }
 0x104   :  { %1763 = vmatmul.mubr.f32.vlgmr.msra.gmra.mrb[14].mxu0 %v4455_v51 }
 0x106   :  { %1833 = vmatmul.mubr.f32.vlgmr.msra.gmra.mrb[14].mxu1 %v4464_v33 }
 0x117   :  { %v1956_v21 = vpop.f32.mrb[2].mxu0 }
 0x118   :  { %v1957_v22 = vpop.f32.mrb[3].mxu0 }
 0x119   :  { %v1991_v23 = vpop.f32.mrb[2].mxu1  ;;  %v1958_v24 = vadd.f32 %v1957_v22, %v1956_v21 }
 0x11a   :  { %v1992_v25 = vpop.f32.mrb[3].mxu1 }
 0x11b   :  { %v1993_v26 = vadd.f32 %v1992_v25, %v1991_v23  ;;  %v925_v27 = vadd.f32 %v1958_v24, %v855_v18 }
 0x11d   :  { %v995_v28 = vadd.f32 %v1993_v26, %v925_v27 }
 0x137   :  { %v2026_v29 = vpop.f32.mrb[4].mxu0 }
 0x138   :  { %v2027_v31 = vpop.f32.mrb[5].mxu0 }
 0x139   :  { %v2061_v30 = vpop.f32.mrb[4].mxu1  ;;  %v2028_v32 = vadd.f32 %v2027_v31, %v2026_v29 }
 0x13a   :  { %v2062_v42 = vpop.f32.mrb[5].mxu1 }
 0x13b   :  { %v2063_v34 = vadd.f32 %v2062_v42, %v2061_v30  ;;  %v1065_v35 = vadd.f32 %v2028_v32, %v995_v28 }
 0x13d   :  { %v1135_v36 = vadd.f32 %v2063_v34, %v1065_v35 }
 0x157   :  { %v2096_v52 = vpop.f32.mrb[6].mxu0 }
 0x158   :  { %v2097_v51 = vpop.f32.mrb[7].mxu0 }
 0x159   :  { %v2131_v37 = vpop.f32.mrb[6].mxu1  ;;  %v2098_v33 = vadd.f32 %v2097_v51, %v2096_v52 }
 0x15a   :  { %v2132_v38 = vpop.f32.mrb[7].mxu1 }
 0x15b   :  { %v2133_v39 = vadd.f32 %v2132_v38, %v2131_v37  ;;  %v1205_v40 = vadd.f32 %v2098_v33, %v1135_v36 }
 0x15d   :  { %v1275_v41 = vadd.f32 %v2133_v39, %v1205_v40 }
 0x177   :  { %v2166_v43 = vpop.f32.mrb[8].mxu0 }
 0x178   :  { %v2167_v44 = vpop.f32.mrb[9].mxu0 }
 0x179   :  { %v2201_v46 = vpop.f32.mrb[8].mxu1  ;;  %v2168_v47 = vadd.f32 %v2167_v44, %v2166_v43 }
 0x17a   :  { %v2202_v48 = vpop.f32.mrb[9].mxu1 }
 0x17b   :  { %v2203_v49 = vadd.f32 %v2202_v48, %v2201_v46  ;;  %v1345_v50 = vadd.f32 %v2168_v47, %v1275_v41 }
 0x17d   :  { %v1415_v53 = vadd.f32 %v2203_v49, %v1345_v50 }
 0x197   :  { %v2236_v54 = vpop.f32.mrb[10].mxu0 }
 0x198   :  { %v2237_v55 = vpop.f32.mrb[11].mxu0 }
 0x199   :  { %v2271_v56 = vpop.f32.mrb[10].mxu1  ;;  %v2238_v57 = vadd.f32 %v2237_v55, %v2236_v54 }
 0x19a   :  { %v2272_v45 = vpop.f32.mrb[11].mxu1 }
 0x19b   :  { %v2273_v58 = vadd.f32 %v2272_v45, %v2271_v56  ;;  %v1485_v59 = vadd.f32 %v2238_v57, %v1415_v53 }
 0x19d   :  { %v1555_v13 = vadd.f32 %v2273_v58, %v1485_v59 }
 0x1b7   :  { %v2306_v60 = vpop.f32.mrb[12].mxu0 }
 0x1b8   :  { %v2307_v61 = vpop.f32.mrb[13].mxu0 }
 0x1b9   :  { %v2341_v62 = vpop.f32.mrb[12].mxu1  ;;  %v2308_v63 = vadd.f32 %v2307_v61, %v2306_v60 }
 0x1ba   :  { %v2342_v0 = vpop.f32.mrb[13].mxu1 }
 0x1bb   :  { %v2343_v1 = vadd.f32 %v2342_v0, %v2341_v62  ;;  %v1625_v2 = vadd.f32 %v2308_v63, %v1555_v13 }
 0x1bd   :  { %v1695_v3 = vadd.f32 %v2343_v1, %v1625_v2 }
 0x1d7   :  { %v2376_v4 = vpop.f32.mrb[14].mxu0 }
 0x1d8   :  { %v2377_v5 = vpop.f32.mrb[15].mxu0 }
 0x1d9   :  { %v2411_v8 = vpop.f32.mrb[14].mxu1  ;;  %v2378_v6 = vadd.f32 %v2377_v5, %v2376_v4 }
 0x1da   :  { %v2412_v7 = vpop.f32.mrb[15].mxu1 }
 0x1db   :  { %v2413_v9 = vadd.f32 %v2412_v7, %v2411_v8  ;;  %v1765_v10 = vadd.f32 %v2378_v6, %v1695_v3 }
 0x1dd   :  { %v1835_v11 = vadd.f32 %v2413_v9, %v1765_v10 }
 0x1df   :  { %1838 = vst [vmem:[#allocation2] sm:$0x3] %v1835_v11 }
 0x1e0   :  { %2947 = shalt.err (!%p2944_p4)
}
 0x1e1   :  { %s2948_s26 = scalar_lea.hbm %s4648_s3, 32 }
 0x1e2   :  { %p2949_p5 = scmp.ne.s32.totalorder %s4648_s3, %s2948_s26  ;;  %p2952_p6 = scmp.lt.u32.totalorder %s2948_s26, %s4648_s3 }
 0x1e4   :  { %p2954_p7 = pnand %p2952_p6, %p2949_p5 }
 0x1e6   :  { %2957 = shalt.err (!%p2954_p7)
}
 0x1e7   :  { %1848 = dma.vmem_to_hbm [thread:$0]  %s1846_s22, 32, %s4648_s3, [#allocation3]  }
 0x1e8   :  { %2958 = dma.done.wait [#allocation3], 32  }
 0x1e9   :  { %2959 = vsyncadd [#allocation3], 4294967264 }
 0x1ea   :  { %1852 = vsyncpa [#allocation3], 1 }

</bundles_post_ra>
